<compile_context>
chip_gen: v5e
topology: v5e:2x2
jax: 0.10.0
libtpu: 0.0.40
codegen_flags: <defaults>
</compile_context>

<pallas_src>
import jax
import jax.numpy as jnp
from jax.experimental import pallas as pl
from jax.experimental.pallas import tpu as pltpu

# --- EEGNet configuration (from the module's __init__) ---
F1, F2, CHANS = 8, 16, 2
KL, KS = 64, 16                        # conv1 length, separable (depthwise) length
KC = KL + KS - 1                       # 79: combined temporal kernel length
FC1_IN, FC1_OUT, NCLASS = 2592, 1000, 2
W2 = FC1_IN // (F2 * CHANS)            # 81  (time after both temporal convs)
W1 = W2 + KS - 1                       # 96  (time after conv1)
T = W1 + KL - 1                        # 159 (input time samples implied by fc1)
T_P = 160                              # time padded to a multiple of 8
F2W2 = F2 * W2                         # 1296 (lane-dense feature width per chan)
FC1_OUT_P = 1024                       # fc1 out_features padded to 128-multiple
TN = 256                               # fc1 output-column block (weight stream)
NJ = FC1_OUT_P // TN                   # grid size


def eegnet_fused_kernel(x_ref, wconv_ref, bconv_ref, wfc1_ref, bfc1_ref,
                        wfc2_ref, bfc2_ref, out_ref, feat_ref, y_ref):
    """One grid step = one 256-column block of fc1.

    x_ref    : (NH, T_P)  f32   rows ordered h-major (row = h*N + n), time on lanes
    wconv_ref: (T_P, F2*W2) f32 Toeplitz matrix of the collapsed conv stack
    bconv_ref: (1, F2*W2) f32   collapsed conv bias (per f2, repeated over t)
    wfc1_ref : (CHANS, F2*W2, TN) bf16  fc1 weight block (rows pre-permuted)
    bfc1_ref : (1, TN) f32      fc1 bias block
    wfc2_ref : (TN, NCLASS) bf16 fc2 weight rows matching this fc1 block
    bfc2_ref : (1, NCLASS) f32
    out_ref  : (N, NCLASS) f32  softmax probabilities
    feat_ref : scratch (CHANS, N, F2*W2) bf16   conv features (persist over grid)
    y_ref    : scratch (N, NCLASS) f32          logit accumulator
    """
    j = pl.program_id(0)
    n = feat_ref.shape[1]  # batch size (static)

    @pl.when(j == 0)
    def _():
        # Entire conv stack (conv1 -> depthwise -> pointwise, all [1,k] temporal
        # convs) as ONE MXU matmul against a Toeplitz weight built offline.
        pw = jnp.dot(x_ref[...], wconv_ref[...],
                     preferred_element_type=jnp.float32,
                     precision=jax.lax.Precision.HIGHEST) + bconv_ref[...]
        for ch in range(CHANS):
            feat_ref[ch] = pw[ch * n:(ch + 1) * n, :].astype(jnp.bfloat16)
        y_ref[...] = jnp.zeros_like(y_ref)

    # fc1 block: bf16 x bf16 on the MXU, f32 accumulation.
    h_blk = jnp.dot(feat_ref[0], wfc1_ref[0], preferred_element_type=jnp.float32)
    for ch in range(1, CHANS):
        h_blk += jnp.dot(feat_ref[ch], wfc1_ref[ch],
                         preferred_element_type=jnp.float32)
    h_blk += bfc1_ref[...]

    # fc2 partial contraction over this block of hidden units -> logit accum.
    y_ref[...] += jnp.dot(h_blk.astype(jnp.bfloat16), wfc2_ref[...],
                          preferred_element_type=jnp.float32)

    @pl.when(j == pl.num_programs(0) - 1)
    def _():
        y = y_ref[...] + bfc2_ref[...]
        y = y - jnp.max(y, axis=1, keepdims=True)
        e = jnp.exp(y)
        out_ref[...] = e / jnp.sum(e, axis=1, keepdims=True)


def prepare_params(params):
    """One-time (offline) weight preparation: conv collapse + Toeplitz build,
    fc weight pre-transpose / row permutation / padding / bf16 cast."""
    w1, b1, wd, wp, fc1_w, fc1_b, fc2_w, fc2_b = params
    f32 = jnp.float32

    # --- collapse conv1 (1->F1, [1,64], bias) o depthwise ([1,16], groups=F1)
    #     o pointwise (F1->F2, 1x1) into a single temporal conv 1->F2, length 79.
    jj = jnp.arange(KC)[:, None]                      # (79, 1)
    kk = jnp.arange(KS)[None, :]                      # (1, 16)
    idx = jj - kk                                     # (79, 16)
    valid = (idx >= 0) & (idx < KL)
    w1_g = jnp.where(valid[None, :, :],
                     w1[:, jnp.clip(idx, 0, KL - 1)], 0.0)      # (F1, 79, 16)
    w_eff = jnp.einsum('fjk,fk->fj', w1_g, wd)                  # (F1, 79)
    b_eff = b1 * jnp.sum(wd, axis=1)                            # (F1,)
    w_full = wp @ w_eff                                         # (F2, 79)
    b_full = wp @ b_eff                                         # (F2,)

    # --- Toeplitz so the whole conv stack is one matmul (NH,T) @ (T, F2*W2):
    #     wconv[s, f2*W2+u] = w_full[f2, s-u] for 0 <= s-u < KC, else 0.
    s = jnp.arange(T)[:, None]                        # (T, 1)
    u = jnp.arange(W2)[None, :]                       # (1, W2)
    d = s - u                                         # (T, W2)
    band = (d >= 0) & (d < KC)
    toep = jnp.where(band[None], w_full[:, jnp.clip(d, 0, KC - 1)], 0.0)
    wconv = toep.transpose(1, 0, 2).reshape(T, F2W2)
    wconv = jnp.pad(wconv, ((0, T_P - T), (0, 0))).astype(f32)
    bconv = jnp.repeat(b_full, W2).reshape(1, F2W2).astype(f32)

    # --- fc1: pre-transpose, regroup PyTorch flatten order (f2, h, t) into the
    #     kernel's per-h (f2*W2 + t) feature order, pad 1000->1024, cast bf16.
    wfc1 = fc1_w.reshape(FC1_OUT, F2, CHANS, W2)      # [o, f2, h, t]
    wfc1 = wfc1.transpose(2, 1, 3, 0)                 # [h, f2, t, o]
    wfc1 = wfc1.reshape(CHANS, F2W2, FC1_OUT)
    wfc1 = jnp.pad(wfc1, ((0, 0), (0, 0), (0, FC1_OUT_P - FC1_OUT)))
    wfc1 = wfc1.astype(jnp.bfloat16)
    bfc1 = jnp.pad(fc1_b, (0, FC1_OUT_P - FC1_OUT)).reshape(1, FC1_OUT_P)
    bfc1 = bfc1.astype(f32)

    # --- fc2: pre-transpose, pad in_features 1000->1024 with zero rows, bf16.
    wfc2 = jnp.pad(fc2_w.T, ((0, FC1_OUT_P - FC1_OUT), (0, 0))).astype(jnp.bfloat16)
    bfc2 = fc2_b.reshape(1, NCLASS).astype(f32)

    return (wconv, bconv, wfc1, bfc1, wfc2, bfc2)


def eegnet_forward(x, prepared):
    """x: (N, 1, CHANS, T) f32 (NCHW). Returns softmax probabilities (N, 2)."""
    wconv, bconv, wfc1, bfc1, wfc2, bfc2 = prepared
    N = x.shape[0]
    NH = N * CHANS

    # Rows ordered h-major (row = h*N + n), time on lanes, padded to T_P.
    x_rows = x[:, 0].transpose(1, 0, 2).reshape(NH, T)
    x_rows = jnp.pad(x_rows, ((0, 0), (0, T_P - T)))

    grid_spec = pltpu.PrefetchScalarGridSpec(
        num_scalar_prefetch=0,
        grid=(NJ,),
        in_specs=[
            pl.BlockSpec((NH, T_P), lambda j: (0, 0)),
            pl.BlockSpec((T_P, F2W2), lambda j: (0, 0)),
            pl.BlockSpec((1, F2W2), lambda j: (0, 0)),
            pl.BlockSpec((CHANS, F2W2, TN), lambda j: (0, 0, j)),   # streamed
            pl.BlockSpec((1, TN), lambda j: (0, j)),
            pl.BlockSpec((TN, NCLASS), lambda j: (j, 0)),           # streamed
            pl.BlockSpec((1, NCLASS), lambda j: (0, 0)),
        ],
        out_specs=pl.BlockSpec((N, NCLASS), lambda j: (0, 0)),
        scratch_shapes=[
            pltpu.VMEM((CHANS, N, F2W2), jnp.bfloat16),   # conv features
            pltpu.VMEM((N, NCLASS), jnp.float32),         # logit accumulator
        ],
    )

    return pl.pallas_call(
        eegnet_fused_kernel,
        out_shape=jax.ShapeDtypeStruct((N, NCLASS), jnp.float32),
        grid_spec=grid_spec,
        compiler_params=pltpu.CompilerParams(
            dimension_semantics=("arbitrary",),   # reduction over fc1 blocks
            vmem_limit_bytes=24 * 1024 * 1024,
        ),
    )(x_rows, wconv, bconv, wfc1, bfc1, wfc2, bfc2)


def eegnet_reference(x, params):
    """Pure-JAX f32 reference of the same forward pass (sequential convs)."""
    w1, b1, wd, wp, fc1_w, fc1_b, fc2_w, fc2_b = params
    N = x.shape[0]
    hp = jax.lax.Precision.HIGHEST
    xs = x[:, 0]                                                 # (N, H, T)
    idx1 = jnp.arange(W1)[:, None] + jnp.arange(KL)[None, :]
    win1 = xs[:, :, idx1]                                        # (N,H,W1,KL)
    c1 = jnp.einsum('nhtk,fk->nfht', win1, w1, precision=hp) \
        + b1[None, :, None, None]
    idx2 = jnp.arange(W2)[:, None] + jnp.arange(KS)[None, :]
    win2 = c1[:, :, :, idx2]                                     # (N,F1,H,W2,KS)
    dwv = jnp.einsum('nfhtk,fk->nfht', win2, wd, precision=hp)
    pwv = jnp.einsum('ncht,fc->nfht', dwv, wp, precision=hp)
    flat = pwv.reshape(N, -1)
    h = jnp.dot(flat, fc1_w.T, precision=hp) + fc1_b
    y = jnp.dot(h, fc2_w.T, precision=hp) + fc2_b
    y = y - jnp.max(y, axis=1, keepdims=True)
    e = jnp.exp(y)
    return e / jnp.sum(e, axis=1, keepdims=True)


def make_params(key):
    ks = jax.random.split(key, 8)
    w1 = jax.random.normal(ks[0], (F1, KL), jnp.float32) / jnp.sqrt(KL)
    b1 = jax.random.normal(ks[1], (F1,), jnp.float32) * 0.1
    wd = jax.random.normal(ks[2], (F1, KS), jnp.float32) / jnp.sqrt(KS)
    wp = jax.random.normal(ks[3], (F2, F1), jnp.float32) / jnp.sqrt(F1)
    fc1_w = jax.random.normal(ks[4], (FC1_OUT, FC1_IN), jnp.float32) / jnp.sqrt(FC1_IN)
    fc1_b = jax.random.normal(ks[5], (FC1_OUT,), jnp.float32) * 0.1
    fc2_w = jax.random.normal(ks[6], (NCLASS, FC1_OUT), jnp.float32) / jnp.sqrt(FC1_OUT)
    fc2_b = jax.random.normal(ks[7], (NCLASS,), jnp.float32) * 0.1
    return (w1, b1, wd, wp, fc1_w, fc1_b, fc2_w, fc2_b)


if __name__ == "__main__":
    key = jax.random.PRNGKey(0)
    pkey, xkey = jax.random.split(key)
    params = make_params(pkey)
    prepared = jax.tree_util.tree_map(jax.block_until_ready,
                                      prepare_params(params))  # one-time prep

    N = 2
    x = jax.random.normal(xkey, (N, 1, CHANS, T), jnp.float32)  # NCHW (2,1,2,159)

    fwd = jax.jit(eegnet_forward)
    out = jax.block_until_ready(fwd(x, prepared))

    ref = jax.block_until_ready(eegnet_reference(x, params))
    assert out.shape == (N, NCLASS)
    max_err = float(jnp.max(jnp.abs(out - ref)))
    # bf16 fc weights/activations give ~1e-3 error on 2-class softmax probs.
    assert max_err < 2e-2, f"mismatch vs f32 reference: max|diff|={max_err}"
    print("KERNEL_OK")
</pallas_src>

<mosaic_0001>
module attributes {stable_mosaic.version = 11 : i64} {
  func.func @eegnet_fused_kernel(%arg0: i32, %arg1: memref<4x160xf32, #tpu.memory_space<vmem>>, %arg2: memref<160x1296xf32, #tpu.memory_space<vmem>>, %arg3: memref<1x1296xf32, #tpu.memory_space<vmem>>, %arg4: memref<2x1296x256xbf16, #tpu.memory_space<vmem>>, %arg5: memref<1x256xf32, #tpu.memory_space<vmem>>, %arg6: memref<256x2xbf16, #tpu.memory_space<vmem>>, %arg7: memref<1x2xf32, #tpu.memory_space<vmem>>, %arg8: memref<2x2xf32, #tpu.memory_space<vmem>>, %arg9: memref<2x2x1296xbf16, #tpu.memory_space<vmem>>, %arg10: memref<2x2xf32, #tpu.memory_space<vmem>>) attributes {dimension_semantics = [#tpu.dimension_semantics<arbitrary>], iteration_bounds = array<i64: 4>, scalar_prefetch = 0 : i64, scratch_operands = 2 : i64, tpu.core_type = #tpu.core_type<tc>, window_params = [{pipeline_mode = #tpu.pipeline_mode<synchronous>, transform_indices = @transform_0, window_bounds = array<i64: 4, 160>}, {pipeline_mode = #tpu.pipeline_mode<synchronous>, transform_indices = @transform_1, window_bounds = array<i64: 160, 1296>}, {pipeline_mode = #tpu.pipeline_mode<synchronous>, transform_indices = @transform_2, window_bounds = array<i64: 1, 1296>}, {transform_indices = @transform_3, window_bounds = array<i64: 2, 1296, 256>}, {transform_indices = @transform_4, window_bounds = array<i64: 1, 256>}, {transform_indices = @transform_5, window_bounds = array<i64: 256, 2>}, {pipeline_mode = #tpu.pipeline_mode<synchronous>, transform_indices = @transform_6, window_bounds = array<i64: 1, 2>}, {pipeline_mode = #tpu.pipeline_mode<synchronous>, transform_indices = @transform_7, window_bounds = array<i64: 2, 2>}]} {
    %c0_i32 = arith.constant 0 : i32
    %0 = arith.cmpi eq, %arg0, %c0_i32 : i32
    %1 = arith.extui %0 : i1 to i32
    %c0_i32_0 = arith.constant 0 : i32
    %2 = arith.cmpi ne, %1, %c0_i32_0 : i32
    scf.if %2 {
      %c0_22 = arith.constant 0 : index
      %c0_23 = arith.constant 0 : index
      %26 = vector.load %arg1[%c0_22, %c0_23] : memref<4x160xf32, #tpu.memory_space<vmem>>, vector<4x160xf32>
      %c0_24 = arith.constant 0 : index
      %c0_25 = arith.constant 0 : index
      %27 = vector.load %arg2[%c0_24, %c0_25] : memref<160x1296xf32, #tpu.memory_space<vmem>>, vector<160x1296xf32>
      %cst_26 = arith.constant dense<0.000000e+00> : vector<4x1296xf32>
      %28 = tpu.matmul %26, %27, %cst_26 {dimension_numbers = #tpu.dot_dimension_numbers<[1], [0], [0], [1], [0, 0, 1, 1], [], []>, precision = #tpu.contract_precision<fp32>} : vector<4x160xf32>, vector<160x1296xf32>, vector<4x1296xf32> -> vector<4x1296xf32>
      %c0_27 = arith.constant 0 : index
      %c0_28 = arith.constant 0 : index
      %29 = vector.load %arg3[%c0_27, %c0_28] : memref<1x1296xf32, #tpu.memory_space<vmem>>, vector<1x1296xf32>
      %30 = vector.broadcast %29 : vector<1x1296xf32> to vector<4x1296xf32>
      %31 = arith.addf %28, %30 : vector<4x1296xf32>
      %32 = vector.extract_strided_slice %31 {offsets = [0, 0], sizes = [2, 1296], strides = [1, 1]} : vector<4x1296xf32> to vector<2x1296xf32>
      %33 = arith.truncf %32 : vector<2x1296xf32> to vector<2x1296xbf16>
      %c0_29 = arith.constant 0 : index
      %c0_30 = arith.constant 0 : index
      %c0_31 = arith.constant 0 : index
      %34 = vector.load %arg9[%c0_29, %c0_30, %c0_31] : memref<2x2x1296xbf16, #tpu.memory_space<vmem>>, vector<1x2x1296xbf16>
      %35 = vector.shape_cast %34 : vector<1x2x1296xbf16> to vector<2x1296xbf16>
      %36 = vector.shape_cast %33 : vector<2x1296xbf16> to vector<1x2x1296xbf16>
      tpu.vector_store %arg9[%c0_29, %c0_30, %c0_31], %36 {strides = array<i32>} : memref<2x2x1296xbf16, #tpu.memory_space<vmem>>, vector<1x2x1296xbf16>,
      %37 = vector.extract_strided_slice %31 {offsets = [2, 0], sizes = [2, 1296], strides = [1, 1]} : vector<4x1296xf32> to vector<2x1296xf32>
      %38 = arith.truncf %37 : vector<2x1296xf32> to vector<2x1296xbf16>
      %c1_32 = arith.constant 1 : index
      %c0_33 = arith.constant 0 : index
      %c0_34 = arith.constant 0 : index
      %39 = vector.load %arg9[%c1_32, %c0_33, %c0_34] : memref<2x2x1296xbf16, #tpu.memory_space<vmem>>, vector<1x2x1296xbf16>
      %40 = vector.shape_cast %39 : vector<1x2x1296xbf16> to vector<2x1296xbf16>
      %41 = vector.shape_cast %38 : vector<2x1296xbf16> to vector<1x2x1296xbf16>
      tpu.vector_store %arg9[%c1_32, %c0_33, %c0_34], %41 {strides = array<i32>} : memref<2x2x1296xbf16, #tpu.memory_space<vmem>>, vector<1x2x1296xbf16>,
      %cst_35 = arith.constant 0.000000e+00 : f32
      %42 = vector.broadcast %cst_35 : f32 to vector<2x2xf32>
      %c0_36 = arith.constant 0 : index
      %c0_37 = arith.constant 0 : index
      %43 = vector.load %arg10[%c0_36, %c0_37] : memref<2x2xf32, #tpu.memory_space<vmem>>, vector<2x2xf32>
      tpu.vector_store %arg10[%c0_36, %c0_37], %42 {strides = array<i32>} : memref<2x2xf32, #tpu.memory_space<vmem>>, vector<2x2xf32>,
    } else {
    }
    %c0 = arith.constant 0 : index
    %c0_1 = arith.constant 0 : index
    %c0_2 = arith.constant 0 : index
    %3 = vector.load %arg9[%c0, %c0_1, %c0_2] : memref<2x2x1296xbf16, #tpu.memory_space<vmem>>, vector<1x2x1296xbf16>
    %4 = vector.shape_cast %3 : vector<1x2x1296xbf16> to vector<2x1296xbf16>
    %c0_3 = arith.constant 0 : index
    %c0_4 = arith.constant 0 : index
    %c0_5 = arith.constant 0 : index
    %5 = vector.load %arg4[%c0_3, %c0_4, %c0_5] : memref<2x1296x256xbf16, #tpu.memory_space<vmem>>, vector<1x1296x256xbf16>
    %6 = vector.shape_cast %5 : vector<1x1296x256xbf16> to vector<1296x256xbf16>
    %cst = arith.constant dense<0.000000e+00> : vector<2x256xf32>
    %7 = tpu.matmul %4, %6, %cst {dimension_numbers = #tpu.dot_dimension_numbers<[1], [0], [0], [1], [0, 0, 1, 1], [], []>} : vector<2x1296xbf16>, vector<1296x256xbf16>, vector<2x256xf32> -> vector<2x256xf32>
    %c1 = arith.constant 1 : index
    %c0_6 = arith.constant 0 : index
    %c0_7 = arith.constant 0 : index
    %8 = vector.load %arg9[%c1, %c0_6, %c0_7] : memref<2x2x1296xbf16, #tpu.memory_space<vmem>>, vector<1x2x1296xbf16>
    %9 = vector.shape_cast %8 : vector<1x2x1296xbf16> to vector<2x1296xbf16>
    %c1_8 = arith.constant 1 : index
    %c0_9 = arith.constant 0 : index
    %c0_10 = arith.constant 0 : index
    %10 = vector.load %arg4[%c1_8, %c0_9, %c0_10] : memref<2x1296x256xbf16, #tpu.memory_space<vmem>>, vector<1x1296x256xbf16>
    %11 = vector.shape_cast %10 : vector<1x1296x256xbf16> to vector<1296x256xbf16>
    %cst_11 = arith.constant dense<0.000000e+00> : vector<2x256xf32>
    %12 = tpu.matmul %9, %11, %cst_11 {dimension_numbers = #tpu.dot_dimension_numbers<[1], [0], [0], [1], [0, 0, 1, 1], [], []>} : vector<2x1296xbf16>, vector<1296x256xbf16>, vector<2x256xf32> -> vector<2x256xf32>
    %13 = arith.addf %7, %12 : vector<2x256xf32>
    %c0_12 = arith.constant 0 : index
    %c0_13 = arith.constant 0 : index
    %14 = vector.load %arg5[%c0_12, %c0_13] : memref<1x256xf32, #tpu.memory_space<vmem>>, vector<1x256xf32>
    %15 = vector.broadcast %14 : vector<1x256xf32> to vector<2x256xf32>
    %16 = arith.addf %13, %15 : vector<2x256xf32>
    %c0_14 = arith.constant 0 : index
    %c0_15 = arith.constant 0 : index
    %17 = vector.load %arg10[%c0_14, %c0_15] : memref<2x2xf32, #tpu.memory_space<vmem>>, vector<2x2xf32>
    %18 = arith.truncf %16 : vector<2x256xf32> to vector<2x256xbf16>
    %c0_16 = arith.constant 0 : index
    %c0_17 = arith.constant 0 : index
    %19 = vector.load %arg6[%c0_16, %c0_17] : memref<256x2xbf16, #tpu.memory_space<vmem>>, vector<256x2xbf16>
    %cst_18 = arith.constant dense<0.000000e+00> : vector<2x2xf32>
    %20 = tpu.matmul %18, %19, %cst_18 {dimension_numbers = #tpu.dot_dimension_numbers<[1], [0], [0], [1], [0, 0, 1, 1], [], []>} : vector<2x256xbf16>, vector<256x2xbf16>, vector<2x2xf32> -> vector<2x2xf32>
    %21 = arith.addf %17, %20 : vector<2x2xf32>
    %c0_19 = arith.constant 0 : index
    %c0_20 = arith.constant 0 : index
    %22 = vector.load %arg10[%c0_19, %c0_20] : memref<2x2xf32, #tpu.memory_space<vmem>>, vector<2x2xf32>
    tpu.vector_store %arg10[%c0_19, %c0_20], %21 {strides = array<i32>} : memref<2x2xf32, #tpu.memory_space<vmem>>, vector<2x2xf32>,
    %c3_i32 = arith.constant 3 : i32
    %23 = arith.cmpi eq, %arg0, %c3_i32 : i32
    %24 = arith.extui %23 : i1 to i32
    %c0_i32_21 = arith.constant 0 : i32
    %25 = arith.cmpi ne, %24, %c0_i32_21 : i32
    scf.if %25 {
      %c0_22 = arith.constant 0 : index
      %c0_23 = arith.constant 0 : index
      %26 = vector.load %arg10[%c0_22, %c0_23] : memref<2x2xf32, #tpu.memory_space<vmem>>, vector<2x2xf32>
      %c0_24 = arith.constant 0 : index
      %c0_25 = arith.constant 0 : index
      %27 = vector.load %arg7[%c0_24, %c0_25] : memref<1x2xf32, #tpu.memory_space<vmem>>, vector<1x2xf32>
      %28 = vector.broadcast %27 : vector<1x2xf32> to vector<2x2xf32>
      %29 = arith.addf %26, %28 : vector<2x2xf32>
      %cst_26 = arith.constant dense<0xFF800000> : vector<2xf32>
      %30 = vector.multi_reduction <maximumf>, %29, %cst_26 [1] : vector<2x2xf32> to vector<2xf32>
      %31 = vector.shape_cast %30 : vector<2xf32> to vector<2x1xf32>
      %32 = vector.broadcast %31 : vector<2x1xf32> to vector<2x2xf32>
      %33 = arith.subf %29, %32 : vector<2x2xf32>
      %34 = math.exp %33 : vector<2x2xf32>
      %cst_27 = arith.constant dense<0.000000e+00> : vector<2xf32>
      %35 = vector.multi_reduction <add>, %34, %cst_27 [1] : vector<2x2xf32> to vector<2xf32>
      %36 = vector.shape_cast %35 : vector<2xf32> to vector<2x1xf32>
      %37 = vector.broadcast %36 : vector<2x1xf32> to vector<2x2xf32>
      %38 = arith.divf %34, %37 : vector<2x2xf32>
      %c0_28 = arith.constant 0 : index
      %c0_29 = arith.constant 0 : index
      %39 = vector.load %arg8[%c0_28, %c0_29] : memref<2x2xf32, #tpu.memory_space<vmem>>, vector<2x2xf32>
      tpu.vector_store %arg8[%c0_28, %c0_29], %38 {strides = array<i32>} : memref<2x2xf32, #tpu.memory_space<vmem>>, vector<2x2xf32>,
    } else {
    }
    return
  }
  func.func @transform_0(%arg0: i32) -> (i32, i32) {
    %c0_i32 = arith.constant 0 : i32
    %c0_i32_0 = arith.constant 0 : i32
    %c0_i32_1 = arith.constant 0 : i32
    return %c0_i32, %c0_i32_0 : i32, i32
  }
  func.func @transform_1(%arg0: i32) -> (i32, i32) {
    %c0_i32 = arith.constant 0 : i32
    %c0_i32_0 = arith.constant 0 : i32
    %c0_i32_1 = arith.constant 0 : i32
    return %c0_i32, %c0_i32_0 : i32, i32
  }
  func.func @transform_2(%arg0: i32) -> (i32, i32) {
    %c0_i32 = arith.constant 0 : i32
    %c0_i32_0 = arith.constant 0 : i32
    %c0_i32_1 = arith.constant 0 : i32
    return %c0_i32, %c0_i32_0 : i32, i32
  }
  func.func @transform_3(%arg0: i32) -> (i32, i32, i32) {
    %c0_i32 = arith.constant 0 : i32
    %c0_i32_0 = arith.constant 0 : i32
    %c0_i32_1 = arith.constant 0 : i32
    return %c0_i32, %c0_i32_0, %arg0 : i32, i32, i32
  }
  func.func @transform_4(%arg0: i32) -> (i32, i32) {
    %c0_i32 = arith.constant 0 : i32
    %c0_i32_0 = arith.constant 0 : i32
    return %c0_i32, %arg0 : i32, i32
  }
  func.func @transform_5(%arg0: i32) -> (i32, i32) {
    %c0_i32 = arith.constant 0 : i32
    %c0_i32_0 = arith.constant 0 : i32
    return %arg0, %c0_i32 : i32, i32
  }
  func.func @transform_6(%arg0: i32) -> (i32, i32) {
    %c0_i32 = arith.constant 0 : i32
    %c0_i32_0 = arith.constant 0 : i32
    %c0_i32_1 = arith.constant 0 : i32
    return %c0_i32, %c0_i32_0 : i32, i32
  }
  func.func @transform_7(%arg0: i32) -> (i32, i32) {
    %c0_i32 = arith.constant 0 : i32
    %c0_i32_0 = arith.constant 0 : i32
    %c0_i32_1 = arith.constant 0 : i32
    return %c0_i32, %c0_i32_0 : i32, i32
  }
}

</mosaic_0001>

<bundles_post_ra>
// kernel: eegnet_forward.1
= control target key start
LH: loop header
LB: loop body
LE: loop exit
PB: predicated region body
PF: predicated region fallthrough
CT: control target
= control target key end

     0   :  { %s16214_s0 = inlined_call_operand.vmem [shape: f32[4,160], index: 0, kind: input, shape index: {}]   ;;  %s16215_s1 = inlined_call_operand.hbm [shape: f32[160,1296], index: 1, kind: input, shape index: {}]   ;;  %s16216_s2 = inlined_call_operand.hbm [shape: f32[1,1296], index: 2, kind: input, shape index: {}]   ;;  %s16217_s3 = inlined_call_operand.hbm [shape: bf16[2,1296,1024], index: 3, kind: input, shape index: {}]   ;;  %s16218_s4 = inlined_call_operand.hbm [shape: f32[1,1024], index: 4, kind: input, shape index: {}]   ;;  %s16219_s5 = inlined_call_operand.vmem [shape: bf16[1024,2], index: 5, kind: input, shape index: {}]   ;;  %s16220_s6 = inlined_call_operand.hbm [shape: f32[1,2], index: 6, kind: input, shape index: {}]   ;;  %s16221_s7 = inlined_call_operand.hbm [shape: f32[2,2], index: 7, kind: output, shape index: {}]  }
   0x1   :  { %16317 = sst [smem:[#allocation20_spill]] %s16215_s1 }
   0x2   :  { %16318 = sst [smem:[#allocation21_spill]] %s16216_s2 }
   0x3   :  { %16319 = sst [smem:[#allocation22_spill]] %s16217_s3 }
   0x4   :  { %12 = vsyncpa [#allocation5], 0 }
   0x5   :  { %13 = vsyncpa [#allocation8], 0 }
   0x6   :  { %14 = vsyncpa [#allocation6], 0  ;;  %s11685_s24 = smov 0   ;;  %s11687_s25 = smov 0  }
   0x7   :  { %s11689_s26 = smov 0   ;;  %s11691_s27 = smov 0  }
   0x8 LB: > { %s11704_s28 = sadd.s32 4294967295, %s11633_s27   ;;  %s11707_s29 = sadd.s32 1, %s11633_s27   ;;  %s11633_s27 = sphi %s11691_s27, %s16423_s27   ;;  %s11629_s26 = sphi %s11689_s26, %s16427_s26   ;;  %s11625_s25 = sphi %s11687_s25, %s16426_s25   ;;  %s11621_s24 = sphi %s11685_s24, %s16425_s24  }
   0x9   : > { %16320 = sst [smem:[#allocation18_spill]] %s11707_s29  ;;  %s87_s30 = ssub.s32 %s11633_s27, %s11707_s29 }
   0xa   : > { %s90_s8 = sadd.s32 1, %s11629_s26  ;;  %p88_p0 = scmp.eq.s32.totalorder %s87_s30, 0 }
   0xb   : > { %p97_p1 = scmp.ne.s32.totalorder %s11629_s26, %s11625_s25  ;;  %p98_p2 = scmp.eq.s32.totalorder %s11633_s27, 0 }
   0xc   : > { %p103_p3 = scmp.ne.s32.totalorder %s11625_s25, %s11621_s24  ;;  %p104_p5 = scmp.eq.s32.totalorder %s11704_s28, 0 }
   0xd   : > { %s11717_s9 = scalar_select %p88_p0, %s11629_s26, %s90_s8  }
   0xe   : > { %p11719_p4 = por %p98_p2, %p97_p1  ;;  %p9416_p6 = scmp.ge.s32.totalorder %s11633_s27, 1 }
   0xf   : > { %16321 = sst [smem:[#allocation19_spill]] %s11717_s9  ;;  %p208_p7 = scmp.lt.s32.totalorder %s11633_s27, 5 }
  0x10   : > { %p11728_p8 = por %p104_p5, %p103_p3  ;;  %p9417_p9 = scmp.ne.s32.totalorder %s11704_s28, 0 }
  0x11   : > { %p11733_p10 = pnand %p9416_p6, %p208_p7  ;;  %s16325_s1 = sld [smem:[#allocation20_spill]] }
  0x12   : > { %s11635_s16 = smov [#allocation4]   ;;  %p11347_p13 = scmp.lt.s32.totalorder %s11633_s27, 4 }
  0x13   : > { %p11327_p11 = pneg %p11733_p10  ;;  %s224_s17 = sshll.u32 %s11635_s16, 4  ;;  %s225_s17 = int_to_ptr.vmem [resolvable:$true] %s224_s17 }
  0x14   : > { %s16327_s2 = sld [smem:[#allocation21_spill]]  ;;  %s11636_s22 = smov 1408  }
  0x15   : > { %p11744_p12 = pnand %p11327_p11, %p104_p5  ;;  %s11637_s23 = smov 88  }
  0x16   : > { %p11756_p0 = pnand %p11347_p13, %p11719_p4  ;;  %s262_s30 = sand.u32 1, %s11633_s27  }
  0x17   : > { %s222_s15 = sshll.u32 %s16325_s1, 4  ;;  %s11638_s8 = smov [#allocation7]   ;;  %s223_s15 = int_to_ptr.hbm [resolvable:$true] %s222_s15 }
  0x18   : > { %11330 = dma.hbm_to_vmem [thread:$0]  (!%p11744_p12), %s223_s15, 28160, %s225_s17, [#allocation5], %s11636_s22, %s11636_s22, %s11637_s23  }
  0x19   : > { %s239_s13 = sshll.u32 %s11638_s8, 4  ;;  %s264_s14 = sand.u32 1, %s11629_s26   ;;  %s240_s13 = int_to_ptr.vmem [resolvable:$true] %s239_s13 }
  0x1a   : > { %s237_s21 = sshll.u32 %s16327_s2, 4  ;;  %s10964_s16 = sshll.u32 %s11633_s27, 3  ;;  %s238_s21 = int_to_ptr.hbm [resolvable:$true] %s237_s21 }
  0x1b   : > { %11333 = dma.hbm_to_vmem [thread:$0]  (!%p11744_p12), %s238_s21, 176, %s240_s13, [#allocation8]  }
  0x1c   : > { %s11305_s19 = smul.u32 2592, %s264_s14  ;;  %s16329_s3 = sld [smem:[#allocation22_spill]] }
  0x1d   : > { %s11770_s1 = scalar_lea.sflag [#allocation5], %s262_s30  ;;  %p11469_p2 = pneg %p11756_p0 }
  0x1e   : > { %s266_s22 = scalar_lea.vmem [#allocation9], %s11305_s19 }
  0x1f   : > { %s274_s23 = sshll.u32 %s266_s22, 4  ;;  %s275_s23 = int_to_ptr.vmem [resolvable:$true] %s274_s23 }
  0x22   : > { %s271_s10 = scalar_lea.hbm %s16329_s3, %s10964_s16  ;;  %s11472_s16 = scalar_lea.hbm %s16329_s3, 10368 }
  0x23   : > { %s272_s17 = sshll.u32 %s271_s10, 4  ;;  %s273_s17 = int_to_ptr.hbm [resolvable:$true] %s272_s17 }
  0x24   : > { %s11465_s8 = sshra.s32 %s273_s17, 4  ;;  %s11466_s8 = int_to_ptr.hbm [resolvable:$true] %s11465_s8 }
  0x25   : > { %s11467_s2 = scalar_lea.hbm %s11466_s8, 2592  ;;  %p11473_p6 = scmp.lt.s32.totalorder %s11466_s8, %s16329_s3 }
  0x26   : > { %p11468_p1 = scmp.ne.s32.totalorder %s11466_s8, %s11467_s2  ;;  %p11474_p7 = scmp.lt.s32.totalorder %s11472_s16, %s11467_s2 }
  0x28   : > { %p11470_p3 = pnand %p11469_p2, %p11468_p1  ;;  %p11475_p11 = por %p11474_p7, %p11473_p6 }
  0x2a   : > { %p11471_p4 = pneg %p11470_p3 }
  0x2c   : > { %p11476_p13 = pnand %p11475_p11, %p11471_p4 }
  0x2e   : > { %11479 = shalt.err (!%p11476_p13)
}
  0x2f   : > { %s11639_s30 = smov 512   ;;  %s11640_s15 = smov 128  }
  0x30   : > { %s11641_s10 = smov 8   ;;  %s249_s13 = sshll.u32 %s16220_s6, 4  ;;  %s250_s13 = int_to_ptr.hbm [resolvable:$true] %s249_s13 }
  0x31   : > { %11340 = dma.hbm_to_vmem [thread:$0]  (!%p11756_p0), %s273_s17, 41472, %s275_s23, %s11770_s1, %s11639_s30, %s11640_s15, %s11641_s10  }
  0x32   : > { %s11642_s8 = smov [#allocation11]   ;;  %s9423_s16 = sshll.u32 %s264_s14, 1 }
  0x33   : > { %s251_s2 = sshll.u32 %s11642_s8, 4  ;;  %s9424_s20 = sshll.u32 %s11633_s27, 1  ;;  %s252_s2 = int_to_ptr.vmem [resolvable:$true] %s251_s2 }
  0x34   : > { %11336 = dma.hbm_to_vmem [thread:$0]  (!%p11744_p12), %s250_s13, 16, %s252_s2, [#allocation8]  }
  0x35   : > { %s292_s9 = scalar_lea.hbm %s16218_s4, %s9424_s20  ;;  %s288_s29 = scalar_lea.vmem [#allocation10], %s9423_s16 }
  0x36   : > { %s296_s17 = sshll.u32 %s288_s29, 4  ;;  %s294_s23 = sshll.u32 %s292_s9, 4  ;;  %s297_s17 = int_to_ptr.vmem [resolvable:$true] %s296_s17  ;;  %s295_s23 = int_to_ptr.hbm [resolvable:$true] %s294_s23 }
  0x37   : > { %s11525_s30 = sshra.s32 %s295_s23, 4  ;;  %s11532_s27 = scalar_lea.hbm %s16218_s4, 8  ;;  %s11526_s30 = int_to_ptr.hbm [resolvable:$true] %s11525_s30 }
  0x38   : > { %s11527_s15 = scalar_lea.hbm %s11526_s30, 2  ;;  %p11533_p12 = scmp.lt.s32.totalorder %s11526_s30, %s16218_s4 }
  0x39   : > { %p11528_p1 = scmp.ne.s32.totalorder %s11526_s30, %s11527_s15  ;;  %p11534_p6 = scmp.lt.s32.totalorder %s11532_s27, %s11527_s15 }
  0x3b   : > { %p11530_p3 = pnand %p11528_p1, %p11469_p2  ;;  %p11535_p7 = por %p11534_p6, %p11533_p12 }
  0x3d   : > { %p11531_p4 = pneg %p11530_p3 }
  0x3f   : > { %p11536_p11 = pnand %p11535_p7, %p11531_p4 }
  0x41   : > { %11539 = shalt.err (!%p11536_p11)
}
  0x42   : > { %11343 = dma.hbm_to_vmem [thread:$0]  (!%p11756_p0), %s295_s23, 32, %s297_s17, %s11770_s1  }
  0x43   : > { %314 = sbr.rel (%p11733_p10) target bundleno = 1864 (0x748), region = 48 }
  0x48   : > { %11600 = dma.done.wait (%p104_p5), [#allocation5], 28160  }
  0x49   : > { %11602 = vsyncadd (%p104_p5), [#allocation5], 4294939136 }
  0x4a   : > { %11604 = dma.done.wait (%p104_p5), [#allocation8], 176  }
  0x4b   : > { %11606 = vsyncadd (%p104_p5), [#allocation8], 4294967120  ;;  %s326_s29 = sand.u32 1, %s11704_s28   ;;  %s328_s1 = sand.u32 1, %s11625_s25  }
  0x4c   : > { %s11306_s9 = smul.u32 2592, %s328_s1  ;;  %s327_s12 = scalar_lea.sflag [#allocation5], %s326_s29 }
  0x4e   : > { %s11821_s24 = scalar_lea.vmem [#allocation9], %s11306_s9 }
  0x4f   : > { %11608 = dma.done.wait (%p11728_p8), %s327_s12, 41504  }
  0x50   : > { %11610 = vsyncadd (%p11728_p8), %s327_s12, 4294925792  ;;  %s11827_s22 = sshll.u32 %s328_s1, 1 }
  0x51   : > { %s340_s21 = scalar_lea.vmem [#allocation10], %s11827_s22 }
  0x52   : > { %11612 = dma.done.wait (%p104_p5), [#allocation8], 16  }
  0x53   : > { %11614 = vsyncadd (%p104_p5), [#allocation8], 4294967280  ;;  %s9430_s13 = sshll.u32 %s11704_s28, 5 }
  0x54   : > { %p385_p10 = scmp.lt.s32.totalorder %s9430_s13, 127  ;;  %394 = sbr.rel (%p9417_p9) target bundleno = 972 (0x3cc), region = 72 }
  0x56   : > { %s16429_s13 = smov (!%p385_p10, %s9430_s13), 127 }
  0x57   : > { %s9431_s8 = sshll.u32 %s16429_s13, 2 }
  0x58   : > { %s11838_s11 = scalar_lea.vmem %s16219_s5, %s9431_s8 }
  0x59   : > { %v561_v0 = vld [vmem:[#allocation4 + $0x528] sm:$0xff]  ;;  %v550_v1 = vld [vmem:[#allocation4 + $0x4d0] sm:$0xff]  ;;  %v539_v2 = vld [vmem:[#allocation4 + $0x478] sm:$0xff]  ;;  %vm647_vm0 = vcmask 261120   ;;  %vm6458_vm1 = vcmask 1040384   ;;  %vm6462_vm2 = vcmask 1042434  }
  0x5a   : > { %v11842_v3 = vand.u32 4294901760, %v561_v0  ;;  %v11844_v4 = vand.u32 4294901760, %v550_v1  ;;  %v11846_v5 = vand.u32 4294901760, %v539_v2  ;;  %v528_v6 = vld [vmem:[#allocation4 + $0x420] sm:$0xff]  ;;  %v517_v7 = vld [vmem:[#allocation4 + $0x3c8] sm:$0xff]  ;;  %v506_v8 = vld [vmem:[#allocation4 + $0x370] sm:$0xff] }
  0x5b   : > { %v11848_v9 = vand.u32 4294901760, %v528_v6  ;;  %v11850_v10 = vand.u32 4294901760, %v517_v7  ;;  %v11852_v11 = vand.u32 4294901760, %v506_v8  ;;  %v495_v12 = vld [vmem:[#allocation4 + $0x318] sm:$0xff]  ;;  %v484_v13 = vld [vmem:[#allocation4 + $0x2c0] sm:$0xff]  ;;  %v473_v18 = vld [vmem:[#allocation4 + $0x268] sm:$0xff] }
  0x5c   : > { %651 = vmatpush.msra.mxu0 %v11842_v3  ;;  %v11856_v14 = vsub.f32 %v561_v0, %v11842_v3  ;;  %v11859_v15 = vsub.f32 %v550_v1, %v11844_v4  ;;  %847 = vmatpush.msra.mxu3 %v11842_v3  ;;  %v11863_v16 = vsub.f32 %v539_v2, %v11846_v5  ;;  %v11865_v17 = vand.u32 4294901760, %v495_v12  ;;  %v462_v26 = vld [vmem:[#allocation4 + $0x210] sm:$0xff]  ;;  %v395_v30 = vld [vmem:[%s16214_s0] sm:$0xff]  ;;  %v451_v37 = vld [vmem:[#allocation4 + $0x1b8] sm:$0xff] }
  0x5d   : > { %v11868_v19 = vsub.f32 %v528_v6, %v11848_v9  ;;  %v11871_v20 = vsub.f32 %v517_v7, %v11850_v10  ;;  %v11873_v21 = vand.u32 4294901760, %v484_v13  ;;  %v11881_v25 = vsub.f32 %v506_v8, %v11852_v11  ;;  %643 = vst [vmem:[#allocation1] ss:$2 sm:$0xff] %v395_v30  ;;  %v440_v43 = vld [vmem:[#allocation4 + $0x160] sm:$0xff]  ;;  %v429_v49 = vld [vmem:[#allocation4 + $0x108] sm:$0xff]  ;;  %v418_v55 = vld [vmem:[#allocation4 + $0xb0] sm:$0xff] }
  0x5e   : > { %653 = vmatpush.msra.mxu0 %v11844_v4  ;;  %794 = vmatpush.msra.mxu2 %v11856_v14  ;;  %v693_v22 = vand.u32 4294901760, %v11856_v14  ;;  %v699_v23 = vand.u32 4294901760, %v11859_v15  ;;  %v705_v24 = vand.u32 4294901760, %v11863_v16  ;;  %v11886_v28 = vsub.f32 %v495_v12, %v11865_v17  ;;  %v605_v60 = vld [vmem:[#allocation4 + $0x688] sm:$0xff]  ;;  %v407_v62 = vld [vmem:[#allocation4 + $0x58] sm:$0xff]  ;;  %v594_v6 = vld [vmem:[#allocation4 + $0x630] sm:$0xff] }
  0x5f   : > { %849 = vmatpush.msra.mxu3 %v11844_v4  ;;  %v711_v27 = vand.u32 4294901760, %v11868_v19  ;;  %v11888_v29 = vand.u32 4294901760, %v473_v18  ;;  %v717_v34 = vand.u32 4294901760, %v11871_v20  ;;  %v11907_v35 = vsub.f32 %v484_v13, %v11873_v21  ;;  %v396_v8 = vld [vmem:[#allocation4] sm:$0xff] }
  0x60   : > { %655 = vmatpush.msra.mxu0 %v11846_v5  ;;  %797 = vmatpush.msra.mxu2 %v11859_v15  ;;  %v694_v31 = vsub.f32 %v11856_v14, %v693_v22  ;;  %v700_v32 = vsub.f32 %v11859_v15, %v699_v23  ;;  %v706_v33 = vsub.f32 %v11863_v16, %v705_v24  ;;  %v11909_v36 = vand.u32 4294901760, %v462_v26 }
  0x61   : > { %851 = vmatpush.msra.mxu3 %v11846_v5  ;;  %v712_v40 = vsub.f32 %v11868_v19, %v711_v27  ;;  %v723_v41 = vand.u32 4294901760, %v11881_v25  ;;  %v729_v42 = vand.u32 4294901760, %v11886_v28  ;;  %v718_v45 = vsub.f32 %v11871_v20, %v717_v34 }
  0x62   : > { %657 = vmatpush.msra.mxu0 %v11848_v9  ;;  %800 = vmatpush.msra.mxu2 %v11863_v16  ;;  %v695_v38 = vand.u32 4294901760, %v694_v31  ;;  %v701_v39 = vand.u32 4294901760, %v700_v32  ;;  %v707_v44 = vand.u32 4294901760, %v706_v33  ;;  %v11924_v46 = vsub.f32 %v473_v18, %v11888_v29 }
  0x63   : > { %853 = vmatpush.msra.mxu3 %v11848_v9  ;;  %v11926_v47 = vand.u32 4294901760, %v451_v37  ;;  %v11931_v48 = vsub.f32 %v462_v26, %v11909_v36  ;;  %v713_v50 = vand.u32 4294901760, %v712_v40  ;;  %v724_v51 = vsub.f32 %v11881_v25, %v723_v41  ;;  %v583_v40 = vld [vmem:[#allocation4 + $0x5d8] sm:$0xff] }
  0x64   : > { %659 = vmatpush.msra.mxu0 %v11850_v10  ;;  %696 = vmatpush.msra.mxu1 %v695_v38  ;;  %v11937_v52 = vand.u32 4294901760, %v440_v43  ;;  %v16233_v53 = vand.u32 4294901760, %v11907_v35  ;;  %v730_v54 = vsub.f32 %v11886_v28, %v729_v42  ;;  %v719_v56 = vand.u32 4294901760, %v718_v45 }
  0x65   : > { %803 = vmatpush.msra.mxu2 %v11868_v19  ;;  %855 = vmatpush.msra.mxu3 %v11850_v10  ;;  %v11947_v57 = vsub.f32 %v451_v37, %v11926_v47  ;;  %v11949_v58 = vand.u32 4294901760, %v429_v49  ;;  %v16231_v59 = vand.u32 4294901760, %v11924_v46  ;;  %v16227_v61 = vand.u32 4294901760, %v11931_v48 }
  0x66   : > { %661 = vmatpush.msra.mxu0 %v11852_v11  ;;  %702 = vmatpush.msra.mxu1 %v701_v39  ;;  %v725_v63 = vand.u32 4294901760, %v724_v51  ;;  %v736_v0 = vsub.f32 %v11907_v35, %v16233_v53  ;;  %v11960_v1 = vsub.f32 %v440_v43, %v11937_v52  ;;  %v11962_v2 = vand.u32 4294901760, %v418_v55  ;;  %v572_v51 = vld [vmem:[#allocation4 + $0x580] sm:$0xff] }
  0x67   : > { %806 = vmatpush.msra.mxu2 %v11871_v20  ;;  %857 = vmatpush.msra.mxu3 %v11852_v11  ;;  %v731_v7 = vand.u32 4294901760, %v730_v54  ;;  %v11966_v12 = vand.u32 4294901760, %v605_v60  ;;  %v742_v13 = vsub.f32 %v11924_v46, %v16231_v59  ;;  %v11973_v18 = vsub.f32 %v429_v49, %v11949_v58 }
  0x68   : > { %663 = vmatpush.msra.mxu0 %v11865_v17  ;;  %708 = vmatpush.msra.mxu1 %v707_v44  ;;  %v11975_v26 = vand.u32 4294901760, %v407_v62  ;;  %v16225_v30 = vand.u32 4294901760, %v11947_v57  ;;  %v748_v31 = vsub.f32 %v11931_v48, %v16227_v61  ;;  %v11983_v32 = vand.u32 4294901760, %v594_v6  ;;  %v644_v61 = vld.sshfl [vmem:[#allocation1] sm:$0xff pattern:$0x75316420] }
  0x69   : > { %809 = vmatpush.msra.mxu2 %v11881_v25  ;;  %859 = vmatpush.msra.mxu3 %v11865_v17  ;;  %v737_v33 = vand.u32 4294901760, %v736_v0  ;;  %v11987_v37 = vsub.f32 %v418_v55, %v11962_v2  ;;  %v11989_v38 = vand.u32 4294901760, %v396_v8  ;;  %v16224_v39 = vand.u32 4294901760, %v11960_v1  ;;  %v645_v0 = vld.sshfl [vmem:[#allocation1 + $0x8] sm:$0xff pattern:$0x75316420] }
  0x6a   : > { %665 = vmatpush.msra.mxu0 %v11873_v21  ;;  %714 = vmatpush.msra.mxu1 %v713_v50  ;;  %v11995_v43 = vsub.f32 %v605_v60, %v11966_v12  ;;  %v743_v44 = vand.u32 4294901760, %v742_v13  ;;  %v754_v45 = vsub.f32 %v11947_v57, %v16225_v30  ;;  %v12002_v49 = vsub.f32 %v407_v62, %v11975_v26  ;;  %v529_v25 = vld [vmem:[#allocation4 + $0x428] sm:$0xff] }
  0x6b   : > { %812 = vmatpush.msra.mxu2 %v11886_v28  ;;  %861 = vmatpush.msra.mxu3 %v11873_v21  ;;  %v16226_v50 = vand.u32 4294901760, %v11973_v18  ;;  %v749_v54 = vand.u32 4294901760, %v748_v31  ;;  %v12007_v55 = vand.u32 4294901760, %v583_v40  ;;  %v760_v60 = vsub.f32 %v11960_v1, %v16224_v39 }
  0x6c   : > { %667 = vmatpush.msra.mxu0 %v11888_v29  ;;  %720 = vmatpush.msra.mxu1 %v719_v56  ;;  %v12010_v56 = vsub.f32 %v594_v6, %v11983_v32  ;;  %v12017_v62 = vsub.f32 %v396_v8, %v11989_v38  ;;  %v16229_v6 = vand.u32 4294901760, %v11995_v43  ;;  %v755_v13 = vand.u32 4294901760, %v754_v45 }
  0x6d   : > { %815 = vmatpush.msra.mxu2 %v11907_v35  ;;  %863 = vmatpush.msra.mxu3 %v11888_v29  ;;  %v766_v8 = vsub.f32 %v11973_v18, %v16226_v50  ;;  %v16230_v31 = vand.u32 4294901760, %v12002_v49  ;;  %v12034_v39 = vsub.f32 %v583_v40, %v12007_v55  ;;  %v648_v30 = vsel %vm647_vm0, %v645_v0, 0 }
  0x6e   : > { %669 = vmatpush.msra.mxu0 %v11909_v36  ;;  %726 = vmatpush.msra.mxu1 %v725_v63  ;;  %v16228_v63 = vand.u32 4294901760, %v11987_v37  ;;  %v783_v50 = vand.u32 4294901760, %v12017_v62  ;;  %v1035_v40 = vsub.f32 %v11995_v43, %v16229_v6  ;;  %v12138_v28 = vand.u32 4294901760, %v529_v25 }
  0x6f   : > { %818 = vmatpush.msra.mxu2 %v11924_v46  ;;  %865 = vmatpush.msra.mxu3 %v11909_v36  ;;  %vm6466_vm3 = vcmask 1041408   ;;  %vm6468_vm4 = vcmask 1044484   ;;  %vm6472_vm5 = vcmask 1046534   ;;  %vm6476_vm6 = vcmask 1045508  }
  0x70   : > { %671 = vmatpush.msra.mxu0 %v11926_v47  ;;  %732 = vmatpush.msra.mxu1 %v731_v7  ;;  %v12023_v7 = vand.u32 4294901760, %v572_v51  ;;  %v772_v45 = vsub.f32 %v11987_v37, %v16228_v63  ;;  %v12053_v63 = vand.u32 4294901760, %v648_v30  ;;  %v1036_v59 = vand.u32 4294901760, %v1035_v40 }
  0x71   : > { %821 = vmatpush.msra.mxu2 %v11931_v48  ;;  %867 = vmatpush.msra.mxu3 %v11926_v47  ;;  %vm6478_vm7 = vcmask 1043456   ;;  %vm6514_vm8 = vcmask 9216   ;;  %vm6490_vm9 = vcmask 1041409   ;;  %vm6492_vm11 = vcmask 124930  }
  0x72   : > { %673 = vmatpush.msra.mxu0 %v11937_v52  ;;  %738 = vmatpush.msra.mxu1 %v737_v33  ;;  %v16232_v33 = vand.u32 4294901760, %v12010_v56  ;;  %v12047_v0 = vsub.f32 %v572_v51, %v12023_v7  ;;  %v1046_v51 = vand.u32 4294901760, %v12034_v39  ;;  %vm6491_vm10 = vmor %vm6490_vm9, %vm6458_vm1 }
  0x73   : > { %824 = vmatpush.msra.mxu2 %v11947_v57  ;;  %869 = vmatpush.msra.mxu3 %v11937_v52  ;;  %vm6493_vm12 = vmor %vm6492_vm11, %vm6491_vm10 }
  0x74   : > { %675 = vmatpush.msra.mxu0 %v11949_v58  ;;  %744 = vmatpush.msra.mxu1 %v743_v44  ;;  %v761_v44 = vand.u32 4294901760, %v760_v60  ;;  %v778_v60 = vsub.f32 %v12002_v49, %v16230_v31  ;;  %v1041_v6 = vsub.f32 %v12010_v56, %v16232_v33  ;;  %v12065_v31 = vand.u32 4294901760, %v644_v61 }
  0x75   : > { %827 = vmatpush.msra.mxu2 %v11960_v1  ;;  %871 = vmatpush.msra.mxu3 %v11949_v58  ;;  %v1052_v33 = vand.u32 4294901760, %v12047_v0  ;;  %v1047_v14 = vsub.f32 %v12034_v39, %v1046_v51 }
  0x76   : > { %677 = vmatpush.msra.mxu0 %v11962_v2  ;;  %750 = vmatpush.msra.mxu1 %v749_v54  ;;  %v767_v54 = vand.u32 4294901760, %v766_v8  ;;  %v784_v8 = vsub.f32 %v12017_v62, %v783_v50  ;;  %v779_v53 = vand.u32 4294901760, %v778_v60  ;;  %v12083_v40 = vsub.f32 %v644_v61, %v12065_v31 }
  0x77   : > { %830 = vmatpush.msra.mxu2 %v11973_v18  ;;  %873 = vmatpush.msra.mxu3 %v11962_v2  ;;  %v1053_v15 = vsub.f32 %v12047_v0, %v1052_v33  ;;  %v1048_v61 = vand.u32 4294901760, %v1047_v14  ;;  %v16334_v14 = vand.u32 4294901760, %v12010_v56 }
  0x78   : > { %679 = vmatpush.msra.mxu0 %v11975_v26  ;;  %756 = vmatpush.msra.mxu1 %v755_v13  ;;  %v773_v13 = vand.u32 4294901760, %v772_v45  ;;  %v1042_v45 = vand.u32 4294901760, %v1041_v6  ;;  %v12098_v16 = vand.u32 4294901760, %v12083_v40  ;;  %v518_v6 = vld [vmem:[#allocation4 + $0x3d0] sm:$0xff] }
  0x79   : > { %833 = vmatpush.msra.mxu2 %v11987_v37  ;;  %875 = vmatpush.msra.mxu3 %v11975_v26  ;;  %v12150_v60 = vand.u32 4294901760, %v518_v6 }
  0x7a   : > { %681 = vmatpush.msra.mxu0 %v11989_v38  ;;  %762 = vmatpush.msra.mxu1 %v761_v44  ;;  %v12073_v44 = vsub.f32 %v648_v30, %v12053_v63  ;;  %v16330_v30 = vand.u32 4294901760, %v11907_v35  ;;  %v16332_v35 = vand.u32 4294901760, %v11995_v43 }
  0x7b   : > { %836 = vmatpush.msra.mxu2 %v12002_v49  ;;  %877 = vmatpush.msra.mxu3 %v11989_v38 }
  0x7c   : > { %888 = vmatpush.msrb.mxu0 %v693_v22  ;;  %768 = vmatpush.msra.mxu1 %v767_v54  ;;  %v785_v22 = vand.u32 4294901760, %v784_v8  ;;  %v16333_v8 = vand.u32 4294901760, %v11931_v48 }
  0x7d   : > { %839 = vmatpush.msra.mxu2 %v12017_v62  ;;  %1037 = vmatpush.msrb.mxu3 %v1036_v59 }
  0x7e   : > { %892 = vmatpush.msrb.mxu0 %v699_v23  ;;  %774 = vmatpush.msra.mxu1 %v773_v13  ;;  %v12092_v23 = vand.u32 4294901760, %v12073_v44  ;;  %v507_v13 = vld [vmem:[#allocation4 + $0x378] sm:$0xff] }
  0x7f   : > { %1004 = vmatpush.msrb.mxu2 %v11966_v12  ;;  %1043 = vmatpush.msrb.mxu3 %v1042_v45  ;;  %v496_v45 = vld [vmem:[#allocation4 + $0x320] sm:$0xff]  ;;  %v12166_v48 = vand.u32 4294901760, %v507_v13 }
  0x80   : > { %896 = vmatpush.msrb.mxu0 %v705_v24  ;;  %780 = vmatpush.msra.mxu1 %v779_v53  ;;  %v1054_v24 = vand.u32 4294901760, %v1053_v15  ;;  %v562_v53 = vld [vmem:[#allocation4 + $0x530] sm:$0xff]  ;;  %v1014_v19 = vsub.f32 %v12073_v44, %v12092_v23 }
  0x81   : > { %1006 = vmatpush.msrb.mxu2 %v11983_v32  ;;  %1049 = vmatpush.msrb.mxu3 %v1048_v61  ;;  %v12111_v20 = vand.u32 4294901760, %v562_v53  ;;  %v12176_v61 = vsub.f32 %v518_v6, %v12150_v60  ;;  %v452_v6 = vld [vmem:[#allocation4 + $0x1c0] sm:$0xff] }
  0x82   : > { %900 = vmatpush.msrb.mxu0 %v711_v27  ;;  %786 = vmatpush.msra.mxu1 %v785_v22  ;;  %v551_v27 = vld [vmem:[#allocation4 + $0x4d8] sm:$0xff]  ;;  %v16335_v22 = vand.u32 4294901760, %v11947_v57  ;;  %v16336_v57 = vand.u32 4294901760, %v11960_v1 }
  0x83   : > { %1008 = vmatpush.msrb.mxu2 %v12007_v55  ;;  %881 = vmatmul.f32.vlgmr.msra.gmra.mxu3 %v12098_v16  ;;  %v12118_v59 = vand.u32 4294901760, %v551_v27 }
  0x84   : > { %842 = vmatmul.f32.vlgmr.msra.gmra.mxu2 %v12083_v40  ;;  %904 = vmatpush.msrb.mxu0 %v717_v34  ;;  %v12116_v34 = vand.u32 4294901760, %v1014_v19  ;;  %v474_v19 = vld [vmem:[#allocation4 + $0x270] sm:$0xff] }
  0x85   : > { %955 = vmatpush.msrb.mxu1 %v11842_v3  ;;  %1010 = vmatpush.msrb.mxu2 %v12023_v7  ;;  %v540_v3 = vld [vmem:[#allocation4 + $0x480] sm:$0xff] }
  0x86   : > { %908 = vmatpush.msrb.mxu0 %v723_v41  ;;  %1055 = vmatpush.msrb.mxu3 %v1054_v24  ;;  %v12128_v41 = vand.u32 4294901760, %v540_v3 }
  0x87   : > { %1075 = vmatpush.msra.mxu2 %v11995_v43  ;;  %957 = vmatpush.msrb.mxu1 %v11844_v4  ;;  %v12126_v4 = vsub.f32 %v562_v53, %v12111_v20  ;;  %v12161_v43 = vsub.f32 %v529_v25, %v12138_v28 }
  0x88   : > { %1104 = vmatpush.msra.mxu3 %v11966_v12  ;;  %912 = vmatpush.msrb.mxu0 %v729_v42  ;;  %v16331_v42 = vand.u32 4294901760, %v11924_v46  ;;  %v12148_v54 = vsub.f32 %v540_v3, %v12128_v41 }
  0x89   : > { %1078 = vmatpush.msra.mxu2 %v12010_v56  ;;  %959 = vmatpush.msrb.mxu1 %v11846_v5  ;;  %v12136_v5 = vsub.f32 %v551_v27, %v12118_v59  ;;  %v485_v56 = vld [vmem:[#allocation4 + $0x2c8] sm:$0xff]  ;;  %v1237_v53 = vand.u32 4294901760, %v12161_v43  ;;  %v12212_v27 = vand.u32 4294901760, %v474_v19 }
  0x8a   : > { %1106 = vmatpush.msra.mxu3 %v11983_v32  ;;  %916 = vmatpush.msrb.mxu0 %v16330_v30  ;;  %v1231_v15 = vand.u32 4294901760, %v12148_v54  ;;  %v12198_v1 = vand.u32 4294901760, %v485_v56 }
  0x8b   : > { %1081 = vmatpush.msra.mxu2 %v12034_v39  ;;  %961 = vmatpush.msrb.mxu1 %v11848_v9  ;;  %v1219_v9 = vand.u32 4294901760, %v12126_v4  ;;  %v1225_v46 = vand.u32 4294901760, %v12136_v5  ;;  %v1238_v3 = vsub.f32 %v12161_v43, %v1237_v53 }
  0x8c   : > { %1016 = vmatmul.f32.vlgmr.msrb.gmra.mxu2 %v12116_v34  ;;  %1108 = vmatpush.msra.mxu3 %v12007_v55  ;;  %v12223_v25 = vsub.f32 %v485_v56, %v12198_v1  ;;  %v430_v56 = vld [vmem:[#allocation4 + $0x110] sm:$0xff] }
  0x8d   : > { %1084 = vmatpush.msra.mxu2 %v12047_v0  ;;  %920 = vmatpush.msrb.mxu0 %v16331_v42  ;;  %v1226_v24 = vsub.f32 %v12136_v5, %v1225_v46  ;;  %v1243_v0 = vand.u32 4294901760, %v12176_v61 }
  0x8e   : > { %963 = vmatpush.msrb.mxu1 %v11850_v10  ;;  %1057 = vmatmul.f32.vlgmr.msrb.gmra.mxu3 %v12053_v63  ;;  %v685_v10 = vsub.f32 %v12083_v40, %v12098_v16 }
  0x8f   : > { %1133 = vmatpush.msrb.mxu2 %v16332_v35  ;;  %924 = vmatpush.msrb.mxu0 %v16333_v8  ;;  %v1244_v35 = vsub.f32 %v12176_v61, %v1243_v0  ;;  %v12236_v8 = vsub.f32 %v474_v19, %v12212_v27  ;;  %v419_v19 = vld [vmem:[#allocation4 + $0xb8] sm:$0xff] }
  0x90   : > { %1110 = vmatpush.msra.mxu3 %v12023_v7  ;;  %965 = vmatpush.msrb.mxu1 %v11852_v11  ;;  %v1220_v11 = vsub.f32 %v12126_v4, %v1219_v9 }
  0x91   : > { %1137 = vmatpush.msrb.mxu2 %v16334_v14  ;;  %928 = vmatpush.msrb.mxu0 %v16335_v22  ;;  %v16339_v14 = vand.u32 4294901760, %v12002_v49  ;;  %v1261_v22 = vand.u32 4294901760, %v12223_v25  ;;  %v1267_v49 = vand.u32 4294901760, %v12236_v8 }
  0x92   : > { %1164 = vmatpush.msrb.mxu3 %v11966_v12  ;;  %967 = vmatpush.msrb.mxu1 %v11865_v17  ;;  %v12181_v12 = vand.u32 4294901760, %v496_v45  ;;  %v12186_v17 = vand.u32 4294901760, %v685_v10  ;;  %v1221_v39 = vand.u32 4294901760, %v1220_v11  ;;  %v441_v10 = vld [vmem:[#allocation4 + $0x168] sm:$0xff] }
  0x93   : > { %1141 = vmatpush.msrb.mxu2 %v1046_v51  ;;  %932 = vmatpush.msrb.mxu0 %v16336_v57  ;;  %v1232_v51 = vsub.f32 %v12148_v54, %v1231_v15  ;;  %v1245_v57 = vand.u32 4294901760, %v1244_v35 }
  0x94   : > { %1166 = vmatpush.msrb.mxu3 %v11983_v32  ;;  %969 = vmatpush.msrb.mxu1 %v11873_v21  ;;  %v12196_v32 = vsub.f32 %v507_v13, %v12166_v48  ;;  %v16337_v21 = vand.u32 4294901760, %v11973_v18  ;;  %v1227_v18 = vand.u32 4294901760, %v1226_v24  ;;  %v12252_v24 = vand.u32 4294901760, %v441_v10 }
  0x95   : > { %1145 = vmatpush.msrb.mxu2 %v1052_v33  ;;  %v463_v33 = vld [vmem:[#allocation4 + $0x218] sm:$0xff]  ;;  %687 = vmatmul.f32.vlgmr.msra.gmra.mxu0 %v12186_v17  ;;  %v1233_v42 = vand.u32 4294901760, %v1232_v51  ;;  %v408_v51 = vld [vmem:[#allocation4 + $0x60] sm:$0xff] }
  0x96   : > { %1168 = vmatpush.msrb.mxu3 %v12007_v55  ;;  %1087 = vmatmul.f32.vlgmr.msra.gmra.mxu2 %v12073_v44  ;;  %v12210_v55 = vsub.f32 %v496_v45, %v12181_v12  ;;  %v12225_v30 = vand.u32 4294901760, %v463_v33  ;;  %v12239_v45 = vand.u32 4294901760, %v452_v6  ;;  %v12290_v35 = vand.u32 4294901760, %v408_v51 }
  0x97   : > { %936 = vmatpush.msrb.mxu0 %v16337_v21  ;;  %1177 = vmatpush.msra.mxu2 %v12111_v20 }
  0x98   : > { %971 = vmatpush.msrb.mxu1 %v11888_v29  ;;  %1170 = vmatpush.msrb.mxu3 %v12023_v7  ;;  %v1249_v29 = vand.u32 4294901760, %v12196_v32  ;;  %v16338_v7 = vand.u32 4294901760, %v11987_v37  ;;  %v1255_v13 = vand.u32 4294901760, %v12210_v55  ;;  %v1239_v37 = vand.u32 4294901760, %v1238_v3 }
  0x99   : > { %1114 = vmatmul.f32.vlgmr.msra.gmra.mxu3 %v12092_v23  ;;  %1179 = vmatpush.msra.mxu2 %v12118_v59  ;;  %v12249_v11 = vsub.f32 %v463_v33, %v12225_v30  ;;  %v12263_v21 = vsub.f32 %v452_v6, %v12239_v45  ;;  %v12275_v33 = vsub.f32 %v441_v10, %v12252_v24  ;;  %v397_v6 = vld [vmem:[#allocation4 + $0x8] sm:$0xff] }
  0x9a   : > { %1222 = vmatpush.msra.mxu3 %v1221_v39  ;;  %940 = vmatpush.msrb.mxu0 %v16338_v7  ;;  %v12265_v39 = vand.u32 4294901760, %v430_v56  ;;  %v1268_v3 = vsub.f32 %v12236_v8, %v1267_v49 }
  0x9b   : > { %973 = vmatpush.msrb.mxu1 %v11909_v36  ;;  %1181 = vmatpush.msra.mxu2 %v12128_v41  ;;  %v1250_v36 = vsub.f32 %v12196_v32, %v1249_v29  ;;  %v1273_v62 = vand.u32 4294901760, %v12249_v11  ;;  %v1279_v7 = vand.u32 4294901760, %v12263_v21 }
  0x9c   : > { %1228 = vmatpush.msra.mxu3 %v1227_v18  ;;  %788 = vmatmul.f32.vlgmr.msra.gmra.mxu1 %v12065_v31  ;;  %v12277_v18 = vand.u32 4294901760, %v419_v19 }
  0x9d   : > { %944 = vmatpush.msrb.mxu0 %v16339_v14  ;;  %975 = vmatpush.msrb.mxu1 %v11926_v47  ;;  %v1256_v47 = vsub.f32 %v12210_v55, %v1255_v13  ;;  %v1274_v10 = vsub.f32 %v12249_v11, %v1273_v62 }
  0x9e   : > { %1183 = vmatpush.msra.mxu2 %v12138_v28  ;;  %1234 = vmatpush.msra.mxu3 %v1233_v42  ;;  %v12288_v42 = vsub.f32 %v430_v56, %v12265_v39  ;;  %v12300_v14 = vsub.f32 %v419_v19, %v12277_v18  ;;  %v1269_v56 = vand.u32 4294901760, %v1268_v3 }
  0x9f   : > { %948 = vmatpush.msrb.mxu0 %v783_v50  ;;  %977 = vmatpush.msrb.mxu1 %v11937_v52  ;;  %v1251_v52 = vand.u32 4294901760, %v1250_v36  ;;  %v1262_v50 = vsub.f32 %v12223_v25, %v1261_v22  ;;  %v12302_v36 = vand.u32 4294901760, %v397_v6  ;;  %v1275_v19 = vand.u32 4294901760, %v1274_v10 }
  0xa0   : > { %1185 = vmatpush.msra.mxu2 %v12150_v60  ;;  %1240 = vmatpush.msra.mxu3 %v1239_v37  ;;  %v1285_v37 = vand.u32 4294901760, %v12275_v33 }
  0xa1   : > { %1320 = vmatpush.msra.mxu0 %v12126_v4  ;;  %979 = vmatpush.msrb.mxu1 %v11949_v58  ;;  %v1257_v58 = vand.u32 4294901760, %v1256_v47  ;;  %v12312_v47 = vsub.f32 %v408_v51, %v12290_v35  ;;  %v573_v4 = vld [vmem:[#allocation4 + $0x588] sm:$0xff] }
  0xa2   : > { %1187 = vmatpush.msra.mxu2 %v12166_v48  ;;  %1246 = vmatpush.msra.mxu3 %v1245_v57  ;;  %v1291_v57 = vand.u32 4294901760, %v12288_v42 }
  0xa3   : > { %1323 = vmatpush.msra.mxu0 %v12136_v5  ;;  %981 = vmatpush.msrb.mxu1 %v11962_v2  ;;  %v1263_v2 = vand.u32 4294901760, %v1262_v50  ;;  %v12322_v50 = vsub.f32 %v397_v6, %v12302_v36  ;;  %v1303_v3 = vand.u32 4294901760, %v12312_v47  ;;  %v12390_v5 = vand.u32 4294901760, %v573_v4 }
  0xa4   : > { %950 = vmatmul.f32.vlgmr.msrb.gmra.mxu0 %v12065_v31  ;;  %1189 = vmatpush.msra.mxu2 %v12181_v12 }
  0xa5   : > { %1252 = vmatpush.msra.mxu3 %v1251_v52  ;;  %1326 = vmatpush.msra.mxu0 %v12148_v54  ;;  %v1297_v52 = vand.u32 4294901760, %v12300_v14  ;;  %v1309_v10 = vand.u32 4294901760, %v12322_v50 }
  0xa6   : > { %983 = vmatpush.msrb.mxu1 %v11975_v26  ;;  %1191 = vmatpush.msra.mxu2 %v12198_v1  ;;  %v1280_v26 = vsub.f32 %v12263_v21, %v1279_v7 }
  0xa7   : > { %1258 = vmatpush.msra.mxu3 %v1257_v58  ;;  %1329 = vmatpush.msra.mxu0 %v12161_v43  ;;  %v1292_v58 = vsub.f32 %v12288_v42, %v1291_v57 }
  0xa8   : > { %985 = vmatpush.msrb.mxu1 %v11989_v38  ;;  %1193 = vmatpush.msra.mxu2 %v12212_v27  ;;  %v1286_v38 = vsub.f32 %v12275_v33, %v1285_v37  ;;  %v1281_v51 = vand.u32 4294901760, %v1280_v26  ;;  %v1304_v26 = vsub.f32 %v12312_v47, %v1303_v3 }
  0xa9   : > { %987 = vmatmul.f32.vlgmr.msrb.gmra.mxu1 %v12065_v31  ;;  %1264 = vmatpush.msra.mxu3 %v1263_v2  ;;  %v1298_v2 = vsub.f32 %v12300_v14, %v1297_v52 }
  0xaa   : > { %1332 = vmatpush.msra.mxu0 %v12176_v61  ;;  %1373 = vmatpush.msra.mxu1 %v12111_v20  ;;  %v1287_v6 = vand.u32 4294901760, %v1286_v38  ;;  %v1310_v38 = vsub.f32 %v12322_v50, %v1309_v10 }
  0xab   : > { %1195 = vmatpush.msra.mxu2 %v12225_v30  ;;  %1270 = vmatpush.msra.mxu3 %v1269_v56  ;;  %v1293_v56 = vand.u32 4294901760, %v1292_v58 }
  0xac   : > { %1335 = vmatpush.msra.mxu0 %v12196_v32  ;;  %1375 = vmatpush.msra.mxu1 %v12118_v59  ;;  %v1311_v58 = vand.u32 4294901760, %v1310_v38 }
  0xad   : > { %1147 = vmatmul.f32.vlgmr.msrb.gmra.mxu2 %v12053_v63  ;;  %1276 = vmatpush.msra.mxu3 %v1275_v19  ;;  %v1299_v19 = vand.u32 4294901760, %v1298_v2  ;;  %v595_v2 = vld [vmem:[#allocation4 + $0x638] sm:$0xff] }
  0xae   : > { %1197 = vmatpush.msra.mxu2 %v12239_v45  ;;  %1338 = vmatpush.msra.mxu0 %v12210_v55  ;;  %v552_v55 = vld [vmem:[#allocation4 + $0x4e0] sm:$0xff] }
  0xaf   : > { %1377 = vmatpush.msra.mxu1 %v12128_v41  ;;  %1172 = vmatmul.f32.vlgmr.msrb.gmra.mxu3 %v12053_v63 }
  0xb0   : > { %1199 = vmatpush.msra.mxu2 %v12252_v24  ;;  %1282 = vmatpush.msra.mxu3 %v1281_v51  ;;  %v1305_v51 = vand.u32 4294901760, %v1304_v26  ;;  %v584_v26 = vld [vmem:[#allocation4 + $0x5e0] sm:$0xff] }
  0xb1   : > { %1341 = vmatpush.msra.mxu0 %v12223_v25  ;;  %1379 = vmatpush.msra.mxu1 %v12138_v28  ;;  %v12374_v38 = vand.u32 4294901760, %v584_v26  ;;  %v12454_v25 = vand.u32 4294901760, %v552_v55 }
  0xb2   : > { %1201 = vmatpush.msra.mxu2 %v12265_v39  ;;  %1288 = vmatpush.msra.mxu3 %v1287_v6  ;;  %v606_v6 = vld [vmem:[#allocation4 + $0x690] sm:$0xff] }
  0xb3   : > { %1344 = vmatpush.msra.mxu0 %v12236_v8  ;;  %1381 = vmatpush.msra.mxu1 %v12150_v60  ;;  %v12396_v54 = vsub.f32 %v584_v26, %v12374_v38 }
  0xb4   : > { %1203 = vmatpush.msra.mxu2 %v12277_v18  ;;  %1294 = vmatpush.msra.mxu3 %v1293_v56  ;;  %v12361_v56 = vand.u32 4294901760, %v606_v6 }
  0xb5   : > { %1347 = vmatpush.msra.mxu0 %v12249_v11  ;;  %1383 = vmatpush.msra.mxu1 %v12166_v48  ;;  %v1572_v43 = vand.u32 4294901760, %v12396_v54  ;;  %v12472_v11 = vsub.f32 %v552_v55, %v12454_v25 }
  0xb6   : > { %1205 = vmatpush.msra.mxu2 %v12290_v35  ;;  %1300 = vmatpush.msra.mxu3 %v1299_v19  ;;  %v12367_v19 = vand.u32 4294901760, %v595_v2 }
  0xb7   : > { %1350 = vmatpush.msra.mxu0 %v12263_v21  ;;  %1385 = vmatpush.msra.mxu1 %v12181_v12 }
  0xb8   : > { %1207 = vmatpush.msra.mxu2 %v12302_v36  ;;  %1306 = vmatpush.msra.mxu3 %v1305_v51  ;;  %v464_v51 = vld [vmem:[#allocation4 + $0x220] sm:$0xff] }
  0xb9   : > { %1353 = vmatpush.msra.mxu0 %v12275_v33  ;;  %1387 = vmatpush.msra.mxu1 %v12198_v1  ;;  %v497_v33 = vld [vmem:[#allocation4 + $0x328] sm:$0xff] }
  0xba   : > { %1414 = vmatpush.msrb.mxu2 %v1219_v9  ;;  %1312 = vmatpush.msra.mxu3 %v1311_v58  ;;  %v12377_v9 = vsub.f32 %v606_v6, %v12361_v56 }
  0xbb   : > { %1356 = vmatpush.msra.mxu0 %v12288_v42  ;;  %1389 = vmatpush.msra.mxu1 %v12212_v27 }
  0xbc   : > { %1418 = vmatpush.msrb.mxu2 %v1225_v46  ;;  %1481 = vmatpush.msrb.mxu3 %v12111_v20  ;;  %v12385_v20 = vsub.f32 %v595_v2, %v12367_v19  ;;  %v12408_v46 = vsub.f32 %v573_v4, %v12390_v5 }
  0xbd   : > { %1359 = vmatpush.msra.mxu0 %v12300_v14  ;;  %1391 = vmatpush.msra.mxu1 %v12225_v30  ;;  %v12504_v14 = vand.u32 4294901760, %v497_v33 }
  0xbe   : > { %1422 = vmatpush.msrb.mxu2 %v1231_v15  ;;  %1483 = vmatpush.msrb.mxu3 %v12118_v59  ;;  %v1560_v59 = vand.u32 4294901760, %v12377_v9 }
  0xbf   : > { %1362 = vmatpush.msra.mxu0 %v12312_v47  ;;  %1393 = vmatpush.msra.mxu1 %v12239_v45  ;;  %v12529_v2 = vsub.f32 %v497_v33, %v12504_v14 }
  0xc0   : > { %1426 = vmatpush.msrb.mxu2 %v1237_v53  ;;  %1485 = vmatpush.msrb.mxu3 %v12128_v41  ;;  %v1566_v41 = vand.u32 4294901760, %v12385_v20  ;;  %v1573_v53 = vsub.f32 %v12396_v54, %v1572_v43 }
  0xc1   : > { %1365 = vmatpush.msra.mxu0 %v12322_v50  ;;  %1395 = vmatpush.msra.mxu1 %v12252_v24 }
  0xc2   : > { %1430 = vmatpush.msrb.mxu2 %v1243_v0  ;;  %1487 = vmatpush.msrb.mxu3 %v12138_v28  ;;  %v1561_v28 = vsub.f32 %v12377_v9, %v1560_v59  ;;  %v1567_v15 = vsub.f32 %v12385_v20, %v1566_v41  ;;  %v1574_v0 = vand.u32 4294901760, %v1573_v53 }
  0xc3   : > { %1530 = vmatpush.msrb.mxu0 %v12361_v56  ;;  %1213 = vmatmul.f32.vlgmr.msra.gmra.mxu2 %v12186_v17 }
  0xc4   : > { %1397 = vmatpush.msra.mxu1 %v12265_v39  ;;  %1434 = vmatpush.msrb.mxu2 %v1249_v29  ;;  %v1562_v61 = vand.u32 4294901760, %v1561_v28  ;;  %v541_v29 = vld [vmem:[#allocation4 + $0x488] sm:$0xff]  ;;  %v16238_v28 = vand.u32 4294901760, %v12529_v2 }
  0xc5   : > { %1489 = vmatpush.msrb.mxu3 %v12150_v60  ;;  %1532 = vmatpush.msrb.mxu0 %v12367_v19  ;;  %v1578_v60 = vand.u32 4294901760, %v12408_v46  ;;  %v12463_v8 = vand.u32 4294901760, %v541_v29 }
  0xc6   : > { %1314 = vmatmul.f32.vlgmr.msra.gmra.mxu3 %v12065_v31  ;;  %1399 = vmatpush.msra.mxu1 %v12277_v18 }
  0xc7   : > { %1438 = vmatpush.msrb.mxu2 %v1255_v13  ;;  %1491 = vmatpush.msrb.mxu3 %v12166_v48  ;;  %v1568_v48 = vand.u32 4294901760, %v1567_v15  ;;  %v1579_v32 = vsub.f32 %v12408_v46, %v1578_v60  ;;  %v12480_v21 = vsub.f32 %v541_v29, %v12463_v8  ;;  %v431_v15 = vld [vmem:[#allocation4 + $0x118] sm:$0xff]  ;;  %v420_v29 = vld [vmem:[#allocation4 + $0xc0] sm:$0xff] }
  0xc8   : > { %1534 = vmatpush.msrb.mxu0 %v12374_v38  ;;  %1401 = vmatpush.msra.mxu1 %v12290_v35 }
  0xc9   : > { %1368 = vmatmul.f32.vlgmr.msra.gmra.mxu0 %v12083_v40  ;;  %1442 = vmatpush.msrb.mxu2 %v1261_v22 }
  0xca   : > { %1493 = vmatpush.msrb.mxu3 %v12181_v12  ;;  %1536 = vmatpush.msrb.mxu0 %v12390_v5  ;;  %v1580_v12 = vand.u32 4294901760, %v1579_v32 }
  0xcb   : > { %1403 = vmatpush.msra.mxu1 %v12302_v36  ;;  %1446 = vmatpush.msrb.mxu2 %v1267_v49  ;;  %v508_v49 = vld [vmem:[#allocation4 + $0x380] sm:$0xff] }
  0xcc   : > { %1601 = vmatpush.msra.mxu0 %v12377_v9  ;;  %1495 = vmatpush.msrb.mxu3 %v12198_v1  ;;  %v563_v1 = vld [vmem:[#allocation4 + $0x538] sm:$0xff]  ;;  %v12543_v9 = vand.u32 4294901760, %v464_v51 }
  0xcd   : > { %1563 = vmatpush.msrb.mxu1 %v1562_v61  ;;  %1450 = vmatpush.msrb.mxu2 %v1273_v62 }
  0xce   : > { %1604 = vmatpush.msra.mxu0 %v12385_v20  ;;  %1497 = vmatpush.msrb.mxu3 %v12212_v27  ;;  %v12449_v27 = vand.u32 4294901760, %v563_v1  ;;  %v12565_v61 = vsub.f32 %v464_v51, %v12543_v9 }
  0xcf   : > { %1569 = vmatpush.msrb.mxu1 %v1568_v48  ;;  %1454 = vmatpush.msrb.mxu2 %v1279_v7  ;;  %v1751_v7 = vand.u32 4294901760, %v12472_v11 }
  0xd0   : > { %1607 = vmatpush.msra.mxu0 %v12396_v54  ;;  %1499 = vmatpush.msrb.mxu3 %v12225_v30  ;;  %v530_v30 = vld [vmem:[#allocation4 + $0x430] sm:$0xff]  ;;  %v12461_v13 = vsub.f32 %v563_v1, %v12449_v27  ;;  %v12579_v1 = vand.u32 4294901760, %v431_v15  ;;  %v16234_v33 = vand.u32 4294901760, %v12565_v61 }
  0xd1   : > { %1575 = vmatpush.msrb.mxu1 %v1574_v0  ;;  %1542 = vmatmul.f32.vlgmr.msrb.gmra.mxu0 %v12116_v34  ;;  %v12466_v22 = vand.u32 4294901760, %v530_v30  ;;  %v1752_v50 = vsub.f32 %v12472_v11, %v1751_v7  ;;  %v442_v54 = vld [vmem:[#allocation4 + $0x170] sm:$0xff]  ;;  %v1782_v0 = vsub.f32 %v12529_v2, %v16238_v28 }
  0xd2   : > { %1407 = vmatmul.f32.vlgmr.msra.gmra.mxu1 %v12098_v16  ;;  %1610 = vmatpush.msra.mxu0 %v12408_v46  ;;  %v12567_v53 = vand.u32 4294901760, %v442_v54 }
  0xd3   : > { %1458 = vmatpush.msrb.mxu2 %v1285_v37  ;;  %1501 = vmatpush.msrb.mxu3 %v12239_v45  ;;  %v519_v45 = vld [vmem:[#allocation4 + $0x3d8] sm:$0xff]  ;;  %v12486_v62 = vsub.f32 %v530_v30, %v12466_v22  ;;  %v486_v37 = vld [vmem:[#allocation4 + $0x2d0] sm:$0xff] }
  0xd4   : > { %1581 = vmatpush.msrb.mxu1 %v1580_v12  ;;  %1659 = vmatpush.msrb.mxu0 %v1560_v59 }
  0xd5   : > { %1462 = vmatpush.msrb.mxu2 %v1291_v57  ;;  %1503 = vmatpush.msrb.mxu3 %v12252_v24  ;;  %v12475_v24 = vand.u32 4294901760, %v519_v45  ;;  %v1757_v57 = vand.u32 4294901760, %v12480_v21  ;;  %v1763_v47 = vand.u32 4294901760, %v12486_v62 }
  0xd6   : > { %1630 = vmatpush.msra.mxu1 %v12361_v56  ;;  %1663 = vmatpush.msrb.mxu0 %v1566_v41 }
  0xd7   : > { %1466 = vmatpush.msrb.mxu2 %v1297_v52  ;;  %1505 = vmatpush.msrb.mxu3 %v12265_v39  ;;  %v1745_v39 = vand.u32 4294901760, %v12461_v13  ;;  %v12497_v42 = vsub.f32 %v519_v45, %v12475_v24  ;;  %v475_v52 = vld [vmem:[#allocation4 + $0x278] sm:$0xff]  ;;  %v1758_v6 = vsub.f32 %v12480_v21, %v1757_v57  ;;  %v1764_v26 = vsub.f32 %v12486_v62, %v1763_v47 }
  0xd8   : > { %1632 = vmatpush.msra.mxu1 %v12367_v19  ;;  %1667 = vmatpush.msrb.mxu0 %v1572_v43 }
  0xd9   : > { %1470 = vmatpush.msrb.mxu2 %v1303_v3  ;;  %1507 = vmatpush.msrb.mxu3 %v12277_v18  ;;  %v12491_v18 = vand.u32 4294901760, %v508_v49  ;;  %v1765_v43 = vand.u32 4294901760, %v1764_v26  ;;  %v398_v26 = vld [vmem:[#allocation4 + $0x10] sm:$0xff] }
  0xda   : > { %1634 = vmatpush.msra.mxu1 %v12374_v38  ;;  %1671 = vmatpush.msrb.mxu0 %v1578_v60 }
  0xdb   : > { %1583 = vmatmul.f32.vlgmr.msrb.gmra.mxu1 %v12053_v63  ;;  %1613 = vmatmul.f32.vlgmr.msra.gmra.mxu0 %v12073_v44  ;;  %v12516_v3 = vsub.f32 %v508_v49, %v12491_v18  ;;  %v12589_v49 = vsub.f32 %v442_v54, %v12567_v53 }
  0xdc   : > { %1636 = vmatpush.msra.mxu1 %v12390_v5  ;;  %1703 = vmatpush.msra.mxu0 %v12449_v27 }
  0xdd   : > { %1474 = vmatpush.msrb.mxu2 %v1309_v10  ;;  %1509 = vmatpush.msrb.mxu3 %v12290_v35  ;;  %v1746_v35 = vsub.f32 %v12461_v13, %v1745_v39  ;;  %v12518_v10 = vand.u32 4294901760, %v486_v37  ;;  %v16240_v20 = vand.u32 4294901760, %v12516_v3 }
  0xde   : > { %1690 = vmatpush.msrb.mxu1 %v12361_v56  ;;  %1476 = vmatmul.f32.vlgmr.msrb.gmra.mxu2 %v12065_v31  ;;  %v12531_v56 = vand.u32 4294901760, %v475_v52 }
  0xdf   : > { %1705 = vmatpush.msra.mxu0 %v12454_v25  ;;  %1846 = vmatpush.msra.mxu2 %v12461_v13  ;;  %v1747_v58 = vand.u32 4294901760, %v1746_v35  ;;  %v12541_v4 = vsub.f32 %v486_v37, %v12518_v10  ;;  %v1776_v60 = vsub.f32 %v12516_v3, %v16240_v20  ;;  %v409_v37 = vld [vmem:[#allocation4 + $0x68] sm:$0xff]  ;;  %v607_v35 = vld [vmem:[#allocation4 + $0x698] sm:$0xff] }
  0xe0   : > { %1511 = vmatpush.msrb.mxu3 %v12302_v36  ;;  %1692 = vmatpush.msrb.mxu1 %v12367_v19  ;;  %v16242_v36 = vand.u32 4294901760, %v12497_v42  ;;  %v453_v19 = vld [vmem:[#allocation4 + $0x1c8] sm:$0xff]  ;;  %v12553_v41 = vsub.f32 %v475_v52, %v12531_v56  ;;  %v12594_v52 = vand.u32 4294901760, %v420_v29 }
  0xe1   : > { %1513 = vmatmul.f32.vlgmr.msrb.gmra.mxu3 %v12065_v31  ;;  %1707 = vmatpush.msra.mxu0 %v12463_v8  ;;  %v12555_v46 = vand.u32 4294901760, %v453_v19  ;;  %v16236_v48 = vand.u32 4294901760, %v12541_v4  ;;  %v1777_v30 = vand.u32 4294901760, %v1776_v60  ;;  %v12620_v60 = vand.u32 4294901760, %v398_v26 }
  0xe2   : > { %1849 = vmatpush.msra.mxu2 %v12472_v11  ;;  %1899 = vmatpush.msra.mxu3 %v12449_v27  ;;  %v1770_v59 = vsub.f32 %v12497_v42, %v16242_v36  ;;  %v16235_v55 = vand.u32 4294901760, %v12553_v41 }
  0xe3   : > { %1694 = vmatpush.msrb.mxu1 %v12374_v38  ;;  %1709 = vmatpush.msra.mxu0 %v12466_v22  ;;  %v1753_v38 = vand.u32 4294901760, %v1752_v50  ;;  %v12577_v12 = vsub.f32 %v453_v19, %v12555_v46  ;;  %v1788_v45 = vsub.f32 %v12541_v4, %v16236_v48  ;;  %v1783_v50 = vand.u32 4294901760, %v1782_v0  ;;  %v596_v19 = vld [vmem:[#allocation4 + $0x640] sm:$0xff]  ;;  %v585_v0 = vld [vmem:[#allocation4 + $0x5e8] sm:$0xff]  ;;  %v574_v48 = vld [vmem:[#allocation4 + $0x590] sm:$0xff] }
  0xe4   : > { %1852 = vmatpush.msra.mxu2 %v12480_v21  ;;  %1901 = vmatpush.msra.mxu3 %v12454_v25  ;;  %v1771_v32 = vand.u32 4294901760, %v1770_v59  ;;  %v1794_v51 = vsub.f32 %v12553_v41, %v16235_v55  ;;  %v12608_v59 = vand.u32 4294901760, %v607_v35  ;;  %v16340_v21 = vand.u32 4294901760, %v12497_v42 }
  0xe5   : > { %1696 = vmatpush.msrb.mxu1 %v12390_v5  ;;  %1711 = vmatpush.msra.mxu0 %v12475_v24  ;;  %v1759_v5 = vand.u32 4294901760, %v1758_v6  ;;  %v16237_v6 = vand.u32 4294901760, %v12577_v12  ;;  %v1789_v54 = vand.u32 4294901760, %v1788_v45 }
  0xe6   : > { %1640 = vmatmul.f32.vlgmr.msra.gmra.mxu1 %v12092_v23  ;;  %1855 = vmatpush.msra.mxu2 %v12486_v62  ;;  %v12635_v55 = vsub.f32 %v607_v35, %v12608_v59  ;;  %v553_v62 = vld [vmem:[#allocation4 + $0x4e8] sm:$0xff] }
  0xe7   : > { %1748 = vmatpush.msra.mxu1 %v1747_v58  ;;  %1903 = vmatpush.msra.mxu3 %v12463_v8  ;;  %v12601_v58 = vsub.f32 %v431_v15, %v12579_v1  ;;  %v12618_v15 = vsub.f32 %v420_v29, %v12594_v52  ;;  %v1806_v45 = vsub.f32 %v12577_v12, %v16237_v6  ;;  %v12641_v6 = vand.u32 4294901760, %v585_v0 }
  0xe8   : > { %1713 = vmatpush.msra.mxu0 %v12491_v18  ;;  %1858 = vmatpush.msra.mxu2 %v12497_v42  ;;  %v542_v42 = vld [vmem:[#allocation4 + $0x490] sm:$0xff] }
  0xe9   : > { %1754 = vmatpush.msra.mxu1 %v1753_v38  ;;  %1905 = vmatpush.msra.mxu3 %v12466_v22  ;;  %v12606_v38 = vand.u32 4294901760, %v409_v37  ;;  %v16243_v35 = vand.u32 4294901760, %v12618_v15 }
  0xea   : > { %1715 = vmatpush.msra.mxu0 %v12504_v14  ;;  %1861 = vmatpush.msra.mxu2 %v12516_v3 }
  0xeb   : > { %1760 = vmatpush.msra.mxu1 %v1759_v5  ;;  %1907 = vmatpush.msra.mxu3 %v12475_v24  ;;  %v1800_v5 = vsub.f32 %v12565_v61, %v16234_v33  ;;  %v16241_v33 = vand.u32 4294901760, %v12601_v58  ;;  %v12632_v29 = vsub.f32 %v409_v37, %v12606_v38  ;;  %v12646_v37 = vsub.f32 %v398_v26, %v12620_v60 }
  0xec   : > { %1717 = vmatpush.msra.mxu0 %v12518_v10  ;;  %1864 = vmatpush.msra.mxu2 %v12529_v2  ;;  %v16244_v26 = vand.u32 4294901760, %v12635_v55 }
  0xed   : > { %1766 = vmatpush.msra.mxu1 %v1765_v43  ;;  %1909 = vmatpush.msra.mxu3 %v12491_v18  ;;  %v16239_v43 = vand.u32 4294901760, %v12589_v49  ;;  %v16245_v20 = vand.u32 4294901760, %v12632_v29  ;;  %v16246_v36 = vand.u32 4294901760, %v12646_v37 }
  0xee   : > { %1719 = vmatpush.msra.mxu0 %v12531_v56  ;;  %1867 = vmatpush.msra.mxu2 %v12541_v4 }
  0xef   : > { %1772 = vmatpush.msra.mxu1 %v1771_v32  ;;  %1911 = vmatpush.msra.mxu3 %v12504_v14  ;;  %v12622_v32 = vand.u32 4294901760, %v596_v19 }
  0xf0   : > { %1721 = vmatpush.msra.mxu0 %v12543_v9  ;;  %1870 = vmatpush.msra.mxu2 %v12553_v41 }
  0xf1   : > { %1778 = vmatpush.msra.mxu1 %v1777_v30  ;;  %1913 = vmatpush.msra.mxu3 %v12518_v10  ;;  %v1795_v30 = vand.u32 4294901760, %v1794_v51  ;;  %v1812_v51 = vsub.f32 %v12589_v49, %v16239_v43  ;;  %v12650_v28 = vsub.f32 %v596_v19, %v12622_v32  ;;  %v12656_v43 = vand.u32 4294901760, %v574_v48 }
  0xf2   : > { %1673 = vmatmul.f32.vlgmr.msrb.gmra.mxu0 %v12053_v63  ;;  %1873 = vmatpush.msra.mxu2 %v12565_v61 }
  0xf3   : > { %1723 = vmatpush.msra.mxu0 %v12555_v46  ;;  %1784 = vmatpush.msra.mxu1 %v1783_v50  ;;  %v1801_v50 = vand.u32 4294901760, %v1800_v5  ;;  %v1818_v5 = vsub.f32 %v12601_v58, %v16241_v33  ;;  %v1813_v19 = vand.u32 4294901760, %v1812_v51  ;;  %v2092_v33 = vand.u32 4294901760, %v12650_v28 }
  0xf4   : > { %1915 = vmatpush.msra.mxu3 %v12531_v56  ;;  %1698 = vmatmul.f32.vlgmr.msrb.gmra.mxu1 %v12053_v63  ;;  %v12675_v51 = vsub.f32 %v574_v48, %v12656_v43 }
  0xf5   : > { %1725 = vmatpush.msra.mxu0 %v12567_v53  ;;  %1790 = vmatpush.msra.mxu1 %v1789_v54  ;;  %v1807_v54 = vand.u32 4294901760, %v1806_v45  ;;  %v1824_v45 = vsub.f32 %v12618_v15, %v16243_v35  ;;  %v1830_v35 = vsub.f32 %v12632_v29, %v16245_v20 }
  0xf6   : > { %1876 = vmatpush.msra.mxu2 %v12577_v12  ;;  %1917 = vmatpush.msra.mxu3 %v12543_v9 }
  0xf7   : > { %1727 = vmatpush.msra.mxu0 %v12579_v1  ;;  %1796 = vmatpush.msra.mxu1 %v1795_v30  ;;  %v12664_v30 = vsub.f32 %v585_v0, %v12641_v6  ;;  %v2087_v0 = vsub.f32 %v12635_v55, %v16244_v26  ;;  %v1825_v48 = vand.u32 4294901760, %v1824_v45  ;;  %v1836_v26 = vsub.f32 %v12646_v37, %v16246_v36 }
  0xf8   : > { %1879 = vmatpush.msra.mxu2 %v12589_v49  ;;  %1919 = vmatpush.msra.mxu3 %v12555_v46  ;;  %v1831_v45 = vand.u32 4294901760, %v1830_v35  ;;  %v564_v35 = vld [vmem:[#allocation4 + $0x540] sm:$0xff] }
  0xf9   : > { %1729 = vmatpush.msra.mxu0 %v12594_v52  ;;  %1802 = vmatpush.msra.mxu1 %v1801_v50  ;;  %v1819_v50 = vand.u32 4294901760, %v1818_v5  ;;  %v2093_v5 = vsub.f32 %v12650_v28, %v2092_v33  ;;  %v2088_v20 = vand.u32 4294901760, %v2087_v0  ;;  %v520_v0 = vld [vmem:[#allocation4 + $0x3e0] sm:$0xff] }
  0xfa   : > { %1882 = vmatpush.msra.mxu2 %v12601_v58  ;;  %1921 = vmatpush.msra.mxu3 %v12567_v53 }
  0xfb   : > { %1731 = vmatpush.msra.mxu0 %v12606_v38  ;;  %1808 = vmatpush.msra.mxu1 %v1807_v54  ;;  %v2098_v54 = vand.u32 4294901760, %v12664_v30  ;;  %v2094_v13 = vand.u32 4294901760, %v2093_v5 }
  0xfc   : > { %1885 = vmatpush.msra.mxu2 %v12618_v15  ;;  %1923 = vmatpush.msra.mxu3 %v12579_v1 }
  0xfd   : > { %1733 = vmatpush.msra.mxu0 %v12620_v60  ;;  %1814 = vmatpush.msra.mxu1 %v1813_v19  ;;  %v2104_v19 = vand.u32 4294901760, %v12675_v51  ;;  %v2099_v36 = vsub.f32 %v12664_v30, %v2098_v54 }
  0xfe   : > { %1888 = vmatpush.msra.mxu2 %v12632_v29  ;;  %1925 = vmatpush.msra.mxu3 %v12594_v52 }
  0xff   : > { %1940 = vmatpush.msrb.mxu0 %v1745_v39  ;;  %1820 = vmatpush.msra.mxu1 %v1819_v50  ;;  %v1837_v39 = vand.u32 4294901760, %v1836_v26  ;;  %v2105_v11 = vsub.f32 %v12675_v51, %v2104_v19  ;;  %v531_v26 = vld [vmem:[#allocation4 + $0x438] sm:$0xff]  ;;  %v16343_v50 = vand.u32 4294901760, %v12541_v4  ;;  %v16345_v4 = vand.u32 4294901760, %v12635_v55 }
 0x100   : > { %1891 = vmatpush.msra.mxu2 %v12646_v37  ;;  %1927 = vmatpush.msra.mxu3 %v12606_v38 }
 0x101   : > { %1944 = vmatpush.msrb.mxu0 %v1751_v7  ;;  %1826 = vmatpush.msra.mxu1 %v1825_v48  ;;  %v2100_v7 = vand.u32 4294901760, %v2099_v36  ;;  %v12725_v36 = vand.u32 4294901760, %v564_v35  ;;  %v16344_v48 = vand.u32 4294901760, %v12553_v41 }
 0x102   : > { %2056 = vmatpush.msrb.mxu2 %v12608_v59  ;;  %1929 = vmatpush.msra.mxu3 %v12620_v60 }
 0x103   : > { %1948 = vmatpush.msrb.mxu0 %v1757_v57  ;;  %1832 = vmatpush.msra.mxu1 %v1831_v45  ;;  %v2106_v57 = vand.u32 4294901760, %v2105_v11  ;;  %v12762_v45 = vand.u32 4294901760, %v520_v0 }
 0x104   : > { %2058 = vmatpush.msrb.mxu2 %v12622_v32  ;;  %2089 = vmatpush.msrb.mxu3 %v2088_v20  ;;  %v16342_v20 = vand.u32 4294901760, %v12529_v2  ;;  %v12750_v2 = vand.u32 4294901760, %v531_v26 }
 0x105   : > { %1952 = vmatpush.msrb.mxu0 %v1763_v47  ;;  %1838 = vmatpush.msra.mxu1 %v1837_v39  ;;  %v16341_v47 = vand.u32 4294901760, %v12516_v3  ;;  %v12740_v3 = vand.u32 4294901760, %v542_v42  ;;  %v16346_v39 = vand.u32 4294901760, %v12565_v61  ;;  %v16347_v61 = vand.u32 4294901760, %v12577_v12 }
 0x106   : > { %2060 = vmatpush.msrb.mxu2 %v12641_v6  ;;  %2095 = vmatpush.msrb.mxu3 %v2094_v13  ;;  %v509_v13 = vld [vmem:[#allocation4 + $0x388] sm:$0xff]  ;;  %v12771_v41 = vsub.f32 %v531_v26, %v12750_v2  ;;  %v16348_v12 = vand.u32 4294901760, %v12589_v49 }
 0x107   : > { %1894 = vmatmul.f32.vlgmr.msra.gmra.mxu2 %v12083_v40  ;;  %1956 = vmatpush.msrb.mxu0 %v16340_v21  ;;  %v12760_v5 = vsub.f32 %v542_v42, %v12740_v3  ;;  %v12776_v11 = vand.u32 4294901760, %v509_v13  ;;  %v12786_v21 = vsub.f32 %v520_v0, %v12762_v45 }
 0x108   : > { %2007 = vmatpush.msrb.mxu1 %v12449_v27  ;;  %2062 = vmatpush.msrb.mxu2 %v12656_v43  ;;  %v12730_v27 = vand.u32 4294901760, %v553_v62 }
 0x109   : > { %2101 = vmatpush.msrb.mxu3 %v2100_v7  ;;  %1960 = vmatpush.msrb.mxu0 %v16341_v47  ;;  %v2283_v7 = vand.u32 4294901760, %v12760_v5 }
 0x10a   : > { %2127 = vmatpush.msra.mxu2 %v12635_v55  ;;  %1933 = vmatmul.f32.vlgmr.msra.gmra.mxu3 %v12098_v16  ;;  %v498_v55 = vld [vmem:[#allocation4 + $0x330] sm:$0xff] }
 0x10b   : > { %2009 = vmatpush.msrb.mxu1 %v12454_v25  ;;  %2107 = vmatpush.msrb.mxu3 %v2106_v57  ;;  %v12738_v25 = vsub.f32 %v564_v35, %v12725_v36  ;;  %v476_v57 = vld [vmem:[#allocation4 + $0x280] sm:$0xff] }
 0x10c   : > { %2130 = vmatpush.msra.mxu2 %v12650_v28  ;;  %1964 = vmatpush.msrb.mxu0 %v16342_v20  ;;  %v487_v28 = vld [vmem:[#allocation4 + $0x2d8] sm:$0xff]  ;;  %v12820_v35 = vand.u32 4294901760, %v476_v57  ;;  %v454_v20 = vld [vmem:[#allocation4 + $0x1d0] sm:$0xff] }
 0x10d   : > { %2156 = vmatpush.msra.mxu3 %v12608_v59  ;;  %2011 = vmatpush.msrb.mxu1 %v12463_v8  ;;  %v12748_v8 = vsub.f32 %v553_v62, %v12730_v27 }
 0x10e   : > { %2133 = vmatpush.msra.mxu2 %v12664_v30  ;;  %1968 = vmatpush.msrb.mxu0 %v16343_v50  ;;  %v12806_v30 = vand.u32 4294901760, %v487_v28 }
 0x10f   : > { %2158 = vmatpush.msra.mxu3 %v12622_v32  ;;  %2013 = vmatpush.msrb.mxu1 %v12466_v22  ;;  %v2271_v22 = vand.u32 4294901760, %v12738_v25 }
 0x110   : > { %2068 = vmatmul.f32.vlgmr.msrb.gmra.mxu2 %v12116_v34  ;;  %1972 = vmatpush.msrb.mxu0 %v16344_v48  ;;  %v12831_v47 = vsub.f32 %v487_v28, %v12806_v30  ;;  %v12844_v48 = vsub.f32 %v476_v57, %v12820_v35  ;;  %v421_v57 = vld [vmem:[#allocation4 + $0xc8] sm:$0xff] }
 0x111   : > { %2160 = vmatpush.msra.mxu3 %v12641_v6  ;;  %2136 = vmatpush.msra.mxu2 %v12675_v51  ;;  %v2295_v51 = vand.u32 4294901760, %v12786_v21 }
 0x112   : > { %2015 = vmatpush.msrb.mxu1 %v12475_v24  ;;  %2109 = vmatmul.f32.vlgmr.msrb.gmra.mxu3 %v12053_v63  ;;  %v2277_v24 = vand.u32 4294901760, %v12748_v8 }
 0x113   : > { %2185 = vmatpush.msrb.mxu2 %v16345_v4  ;;  %1976 = vmatpush.msrb.mxu0 %v16346_v39  ;;  %v2296_v50 = vsub.f32 %v12786_v21, %v2295_v51  ;;  %v443_v4 = vld [vmem:[#allocation4 + $0x178] sm:$0xff]  ;;  %v16351_v39 = vand.u32 4294901760, %v12632_v29  ;;  %v16352_v29 = vand.u32 4294901760, %v12646_v37 }
 0x114   : > { %2162 = vmatpush.msra.mxu3 %v12656_v43  ;;  %2017 = vmatpush.msrb.mxu1 %v12491_v18  ;;  %v2272_v18 = vsub.f32 %v12738_v25, %v2271_v22 }
 0x115   : > { %2189 = vmatpush.msrb.mxu2 %v2092_v33  ;;  %1980 = vmatpush.msrb.mxu0 %v16347_v61  ;;  %v12791_v33 = vand.u32 4294901760, %v498_v55  ;;  %v2297_v28 = vand.u32 4294901760, %v2296_v50 }
 0x116   : > { %2216 = vmatpush.msrb.mxu3 %v12608_v59  ;;  %2019 = vmatpush.msrb.mxu1 %v12504_v14  ;;  %v2278_v14 = vsub.f32 %v12748_v8, %v2277_v24  ;;  %v2289_v59 = vand.u32 4294901760, %v12771_v41  ;;  %v2273_v49 = vand.u32 4294901760, %v2272_v18  ;;  %v432_v18 = vld [vmem:[#allocation4 + $0x120] sm:$0xff] }
 0x117   : > { %2193 = vmatpush.msrb.mxu2 %v2098_v54  ;;  %1984 = vmatpush.msrb.mxu0 %v16348_v12  ;;  %v2284_v54 = vsub.f32 %v12760_v5, %v2283_v7  ;;  %v12860_v12 = vand.u32 4294901760, %v443_v4 }
 0x118   : > { %2218 = vmatpush.msrb.mxu3 %v12622_v32  ;;  %2021 = vmatpush.msrb.mxu1 %v12518_v10  ;;  %v12804_v32 = vsub.f32 %v509_v13, %v12776_v11  ;;  %v16349_v10 = vand.u32 4294901760, %v12601_v58  ;;  %v2279_v58 = vand.u32 4294901760, %v2278_v14  ;;  %v2290_v62 = vsub.f32 %v12771_v41, %v2289_v59 }
 0x119   : > { %2197 = vmatpush.msrb.mxu2 %v2104_v19  ;;  %v465_v19 = vld [vmem:[#allocation4 + $0x228] sm:$0xff]  ;;  %1739 = vmatmul.f32.vlgmr.msra.gmra.mxu0 %v12186_v17  ;;  %v2285_v26 = vand.u32 4294901760, %v2284_v54  ;;  %v12847_v13 = vand.u32 4294901760, %v454_v20  ;;  %v2319_v14 = vand.u32 4294901760, %v12844_v48 }
 0x11a   : > { %2220 = vmatpush.msrb.mxu3 %v12641_v6  ;;  %2139 = vmatmul.f32.vlgmr.msra.gmra.mxu2 %v12073_v44  ;;  %v12818_v6 = vsub.f32 %v498_v55, %v12791_v33  ;;  %v12833_v42 = vand.u32 4294901760, %v465_v19  ;;  %v2313_v55 = vand.u32 4294901760, %v12831_v47 }
 0x11b   : > { %1988 = vmatpush.msrb.mxu0 %v16349_v10  ;;  %2229 = vmatpush.msra.mxu2 %v12725_v36  ;;  %v12871_v10 = vsub.f32 %v454_v20, %v12847_v13  ;;  %v2320_v20 = vsub.f32 %v12844_v48, %v2319_v14 }
 0x11c   : > { %2023 = vmatpush.msrb.mxu1 %v12531_v56  ;;  %2222 = vmatpush.msrb.mxu3 %v12656_v43  ;;  %v2301_v56 = vand.u32 4294901760, %v12804_v32  ;;  %v16350_v43 = vand.u32 4294901760, %v12618_v15  ;;  %v2307_v0 = vand.u32 4294901760, %v12818_v6  ;;  %v2291_v15 = vand.u32 4294901760, %v2290_v62 }
 0x11d   : > { %2166 = vmatmul.f32.vlgmr.msra.gmra.mxu3 %v12092_v23  ;;  %2231 = vmatpush.msra.mxu2 %v12730_v27  ;;  %v12857_v61 = vsub.f32 %v465_v19, %v12833_v42  ;;  %v2314_v37 = vsub.f32 %v12831_v47, %v2313_v55  ;;  %v410_v19 = vld [vmem:[#allocation4 + $0x70] sm:$0xff]  ;;  %v12885_v62 = vand.u32 4294901760, %v421_v57 }
 0x11e   : > { %2274 = vmatpush.msra.mxu3 %v2273_v49  ;;  %1992 = vmatpush.msrb.mxu0 %v16350_v43  ;;  %v12873_v49 = vand.u32 4294901760, %v432_v18  ;;  %v399_v43 = vld [vmem:[#allocation4 + $0x18] sm:$0xff] }
 0x11f   : > { %2025 = vmatpush.msrb.mxu1 %v12543_v9  ;;  %2233 = vmatpush.msra.mxu2 %v12740_v3  ;;  %v2302_v9 = vsub.f32 %v12804_v32, %v2301_v56  ;;  %v2325_v54 = vand.u32 4294901760, %v12857_v61 }
 0x120   : > { %2280 = vmatpush.msra.mxu3 %v2279_v58  ;;  %1840 = vmatmul.f32.vlgmr.msra.gmra.mxu1 %v12065_v31  ;;  %v12883_v58 = vsub.f32 %v443_v4, %v12860_v12  ;;  %v12896_v50 = vsub.f32 %v432_v18, %v12873_v49  ;;  %v12898_v4 = vand.u32 4294901760, %v410_v19  ;;  %v12910_v18 = vand.u32 4294901760, %v399_v43 }
 0x121   : > { %1996 = vmatpush.msrb.mxu0 %v16351_v39  ;;  %2027 = vmatpush.msrb.mxu1 %v12555_v46  ;;  %v2308_v46 = vsub.f32 %v12818_v6, %v2307_v0 }
 0x122   : > { %2235 = vmatpush.msra.mxu2 %v12750_v2  ;;  %2286 = vmatpush.msra.mxu3 %v2285_v26  ;;  %v2331_v26 = vand.u32 4294901760, %v12871_v10  ;;  %v16248_v39 = vand.u32 4294901760, %v12883_v58 }
 0x123   : > { %2000 = vmatpush.msrb.mxu0 %v16352_v29  ;;  %2029 = vmatpush.msrb.mxu1 %v12567_v53  ;;  %v2303_v53 = vand.u32 4294901760, %v2302_v9  ;;  %v12908_v9 = vsub.f32 %v421_v57, %v12885_v62  ;;  %v2321_v29 = vand.u32 4294901760, %v2320_v20  ;;  %v12922_v57 = vsub.f32 %v410_v19, %v12898_v4  ;;  %v12934_v20 = vpop.f32.mrf.mxu3 }
 0x124   : > { %2237 = vmatpush.msra.mxu2 %v12762_v45  ;;  %2292 = vmatpush.msra.mxu3 %v2291_v15  ;;  %v2326_v15 = vsub.f32 %v12857_v61, %v2325_v54 }
 0x125   : > { %2372 = vmatpush.msra.mxu0 %v12738_v25  ;;  %2031 = vmatpush.msrb.mxu1 %v12579_v1  ;;  %v2309_v1 = vand.u32 4294901760, %v2308_v46  ;;  %v16247_v46 = vand.u32 4294901760, %v12896_v50 }
 0x126   : > { %2239 = vmatpush.msra.mxu2 %v12776_v11  ;;  %2298 = vmatpush.msra.mxu3 %v2297_v28  ;;  %v12912_v28 = vpop.f32.mrf.mxu2 }
 0x127   : > { %2375 = vmatpush.msra.mxu0 %v12748_v8  ;;  %2033 = vmatpush.msrb.mxu1 %v12594_v52  ;;  %v2315_v52 = vand.u32 4294901760, %v2314_v37  ;;  %v16249_v37 = vand.u32 4294901760, %v12908_v9 }
 0x128   : > { %2002 = vmatmul.f32.vlgmr.msrb.gmra.mxu0 %v12065_v31  ;;  %2241 = vmatpush.msra.mxu2 %v12791_v33 }
 0x129   : > { %2304 = vmatpush.msra.mxu3 %v2303_v53  ;;  %2378 = vmatpush.msra.mxu0 %v12760_v5  ;;  %v2327_v53 = vand.u32 4294901760, %v2326_v15  ;;  %v16251_v15 = vand.u32 4294901760, %v12922_v57 }
 0x12a   : > { %2035 = vmatpush.msrb.mxu1 %v12606_v38  ;;  %2243 = vmatpush.msra.mxu2 %v12806_v30  ;;  %v2332_v38 = vsub.f32 %v12871_v10, %v2331_v26 }
 0x12b   : > { %2310 = vmatpush.msra.mxu3 %v2309_v1  ;;  %2381 = vmatpush.msra.mxu0 %v12771_v41  ;;  %v12932_v1 = vsub.f32 %v399_v43, %v12910_v18 }
 0x12c   : > { %2037 = vmatpush.msrb.mxu1 %v12620_v60  ;;  %2245 = vmatpush.msra.mxu2 %v12820_v35  ;;  %v2338_v60 = vsub.f32 %v12883_v58, %v16248_v39  ;;  %v2333_v19 = vand.u32 4294901760, %v2332_v38 }
 0x12d   : > { %2039 = vmatmul.f32.vlgmr.msrb.gmra.mxu1 %v12065_v31  ;;  %2316 = vmatpush.msra.mxu3 %v2315_v52  ;;  %v2344_v52 = vsub.f32 %v12896_v50, %v16247_v46  ;;  %v16250_v38 = vand.u32 4294901760, %v12932_v1 }
 0x12e   : > { %2384 = vmatpush.msra.mxu0 %v12786_v21  ;;  %2425 = vmatpush.msra.mxu1 %v12725_v36  ;;  %v2339_v43 = vand.u32 4294901760, %v2338_v60  ;;  %v12956_v39 = vpop.f32.mrf.mxu2 }
 0x12f   : > { %2247 = vmatpush.msra.mxu2 %v12833_v42  ;;  %2322 = vmatpush.msra.mxu3 %v2321_v29  ;;  %v2350_v29 = vsub.f32 %v12908_v9, %v16249_v37  ;;  %v2345_v46 = vand.u32 4294901760, %v2344_v52  ;;  %v2362_v37 = vsub.f32 %v12932_v1, %v16250_v38  ;;  %v12967_v52 = vpop.f32.mrf.mxu3 }
 0x130   : > { %2387 = vmatpush.msra.mxu0 %v12804_v32  ;;  %2427 = vmatpush.msra.mxu1 %v12730_v27 }
 0x131   : > { %2199 = vmatmul.f32.vlgmr.msrb.gmra.mxu2 %v12053_v63  ;;  %2328 = vmatpush.msra.mxu3 %v2327_v53  ;;  %v2356_v53 = vsub.f32 %v12922_v57, %v16251_v15  ;;  %v2351_v60 = vand.u32 4294901760, %v2350_v29  ;;  %v608_v29 = vld [vmem:[#allocation4 + $0x6a0] sm:$0xff]  ;;  %v688_v15 = vpop.f32.mrf.mxu0 }
 0x132   : > { %2249 = vmatpush.msra.mxu2 %v12847_v13  ;;  %2390 = vmatpush.msra.mxu0 %v12818_v6 }
 0x133   : > { %2429 = vmatpush.msra.mxu1 %v12740_v3  ;;  %2224 = vmatmul.f32.vlgmr.msrb.gmra.mxu3 %v12053_v63 }
 0x134   : > { %2251 = vmatpush.msra.mxu2 %v12860_v12  ;;  %2334 = vmatpush.msra.mxu3 %v2333_v19  ;;  %v2357_v19 = vand.u32 4294901760, %v2356_v53  ;;  %v12977_v53 = vand.u32 4294901760, %v608_v29 }
 0x135   : > { %2393 = vmatpush.msra.mxu0 %v12831_v47  ;;  %2431 = vmatpush.msra.mxu1 %v12750_v2 }
 0x136   : > { %2253 = vmatpush.msra.mxu2 %v12873_v49  ;;  %2340 = vmatpush.msra.mxu3 %v2339_v43  ;;  %v2363_v43 = vand.u32 4294901760, %v2362_v37  ;;  %v586_v37 = vld [vmem:[#allocation4 + $0x5f0] sm:$0xff] }
 0x137   : > { %2396 = vmatpush.msra.mxu0 %v12844_v48  ;;  %2433 = vmatpush.msra.mxu1 %v12762_v45  ;;  %v12994_v25 = vand.u32 4294901760, %v586_v37  ;;  %v13002_v8 = vpop.f32.mrf.mxu3 }
 0x138   : > { %2255 = vmatpush.msra.mxu2 %v12885_v62  ;;  %2346 = vmatpush.msra.mxu3 %v2345_v46  ;;  %v597_v46 = vld [vmem:[#allocation4 + $0x648] sm:$0xff] }
 0x139   : > { %2399 = vmatpush.msra.mxu0 %v12857_v61  ;;  %2435 = vmatpush.msra.mxu1 %v12776_v11  ;;  %v12985_v38 = vand.u32 4294901760, %v597_v46  ;;  %v951_v32 = vpop.f32.mrf.mxu0 }
 0x13a   : > { %2257 = vmatpush.msra.mxu2 %v12898_v4  ;;  %2352 = vmatpush.msra.mxu3 %v2351_v60  ;;  %v12981_v60 = vpop.f32.mrf.mxu2 }
 0x13b   : > { %2402 = vmatpush.msra.mxu0 %v12871_v10  ;;  %2437 = vmatpush.msra.mxu1 %v12791_v33 }
 0x13c   : > { %2259 = vmatpush.msra.mxu2 %v12910_v18  ;;  %2358 = vmatpush.msra.mxu3 %v2357_v19  ;;  %v12990_v19 = vld [vmem:[#allocation7] sm:$0xff] }
 0x13d   : > { %2405 = vmatpush.msra.mxu0 %v12883_v58  ;;  %2439 = vmatpush.msra.mxu1 %v12806_v30 }
 0x13e   : > { %2466 = vmatpush.msrb.mxu2 %v2271_v22  ;;  %2364 = vmatpush.msra.mxu3 %v2363_v43  ;;  %v575_v22 = vld [vmem:[#allocation4 + $0x598] sm:$0xff]  ;;  %v12997_v43 = vsub.f32 %v608_v29, %v12977_v53  ;;  %v13019_v29 = vsub.f32 %v586_v37, %v12994_v25 }
 0x13f   : > { %2408 = vmatpush.msra.mxu0 %v12896_v50  ;;  %2441 = vmatpush.msra.mxu1 %v12820_v35  ;;  %v13013_v5 = vand.u32 4294901760, %v575_v22  ;;  %v13052_v37 = vpop.f32.mrf.mxu3 }
 0x140   : > { %2470 = vmatpush.msrb.mxu2 %v2277_v24  ;;  %2533 = vmatpush.msrb.mxu3 %v12725_v36  ;;  %v13007_v36 = vsub.f32 %v597_v46, %v12985_v38  ;;  %v620_v24 = vperm.slane %v12990_v19, 0  ;;  %v2624_v21 = vand.u32 4294901760, %v13019_v29 }
 0x141   : > { %2411 = vmatpush.msra.mxu0 %v12908_v9  ;;  %2443 = vmatpush.msra.mxu1 %v12833_v42 }
 0x142   : > { %2474 = vmatpush.msrb.mxu2 %v2283_v7  ;;  %2535 = vmatpush.msrb.mxu3 %v12730_v27  ;;  %v789_v7 = vpop.f32.mrf.mxu1  ;;  %v2612_v27 = vand.u32 4294901760, %v12997_v43  ;;  %v689_v41 = vadd.f32 %v688_v15, %v620_v24  ;;  %v13033_v46 = vpop.f32.mrf.mxu2  ;;  %v2625_v6 = vsub.f32 %v13019_v29, %v2624_v21 }
 0x143   : > { %2414 = vmatpush.msra.mxu0 %v12922_v57  ;;  %2445 = vmatpush.msra.mxu1 %v12847_v13 }
 0x144   : > { %2478 = vmatpush.msrb.mxu2 %v2289_v59  ;;  %2537 = vmatpush.msrb.mxu3 %v12740_v3  ;;  %v2618_v3 = vand.u32 4294901760, %v13007_v36  ;;  %v13031_v59 = vsub.f32 %v575_v22, %v13013_v5 }
 0x145   : > { %2417 = vmatpush.msra.mxu0 %v12932_v1  ;;  %2447 = vmatpush.msra.mxu1 %v12860_v12 }
 0x146   : > { %2482 = vmatpush.msrb.mxu2 %v2295_v51  ;;  %2539 = vmatpush.msrb.mxu3 %v12750_v2  ;;  %v2613_v2 = vsub.f32 %v12997_v43, %v2612_v27  ;;  %v790_v51 = vadd.f32 %v789_v7, %v689_v41  ;;  %v16354_v41 = vand.u32 4294901760, %v12896_v50  ;;  %v521_v50 = vld [vmem:[#allocation4 + $0x3e8] sm:$0xff] }
 0x147   : > { %2582 = vmatpush.msrb.mxu0 %v12977_v53  ;;  %2265 = vmatmul.f32.vlgmr.msra.gmra.mxu2 %v12186_v17 }
 0x148   : > { %2449 = vmatpush.msra.mxu1 %v12873_v49  ;;  %2486 = vmatpush.msrb.mxu2 %v2301_v56  ;;  %v2630_v56 = vand.u32 4294901760, %v13031_v59  ;;  %v844_v22 = vadd.f32 %v12912_v28, %v790_v51  ;;  %v510_v51 = vld [vmem:[#allocation4 + $0x390] sm:$0xff] }
 0x149   : > { %2541 = vmatpush.msrb.mxu3 %v12762_v45  ;;  %2584 = vmatpush.msrb.mxu0 %v12985_v38  ;;  %v2619_v45 = vsub.f32 %v13007_v36, %v2618_v3  ;;  %v1315_v61 = vpop.f32.mrf.mxu3 }
 0x14a   : > { %2366 = vmatmul.f32.vlgmr.msra.gmra.mxu3 %v12065_v31  ;;  %2451 = vmatpush.msra.mxu1 %v12885_v62  ;;  %v988_v15 = vpop.f32.mrf.mxu1  ;;  %v2631_v47 = vsub.f32 %v13031_v59, %v2630_v56  ;;  %v1214_v24 = vpop.f32.mrf.mxu2  ;;  %v883_v48 = vadd.f32 %v12934_v20, %v844_v22  ;;  %v16353_v20 = vand.u32 4294901760, %v12883_v58  ;;  %v532_v58 = vld [vmem:[#allocation4 + $0x440] sm:$0xff] }
 0x14b   : > { %2490 = vmatpush.msrb.mxu2 %v2307_v0  ;;  %2543 = vmatpush.msrb.mxu3 %v12776_v11  ;;  %v2614_v11 = vand.u32 4294901760, %v2613_v2  ;;  %v2620_v0 = vand.u32 4294901760, %v2619_v45 }
 0x14c   : > { %2586 = vmatpush.msrb.mxu0 %v12994_v25  ;;  %2453 = vmatpush.msra.mxu1 %v12898_v4 }
 0x14d   : > { %2420 = vmatmul.f32.vlgmr.msra.gmra.mxu0 %v12083_v40  ;;  %2494 = vmatpush.msrb.mxu2 %v2313_v55  ;;  %v2626_v55 = vand.u32 4294901760, %v2625_v6 }
 0x14e   : > { %2545 = vmatpush.msrb.mxu3 %v12791_v33  ;;  %2588 = vmatpush.msrb.mxu0 %v13013_v5  ;;  %v621_v33 = vperm.slane %v12990_v19, 1  ;;  %v565_v19 = vld [vmem:[#allocation4 + $0x548] sm:$0xff] }
 0x14f   : > { %2455 = vmatpush.msra.mxu1 %v12910_v18  ;;  %2498 = vmatpush.msrb.mxu2 %v2319_v14  ;;  %v2632_v14 = vand.u32 4294901760, %v2631_v47  ;;  %v13087_v10 = vand.u32 4294901760, %v565_v19 }
 0x150   : > { %2653 = vmatpush.msra.mxu0 %v12997_v43  ;;  %2547 = vmatpush.msrb.mxu3 %v12806_v30  ;;  %v1369_v30 = vpop.f32.mrf.mxu0  ;;  %v1215_v28 = vadd.f32 %v1214_v24, %v621_v33  ;;  %v16355_v43 = vand.u32 4294901760, %v12908_v9 }
 0x151   : > { %2615 = vmatpush.msrb.mxu1 %v2614_v11  ;;  %2502 = vmatpush.msrb.mxu2 %v2325_v54  ;;  %v16357_v11 = vand.u32 4294901760, %v12932_v1 }
 0x152   : > { %2656 = vmatpush.msra.mxu0 %v13007_v36  ;;  %2549 = vmatpush.msrb.mxu3 %v12820_v35  ;;  %v1408_v54 = vpop.f32.mrf.mxu1  ;;  %v554_v35 = vld [vmem:[#allocation4 + $0x4f0] sm:$0xff]  ;;  %v1316_v7 = vadd.f32 %v1315_v61, %v1215_v28  ;;  %v16356_v36 = vand.u32 4294901760, %v12922_v57 }
 0x153   : > { %2621 = vmatpush.msrb.mxu1 %v2620_v0  ;;  %2506 = vmatpush.msrb.mxu2 %v2331_v26  ;;  %v952_v26 = vadd.f32 %v951_v32, %v883_v48  ;;  %v13094_v2 = vand.u32 4294901760, %v554_v35  ;;  %v13110_v32 = vand.u32 4294901760, %v532_v58 }
 0x154   : > { %2659 = vmatpush.msra.mxu0 %v13019_v29  ;;  %2551 = vmatpush.msrb.mxu3 %v12833_v42  ;;  %v543_v42 = vld [vmem:[#allocation4 + $0x498] sm:$0xff]  ;;  %v13125_v29 = vand.u32 4294901760, %v521_v50 }
 0x155   : > { %2627 = vmatpush.msrb.mxu1 %v2626_v55  ;;  %2594 = vmatmul.f32.vlgmr.msrb.gmra.mxu0 %v12116_v34  ;;  %v989_v45 = vadd.f32 %v988_v15, %v952_v26  ;;  %v13116_v9 = vsub.f32 %v554_v35, %v13094_v2  ;;  %v488_v55 = vld [vmem:[#allocation4 + $0x2e0] sm:$0xff] }
 0x156   : > { %2459 = vmatmul.f32.vlgmr.msra.gmra.mxu1 %v12098_v16  ;;  %2662 = vmatpush.msra.mxu0 %v13031_v59  ;;  %v13135_v59 = vand.u32 4294901760, %v510_v51  ;;  %v13145_v47 = vsub.f32 %v521_v50, %v13125_v29  ;;  %v13166_v28 = vand.u32 4294901760, %v488_v55 }
 0x157   : > { %2510 = vmatpush.msrb.mxu2 %v16353_v20  ;;  %2553 = vmatpush.msrb.mxu3 %v12847_v13  ;;  %v13099_v13 = vand.u32 4294901760, %v543_v42  ;;  %v1018_v15 = vadd.f32 %v12956_v39, %v989_v45  ;;  %v13133_v39 = vsub.f32 %v532_v58, %v13110_v32  ;;  %v2803_v6 = vand.u32 4294901760, %v13116_v9 }
 0x158   : > { %2633 = vmatpush.msrb.mxu1 %v2632_v14  ;;  %2711 = vmatpush.msrb.mxu0 %v2612_v27  ;;  %v13105_v27 = vsub.f32 %v565_v19, %v13087_v10  ;;  %v16260_v61 = vand.u32 4294901760, %v13145_v47  ;;  %v13191_v45 = vsub.f32 %v488_v55, %v13166_v28 }
 0x159   : > { %2514 = vmatpush.msrb.mxu2 %v16354_v41  ;;  %2555 = vmatpush.msrb.mxu3 %v12860_v12  ;;  %v1370_v12 = vadd.f32 %v1369_v30, %v1316_v7  ;;  %v1059_v22 = vadd.f32 %v12967_v52, %v1018_v15  ;;  %v13158_v52 = vsub.f32 %v510_v51, %v13135_v59  ;;  %v477_v30 = vld [vmem:[#allocation4 + $0x288] sm:$0xff]  ;;  %v455_v41 = vld [vmem:[#allocation4 + $0x1d8] sm:$0xff]  ;;  %v444_v51 = vld [vmem:[#allocation4 + $0x180] sm:$0xff] }
 0x15a   : > { %2682 = vmatpush.msra.mxu1 %v12977_v53  ;;  %2715 = vmatpush.msrb.mxu0 %v2618_v3  ;;  %v1543_v3 = vpop.f32.mrf.mxu0  ;;  %v2797_v57 = vand.u32 4294901760, %v13105_v27  ;;  %v2804_v14 = vsub.f32 %v13116_v9, %v2803_v6  ;;  %v13217_v55 = vand.u32 4294901760, %v444_v51 }
 0x15b   : > { %2518 = vmatpush.msrb.mxu2 %v16355_v43  ;;  %2557 = vmatpush.msrb.mxu3 %v12873_v49  ;;  %v13123_v49 = vsub.f32 %v543_v42, %v13099_v13 }
 0x15c   : > { %2684 = vmatpush.msra.mxu1 %v12985_v38  ;;  %2719 = vmatpush.msrb.mxu0 %v2624_v21  ;;  %v1584_v21 = vpop.f32.mrf.mxu1  ;;  %v2805_v58 = vand.u32 4294901760, %v2804_v14 }
 0x15d   : > { %2522 = vmatpush.msrb.mxu2 %v16356_v36  ;;  %2559 = vmatpush.msrb.mxu3 %v12885_v62  ;;  %v1409_v62 = vadd.f32 %v1408_v54, %v1370_v12  ;;  %v2809_v33 = vand.u32 4294901760, %v13123_v49  ;;  %v466_v54 = vld [vmem:[#allocation4 + $0x230] sm:$0xff] }
 0x15e   : > { %2686 = vmatpush.msra.mxu1 %v12994_v25  ;;  %2723 = vmatpush.msrb.mxu0 %v2630_v56  ;;  %v499_v56 = vld [vmem:[#allocation4 + $0x338] sm:$0xff]  ;;  %v13193_v43 = vand.u32 4294901760, %v466_v54 }
 0x15f   : > { %2635 = vmatmul.f32.vlgmr.msrb.gmra.mxu1 %v12053_v63  ;;  %2665 = vmatmul.f32.vlgmr.msra.gmra.mxu0 %v12073_v44  ;;  %v13153_v1 = vand.u32 4294901760, %v499_v56  ;;  %v2810_v19 = vsub.f32 %v13123_v49, %v2809_v33 }
 0x160   : > { %2688 = vmatpush.msra.mxu1 %v13013_v5  ;;  %2755 = vmatpush.msra.mxu0 %v13087_v10 }
 0x161   : > { %2526 = vmatpush.msrb.mxu2 %v16357_v11  ;;  %2561 = vmatpush.msrb.mxu3 %v12898_v4  ;;  %v1477_v0 = vpop.f32.mrf.mxu2  ;;  %v2798_v4 = vsub.f32 %v13105_v27, %v2797_v57  ;;  %v13178_v20 = vsub.f32 %v499_v56, %v13153_v1 }
 0x162   : > { %2742 = vmatpush.msrb.mxu1 %v12977_v53  ;;  %2528 = vmatmul.f32.vlgmr.msrb.gmra.mxu2 %v12065_v31  ;;  %v1478_v24 = vadd.f32 %v1477_v0, %v1409_v62  ;;  %v2815_v53 = vand.u32 4294901760, %v13133_v39  ;;  %v1614_v42 = vpop.f32.mrf.mxu0  ;;  %v13205_v62 = vand.u32 4294901760, %v455_v41  ;;  %v433_v0 = vld [vmem:[#allocation4 + $0x128] sm:$0xff] }
 0x163   : > { %2757 = vmatpush.msra.mxu0 %v13094_v2  ;;  %2898 = vmatpush.msra.mxu2 %v13105_v27  ;;  %v2799_v35 = vand.u32 4294901760, %v2798_v4 }
 0x164   : > { %2563 = vmatpush.msrb.mxu3 %v12910_v18  ;;  %2744 = vmatpush.msrb.mxu1 %v12985_v38  ;;  %v1514_v48 = vpop.f32.mrf.mxu3  ;;  %v1089_v38 = vadd.f32 %v12981_v60, %v1059_v22  ;;  %v13180_v60 = vand.u32 4294901760, %v477_v30  ;;  %v2816_v7 = vsub.f32 %v13133_v39, %v2815_v53  ;;  %v1641_v50 = vpop.f32.mrf.mxu1  ;;  %v13215_v22 = vsub.f32 %v466_v54, %v13193_v43 }
 0x165   : > { %2565 = vmatmul.f32.vlgmr.msrb.gmra.mxu3 %v12065_v31  ;;  %2759 = vmatpush.msra.mxu0 %v13099_v13  ;;  %v1515_v18 = vadd.f32 %v1514_v48, %v1478_v24  ;;  %v16254_v24 = vand.u32 4294901760, %v13191_v45 }
 0x166   : > { %2901 = vmatpush.msra.mxu2 %v13116_v9  ;;  %2951 = vmatpush.msra.mxu3 %v13087_v10  ;;  %v1116_v36 = vadd.f32 %v13002_v8, %v1089_v38  ;;  %v13203_v15 = vsub.f32 %v477_v30, %v13180_v60  ;;  %v16256_v8 = vand.u32 4294901760, %v13178_v20  ;;  %v2817_v56 = vand.u32 4294901760, %v2816_v7 }
 0x167   : > { %2746 = vmatpush.msrb.mxu1 %v12994_v25  ;;  %2761 = vmatpush.msra.mxu0 %v13110_v32  ;;  %v1544_v26 = vadd.f32 %v1543_v3, %v1515_v18  ;;  %v16258_v25 = vand.u32 4294901760, %v13158_v52  ;;  %v2811_v3 = vand.u32 4294901760, %v2810_v19  ;;  %v13228_v18 = vsub.f32 %v455_v41, %v13205_v62 }
 0x168   : > { %2904 = vmatpush.msra.mxu2 %v13123_v49  ;;  %2953 = vmatpush.msra.mxu3 %v13094_v2  ;;  %v1149_v30 = vadd.f32 %v13033_v46, %v1116_v36  ;;  %v2834_v14 = vsub.f32 %v13178_v20, %v16256_v8  ;;  %v13230_v38 = vand.u32 4294901760, %v433_v0  ;;  %v16253_v19 = vand.u32 4294901760, %v13203_v15  ;;  %v422_v46 = vld [vmem:[#allocation4 + $0xd0] sm:$0xff] }
 0x169   : > { %2748 = vmatpush.msrb.mxu1 %v13013_v5  ;;  %2763 = vmatpush.msra.mxu0 %v13125_v29  ;;  %v1585_v12 = vadd.f32 %v1584_v21, %v1544_v26  ;;  %v2822_v5 = vsub.f32 %v13145_v47, %v16260_v61  ;;  %v2828_v11 = vsub.f32 %v13158_v52, %v16258_v25  ;;  %v16252_v41 = vand.u32 4294901760, %v13215_v22 }
 0x16a   : > { %2692 = vmatmul.f32.vlgmr.msra.gmra.mxu1 %v12092_v23  ;;  %2907 = vmatpush.msra.mxu2 %v13133_v39  ;;  %v2840_v26 = vsub.f32 %v13191_v45, %v16254_v24  ;;  %v13240_v7 = vsub.f32 %v444_v51, %v13217_v55  ;;  %v1174_v36 = vadd.f32 %v13052_v37, %v1149_v30  ;;  %v16255_v37 = vand.u32 4294901760, %v13228_v18  ;;  %v576_v24 = vld [vmem:[#allocation4 + $0x5a0] sm:$0xff]  ;;  %v555_v39 = vld [vmem:[#allocation4 + $0x4f8] sm:$0xff] }
 0x16b   : > { %2800 = vmatpush.msra.mxu1 %v2799_v35  ;;  %2955 = vmatpush.msra.mxu3 %v13099_v13  ;;  %v1615_v21 = vadd.f32 %v1614_v42, %v1585_v12  ;;  %v2823_v48 = vand.u32 4294901760, %v2822_v5  ;;  %v2829_v42 = vand.u32 4294901760, %v2828_v11  ;;  %v609_v12 = vld [vmem:[#allocation4 + $0x6a8] sm:$0xff]  ;;  %v2846_v51 = vsub.f32 %v13203_v15, %v16253_v19  ;;  %v400_v11 = vld [vmem:[#allocation4 + $0x20] sm:$0xff] }
 0x16c   : > { %2765 = vmatpush.msra.mxu0 %v13135_v59  ;;  %2910 = vmatpush.msra.mxu2 %v13145_v47  ;;  %v16358_v49 = vand.u32 4294901760, %v13145_v47  ;;  %v544_v47 = vld [vmem:[#allocation4 + $0x4a0] sm:$0xff] }
 0x16d   : > { %2806 = vmatpush.msra.mxu1 %v2805_v58  ;;  %2957 = vmatpush.msra.mxu3 %v13110_v32  ;;  %v1642_v4 = vadd.f32 %v1641_v50, %v1615_v21  ;;  %v411_v58 = vld [vmem:[#allocation4 + $0x78] sm:$0xff]  ;;  %v2835_v21 = vand.u32 4294901760, %v2834_v14  ;;  %v2841_v14 = vand.u32 4294901760, %v2840_v26  ;;  %v2847_v26 = vand.u32 4294901760, %v2846_v51 }
 0x16e   : > { %2767 = vmatpush.msra.mxu0 %v13153_v1  ;;  %2913 = vmatpush.msra.mxu2 %v13158_v52  ;;  %v13258_v30 = vand.u32 4294901760, %v411_v58 }
 0x16f   : > { %2812 = vmatpush.msra.mxu1 %v2811_v3  ;;  %2959 = vmatpush.msra.mxu3 %v13125_v29  ;;  %v1674_v54 = vpop.f32.mrf.mxu0  ;;  %v13246_v3 = vand.u32 4294901760, %v422_v46 }
 0x170   : > { %2769 = vmatpush.msra.mxu0 %v13166_v28  ;;  %2916 = vmatpush.msra.mxu2 %v13178_v20  ;;  %v1675_v35 = vadd.f32 %v1674_v54, %v1642_v4  ;;  %v598_v4 = vld [vmem:[#allocation4 + $0x650] sm:$0xff]  ;;  %v13260_v54 = vand.u32 4294901760, %v609_v12 }
 0x171   : > { %2818 = vmatpush.msra.mxu1 %v2817_v56  ;;  %2961 = vmatpush.msra.mxu3 %v13135_v59  ;;  %v1699_v50 = vpop.f32.mrf.mxu1  ;;  %v13253_v56 = vsub.f32 %v433_v0, %v13230_v38  ;;  %v2852_v0 = vsub.f32 %v13215_v22, %v16252_v41  ;;  %v2858_v41 = vsub.f32 %v13228_v18, %v16255_v37 }
 0x172   : > { %2771 = vmatpush.msra.mxu0 %v13180_v60  ;;  %2919 = vmatpush.msra.mxu2 %v13191_v45  ;;  %v1700_v5 = vadd.f32 %v1699_v50, %v1675_v35  ;;  %v16257_v35 = vand.u32 4294901760, %v13240_v7  ;;  %v13270_v50 = vsub.f32 %v422_v46, %v13246_v3  ;;  %v13284_v46 = vsub.f32 %v411_v58, %v13258_v30 }
 0x173   : > { %2824 = vmatpush.msra.mxu1 %v2823_v48  ;;  %2963 = vmatpush.msra.mxu3 %v13153_v1  ;;  %v16259_v19 = vand.u32 4294901760, %v13253_v56 }
 0x174   : > { %2773 = vmatpush.msra.mxu0 %v13193_v43  ;;  %2922 = vmatpush.msra.mxu2 %v13203_v15  ;;  %v6436_v48 = vpack.c.bf16 %v1700_v5, %v1174_v36  ;;  %v13272_v36 = vand.u32 4294901760, %v400_v11  ;;  %v587_v5 = vld [vmem:[#allocation4 + $0x5f8] sm:$0xff]  ;;  %v2864_v51 = vsub.f32 %v13240_v7, %v16257_v35  ;;  %v13308_v35 = vand.u32 4294901760, %v576_v24 }
 0x175   : > { %2830 = vmatpush.msra.mxu1 %v2829_v42  ;;  %2965 = vmatpush.msra.mxu3 %v13166_v28  ;;  %v13274_v42 = vand.u32 4294901760, %v598_v4  ;;  %v13293_v37 = vand.u32 4294901760, %v587_v5  ;;  %v16263_v25 = vand.u32 4294901760, %v13284_v46 }
 0x176   : > { %2725 = vmatmul.f32.vlgmr.msrb.gmra.mxu0 %v12053_v63  ;;  %2925 = vmatpush.msra.mxu2 %v13215_v22  ;;  %6495 = vst [vmem:[#allocation1] sm:$0xff] %v6436_v48  ;;  %v13287_v48 = vsub.f32 %v609_v12, %v13260_v54  ;;  %v13298_v58 = vsub.f32 %v400_v11, %v13272_v36  ;;  %v16261_v12 = vand.u32 4294901760, %v13270_v50 }
 0x177   : > { %2775 = vmatpush.msra.mxu0 %v13205_v62  ;;  %2836 = vmatpush.msra.mxu1 %v2835_v21  ;;  %v2853_v21 = vand.u32 4294901760, %v2852_v0  ;;  %v13302_v8 = vsub.f32 %v598_v4, %v13274_v42  ;;  %v2870_v0 = vsub.f32 %v13253_v56, %v16259_v19  ;;  %v2865_v4 = vand.u32 4294901760, %v2864_v51 }
 0x178   : > { %2967 = vmatpush.msra.mxu3 %v13180_v60  ;;  %2750 = vmatmul.f32.vlgmr.msrb.gmra.mxu1 %v12053_v63  ;;  %v16262_v11 = vand.u32 4294901760, %v13287_v48  ;;  %v16264_v61 = vand.u32 4294901760, %v13298_v58  ;;  %v13327_v51 = vsub.f32 %v576_v24, %v13308_v35 }
 0x179   : > { %2777 = vmatpush.msra.mxu0 %v13217_v55  ;;  %2842 = vmatpush.msra.mxu1 %v2841_v14  ;;  %v2859_v14 = vand.u32 4294901760, %v2858_v41  ;;  %v13316_v41 = vsub.f32 %v587_v5, %v13293_v37  ;;  %v3144_v19 = vand.u32 4294901760, %v13302_v8 }
 0x17a   : > { %2928 = vmatpush.msra.mxu2 %v13228_v18  ;;  %2969 = vmatpush.msra.mxu3 %v13193_v43  ;;  %v3139_v5 = vsub.f32 %v13287_v48, %v16262_v11  ;;  %v2888_v11 = vsub.f32 %v13298_v58, %v16264_v61 }
 0x17b   : > { %2779 = vmatpush.msra.mxu0 %v13230_v38  ;;  %2848 = vmatpush.msra.mxu1 %v2847_v26  ;;  %v2876_v26 = vsub.f32 %v13270_v50, %v16261_v12  ;;  %v2882_v12 = vsub.f32 %v13284_v46, %v16263_v25 }
 0x17c   : > { %2931 = vmatpush.msra.mxu2 %v13240_v7  ;;  %2971 = vmatpush.msra.mxu3 %v13205_v62  ;;  %v3140_v25 = vand.u32 4294901760, %v3139_v5  ;;  %v522_v5 = vld [vmem:[#allocation4 + $0x3f0] sm:$0xff] }
 0x17d   : > { %2781 = vmatpush.msra.mxu0 %v13246_v3  ;;  %2854 = vmatpush.msra.mxu1 %v2853_v21  ;;  %v2871_v21 = vand.u32 4294901760, %v2870_v0  ;;  %v2877_v24 = vand.u32 4294901760, %v2876_v26  ;;  %v3145_v0 = vsub.f32 %v13302_v8, %v3144_v19  ;;  %v2883_v26 = vand.u32 4294901760, %v2882_v12  ;;  %v566_v12 = vld [vmem:[#allocation4 + $0x550] sm:$0xff] }
 0x17e   : > { %2934 = vmatpush.msra.mxu2 %v13253_v56  ;;  %2973 = vmatpush.msra.mxu3 %v13217_v55 }
 0x17f   : > { %2783 = vmatpush.msra.mxu0 %v13258_v30  ;;  %2860 = vmatpush.msra.mxu1 %v2859_v14  ;;  %v3150_v14 = vand.u32 4294901760, %v13316_v41  ;;  %v3146_v27 = vand.u32 4294901760, %v3145_v0 }
 0x180   : > { %2937 = vmatpush.msra.mxu2 %v13270_v50  ;;  %2975 = vmatpush.msra.mxu3 %v13230_v38 }
 0x181   : > { %2785 = vmatpush.msra.mxu0 %v13272_v36  ;;  %2866 = vmatpush.msra.mxu1 %v2865_v4  ;;  %v3156_v4 = vand.u32 4294901760, %v13327_v51  ;;  %v3151_v61 = vsub.f32 %v13316_v41, %v3150_v14 }
 0x182   : > { %2940 = vmatpush.msra.mxu2 %v13284_v46  ;;  %2977 = vmatpush.msra.mxu3 %v13246_v3 }
 0x183   : > { %2992 = vmatpush.msrb.mxu0 %v2797_v57  ;;  %2872 = vmatpush.msra.mxu1 %v2871_v21  ;;  %v2889_v57 = vand.u32 4294901760, %v2888_v11  ;;  %v3157_v9 = vsub.f32 %v13327_v51, %v3156_v4  ;;  %v533_v11 = vld [vmem:[#allocation4 + $0x448] sm:$0xff]  ;;  %v16361_v21 = vand.u32 4294901760, %v13191_v45  ;;  %v16363_v45 = vand.u32 4294901760, %v13287_v48 }
 0x184   : > { %2943 = vmatpush.msra.mxu2 %v13298_v58  ;;  %2979 = vmatpush.msra.mxu3 %v13258_v30 }
 0x185   : > { %2996 = vmatpush.msrb.mxu0 %v2803_v6  ;;  %2878 = vmatpush.msra.mxu1 %v2877_v24  ;;  %v3152_v6 = vand.u32 4294901760, %v3151_v61  ;;  %v13377_v61 = vand.u32 4294901760, %v566_v12  ;;  %v16362_v24 = vand.u32 4294901760, %v13203_v15 }
 0x186   : > { %3108 = vmatpush.msrb.mxu2 %v13260_v54  ;;  %2981 = vmatpush.msra.mxu3 %v13272_v36 }
 0x187   : > { %3000 = vmatpush.msrb.mxu0 %v2809_v33  ;;  %2884 = vmatpush.msra.mxu1 %v2883_v26  ;;  %v3158_v33 = vand.u32 4294901760, %v3157_v9  ;;  %v13414_v26 = vand.u32 4294901760, %v522_v5 }
 0x188   : > { %3110 = vmatpush.msrb.mxu2 %v13274_v42  ;;  %3141 = vmatpush.msrb.mxu3 %v3140_v25  ;;  %v16360_v25 = vand.u32 4294901760, %v13178_v20  ;;  %v13402_v20 = vand.u32 4294901760, %v533_v11 }
 0x189   : > { %3004 = vmatpush.msrb.mxu0 %v2815_v53  ;;  %2890 = vmatpush.msra.mxu1 %v2889_v57  ;;  %v16359_v53 = vand.u32 4294901760, %v13158_v52  ;;  %v13392_v52 = vand.u32 4294901760, %v544_v47  ;;  %v16364_v57 = vand.u32 4294901760, %v13215_v22  ;;  %v16365_v22 = vand.u32 4294901760, %v13228_v18 }
 0x18a   : > { %3112 = vmatpush.msrb.mxu2 %v13293_v37  ;;  %3147 = vmatpush.msrb.mxu3 %v3146_v27  ;;  %v511_v27 = vld [vmem:[#allocation4 + $0x398] sm:$0xff]  ;;  %v13423_v15 = vsub.f32 %v533_v11, %v13402_v20  ;;  %v16366_v18 = vand.u32 4294901760, %v13240_v7 }
 0x18b   : > { %2946 = vmatmul.f32.vlgmr.msra.gmra.mxu2 %v12083_v40  ;;  %3008 = vmatpush.msrb.mxu0 %v16358_v49  ;;  %v13412_v0 = vsub.f32 %v544_v47, %v13392_v52  ;;  %v13428_v9 = vand.u32 4294901760, %v511_v27  ;;  %v13438_v49 = vsub.f32 %v522_v5, %v13414_v26 }
 0x18c   : > { %3059 = vmatpush.msrb.mxu1 %v13087_v10  ;;  %3114 = vmatpush.msrb.mxu2 %v13308_v35  ;;  %v13382_v10 = vand.u32 4294901760, %v555_v39 }
 0x18d   : > { %3153 = vmatpush.msrb.mxu3 %v3152_v6  ;;  %3012 = vmatpush.msrb.mxu0 %v16359_v53  ;;  %v3335_v6 = vand.u32 4294901760, %v13412_v0 }
 0x18e   : > { %3179 = vmatpush.msra.mxu2 %v13287_v48  ;;  %2985 = vmatmul.f32.vlgmr.msra.gmra.mxu3 %v12098_v16  ;;  %v500_v48 = vld [vmem:[#allocation4 + $0x340] sm:$0xff] }
 0x18f   : > { %3061 = vmatpush.msrb.mxu1 %v13094_v2  ;;  %3159 = vmatpush.msrb.mxu3 %v3158_v33  ;;  %v13390_v2 = vsub.f32 %v566_v12, %v13377_v61  ;;  %v478_v33 = vld [vmem:[#allocation4 + $0x290] sm:$0xff] }
 0x190   : > { %3182 = vmatpush.msra.mxu2 %v13302_v8  ;;  %3016 = vmatpush.msrb.mxu0 %v16360_v25  ;;  %v489_v8 = vld [vmem:[#allocation4 + $0x2e8] sm:$0xff]  ;;  %v13472_v12 = vand.u32 4294901760, %v478_v33  ;;  %v456_v25 = vld [vmem:[#allocation4 + $0x1e0] sm:$0xff] }
 0x191   : > { %3208 = vmatpush.msra.mxu3 %v13260_v54  ;;  %3063 = vmatpush.msrb.mxu1 %v13099_v13  ;;  %v13400_v13 = vsub.f32 %v555_v39, %v13382_v10 }
 0x192   : > { %3185 = vmatpush.msra.mxu2 %v13316_v41  ;;  %3020 = vmatpush.msrb.mxu0 %v16361_v21  ;;  %v13458_v41 = vand.u32 4294901760, %v489_v8 }
 0x193   : > { %3210 = vmatpush.msra.mxu3 %v13274_v42  ;;  %3065 = vmatpush.msrb.mxu1 %v13110_v32  ;;  %v3323_v32 = vand.u32 4294901760, %v13390_v2 }
 0x194   : > { %3120 = vmatmul.f32.vlgmr.msrb.gmra.mxu2 %v12116_v34  ;;  %3024 = vmatpush.msrb.mxu0 %v16362_v24  ;;  %v13483_v53 = vsub.f32 %v489_v8, %v13458_v41  ;;  %v13496_v24 = vsub.f32 %v478_v33, %v13472_v12  ;;  %v423_v33 = vld [vmem:[#allocation4 + $0xd8] sm:$0xff] }
 0x195   : > { %3212 = vmatpush.msra.mxu3 %v13293_v37  ;;  %3188 = vmatpush.msra.mxu2 %v13327_v51  ;;  %v3347_v51 = vand.u32 4294901760, %v13438_v49 }
 0x196   : > { %3067 = vmatpush.msrb.mxu1 %v13125_v29  ;;  %3161 = vmatmul.f32.vlgmr.msrb.gmra.mxu3 %v12053_v63  ;;  %v3329_v29 = vand.u32 4294901760, %v13400_v13 }
 0x197   : > { %3237 = vmatpush.msrb.mxu2 %v16363_v45  ;;  %3028 = vmatpush.msrb.mxu0 %v16364_v57  ;;  %v3348_v21 = vsub.f32 %v13438_v49, %v3347_v51  ;;  %v445_v45 = vld [vmem:[#allocation4 + $0x188] sm:$0xff]  ;;  %v16369_v57 = vand.u32 4294901760, %v13284_v46  ;;  %v16370_v46 = vand.u32 4294901760, %v13298_v58 }
 0x198   : > { %3214 = vmatpush.msra.mxu3 %v13308_v35  ;;  %3069 = vmatpush.msrb.mxu1 %v13135_v59  ;;  %v3324_v59 = vsub.f32 %v13390_v2, %v3323_v32 }
 0x199   : > { %3241 = vmatpush.msrb.mxu2 %v3144_v19  ;;  %3032 = vmatpush.msrb.mxu0 %v16365_v22  ;;  %v13443_v19 = vand.u32 4294901760, %v500_v48  ;;  %v3349_v8 = vand.u32 4294901760, %v3348_v21 }
 0x19a   : > { %3268 = vmatpush.msrb.mxu3 %v13260_v54  ;;  %3071 = vmatpush.msrb.mxu1 %v13153_v1  ;;  %v3330_v1 = vsub.f32 %v13400_v13, %v3329_v29  ;;  %v3341_v54 = vand.u32 4294901760, %v13423_v15  ;;  %v3325_v7 = vand.u32 4294901760, %v3324_v59  ;;  %v434_v59 = vld [vmem:[#allocation4 + $0x130] sm:$0xff] }
 0x19b   : > { %3245 = vmatpush.msrb.mxu2 %v3150_v14  ;;  %3036 = vmatpush.msrb.mxu0 %v16366_v18  ;;  %v3336_v14 = vsub.f32 %v13412_v0, %v3335_v6  ;;  %v13512_v18 = vand.u32 4294901760, %v445_v45 }
 0x19c   : > { %3270 = vmatpush.msrb.mxu3 %v13274_v42  ;;  %3073 = vmatpush.msrb.mxu1 %v13166_v28  ;;  %v13456_v42 = vsub.f32 %v511_v27, %v13428_v9  ;;  %v16367_v28 = vand.u32 4294901760, %v13253_v56  ;;  %v3331_v56 = vand.u32 4294901760, %v3330_v1  ;;  %v3342_v39 = vsub.f32 %v13423_v15, %v3341_v54 }
 0x19d   : > { %3249 = vmatpush.msrb.mxu2 %v3156_v4  ;;  %v467_v4 = vld [vmem:[#allocation4 + $0x238] sm:$0xff]  ;;  %2791 = vmatmul.f32.vlgmr.msra.gmra.mxu0 %v12186_v17  ;;  %v3337_v11 = vand.u32 4294901760, %v3336_v14  ;;  %v13499_v27 = vand.u32 4294901760, %v456_v25  ;;  %v3371_v1 = vand.u32 4294901760, %v13496_v24 }
 0x19e   : > { %3272 = vmatpush.msrb.mxu3 %v13293_v37  ;;  %3191 = vmatmul.f32.vlgmr.msra.gmra.mxu2 %v12073_v44  ;;  %v13470_v37 = vsub.f32 %v500_v48, %v13443_v19  ;;  %v13485_v47 = vand.u32 4294901760, %v467_v4  ;;  %v3365_v48 = vand.u32 4294901760, %v13483_v53 }
 0x19f   : > { %3040 = vmatpush.msrb.mxu0 %v16367_v28  ;;  %3281 = vmatpush.msra.mxu2 %v13377_v61  ;;  %v13523_v28 = vsub.f32 %v456_v25, %v13499_v27  ;;  %v3372_v25 = vsub.f32 %v13496_v24, %v3371_v1 }
 0x1a0   : > { %3075 = vmatpush.msrb.mxu1 %v13180_v60  ;;  %3274 = vmatpush.msrb.mxu3 %v13308_v35  ;;  %v3353_v60 = vand.u32 4294901760, %v13456_v42  ;;  %v16368_v35 = vand.u32 4294901760, %v13270_v50  ;;  %v3359_v5 = vand.u32 4294901760, %v13470_v37  ;;  %v3343_v50 = vand.u32 4294901760, %v3342_v39 }
 0x1a1   : > { %3218 = vmatmul.f32.vlgmr.msra.gmra.mxu3 %v12092_v23  ;;  %3283 = vmatpush.msra.mxu2 %v13382_v10  ;;  %v13509_v22 = vsub.f32 %v467_v4, %v13485_v47  ;;  %v3366_v58 = vsub.f32 %v13483_v53, %v3365_v48  ;;  %v412_v4 = vld [vmem:[#allocation4 + $0x80] sm:$0xff]  ;;  %v13537_v39 = vand.u32 4294901760, %v423_v33 }
 0x1a2   : > { %3326 = vmatpush.msra.mxu3 %v3325_v7  ;;  %3044 = vmatpush.msrb.mxu0 %v16368_v35  ;;  %v13525_v7 = vand.u32 4294901760, %v434_v59  ;;  %v401_v35 = vld [vmem:[#allocation4 + $0x28] sm:$0xff] }
 0x1a3   : > { %3077 = vmatpush.msrb.mxu1 %v13193_v43  ;;  %3285 = vmatpush.msra.mxu2 %v13392_v52  ;;  %v3354_v43 = vsub.f32 %v13456_v42, %v3353_v60  ;;  %v3377_v14 = vand.u32 4294901760, %v13509_v22 }
 0x1a4   : > { %3332 = vmatpush.msra.mxu3 %v3331_v56  ;;  %2892 = vmatmul.f32.vlgmr.msra.gmra.mxu1 %v12065_v31  ;;  %v13535_v56 = vsub.f32 %v445_v45, %v13512_v18  ;;  %v13548_v21 = vsub.f32 %v434_v59, %v13525_v7  ;;  %v13550_v45 = vand.u32 4294901760, %v412_v4  ;;  %v13562_v59 = vand.u32 4294901760, %v401_v35 }
 0x1a5   : > { %3048 = vmatpush.msrb.mxu0 %v16369_v57  ;;  %3079 = vmatpush.msrb.mxu1 %v13205_v62  ;;  %v3360_v62 = vsub.f32 %v13470_v37, %v3359_v5 }
 0x1a6   : > { %3287 = vmatpush.msra.mxu2 %v13402_v20  ;;  %3338 = vmatpush.msra.mxu3 %v3337_v11  ;;  %v3383_v11 = vand.u32 4294901760, %v13523_v28  ;;  %v16266_v57 = vand.u32 4294901760, %v13535_v56 }
 0x1a7   : > { %3052 = vmatpush.msrb.mxu0 %v16370_v46  ;;  %3081 = vmatpush.msrb.mxu1 %v13217_v55  ;;  %v3355_v55 = vand.u32 4294901760, %v3354_v43  ;;  %v13560_v43 = vsub.f32 %v423_v33, %v13537_v39  ;;  %v3373_v46 = vand.u32 4294901760, %v3372_v25  ;;  %v13574_v33 = vsub.f32 %v412_v4, %v13550_v45  ;;  %v13586_v25 = vpop.f32.mrf.mxu3 }
 0x1a8   : > { %3289 = vmatpush.msra.mxu2 %v13414_v26  ;;  %3344 = vmatpush.msra.mxu3 %v3343_v50  ;;  %v3378_v50 = vsub.f32 %v13509_v22, %v3377_v14 }
 0x1a9   : > { %3424 = vmatpush.msra.mxu0 %v13390_v2  ;;  %3083 = vmatpush.msrb.mxu1 %v13230_v38  ;;  %v3361_v38 = vand.u32 4294901760, %v3360_v62  ;;  %v16265_v62 = vand.u32 4294901760, %v13548_v21 }
 0x1aa   : > { %3291 = vmatpush.msra.mxu2 %v13428_v9  ;;  %3350 = vmatpush.msra.mxu3 %v3349_v8  ;;  %v13564_v8 = vpop.f32.mrf.mxu2 }
 0x1ab   : > { %3427 = vmatpush.msra.mxu0 %v13400_v13  ;;  %3085 = vmatpush.msrb.mxu1 %v13246_v3  ;;  %v3367_v3 = vand.u32 4294901760, %v3366_v58  ;;  %v16267_v58 = vand.u32 4294901760, %v13560_v43  ;;  %v13652_v13 = vld [vmem:[#allocation7] sm:$0xff] }
 0x1ac   : > { %3054 = vmatmul.f32.vlgmr.msrb.gmra.mxu0 %v12065_v31  ;;  %3293 = vmatpush.msra.mxu2 %v13443_v19 }
 0x1ad   : > { %3356 = vmatpush.msra.mxu3 %v3355_v55  ;;  %3430 = vmatpush.msra.mxu0 %v13412_v0  ;;  %v3379_v55 = vand.u32 4294901760, %v3378_v50  ;;  %v16269_v50 = vand.u32 4294901760, %v13574_v33 }
 0x1ae   : > { %3087 = vmatpush.msrb.mxu1 %v13258_v30  ;;  %3295 = vmatpush.msra.mxu2 %v13458_v41  ;;  %v3384_v30 = vsub.f32 %v13523_v28, %v3383_v11 }
 0x1af   : > { %3362 = vmatpush.msra.mxu3 %v3361_v38  ;;  %3433 = vmatpush.msra.mxu0 %v13423_v15  ;;  %v13584_v38 = vsub.f32 %v401_v35, %v13562_v59 }
 0x1b0   : > { %3089 = vmatpush.msrb.mxu1 %v13272_v36  ;;  %3297 = vmatpush.msra.mxu2 %v13472_v12  ;;  %v3390_v36 = vsub.f32 %v13535_v56, %v16266_v57  ;;  %v3385_v4 = vand.u32 4294901760, %v3384_v30 }
 0x1b1   : > { %3091 = vmatmul.f32.vlgmr.msrb.gmra.mxu1 %v12065_v31  ;;  %3368 = vmatpush.msra.mxu3 %v3367_v3  ;;  %v3396_v3 = vsub.f32 %v13548_v21, %v16265_v62  ;;  %v16268_v30 = vand.u32 4294901760, %v13584_v38 }
 0x1b2   : > { %3436 = vmatpush.msra.mxu0 %v13438_v49  ;;  %3477 = vmatpush.msra.mxu1 %v13377_v61  ;;  %v3391_v35 = vand.u32 4294901760, %v3390_v36  ;;  %v13608_v57 = vpop.f32.mrf.mxu2 }
 0x1b3   : > { %3299 = vmatpush.msra.mxu2 %v13485_v47  ;;  %3374 = vmatpush.msra.mxu3 %v3373_v46  ;;  %v3402_v46 = vsub.f32 %v13560_v43, %v16267_v58  ;;  %v3397_v62 = vand.u32 4294901760, %v3396_v3  ;;  %v3414_v58 = vsub.f32 %v13584_v38, %v16268_v30  ;;  %v13619_v3 = vpop.f32.mrf.mxu3 }
 0x1b4   : > { %3439 = vmatpush.msra.mxu0 %v13456_v42  ;;  %3479 = vmatpush.msra.mxu1 %v13382_v10 }
 0x1b5   : > { %3251 = vmatmul.f32.vlgmr.msrb.gmra.mxu2 %v12053_v63  ;;  %3380 = vmatpush.msra.mxu3 %v3379_v55  ;;  %v3408_v55 = vsub.f32 %v13574_v33, %v16269_v50  ;;  %v3403_v36 = vand.u32 4294901760, %v3402_v46  ;;  %v610_v46 = vld [vmem:[#allocation4 + $0x6b0] sm:$0xff] }
 0x1b6   : > { %3301 = vmatpush.msra.mxu2 %v13499_v27  ;;  %3442 = vmatpush.msra.mxu0 %v13470_v37 }
 0x1b7   : > { %3481 = vmatpush.msra.mxu1 %v13392_v52  ;;  %3276 = vmatmul.f32.vlgmr.msrb.gmra.mxu3 %v12053_v63 }
 0x1b8   : > { %3303 = vmatpush.msra.mxu2 %v13512_v18  ;;  %3386 = vmatpush.msra.mxu3 %v3385_v4  ;;  %v3409_v4 = vand.u32 4294901760, %v3408_v55  ;;  %v13629_v55 = vand.u32 4294901760, %v610_v46 }
 0x1b9   : > { %3445 = vmatpush.msra.mxu0 %v13483_v53  ;;  %3483 = vmatpush.msra.mxu1 %v13402_v20 }
 0x1ba   : > { %3305 = vmatpush.msra.mxu2 %v13525_v7  ;;  %3392 = vmatpush.msra.mxu3 %v3391_v35  ;;  %v3415_v35 = vand.u32 4294901760, %v3414_v58  ;;  %v588_v58 = vld [vmem:[#allocation4 + $0x600] sm:$0xff] }
 0x1bb   : > { %3448 = vmatpush.msra.mxu0 %v13496_v24  ;;  %3485 = vmatpush.msra.mxu1 %v13414_v26  ;;  %v13644_v2 = vand.u32 4294901760, %v588_v58 }
 0x1bc   : > { %3307 = vmatpush.msra.mxu2 %v13537_v39  ;;  %3398 = vmatpush.msra.mxu3 %v3397_v62  ;;  %v599_v62 = vld [vmem:[#allocation4 + $0x658] sm:$0xff] }
 0x1bd   : > { %3451 = vmatpush.msra.mxu0 %v13509_v22  ;;  %3487 = vmatpush.msra.mxu1 %v13428_v9  ;;  %v13637_v30 = vand.u32 4294901760, %v599_v62 }
 0x1be   : > { %3309 = vmatpush.msra.mxu2 %v13550_v45  ;;  %3404 = vmatpush.msra.mxu3 %v3403_v36  ;;  %v13633_v36 = vpop.f32.mrf.mxu2 }
 0x1bf   : > { %3454 = vmatpush.msra.mxu0 %v13523_v28  ;;  %3489 = vmatpush.msra.mxu1 %v13443_v19  ;;  %v13660_v50 = vsub.f32 %v599_v62, %v13637_v30  ;;  %v545_v28 = vld [vmem:[#allocation4 + $0x4a8] sm:$0xff] }
 0x1c0   : > { %3311 = vmatpush.msra.mxu2 %v13562_v59  ;;  %3410 = vmatpush.msra.mxu3 %v3409_v4  ;;  %v1740_v4 = vpop.f32.mrf.mxu0 }
 0x1c1   : > { %3457 = vmatpush.msra.mxu0 %v13535_v56  ;;  %3491 = vmatpush.msra.mxu1 %v13458_v41 }
 0x1c2   : > { %3518 = vmatpush.msrb.mxu2 %v3323_v32  ;;  %3416 = vmatpush.msra.mxu3 %v3415_v35  ;;  %v577_v32 = vld [vmem:[#allocation4 + $0x5a8] sm:$0xff]  ;;  %v13647_v35 = vsub.f32 %v610_v46, %v13629_v55  ;;  %v13671_v46 = vsub.f32 %v588_v58, %v13644_v2 }
 0x1c3   : > { %3460 = vmatpush.msra.mxu0 %v13548_v21  ;;  %3493 = vmatpush.msra.mxu1 %v13472_v12  ;;  %v13665_v0 = vand.u32 4294901760, %v577_v32 }
 0x1c4   : > { %3522 = vmatpush.msrb.mxu2 %v3329_v29  ;;  %3585 = vmatpush.msrb.mxu3 %v13377_v61  ;;  %v622_v61 = vperm.slane %v13652_v13, 2  ;;  %v13655_v29 = vpop.f32.mrf.mxu3  ;;  %v3676_v49 = vand.u32 4294901760, %v13671_v46 }
 0x1c5   : > { %3463 = vmatpush.msra.mxu0 %v13560_v43  ;;  %3495 = vmatpush.msra.mxu1 %v13485_v47 }
 0x1c6   : > { %3526 = vmatpush.msrb.mxu2 %v3335_v6  ;;  %3587 = vmatpush.msrb.mxu3 %v13382_v10  ;;  %v1841_v10 = vpop.f32.mrf.mxu1  ;;  %v3664_v6 = vand.u32 4294901760, %v13647_v35  ;;  %v1741_v15 = vadd.f32 %v1740_v4, %v622_v61  ;;  %v13685_v62 = vpop.f32.mrf.mxu2  ;;  %v567_v61 = vld [vmem:[#allocation4 + $0x558] sm:$0xff] }
 0x1c7   : > { %3466 = vmatpush.msra.mxu0 %v13574_v33  ;;  %3497 = vmatpush.msra.mxu1 %v13499_v27 }
 0x1c8   : > { %3530 = vmatpush.msrb.mxu2 %v3341_v54  ;;  %3589 = vmatpush.msrb.mxu3 %v13392_v52  ;;  %v3670_v52 = vand.u32 4294901760, %v13660_v50  ;;  %v13683_v54 = vsub.f32 %v577_v32, %v13665_v0  ;;  %v1842_v42 = vadd.f32 %v1841_v10, %v1741_v15  ;;  %v16371_v10 = vand.u32 4294901760, %v13535_v56  ;;  %v534_v56 = vld [vmem:[#allocation4 + $0x450] sm:$0xff] }
 0x1c9   : > { %3469 = vmatpush.msra.mxu0 %v13584_v38  ;;  %3499 = vmatpush.msra.mxu1 %v13512_v18 }
 0x1ca   : > { %3534 = vmatpush.msrb.mxu2 %v3347_v51  ;;  %3591 = vmatpush.msrb.mxu3 %v13402_v20  ;;  %v3665_v20 = vsub.f32 %v13647_v35, %v3664_v6  ;;  %v2003_v51 = vpop.f32.mrf.mxu0 }
 0x1cb   : > { %3634 = vmatpush.msrb.mxu0 %v13629_v55  ;;  %3317 = vmatmul.f32.vlgmr.msra.gmra.mxu2 %v12186_v17 }
 0x1cc   : > { %3501 = vmatpush.msra.mxu1 %v13525_v7  ;;  %3538 = vmatpush.msrb.mxu2 %v3353_v60  ;;  %v3682_v60 = vand.u32 4294901760, %v13683_v54  ;;  %v13704_v4 = vpop.f32.mrf.mxu3  ;;  %v3666_v37 = vand.u32 4294901760, %v3665_v20  ;;  %v16372_v20 = vand.u32 4294901760, %v13548_v21  ;;  %v523_v21 = vld [vmem:[#allocation4 + $0x3f8] sm:$0xff] }
 0x1cd   : > { %3593 = vmatpush.msrb.mxu3 %v13414_v26  ;;  %3636 = vmatpush.msrb.mxu0 %v13637_v30  ;;  %v3671_v26 = vsub.f32 %v13660_v50, %v3670_v52 }
 0x1ce   : > { %3418 = vmatmul.f32.vlgmr.msra.gmra.mxu3 %v12065_v31  ;;  %3503 = vmatpush.msra.mxu1 %v13537_v39  ;;  %v2040_v58 = vpop.f32.mrf.mxu1  ;;  %v3683_v53 = vsub.f32 %v13683_v54, %v3682_v60 }
 0x1cf   : > { %3542 = vmatpush.msrb.mxu2 %v3359_v5  ;;  %3595 = vmatpush.msrb.mxu3 %v13428_v9  ;;  %v3677_v9 = vsub.f32 %v13671_v46, %v3676_v49  ;;  %v1896_v5 = vadd.f32 %v13564_v8, %v1842_v42  ;;  %v3672_v32 = vand.u32 4294901760, %v3671_v26  ;;  %v2266_v8 = vpop.f32.mrf.mxu2 }
 0x1d0   : > { %3638 = vmatpush.msrb.mxu0 %v13644_v2  ;;  %3505 = vmatpush.msra.mxu1 %v13550_v45 }
 0x1d1   : > { %3472 = vmatmul.f32.vlgmr.msra.gmra.mxu0 %v12083_v40  ;;  %3546 = vmatpush.msrb.mxu2 %v3365_v48  ;;  %v3678_v48 = vand.u32 4294901760, %v3677_v9  ;;  %v1935_v24 = vadd.f32 %v13586_v25, %v1896_v5 }
 0x1d2   : > { %3597 = vmatpush.msrb.mxu3 %v13443_v19  ;;  %3640 = vmatpush.msrb.mxu0 %v13665_v0  ;;  %v623_v19 = vperm.slane %v13652_v13, 3 }
 0x1d3   : > { %3507 = vmatpush.msra.mxu1 %v13562_v59  ;;  %3550 = vmatpush.msrb.mxu2 %v3371_v1  ;;  %v3684_v1 = vand.u32 4294901760, %v3683_v53  ;;  %v2004_v25 = vadd.f32 %v2003_v51, %v1935_v24  ;;  %v13769_v51 = vand.u32 4294901760, %v534_v56 }
 0x1d4   : > { %3705 = vmatpush.msra.mxu0 %v13647_v35  ;;  %3599 = vmatpush.msrb.mxu3 %v13458_v41  ;;  %v2421_v41 = vpop.f32.mrf.mxu0  ;;  %v2267_v13 = vadd.f32 %v2266_v8, %v623_v19  ;;  %v2367_v22 = vpop.f32.mrf.mxu3  ;;  %v16373_v35 = vand.u32 4294901760, %v13560_v43 }
 0x1d5   : > { %3667 = vmatpush.msrb.mxu1 %v3666_v37  ;;  %3554 = vmatpush.msrb.mxu2 %v3377_v14  ;;  %v2041_v15 = vadd.f32 %v2040_v58, %v2004_v25  ;;  %v501_v58 = vld [vmem:[#allocation4 + $0x348] sm:$0xff]  ;;  %v16375_v37 = vand.u32 4294901760, %v13584_v38  ;;  %v13789_v9 = vsub.f32 %v534_v56, %v13769_v51 }
 0x1d6   : > { %3708 = vmatpush.msra.mxu0 %v13660_v50  ;;  %3601 = vmatpush.msrb.mxu3 %v13472_v12  ;;  %v2460_v14 = vpop.f32.mrf.mxu1  ;;  %v556_v12 = vld [vmem:[#allocation4 + $0x500] sm:$0xff] }
 0x1d7   : > { %3673 = vmatpush.msrb.mxu1 %v3672_v32  ;;  %3558 = vmatpush.msrb.mxu2 %v3383_v11  ;;  %v2368_v11 = vadd.f32 %v2367_v22, %v2267_v13  ;;  %v13746_v42 = vand.u32 4294901760, %v556_v12  ;;  %v2070_v50 = vadd.f32 %v13608_v57, %v2041_v15  ;;  %v13777_v57 = vand.u32 4294901760, %v523_v21 }
 0x1d8   : > { %3711 = vmatpush.msra.mxu0 %v13671_v46  ;;  %3603 = vmatpush.msrb.mxu3 %v13485_v47  ;;  %v13739_v47 = vand.u32 4294901760, %v567_v61  ;;  %v512_v46 = vld [vmem:[#allocation4 + $0x3a0] sm:$0xff]  ;;  %v16276_v13 = vand.u32 4294901760, %v13789_v9 }
 0x1d9   : > { %3679 = vmatpush.msrb.mxu1 %v3678_v48  ;;  %3646 = vmatmul.f32.vlgmr.msrb.gmra.mxu0 %v12116_v34  ;;  %v13767_v43 = vsub.f32 %v556_v12, %v13746_v42  ;;  %v13791_v5 = vand.u32 4294901760, %v512_v46  ;;  %v13797_v19 = vsub.f32 %v523_v21, %v13777_v57 }
 0x1da   : > { %3511 = vmatmul.f32.vlgmr.msra.gmra.mxu1 %v12098_v16  ;;  %3714 = vmatpush.msra.mxu0 %v13683_v54  ;;  %v490_v54 = vld [vmem:[#allocation4 + $0x2f0] sm:$0xff]  ;;  %v3868_v56 = vsub.f32 %v13789_v9, %v16276_v13 }
 0x1db   : > { %3562 = vmatpush.msrb.mxu2 %v16371_v10  ;;  %3605 = vmatpush.msrb.mxu3 %v13499_v27  ;;  %v13751_v27 = vand.u32 4294901760, %v545_v28  ;;  %v3855_v32 = vand.u32 4294901760, %v13767_v43  ;;  %v13807_v8 = vand.u32 4294901760, %v490_v54  ;;  %v16275_v12 = vand.u32 4294901760, %v13797_v19 }
 0x1dc   : > { %3685 = vmatpush.msrb.mxu1 %v3684_v1  ;;  %3763 = vmatpush.msrb.mxu0 %v3664_v6  ;;  %v13757_v6 = vsub.f32 %v567_v61, %v13739_v47  ;;  %v2595_v26 = vpop.f32.mrf.mxu0  ;;  %v13817_v1 = vsub.f32 %v512_v46, %v13791_v5  ;;  %v468_v61 = vld [vmem:[#allocation4 + $0x240] sm:$0xff]  ;;  %v446_v46 = vld [vmem:[#allocation4 + $0x190] sm:$0xff] }
 0x1dd   : > { %3566 = vmatpush.msrb.mxu2 %v16372_v20  ;;  %3607 = vmatpush.msrb.mxu3 %v13512_v18  ;;  %v2422_v18 = vadd.f32 %v2421_v41, %v2368_v11  ;;  %v3856_v41 = vsub.f32 %v13767_v43, %v3855_v32  ;;  %v13839_v15 = vand.u32 4294901760, %v468_v61  ;;  %v457_v20 = vld [vmem:[#allocation4 + $0x1e8] sm:$0xff] }
 0x1de   : > { %3734 = vmatpush.msra.mxu1 %v13629_v55  ;;  %3767 = vmatpush.msrb.mxu0 %v3670_v52  ;;  %v16374_v52 = vand.u32 4294901760, %v13574_v33  ;;  %v3849_v33 = vand.u32 4294901760, %v13757_v6 }
 0x1df   : > { %3570 = vmatpush.msrb.mxu2 %v16373_v35  ;;  %3609 = vmatpush.msrb.mxu3 %v13525_v7  ;;  %v13775_v7 = vsub.f32 %v545_v28, %v13751_v27  ;;  %v16274_v35 = vand.u32 4294901760, %v13817_v1 }
 0x1e0   : > { %3736 = vmatpush.msra.mxu1 %v13637_v30  ;;  %3771 = vmatpush.msrb.mxu0 %v3676_v49  ;;  %v2636_v49 = vpop.f32.mrf.mxu1  ;;  %v3850_v48 = vsub.f32 %v13757_v6, %v3849_v33 }
 0x1e1   : > { %3574 = vmatpush.msrb.mxu2 %v16374_v52  ;;  %3611 = vmatpush.msrb.mxu3 %v13537_v39  ;;  %v2461_v39 = vadd.f32 %v2460_v14, %v2422_v18  ;;  %v16278_v38 = vand.u32 4294901760, %v13775_v7 }
 0x1e2   : > { %3738 = vmatpush.msra.mxu1 %v13644_v2  ;;  %3775 = vmatpush.msrb.mxu0 %v3682_v60  ;;  %v2111_v60 = vadd.f32 %v13619_v3, %v2070_v50  ;;  %v13799_v3 = vand.u32 4294901760, %v501_v58  ;;  %v3851_v25 = vand.u32 4294901760, %v3850_v48 }
 0x1e3   : > { %3687 = vmatmul.f32.vlgmr.msrb.gmra.mxu1 %v12053_v63  ;;  %3717 = vmatmul.f32.vlgmr.msra.gmra.mxu0 %v12073_v44 }
 0x1e4   : > { %3740 = vmatpush.msra.mxu1 %v13665_v0  ;;  %3807 = vmatpush.msra.mxu0 %v13739_v47  ;;  %v13827_v14 = vsub.f32 %v501_v58, %v13799_v3  ;;  %v2666_v28 = vpop.f32.mrf.mxu0 }
 0x1e5   : > { %3578 = vmatpush.msrb.mxu2 %v16375_v37  ;;  %3613 = vmatpush.msrb.mxu3 %v13550_v45  ;;  %v2529_v53 = vpop.f32.mrf.mxu2  ;;  %v3869_v37 = vand.u32 4294901760, %v3868_v56 }
 0x1e6   : > { %3794 = vmatpush.msrb.mxu1 %v13629_v55  ;;  %3580 = vmatmul.f32.vlgmr.msrb.gmra.mxu2 %v12065_v31  ;;  %v2530_v45 = vadd.f32 %v2529_v53, %v2461_v39  ;;  %v479_v55 = vld [vmem:[#allocation4 + $0x298] sm:$0xff]  ;;  %v3880_v53 = vsub.f32 %v13817_v1, %v16274_v35 }
 0x1e7   : > { %3809 = vmatpush.msra.mxu0 %v13746_v42  ;;  %3950 = vmatpush.msra.mxu2 %v13757_v6  ;;  %v13832_v10 = vand.u32 4294901760, %v479_v55 }
 0x1e8   : > { %3615 = vmatpush.msrb.mxu3 %v13562_v59  ;;  %3796 = vmatpush.msrb.mxu1 %v13637_v30  ;;  %v2566_v24 = vpop.f32.mrf.mxu3  ;;  %v2141_v59 = vadd.f32 %v13633_v36, %v2111_v60  ;;  %v3862_v30 = vsub.f32 %v13775_v7, %v16278_v38  ;;  %v13835_v36 = vsub.f32 %v490_v54, %v13807_v8  ;;  %v2693_v21 = vpop.f32.mrf.mxu1  ;;  %v435_v60 = vld [vmem:[#allocation4 + $0x138] sm:$0xff] }
 0x1e9   : > { %3617 = vmatmul.f32.vlgmr.msrb.gmra.mxu3 %v12065_v31  ;;  %3811 = vmatpush.msra.mxu0 %v13751_v27  ;;  %v2567_v22 = vadd.f32 %v2566_v24, %v2530_v45  ;;  %v13856_v58 = vsub.f32 %v479_v55, %v13832_v10  ;;  %v13864_v54 = vsub.f32 %v468_v61, %v13839_v15  ;;  %v13870_v45 = vand.u32 4294901760, %v446_v46  ;;  %v424_v61 = vld [vmem:[#allocation4 + $0xe0] sm:$0xff] }
 0x1ea   : > { %3953 = vmatpush.msra.mxu2 %v13767_v43  ;;  %4003 = vmatpush.msra.mxu3 %v13739_v47  ;;  %v2168_v50 = vadd.f32 %v13655_v29, %v2141_v59  ;;  %v3863_v52 = vand.u32 4294901760, %v3862_v30  ;;  %v16270_v29 = vand.u32 4294901760, %v13835_v36  ;;  %v13887_v59 = vand.u32 4294901760, %v435_v60 }
 0x1eb   : > { %3798 = vmatpush.msrb.mxu1 %v13644_v2  ;;  %3813 = vmatpush.msra.mxu0 %v13769_v51  ;;  %v2596_v11 = vadd.f32 %v2595_v26, %v2567_v22  ;;  %v3857_v2 = vand.u32 4294901760, %v3856_v41  ;;  %v16273_v26 = vand.u32 4294901760, %v13827_v14  ;;  %v16271_v30 = vand.u32 4294901760, %v13856_v58 }
 0x1ec   : > { %3956 = vmatpush.msra.mxu2 %v13775_v7  ;;  %4005 = vmatpush.msra.mxu3 %v13746_v42  ;;  %v2201_v55 = vadd.f32 %v13685_v62, %v2168_v50  ;;  %v13882_v22 = vsub.f32 %v13835_v36, %v16270_v29  ;;  %v13897_v56 = vand.u32 4294901760, %v424_v61  ;;  %v611_v50 = vld [vmem:[#allocation4 + $0x6b8] sm:$0xff]  ;;  %v13908_v29 = vsub.f32 %v435_v60, %v13887_v59 }
 0x1ed   : > { %3800 = vmatpush.msrb.mxu1 %v13665_v0  ;;  %3815 = vmatpush.msra.mxu0 %v13777_v57  ;;  %v2637_v18 = vadd.f32 %v2636_v49, %v2596_v11  ;;  %v3874_v0 = vsub.f32 %v13797_v19, %v16275_v12  ;;  %v13858_v49 = vand.u32 4294901760, %v457_v20  ;;  %v3886_v41 = vsub.f32 %v13827_v14, %v16273_v26 }
 0x1ee   : > { %3744 = vmatmul.f32.vlgmr.msra.gmra.mxu1 %v12092_v23  ;;  %3959 = vmatpush.msra.mxu2 %v13789_v9  ;;  %v13922_v60 = vsub.f32 %v424_v61, %v13897_v56  ;;  %v16279_v12 = vand.u32 4294901760, %v13908_v29 }
 0x1ef   : > { %3852 = vmatpush.msra.mxu1 %v3851_v25  ;;  %4007 = vmatpush.msra.mxu3 %v13751_v27  ;;  %v2667_v39 = vadd.f32 %v2666_v28, %v2637_v18  ;;  %v3875_v24 = vand.u32 4294901760, %v3874_v0  ;;  %v13885_v62 = vsub.f32 %v457_v20, %v13858_v49  ;;  %v16272_v28 = vand.u32 4294901760, %v13864_v54 }
 0x1f0   : > { %3817 = vmatpush.msra.mxu0 %v13791_v5  ;;  %3962 = vmatpush.msra.mxu2 %v13797_v19  ;;  %v13895_v20 = vsub.f32 %v446_v46, %v13870_v45  ;;  %v3893_v46 = vand.u32 4294901760, %v13882_v22 }
 0x1f1   : > { %3858 = vmatpush.msra.mxu1 %v3857_v2  ;;  %4009 = vmatpush.msra.mxu3 %v13769_v51  ;;  %v2694_v48 = vadd.f32 %v2693_v21, %v2667_v39  ;;  %v3881_v2 = vand.u32 4294901760, %v3880_v53  ;;  %v413_v21 = vld [vmem:[#allocation4 + $0x88] sm:$0xff]  ;;  %v2226_v39 = vadd.f32 %v13704_v4, %v2201_v55  ;;  %v3898_v53 = vsub.f32 %v13856_v58, %v16271_v30  ;;  %v402_v55 = vld [vmem:[#allocation4 + $0x30] sm:$0xff] }
 0x1f2   : > { %3819 = vmatpush.msra.mxu0 %v13799_v3  ;;  %3965 = vmatpush.msra.mxu2 %v13817_v1  ;;  %v16277_v4 = vand.u32 4294901760, %v13885_v62 }
 0x1f3   : > { %3864 = vmatpush.msra.mxu1 %v3863_v52  ;;  %4011 = vmatpush.msra.mxu3 %v13777_v57  ;;  %v2726_v25 = vpop.f32.mrf.mxu0  ;;  %v11396_v52 = vld [vmem:[#allocation1] sm:$0xff]  ;;  %v3899_v61 = vand.u32 4294901760, %v3898_v53 }
 0x1f4   : > { %3821 = vmatpush.msra.mxu0 %v13807_v8  ;;  %3968 = vmatpush.msra.mxu2 %v13827_v14  ;;  %v2727_v11 = vadd.f32 %v2726_v25, %v2694_v48  ;;  %v6448_v0 = vrot.slane %v11396_v52, 3  ;;  %v600_v25 = vld [vmem:[#allocation4 + $0x660] sm:$0xff]  ;;  %v3910_v35 = vsub.f32 %v13885_v62, %v16277_v4 }
 0x1f5   : > { %3870 = vmatpush.msra.mxu1 %v3869_v37  ;;  %4013 = vmatpush.msra.mxu3 %v13791_v5  ;;  %v2751_v18 = vpop.f32.mrf.mxu1  ;;  %v3887_v37 = vand.u32 4294901760, %v3886_v41  ;;  %v13916_v41 = vand.u32 4294901760, %v413_v21  ;;  %v13925_v30 = vand.u32 4294901760, %v600_v25 }
 0x1f6   : > { %3823 = vmatpush.msra.mxu0 %v13832_v10  ;;  %3971 = vmatpush.msra.mxu2 %v13835_v36  ;;  %v2752_v48 = vadd.f32 %v2751_v18, %v2727_v11  ;;  %v13918_v11 = vand.u32 4294901760, %v611_v50  ;;  %v16281_v18 = vand.u32 4294901760, %v13895_v20  ;;  %v6461_v26 = vsel %vm6458_vm1, %v11396_v52, %v6448_v0  ;;  %v578_v0 = vld [vmem:[#allocation4 + $0x5b0] sm:$0xff] }
 0x1f7   : > { %3876 = vmatpush.msra.mxu1 %v3875_v24  ;;  %4015 = vmatpush.msra.mxu3 %v13799_v3  ;;  %v3904_v24 = vsub.f32 %v13864_v54, %v16272_v28  ;;  %v13929_v28 = vand.u32 4294901760, %v402_v55  ;;  %v13940_v13 = vsub.f32 %v413_v21, %v13916_v41 }
 0x1f8   : > { %3825 = vmatpush.msra.mxu0 %v13839_v15  ;;  %3974 = vmatpush.msra.mxu2 %v13856_v58  ;;  %v6437_v22 = vpack.c.bf16 %v2752_v48, %v2226_v39  ;;  %v13944_v52 = vsub.f32 %v611_v50, %v13918_v11  ;;  %v3916_v53 = vsub.f32 %v13895_v20, %v16281_v18  ;;  %v16280_v50 = vand.u32 4294901760, %v13922_v60 }
 0x1f9   : > { %3882 = vmatpush.msra.mxu1 %v3881_v2  ;;  %4017 = vmatpush.msra.mxu3 %v13807_v8  ;;  %v589_v2 = vld [vmem:[#allocation4 + $0x608] sm:$0xff]  ;;  %v13958_v21 = vsub.f32 %v402_v55, %v13929_v28 }
 0x1fa   : > { %3777 = vmatmul.f32.vlgmr.msrb.gmra.mxu0 %v12053_v63  ;;  %3977 = vmatpush.msra.mxu2 %v13864_v54  ;;  %v6449_v39 = vrot.slane %v6437_v22, 6  ;;  %v6450_v48 = vrot.slane %v6437_v22, 1  ;;  %6497 = vst [vmem:[#allocation1 + $0x8] sm:$0xff] %v6437_v22  ;;  %v13953_v38 = vand.u32 4294901760, %v589_v2  ;;  %v4190_v55 = vand.u32 4294901760, %v13944_v52 }
 0x1fb   : > { %3827 = vmatpush.msra.mxu0 %v13858_v49  ;;  %3888 = vmatpush.msra.mxu1 %v3887_v37  ;;  %v3905_v37 = vand.u32 4294901760, %v3904_v24  ;;  %v3911_v24 = vand.u32 4294901760, %v3910_v35 }
 0x1fc   : > { %4019 = vmatpush.msra.mxu3 %v13832_v10  ;;  %3802 = vmatmul.f32.vlgmr.msrb.gmra.mxu1 %v12053_v63  ;;  %v6465_v22 = vsel %vm6462_vm2, %v6449_v39, %v6450_v48  ;;  %v13968_v39 = vand.u32 4294901760, %v578_v0  ;;  %v16282_v48 = vand.u32 4294901760, %v13940_v13  ;;  %v13976_v35 = vsub.f32 %v589_v2, %v13953_v38 }
 0x1fd   : > { %3829 = vmatpush.msra.mxu0 %v13870_v45  ;;  %3894 = vmatpush.msra.mxu1 %v3893_v46  ;;  %v13951_v4 = vsel %vm6466_vm3, %v6461_v26, %v6465_v22  ;;  %v13962_v46 = vsub.f32 %v600_v25, %v13925_v30  ;;  %v3922_v26 = vsub.f32 %v13908_v29, %v16279_v12  ;;  %v3917_v25 = vand.u32 4294901760, %v3916_v53 }
 0x1fe   : > { %3980 = vmatpush.msra.mxu2 %v13885_v62  ;;  %4021 = vmatpush.msra.mxu3 %v13839_v15  ;;  %v16283_v12 = vand.u32 4294901760, %v13958_v21  ;;  %v13987_v53 = vsub.f32 %v578_v0, %v13968_v39  ;;  %v4191_v2 = vsub.f32 %v13944_v52, %v4190_v55 }
 0x1ff   : > { %3831 = vmatpush.msra.mxu0 %v13887_v59  ;;  %3900 = vmatpush.msra.mxu1 %v3899_v61  ;;  %v3928_v61 = vsub.f32 %v13922_v60, %v16280_v50  ;;  %v4196_v22 = vand.u32 4294901760, %v13962_v46  ;;  %v3934_v50 = vsub.f32 %v13940_v13, %v16282_v48 }
 0x200   : > { %3983 = vmatpush.msra.mxu2 %v13895_v20  ;;  %4023 = vmatpush.msra.mxu3 %v13858_v49  ;;  %v3940_v18 = vsub.f32 %v13958_v21, %v16283_v12  ;;  %v4192_v48 = vand.u32 4294901760, %v4191_v2  ;;  %v568_v2 = vld [vmem:[#allocation4 + $0x560] sm:$0xff] }
 0x201   : > { %3833 = vmatpush.msra.mxu0 %v13897_v56  ;;  %3906 = vmatpush.msra.mxu1 %v3905_v37  ;;  %v3923_v37 = vand.u32 4294901760, %v3922_v26  ;;  %v3929_v0 = vand.u32 4294901760, %v3928_v61  ;;  %v4197_v26 = vsub.f32 %v13962_v46, %v4196_v22  ;;  %v3935_v61 = vand.u32 4294901760, %v3934_v50 }
 0x202   : > { %3986 = vmatpush.msra.mxu2 %v13908_v29  ;;  %4025 = vmatpush.msra.mxu3 %v13870_v45 }
 0x203   : > { %3835 = vmatpush.msra.mxu0 %v13916_v41  ;;  %3912 = vmatpush.msra.mxu1 %v3911_v24  ;;  %v4202_v24 = vand.u32 4294901760, %v13976_v35  ;;  %v4198_v6 = vand.u32 4294901760, %v4197_v26  ;;  %v535_v26 = vld [vmem:[#allocation4 + $0x458] sm:$0xff] }
 0x204   : > { %3989 = vmatpush.msra.mxu2 %v13922_v60  ;;  %4027 = vmatpush.msra.mxu3 %v13887_v59 }
 0x205   : > { %3837 = vmatpush.msra.mxu0 %v13929_v28  ;;  %3918 = vmatpush.msra.mxu1 %v3917_v25  ;;  %v4208_v25 = vand.u32 4294901760, %v13987_v53  ;;  %v4203_v12 = vsub.f32 %v13976_v35, %v4202_v24 }
 0x206   : > { %3992 = vmatpush.msra.mxu2 %v13940_v13  ;;  %4029 = vmatpush.msra.mxu3 %v13897_v56 }
 0x207   : > { %4044 = vmatpush.msrb.mxu0 %v3849_v33  ;;  %3924 = vmatpush.msra.mxu1 %v3923_v37  ;;  %v3941_v33 = vand.u32 4294901760, %v3940_v18  ;;  %v16376_v37 = vand.u32 4294901760, %v13775_v7  ;;  %v4209_v43 = vsub.f32 %v13987_v53, %v4208_v25  ;;  %v4204_v50 = vand.u32 4294901760, %v4203_v12 }
 0x208   : > { %3995 = vmatpush.msra.mxu2 %v13958_v21  ;;  %4031 = vmatpush.msra.mxu3 %v13916_v41  ;;  %v16378_v7 = vand.u32 4294901760, %v13797_v19  ;;  %v16379_v12 = vand.u32 4294901760, %v13817_v1  ;;  %v546_v19 = vld [vmem:[#allocation4 + $0x4b0] sm:$0xff] }
 0x209   : > { %4048 = vmatpush.msrb.mxu0 %v3855_v32  ;;  %3930 = vmatpush.msra.mxu1 %v3929_v0  ;;  %v16377_v32 = vand.u32 4294901760, %v13789_v9  ;;  %v4210_v18 = vand.u32 4294901760, %v4209_v43  ;;  %v557_v9 = vld [vmem:[#allocation4 + $0x508] sm:$0xff]  ;;  %v16380_v0 = vand.u32 4294901760, %v13827_v14  ;;  %v14052_v1 = vand.u32 4294901760, %v546_v19 }
 0x20a   : > { %4160 = vmatpush.msrb.mxu2 %v13918_v11  ;;  %4033 = vmatpush.msra.mxu3 %v13929_v28  ;;  %v14062_v14 = vand.u32 4294901760, %v535_v26  ;;  %v513_v43 = vld [vmem:[#allocation4 + $0x3a8] sm:$0xff] }
 0x20b   : > { %4052 = vmatpush.msrb.mxu0 %v16376_v37  ;;  %3936 = vmatpush.msra.mxu1 %v3935_v61  ;;  %v16381_v61 = vand.u32 4294901760, %v13835_v36  ;;  %v14072_v36 = vsub.f32 %v546_v19, %v14052_v1 }
 0x20c   : > { %4162 = vmatpush.msrb.mxu2 %v13925_v30  ;;  %4193 = vmatpush.msrb.mxu3 %v4192_v48  ;;  %v14037_v48 = vand.u32 4294901760, %v568_v2 }
 0x20d   : > { %4056 = vmatpush.msrb.mxu0 %v16377_v32  ;;  %3942 = vmatpush.msra.mxu1 %v3941_v33  ;;  %v16382_v33 = vand.u32 4294901760, %v13856_v58  ;;  %v16383_v32 = vand.u32 4294901760, %v13864_v54  ;;  %v14083_v58 = vsub.f32 %v535_v26, %v14062_v14  ;;  %v16384_v54 = vand.u32 4294901760, %v13885_v62 }
 0x20e   : > { %4164 = vmatpush.msrb.mxu2 %v13953_v38  ;;  %4199 = vmatpush.msrb.mxu3 %v4198_v6  ;;  %v524_v6 = vld [vmem:[#allocation4 + $0x400] sm:$0xff]  ;;  %v16385_v62 = vand.u32 4294901760, %v13895_v20 }
 0x20f   : > { %3998 = vmatmul.f32.vlgmr.msra.gmra.mxu2 %v12083_v40  ;;  %4060 = vmatpush.msrb.mxu0 %v16378_v7  ;;  %v14074_v37 = vand.u32 4294901760, %v524_v6 }
 0x210   : > { %4111 = vmatpush.msrb.mxu1 %v13739_v47  ;;  %4166 = vmatpush.msrb.mxu2 %v13968_v39  ;;  %v14042_v47 = vand.u32 4294901760, %v557_v9 }
 0x211   : > { %4205 = vmatpush.msrb.mxu3 %v4204_v50  ;;  %4064 = vmatpush.msrb.mxu0 %v16379_v12  ;;  %v4387_v50 = vand.u32 4294901760, %v14072_v36  ;;  %v14098_v7 = vsub.f32 %v524_v6, %v14074_v37 }
 0x212   : > { %4231 = vmatpush.msra.mxu2 %v13944_v52  ;;  %4037 = vmatmul.f32.vlgmr.msra.gmra.mxu3 %v12098_v16  ;;  %v502_v52 = vld [vmem:[#allocation4 + $0x350] sm:$0xff] }
 0x213   : > { %4113 = vmatpush.msrb.mxu1 %v13746_v42  ;;  %4211 = vmatpush.msrb.mxu3 %v4210_v18  ;;  %v14050_v42 = vsub.f32 %v568_v2, %v14037_v48  ;;  %v480_v18 = vld [vmem:[#allocation4 + $0x2a0] sm:$0xff] }
 0x214   : > { %4234 = vmatpush.msra.mxu2 %v13962_v46  ;;  %4068 = vmatpush.msrb.mxu0 %v16380_v0  ;;  %v491_v46 = vld [vmem:[#allocation4 + $0x2f8] sm:$0xff]  ;;  %v14132_v2 = vand.u32 4294901760, %v480_v18  ;;  %v458_v0 = vld [vmem:[#allocation4 + $0x1f0] sm:$0xff] }
 0x215   : > { %4260 = vmatpush.msra.mxu3 %v13918_v11  ;;  %4115 = vmatpush.msrb.mxu1 %v13751_v27  ;;  %v14060_v27 = vsub.f32 %v557_v9, %v14042_v47 }
 0x216   : > { %4237 = vmatpush.msra.mxu2 %v13976_v35  ;;  %4072 = vmatpush.msrb.mxu0 %v16381_v61  ;;  %v14118_v35 = vand.u32 4294901760, %v491_v46 }
 0x217   : > { %4262 = vmatpush.msra.mxu3 %v13925_v30  ;;  %4117 = vmatpush.msrb.mxu1 %v13769_v51  ;;  %v4375_v51 = vand.u32 4294901760, %v14050_v42 }
 0x218   : > { %4172 = vmatmul.f32.vlgmr.msrb.gmra.mxu2 %v12116_v34  ;;  %4076 = vmatpush.msrb.mxu0 %v16382_v33  ;;  %v14143_v12 = vsub.f32 %v491_v46, %v14118_v35  ;;  %v14156_v33 = vsub.f32 %v480_v18, %v14132_v2  ;;  %v436_v46 = vld [vmem:[#allocation4 + $0x140] sm:$0xff] }
 0x219   : > { %4264 = vmatpush.msra.mxu3 %v13953_v38  ;;  %4240 = vmatpush.msra.mxu2 %v13987_v53  ;;  %v4399_v53 = vand.u32 4294901760, %v14098_v7 }
 0x21a   : > { %4119 = vmatpush.msrb.mxu1 %v13777_v57  ;;  %4213 = vmatmul.f32.vlgmr.msrb.gmra.mxu3 %v12053_v63  ;;  %v4381_v57 = vand.u32 4294901760, %v14060_v27  ;;  %v4423_v18 = vand.u32 4294901760, %v14156_v33 }
 0x21b   : > { %4289 = vmatpush.msrb.mxu2 %v4190_v55  ;;  %4080 = vmatpush.msrb.mxu0 %v16383_v32  ;;  %v14088_v55 = vand.u32 4294901760, %v513_v43  ;;  %v4400_v61 = vsub.f32 %v14098_v7, %v4399_v53  ;;  %v14159_v32 = vand.u32 4294901760, %v458_v0 }
 0x21c   : > { %4266 = vmatpush.msra.mxu3 %v13968_v39  ;;  %4121 = vmatpush.msrb.mxu1 %v13791_v5  ;;  %v4376_v5 = vsub.f32 %v14050_v42, %v4375_v51 }
 0x21d   : > { %4293 = vmatpush.msrb.mxu2 %v4196_v22  ;;  %4084 = vmatpush.msrb.mxu0 %v16384_v54  ;;  %v4393_v22 = vand.u32 4294901760, %v14083_v58  ;;  %v4417_v54 = vand.u32 4294901760, %v14143_v12 }
 0x21e   : > { %4320 = vmatpush.msrb.mxu3 %v13918_v11  ;;  %4123 = vmatpush.msrb.mxu1 %v13799_v3  ;;  %v14103_v11 = vand.u32 4294901760, %v502_v52  ;;  %v4382_v3 = vsub.f32 %v14060_v27, %v4381_v57  ;;  %v4377_v20 = vand.u32 4294901760, %v4376_v5 }
 0x21f   : > { %4297 = vmatpush.msrb.mxu2 %v4202_v24  ;;  %4088 = vmatpush.msrb.mxu0 %v16385_v62  ;;  %v4388_v24 = vsub.f32 %v14072_v36, %v4387_v50  ;;  %v4394_v9 = vsub.f32 %v14083_v58, %v4393_v22  ;;  %v4401_v62 = vand.u32 4294901760, %v4400_v61 }
 0x220   : > { %4322 = vmatpush.msrb.mxu3 %v13925_v30  ;;  %4125 = vmatpush.msrb.mxu1 %v13807_v8  ;;  %v14116_v30 = vsub.f32 %v513_v43, %v14088_v55  ;;  %v16386_v8 = vand.u32 4294901760, %v13908_v29  ;;  %v4383_v29 = vand.u32 4294901760, %v4382_v3  ;;  %v447_v43 = vld [vmem:[#allocation4 + $0x198] sm:$0xff] }
 0x221   : > { %4301 = vmatpush.msrb.mxu2 %v4208_v25  ;;  %v469_v25 = vld [vmem:[#allocation4 + $0x248] sm:$0xff]  ;;  %3843 = vmatmul.f32.vlgmr.msra.gmra.mxu0 %v12186_v17  ;;  %v4389_v26 = vand.u32 4294901760, %v4388_v24  ;;  %v14172_v3 = vand.u32 4294901760, %v447_v43  ;;  %v14185_v24 = vand.u32 4294901760, %v436_v46 }
 0x222   : > { %4324 = vmatpush.msrb.mxu3 %v13953_v38  ;;  %4243 = vmatmul.f32.vlgmr.msra.gmra.mxu2 %v12073_v44  ;;  %v14130_v38 = vsub.f32 %v502_v52, %v14103_v11  ;;  %v14145_v19 = vand.u32 4294901760, %v469_v25  ;;  %v16388_v52 = vand.u32 4294901760, %v13940_v13  ;;  %v16389_v13 = vand.u32 4294901760, %v13958_v21 }
 0x223   : > { %4092 = vmatpush.msrb.mxu0 %v16386_v8  ;;  %4333 = vmatpush.msra.mxu2 %v14037_v48  ;;  %v425_v8 = vld [vmem:[#allocation4 + $0xe8] sm:$0xff]  ;;  %v4418_v21 = vsub.f32 %v14143_v12, %v4417_v54 }
 0x224   : > { %4127 = vmatpush.msrb.mxu1 %v13832_v10  ;;  %4326 = vmatpush.msrb.mxu3 %v13968_v39  ;;  %v4405_v10 = vand.u32 4294901760, %v14116_v30  ;;  %v16387_v39 = vand.u32 4294901760, %v13922_v60  ;;  %v4411_v6 = vand.u32 4294901760, %v14130_v38  ;;  %v4395_v60 = vand.u32 4294901760, %v4394_v9 }
 0x225   : > { %4270 = vmatmul.f32.vlgmr.msra.gmra.mxu3 %v12092_v23  ;;  %4335 = vmatpush.msra.mxu2 %v14042_v47  ;;  %v14169_v5 = vsub.f32 %v469_v25, %v14145_v19  ;;  %v14195_v9 = vsub.f32 %v447_v43, %v14172_v3  ;;  %v14208_v43 = vsub.f32 %v436_v46, %v14185_v24 }
 0x226   : > { %4378 = vmatpush.msra.mxu3 %v4377_v20  ;;  %4096 = vmatpush.msrb.mxu0 %v16387_v39  ;;  %v14183_v20 = vsub.f32 %v458_v0, %v14159_v32  ;;  %v14197_v0 = vand.u32 4294901760, %v425_v8  ;;  %v4424_v39 = vsub.f32 %v14156_v33, %v4423_v18 }
 0x227   : > { %4129 = vmatpush.msrb.mxu1 %v13839_v15  ;;  %4337 = vmatpush.msra.mxu2 %v14052_v1  ;;  %v4406_v15 = vsub.f32 %v14116_v30, %v4405_v10  ;;  %v4429_v25 = vand.u32 4294901760, %v14169_v5 }
 0x228   : > { %4384 = vmatpush.msra.mxu3 %v4383_v29  ;;  %3944 = vmatmul.f32.vlgmr.msra.gmra.mxu1 %v12065_v31  ;;  %v414_v29 = vld [vmem:[#allocation4 + $0x90] sm:$0xff]  ;;  %v16284_v61 = vand.u32 4294901760, %v14183_v20 }
 0x229   : > { %4100 = vmatpush.msrb.mxu0 %v16388_v52  ;;  %4131 = vmatpush.msrb.mxu1 %v13858_v49  ;;  %v4412_v49 = vsub.f32 %v14130_v38, %v4411_v6  ;;  %v4430_v52 = vsub.f32 %v14169_v5, %v4429_v25 }
 0x22a   : > { %4339 = vmatpush.msra.mxu2 %v14062_v14  ;;  %4390 = vmatpush.msra.mxu3 %v4389_v26  ;;  %v403_v26 = vld [vmem:[#allocation4 + $0x38] sm:$0xff] }
 0x22b   : > { %4104 = vmatpush.msrb.mxu0 %v16389_v13  ;;  %4133 = vmatpush.msrb.mxu1 %v13870_v45  ;;  %v4407_v45 = vand.u32 4294901760, %v4406_v15  ;;  %v16286_v15 = vand.u32 4294901760, %v14195_v9  ;;  %v14222_v46 = vand.u32 4294901760, %v403_v26  ;;  %v14224_v13 = vpop.f32.mrf.mxu2 }
 0x22c   : > { %4341 = vmatpush.msra.mxu2 %v14074_v37  ;;  %4396 = vmatpush.msra.mxu3 %v4395_v60  ;;  %v14210_v60 = vand.u32 4294901760, %v414_v29 }
 0x22d   : > { %4476 = vmatpush.msra.mxu0 %v14050_v42  ;;  %4135 = vmatpush.msrb.mxu1 %v13887_v59  ;;  %v4413_v59 = vand.u32 4294901760, %v4412_v49  ;;  %v4425_v49 = vand.u32 4294901760, %v4424_v39  ;;  %v14244_v39 = vsub.f32 %v403_v26, %v14222_v46 }
 0x22e   : > { %4343 = vmatpush.msra.mxu2 %v14088_v55  ;;  %4402 = vmatpush.msra.mxu3 %v4401_v62  ;;  %v14220_v62 = vsub.f32 %v425_v8, %v14197_v0  ;;  %v14234_v8 = vsub.f32 %v414_v29, %v14210_v60 }
 0x22f   : > { %4479 = vmatpush.msra.mxu0 %v14060_v27  ;;  %4137 = vmatpush.msrb.mxu1 %v13897_v56  ;;  %v4419_v56 = vand.u32 4294901760, %v4418_v21  ;;  %v4431_v21 = vand.u32 4294901760, %v4430_v52 }
 0x230   : > { %4106 = vmatmul.f32.vlgmr.msrb.gmra.mxu0 %v12065_v31  ;;  %4345 = vmatpush.msra.mxu2 %v14103_v11  ;;  %v16289_v52 = vand.u32 4294901760, %v14234_v8 }
 0x231   : > { %4408 = vmatpush.msra.mxu3 %v4407_v45  ;;  %4482 = vmatpush.msra.mxu0 %v14072_v36  ;;  %v16285_v45 = vand.u32 4294901760, %v14208_v43 }
 0x232   : > { %4139 = vmatpush.msrb.mxu1 %v13916_v41  ;;  %4347 = vmatpush.msra.mxu2 %v14118_v35  ;;  %v4436_v41 = vsub.f32 %v14183_v20, %v16284_v61  ;;  %v14246_v61 = vpop.f32.mrf.mxu3 }
 0x233   : > { %4414 = vmatpush.msra.mxu3 %v4413_v59  ;;  %4485 = vmatpush.msra.mxu0 %v14083_v58  ;;  %v16287_v59 = vand.u32 4294901760, %v14220_v62 }
 0x234   : > { %4141 = vmatpush.msrb.mxu1 %v13929_v28  ;;  %4349 = vmatpush.msra.mxu2 %v14132_v2  ;;  %v4442_v28 = vsub.f32 %v14195_v9, %v16286_v15  ;;  %v4437_v29 = vand.u32 4294901760, %v4436_v41  ;;  %v16288_v41 = vand.u32 4294901760, %v14244_v39  ;;  %v14268_v15 = vpop.f32.mrf.mxu2 }
 0x235   : > { %4143 = vmatmul.f32.vlgmr.msrb.gmra.mxu1 %v12065_v31  ;;  %4420 = vmatpush.msra.mxu3 %v4419_v56  ;;  %v4448_v56 = vsub.f32 %v14208_v43, %v16285_v45 }
 0x236   : > { %4488 = vmatpush.msra.mxu0 %v14098_v7  ;;  %4529 = vmatpush.msra.mxu1 %v14037_v48  ;;  %v4443_v26 = vand.u32 4294901760, %v4442_v28 }
 0x237   : > { %4351 = vmatpush.msra.mxu2 %v14145_v19  ;;  %4426 = vmatpush.msra.mxu3 %v4425_v49  ;;  %v4454_v49 = vsub.f32 %v14220_v62, %v16287_v59  ;;  %v4449_v45 = vand.u32 4294901760, %v4448_v56  ;;  %v4466_v59 = vsub.f32 %v14244_v39, %v16288_v41 }
 0x238   : > { %4491 = vmatpush.msra.mxu0 %v14116_v30  ;;  %4531 = vmatpush.msra.mxu1 %v14042_v47 }
 0x239   : > { %4303 = vmatmul.f32.vlgmr.msrb.gmra.mxu2 %v12053_v63  ;;  %4432 = vmatpush.msra.mxu3 %v4431_v21  ;;  %v4460_v21 = vsub.f32 %v14234_v8, %v16289_v52  ;;  %v4455_v28 = vand.u32 4294901760, %v4454_v49  ;;  %v612_v49 = vld [vmem:[#allocation4 + $0x6c0] sm:$0xff] }
 0x23a   : > { %4353 = vmatpush.msra.mxu2 %v14159_v32  ;;  %4494 = vmatpush.msra.mxu0 %v14130_v38  ;;  %v14279_v56 = vpop.f32.mrf.mxu3 }
 0x23b   : > { %4533 = vmatpush.msra.mxu1 %v14052_v1  ;;  %4328 = vmatmul.f32.vlgmr.msrb.gmra.mxu3 %v12053_v63 }
 0x23c   : > { %4355 = vmatpush.msra.mxu2 %v14172_v3  ;;  %4438 = vmatpush.msra.mxu3 %v4437_v29  ;;  %v4461_v29 = vand.u32 4294901760, %v4460_v21  ;;  %v14289_v21 = vand.u32 4294901760, %v612_v49 }
 0x23d   : > { %4497 = vmatpush.msra.mxu0 %v14143_v12  ;;  %4535 = vmatpush.msra.mxu1 %v14062_v14 }
 0x23e   : > { %4357 = vmatpush.msra.mxu2 %v14185_v24  ;;  %4444 = vmatpush.msra.mxu3 %v4443_v26  ;;  %v4467_v26 = vand.u32 4294901760, %v4466_v59  ;;  %v590_v59 = vld [vmem:[#allocation4 + $0x610] sm:$0xff] }
 0x23f   : > { %4500 = vmatpush.msra.mxu0 %v14156_v33  ;;  %4537 = vmatpush.msra.mxu1 %v14074_v37  ;;  %v14304_v42 = vand.u32 4294901760, %v590_v59 }
 0x240   : > { %4359 = vmatpush.msra.mxu2 %v14197_v0  ;;  %4450 = vmatpush.msra.mxu3 %v4449_v45  ;;  %v601_v45 = vld [vmem:[#allocation4 + $0x668] sm:$0xff] }
 0x241   : > { %4503 = vmatpush.msra.mxu0 %v14169_v5  ;;  %4539 = vmatpush.msra.mxu1 %v14088_v55  ;;  %v14297_v41 = vand.u32 4294901760, %v601_v45 }
 0x242   : > { %4361 = vmatpush.msra.mxu2 %v14210_v60  ;;  %4456 = vmatpush.msra.mxu3 %v4455_v28  ;;  %v14293_v28 = vpop.f32.mrf.mxu2  ;;  %v14312_v27 = vpop.f32.mrf.mxu3 }
 0x243   : > { %4506 = vmatpush.msra.mxu0 %v14183_v20  ;;  %4541 = vmatpush.msra.mxu1 %v14103_v11 }
 0x244   : > { %4363 = vmatpush.msra.mxu2 %v14222_v46  ;;  %4462 = vmatpush.msra.mxu3 %v4461_v29  ;;  %v2792_v29 = vpop.f32.mrf.mxu0 }
 0x245   : > { %4509 = vmatpush.msra.mxu0 %v14195_v9  ;;  %4543 = vmatpush.msra.mxu1 %v14118_v35 }
 0x246   : > { %4570 = vmatpush.msrb.mxu2 %v4375_v51  ;;  %4468 = vmatpush.msra.mxu3 %v4467_v26  ;;  %v579_v51 = vld [vmem:[#allocation4 + $0x5b8] sm:$0xff]  ;;  %v14307_v26 = vsub.f32 %v612_v49, %v14289_v21  ;;  %v14331_v49 = vsub.f32 %v590_v59, %v14304_v42 }
 0x247   : > { %4512 = vmatpush.msra.mxu0 %v14208_v43  ;;  %4545 = vmatpush.msra.mxu1 %v14132_v2  ;;  %v14325_v36 = vand.u32 4294901760, %v579_v51 }
 0x248   : > { %4574 = vmatpush.msrb.mxu2 %v4381_v57  ;;  %4637 = vmatpush.msrb.mxu3 %v14037_v48  ;;  %v14317_v48 = vsub.f32 %v601_v45, %v14297_v41  ;;  %v14319_v57 = vld [vmem:[#allocation7] sm:$0xff]  ;;  %v4728_v7 = vand.u32 4294901760, %v14331_v49 }
 0x249   : > { %4515 = vmatpush.msra.mxu0 %v14220_v62  ;;  %4547 = vmatpush.msra.mxu1 %v14145_v19  ;;  %v624_v52 = vperm.slane %v14319_v57, 4 }
 0x24a   : > { %4578 = vmatpush.msrb.mxu2 %v4387_v50  ;;  %4639 = vmatpush.msrb.mxu3 %v14042_v47  ;;  %v2893_v47 = vpop.f32.mrf.mxu1  ;;  %v4716_v50 = vand.u32 4294901760, %v14307_v26  ;;  %v14345_v45 = vpop.f32.mrf.mxu2  ;;  %v4729_v38 = vsub.f32 %v14331_v49, %v4728_v7 }
 0x24b   : > { %4518 = vmatpush.msra.mxu0 %v14234_v8  ;;  %4549 = vmatpush.msra.mxu1 %v14159_v32  ;;  %v2793_v58 = vadd.f32 %v2792_v29, %v624_v52  ;;  %v14364_v59 = vpop.f32.mrf.mxu3 }
 0x24c   : > { %4582 = vmatpush.msrb.mxu2 %v4393_v22  ;;  %4641 = vmatpush.msrb.mxu3 %v14052_v1  ;;  %v4722_v1 = vand.u32 4294901760, %v14317_v48  ;;  %v14343_v22 = vsub.f32 %v579_v51, %v14325_v36  ;;  %v3055_v30 = vpop.f32.mrf.mxu0 }
 0x24d   : > { %4521 = vmatpush.msra.mxu0 %v14244_v39  ;;  %4551 = vmatpush.msra.mxu1 %v14172_v3 }
 0x24e   : > { %4586 = vmatpush.msrb.mxu2 %v4399_v53  ;;  %4643 = vmatpush.msrb.mxu3 %v14062_v14  ;;  %v4717_v14 = vsub.f32 %v14307_v26, %v4716_v50  ;;  %v2894_v53 = vadd.f32 %v2893_v47, %v2793_v58  ;;  %v569_v47 = vld [vmem:[#allocation4 + $0x568] sm:$0xff] }
 0x24f   : > { %4686 = vmatpush.msrb.mxu0 %v14289_v21  ;;  %4369 = vmatmul.f32.vlgmr.msra.gmra.mxu2 %v12186_v17 }
 0x250   : > { %4553 = vmatpush.msra.mxu1 %v14185_v24  ;;  %4590 = vmatpush.msrb.mxu2 %v4405_v10  ;;  %v4734_v10 = vand.u32 4294901760, %v14343_v22  ;;  %v2948_v29 = vadd.f32 %v14224_v13, %v2894_v53 }
 0x251   : > { %4645 = vmatpush.msrb.mxu3 %v14074_v37  ;;  %4688 = vmatpush.msrb.mxu0 %v14297_v41  ;;  %v4723_v37 = vsub.f32 %v14317_v48, %v4722_v1 }
 0x252   : > { %4470 = vmatmul.f32.vlgmr.msra.gmra.mxu3 %v12065_v31  ;;  %4555 = vmatpush.msra.mxu1 %v14197_v0  ;;  %v3092_v52 = vpop.f32.mrf.mxu1  ;;  %v4735_v12 = vsub.f32 %v14343_v22, %v4734_v10  ;;  %v3318_v51 = vpop.f32.mrf.mxu2  ;;  %v2987_v33 = vadd.f32 %v14246_v61, %v2948_v29  ;;  %v16391_v61 = vand.u32 4294901760, %v14195_v9  ;;  %v536_v9 = vld [vmem:[#allocation4 + $0x460] sm:$0xff] }
 0x253   : > { %4594 = vmatpush.msrb.mxu2 %v4411_v6  ;;  %4647 = vmatpush.msrb.mxu3 %v14088_v55  ;;  %v4718_v55 = vand.u32 4294901760, %v4717_v14  ;;  %v4724_v6 = vand.u32 4294901760, %v4723_v37  ;;  %v3419_v5 = vpop.f32.mrf.mxu3  ;;  %v16392_v37 = vand.u32 4294901760, %v14208_v43  ;;  %v525_v43 = vld [vmem:[#allocation4 + $0x408] sm:$0xff] }
 0x254   : > { %4690 = vmatpush.msrb.mxu0 %v14304_v42  ;;  %4557 = vmatpush.msra.mxu1 %v14210_v60  ;;  %v4736_v13 = vand.u32 4294901760, %v4735_v12  ;;  %v3056_v58 = vadd.f32 %v3055_v30, %v2987_v33  ;;  %v14422_v30 = vand.u32 4294901760, %v536_v9 }
 0x255   : > { %4524 = vmatmul.f32.vlgmr.msra.gmra.mxu0 %v12083_v40  ;;  %4598 = vmatpush.msrb.mxu2 %v4417_v54  ;;  %v4730_v54 = vand.u32 4294901760, %v4729_v38 }
 0x256   : > { %4649 = vmatpush.msrb.mxu3 %v14103_v11  ;;  %4692 = vmatpush.msrb.mxu0 %v14325_v36  ;;  %v625_v11 = vperm.slane %v14319_v57, 5 }
 0x257   : > { %4559 = vmatpush.msra.mxu1 %v14222_v46  ;;  %4602 = vmatpush.msrb.mxu2 %v4423_v18  ;;  %v16390_v18 = vand.u32 4294901760, %v14183_v20  ;;  %v14399_v20 = vand.u32 4294901760, %v569_v47 }
 0x258   : > { %4757 = vmatpush.msra.mxu0 %v14307_v26  ;;  %4651 = vmatpush.msrb.mxu3 %v14118_v35  ;;  %v3473_v35 = vpop.f32.mrf.mxu0  ;;  %v3319_v57 = vadd.f32 %v3318_v51, %v625_v11  ;;  %v16393_v26 = vand.u32 4294901760, %v14220_v62 }
 0x259   : > { %4719 = vmatpush.msrb.mxu1 %v4718_v55  ;;  %4606 = vmatpush.msrb.mxu2 %v4429_v25  ;;  %v3093_v55 = vadd.f32 %v3092_v52, %v3056_v58  ;;  %v514_v52 = vld [vmem:[#allocation4 + $0x3b0] sm:$0xff] }
 0x25a   : > { %4760 = vmatpush.msra.mxu0 %v14317_v48  ;;  %4653 = vmatpush.msrb.mxu3 %v14132_v2  ;;  %v3512_v25 = vpop.f32.mrf.mxu1  ;;  %v558_v2 = vld [vmem:[#allocation4 + $0x510] sm:$0xff]  ;;  %v3420_v14 = vadd.f32 %v3419_v5, %v3319_v57  ;;  %v16394_v48 = vand.u32 4294901760, %v14234_v8 }
 0x25b   : > { %4725 = vmatpush.msrb.mxu1 %v4724_v6  ;;  %4610 = vmatpush.msrb.mxu2 %v16390_v18  ;;  %v14406_v53 = vand.u32 4294901760, %v558_v2  ;;  %v3122_v38 = vadd.f32 %v14268_v15, %v3093_v55  ;;  %v14445_v15 = vsub.f32 %v536_v9, %v14422_v30  ;;  %v16395_v6 = vand.u32 4294901760, %v14244_v39  ;;  %v481_v18 = vld [vmem:[#allocation4 + $0x2a8] sm:$0xff]  ;;  %v459_v9 = vld [vmem:[#allocation4 + $0x1f8] sm:$0xff] }
 0x25c   : > { %4763 = vmatpush.msra.mxu0 %v14331_v49  ;;  %4655 = vmatpush.msrb.mxu3 %v14145_v19  ;;  %v547_v19 = vld [vmem:[#allocation4 + $0x4b8] sm:$0xff]  ;;  %v14437_v49 = vand.u32 4294901760, %v525_v43 }
 0x25d   : > { %4731 = vmatpush.msrb.mxu1 %v4730_v54  ;;  %4698 = vmatmul.f32.vlgmr.msrb.gmra.mxu0 %v12116_v34  ;;  %v14428_v62 = vsub.f32 %v558_v2, %v14406_v53  ;;  %v3163_v11 = vadd.f32 %v14279_v56, %v3122_v38  ;;  %v470_v2 = vld [vmem:[#allocation4 + $0x250] sm:$0xff]  ;;  %v448_v38 = vld [vmem:[#allocation4 + $0x1a0] sm:$0xff] }
 0x25e   : > { %4563 = vmatmul.f32.vlgmr.msra.gmra.mxu1 %v12098_v16  ;;  %4766 = vmatpush.msra.mxu0 %v14343_v22  ;;  %v14447_v22 = vand.u32 4294901760, %v514_v52  ;;  %v14457_v54 = vsub.f32 %v525_v43, %v14437_v49  ;;  %v14505_v43 = vand.u32 4294901760, %v470_v2 }
 0x25f   : > { %4614 = vmatpush.msrb.mxu2 %v16391_v61  ;;  %4657 = vmatpush.msrb.mxu3 %v14159_v32  ;;  %v14411_v32 = vand.u32 4294901760, %v547_v19  ;;  %v4907_v29 = vand.u32 4294901760, %v14428_v62 }
 0x260   : > { %4737 = vmatpush.msrb.mxu1 %v4736_v13  ;;  %4815 = vmatpush.msrb.mxu0 %v4716_v50  ;;  %v14417_v50 = vsub.f32 %v569_v47, %v14399_v20  ;;  %v14470_v56 = vsub.f32 %v514_v52, %v14447_v22 }
 0x261   : > { %4618 = vmatpush.msrb.mxu2 %v16392_v37  ;;  %4659 = vmatpush.msrb.mxu3 %v14172_v3  ;;  %v3474_v3 = vadd.f32 %v3473_v35, %v3420_v14  ;;  %v492_v35 = vld [vmem:[#allocation4 + $0x300] sm:$0xff]  ;;  %v4908_v57 = vsub.f32 %v14428_v62, %v4907_v29 }
 0x262   : > { %4786 = vmatpush.msra.mxu1 %v14289_v21  ;;  %4819 = vmatpush.msrb.mxu0 %v4722_v1  ;;  %v3647_v1 = vpop.f32.mrf.mxu0  ;;  %v4901_v8 = vand.u32 4294901760, %v14417_v50  ;;  %v14478_v47 = vand.u32 4294901760, %v492_v35 }
 0x263   : > { %4622 = vmatpush.msrb.mxu2 %v16393_v26  ;;  %4661 = vmatpush.msrb.mxu3 %v14185_v24  ;;  %v14435_v24 = vsub.f32 %v547_v19, %v14411_v32  ;;  %v4909_v55 = vand.u32 4294901760, %v4908_v57 }
 0x264   : > { %4788 = vmatpush.msra.mxu1 %v14297_v41  ;;  %4823 = vmatpush.msrb.mxu0 %v4728_v7  ;;  %v3688_v7 = vpop.f32.mrf.mxu1  ;;  %v14503_v26 = vsub.f32 %v492_v35, %v14478_v47  ;;  %v14527_v35 = vsub.f32 %v470_v2, %v14505_v43 }
 0x265   : > { %4626 = vmatpush.msrb.mxu2 %v16394_v48  ;;  %4663 = vmatpush.msrb.mxu3 %v14197_v0  ;;  %v3513_v0 = vadd.f32 %v3512_v25, %v3474_v3  ;;  %v4913_v51 = vand.u32 4294901760, %v14435_v24  ;;  %v16297_v25 = vand.u32 4294901760, %v14457_v54 }
 0x266   : > { %4790 = vmatpush.msra.mxu1 %v14304_v42  ;;  %4827 = vmatpush.msrb.mxu0 %v4734_v10  ;;  %v503_v10 = vld [vmem:[#allocation4 + $0x358] sm:$0xff] }
 0x267   : > { %4739 = vmatmul.f32.vlgmr.msrb.gmra.mxu1 %v12053_v63  ;;  %4769 = vmatmul.f32.vlgmr.msra.gmra.mxu0 %v12073_v44  ;;  %v14465_v39 = vand.u32 4294901760, %v503_v10  ;;  %v4914_v5 = vsub.f32 %v14435_v24, %v4913_v51 }
 0x268   : > { %4792 = vmatpush.msra.mxu1 %v14325_v36  ;;  %4859 = vmatpush.msra.mxu0 %v14399_v20 }
 0x269   : > { %4630 = vmatpush.msrb.mxu2 %v16395_v6  ;;  %4665 = vmatpush.msrb.mxu3 %v14210_v60  ;;  %v3581_v12 = vpop.f32.mrf.mxu2  ;;  %v4902_v60 = vsub.f32 %v14417_v50, %v4901_v8  ;;  %v14490_v19 = vsub.f32 %v503_v10, %v14465_v39  ;;  %v4915_v52 = vand.u32 4294901760, %v4914_v5  ;;  %v14517_v10 = vand.u32 4294901760, %v459_v9 }
 0x26a   : > { %4846 = vmatpush.msrb.mxu1 %v14289_v21  ;;  %4632 = vmatmul.f32.vlgmr.msrb.gmra.mxu2 %v12065_v31  ;;  %v3582_v33 = vadd.f32 %v3581_v12, %v3513_v0  ;;  %v16299_v21 = vand.u32 4294901760, %v14445_v15  ;;  %v3718_v58 = vpop.f32.mrf.mxu0 }
 0x26b   : > { %4861 = vmatpush.msra.mxu0 %v14406_v53  ;;  %5002 = vmatpush.msra.mxu2 %v14417_v50  ;;  %v4903_v61 = vand.u32 4294901760, %v4902_v60  ;;  %v16292_v60 = vand.u32 4294901760, %v14503_v26 }
 0x26c   : > { %4667 = vmatpush.msrb.mxu3 %v14222_v46  ;;  %4848 = vmatpush.msrb.mxu1 %v14297_v41  ;;  %v3618_v13 = vpop.f32.mrf.mxu3  ;;  %v3193_v41 = vadd.f32 %v14293_v28, %v3163_v11  ;;  %v14492_v28 = vand.u32 4294901760, %v481_v18  ;;  %v4920_v37 = vsub.f32 %v14445_v15, %v16299_v21  ;;  %v3745_v3 = vpop.f32.mrf.mxu1  ;;  %v437_v11 = vld [vmem:[#allocation4 + $0x148] sm:$0xff] }
 0x26d   : > { %4669 = vmatmul.f32.vlgmr.msrb.gmra.mxu3 %v12065_v31  ;;  %4863 = vmatpush.msra.mxu0 %v14411_v32  ;;  %v3619_v46 = vadd.f32 %v3618_v13, %v3582_v33  ;;  %v14529_v33 = vand.u32 4294901760, %v448_v38  ;;  %v14542_v5 = vand.u32 4294901760, %v437_v11 }
 0x26e   : > { %5005 = vmatpush.msra.mxu2 %v14428_v62  ;;  %5055 = vmatpush.msra.mxu3 %v14399_v20  ;;  %v14515_v0 = vsub.f32 %v481_v18, %v14492_v28  ;;  %v4921_v6 = vand.u32 4294901760, %v4920_v37  ;;  %v4944_v37 = vsub.f32 %v14503_v26, %v16292_v60 }
 0x26f   : > { %4850 = vmatpush.msrb.mxu1 %v14304_v42  ;;  %4865 = vmatpush.msra.mxu0 %v14422_v30  ;;  %v3648_v14 = vadd.f32 %v3647_v1, %v3619_v46  ;;  %v16295_v42 = vand.u32 4294901760, %v14470_v56  ;;  %v3220_v1 = vadd.f32 %v14312_v27, %v3193_v41  ;;  %v16293_v27 = vand.u32 4294901760, %v14490_v19 }
 0x270   : > { %5008 = vmatpush.msra.mxu2 %v14435_v24  ;;  %5057 = vmatpush.msra.mxu3 %v14406_v53  ;;  %v14540_v41 = vsub.f32 %v459_v9, %v14517_v10  ;;  %v16290_v2 = vand.u32 4294901760, %v14515_v0  ;;  %v14552_v9 = vsub.f32 %v448_v38, %v14529_v33  ;;  %v16397_v24 = vand.u32 4294901760, %v14457_v54 }
 0x271   : > { %4852 = vmatpush.msrb.mxu1 %v14325_v36  ;;  %4867 = vmatpush.msra.mxu0 %v14437_v49  ;;  %v3689_v48 = vadd.f32 %v3688_v7, %v3648_v14  ;;  %v4926_v36 = vsub.f32 %v14457_v54, %v16297_v25  ;;  %v4932_v12 = vsub.f32 %v14470_v56, %v16295_v42 }
 0x272   : > { %4796 = vmatmul.f32.vlgmr.msra.gmra.mxu1 %v12092_v23  ;;  %5011 = vmatpush.msra.mxu2 %v14445_v15  ;;  %v3253_v13 = vadd.f32 %v14345_v45, %v3220_v1  ;;  %v4938_v46 = vsub.f32 %v14490_v19, %v16293_v27  ;;  %v426_v45 = vld [vmem:[#allocation4 + $0xf0] sm:$0xff]  ;;  %v613_v1 = vld [vmem:[#allocation4 + $0x6c8] sm:$0xff]  ;;  %v4950_v38 = vsub.f32 %v14515_v0, %v16290_v2  ;;  %v580_v27 = vld [vmem:[#allocation4 + $0x5c0] sm:$0xff] }
 0x273   : > { %4904 = vmatpush.msra.mxu1 %v4903_v61  ;;  %5059 = vmatpush.msra.mxu3 %v14411_v32  ;;  %v3719_v7 = vadd.f32 %v3718_v58, %v3689_v48  ;;  %v4927_v57 = vand.u32 4294901760, %v4926_v36  ;;  %v4933_v14 = vand.u32 4294901760, %v4932_v12  ;;  %v14558_v36 = vand.u32 4294901760, %v426_v45 }
 0x274   : > { %4869 = vmatpush.msra.mxu0 %v14447_v22  ;;  %5014 = vmatpush.msra.mxu2 %v14457_v54  ;;  %v14565_v12 = vsub.f32 %v437_v11, %v14542_v5  ;;  %v548_v54 = vld [vmem:[#allocation4 + $0x4c0] sm:$0xff] }
 0x275   : > { %4910 = vmatpush.msra.mxu1 %v4909_v55  ;;  %5061 = vmatpush.msra.mxu3 %v14422_v30  ;;  %v3746_v18 = vadd.f32 %v3745_v3, %v3719_v7  ;;  %v16291_v55 = vand.u32 4294901760, %v14527_v35  ;;  %v415_v3 = vld [vmem:[#allocation4 + $0x98] sm:$0xff]  ;;  %v14582_v2 = vsub.f32 %v426_v45, %v14558_v36 }
 0x276   : > { %4871 = vmatpush.msra.mxu0 %v14465_v39  ;;  %5017 = vmatpush.msra.mxu2 %v14470_v56  ;;  %v16298_v60 = vand.u32 4294901760, %v14565_v12 }
 0x277   : > { %4916 = vmatpush.msra.mxu1 %v4915_v52  ;;  %5063 = vmatpush.msra.mxu3 %v14437_v49  ;;  %v3778_v61 = vpop.f32.mrf.mxu0  ;;  %v3278_v52 = vadd.f32 %v14364_v59, %v3253_v13  ;;  %v16294_v59 = vand.u32 4294901760, %v14540_v41  ;;  %v602_v13 = vld [vmem:[#allocation4 + $0x670] sm:$0xff]  ;;  %v4956_v11 = vsub.f32 %v14527_v35, %v16291_v55 }
 0x278   : > { %4873 = vmatpush.msra.mxu0 %v14478_v47  ;;  %5020 = vmatpush.msra.mxu2 %v14490_v19  ;;  %v3779_v58 = vadd.f32 %v3778_v61, %v3746_v18  ;;  %v404_v18 = vld [vmem:[#allocation4 + $0x40] sm:$0xff]  ;;  %v14570_v61 = vand.u32 4294901760, %v415_v3 }
 0x279   : > { %4922 = vmatpush.msra.mxu1 %v4921_v6  ;;  %5065 = vmatpush.msra.mxu3 %v14447_v22  ;;  %v3803_v48 = vpop.f32.mrf.mxu1  ;;  %v4939_v6 = vand.u32 4294901760, %v4938_v46  ;;  %v4945_v46 = vand.u32 4294901760, %v4944_v37  ;;  %v4951_v37 = vand.u32 4294901760, %v4950_v38  ;;  %v4962_v55 = vsub.f32 %v14540_v41, %v16294_v59 }
 0x27a   : > { %4875 = vmatpush.msra.mxu0 %v14492_v28  ;;  %5023 = vmatpush.msra.mxu2 %v14503_v26  ;;  %v3804_v7 = vadd.f32 %v3803_v48, %v3779_v58  ;;  %v14572_v58 = vand.u32 4294901760, %v613_v1  ;;  %v16296_v48 = vand.u32 4294901760, %v14552_v9  ;;  %v14596_v45 = vsub.f32 %v415_v3, %v14570_v61 }
 0x27b   : > { %4928 = vmatpush.msra.mxu1 %v4927_v57  ;;  %5067 = vmatpush.msra.mxu3 %v14465_v39 }
 0x27c   : > { %4877 = vmatpush.msra.mxu0 %v14505_v43  ;;  %5026 = vmatpush.msra.mxu2 %v14515_v0  ;;  %v6438_v57 = vpack.c.bf16 %v3804_v7, %v3278_v52  ;;  %v14584_v52 = vand.u32 4294901760, %v404_v18  ;;  %v591_v7 = vld [vmem:[#allocation4 + $0x618] sm:$0xff]  ;;  %v4968_v38 = vsub.f32 %v14552_v9, %v16296_v48  ;;  %v14620_v48 = vand.u32 4294901760, %v580_v27 }
 0x27d   : > { %4934 = vmatpush.msra.mxu1 %v4933_v14  ;;  %5069 = vmatpush.msra.mxu3 %v14478_v47  ;;  %v14586_v14 = vand.u32 4294901760, %v602_v13  ;;  %v14605_v59 = vand.u32 4294901760, %v591_v7  ;;  %v16302_v25 = vand.u32 4294901760, %v14596_v45 }
 0x27e   : > { %4829 = vmatmul.f32.vlgmr.msrb.gmra.mxu0 %v12053_v63  ;;  %5029 = vmatpush.msra.mxu2 %v14527_v35  ;;  %6499 = vst [vmem:[#allocation1 + $0x10] sm:$0xff] %v6438_v57  ;;  %v14599_v57 = vsub.f32 %v613_v1, %v14572_v58  ;;  %v14610_v3 = vsub.f32 %v404_v18, %v14584_v52  ;;  %v16300_v1 = vand.u32 4294901760, %v14582_v2 }
 0x27f   : > { %4879 = vmatpush.msra.mxu0 %v14517_v10  ;;  %4940 = vmatpush.msra.mxu1 %v4939_v6  ;;  %v4957_v6 = vand.u32 4294901760, %v4956_v11  ;;  %v14614_v42 = vsub.f32 %v602_v13, %v14586_v14  ;;  %v4974_v11 = vsub.f32 %v14565_v12, %v16298_v60  ;;  %v4969_v13 = vand.u32 4294901760, %v4968_v38 }
 0x280   : > { %5071 = vmatpush.msra.mxu3 %v14492_v28  ;;  %4854 = vmatmul.f32.vlgmr.msrb.gmra.mxu1 %v12053_v63  ;;  %v16301_v18 = vand.u32 4294901760, %v14599_v57  ;;  %v16303_v21 = vand.u32 4294901760, %v14610_v3  ;;  %v14639_v38 = vsub.f32 %v580_v27, %v14620_v48 }
 0x281   : > { %4881 = vmatpush.msra.mxu0 %v14529_v33  ;;  %4946 = vmatpush.msra.mxu1 %v4945_v46  ;;  %v4963_v46 = vand.u32 4294901760, %v4962_v55  ;;  %v14628_v55 = vsub.f32 %v591_v7, %v14605_v59  ;;  %v5248_v60 = vand.u32 4294901760, %v14614_v42 }
 0x282   : > { %5032 = vmatpush.msra.mxu2 %v14540_v41  ;;  %5073 = vmatpush.msra.mxu3 %v14505_v43  ;;  %v5243_v7 = vsub.f32 %v14599_v57, %v16301_v18  ;;  %v4992_v18 = vsub.f32 %v14610_v3, %v16303_v21 }
 0x283   : > { %4883 = vmatpush.msra.mxu0 %v14542_v5  ;;  %4952 = vmatpush.msra.mxu1 %v4951_v37  ;;  %v4980_v37 = vsub.f32 %v14582_v2, %v16300_v1  ;;  %v4986_v1 = vsub.f32 %v14596_v45, %v16302_v25 }
 0x284   : > { %5035 = vmatpush.msra.mxu2 %v14552_v9  ;;  %5075 = vmatpush.msra.mxu3 %v14517_v10  ;;  %v5244_v25 = vand.u32 4294901760, %v5243_v7  ;;  %v537_v7 = vld [vmem:[#allocation4 + $0x468] sm:$0xff] }
 0x285   : > { %4885 = vmatpush.msra.mxu0 %v14558_v36  ;;  %4958 = vmatpush.msra.mxu1 %v4957_v6  ;;  %v4975_v6 = vand.u32 4294901760, %v4974_v11  ;;  %v4981_v27 = vand.u32 4294901760, %v4980_v37  ;;  %v5249_v11 = vsub.f32 %v14614_v42, %v5248_v60  ;;  %v4987_v37 = vand.u32 4294901760, %v4986_v1 }
 0x286   : > { %5038 = vmatpush.msra.mxu2 %v14565_v12  ;;  %5077 = vmatpush.msra.mxu3 %v14529_v33 }
 0x287   : > { %4887 = vmatpush.msra.mxu0 %v14570_v61  ;;  %4964 = vmatpush.msra.mxu1 %v4963_v46  ;;  %v5254_v46 = vand.u32 4294901760, %v14628_v55  ;;  %v5250_v50 = vand.u32 4294901760, %v5249_v11  ;;  %v526_v11 = vld [vmem:[#allocation4 + $0x410] sm:$0xff] }
 0x288   : > { %5041 = vmatpush.msra.mxu2 %v14582_v2  ;;  %5079 = vmatpush.msra.mxu3 %v14542_v5 }
 0x289   : > { %4889 = vmatpush.msra.mxu0 %v14584_v52  ;;  %4970 = vmatpush.msra.mxu1 %v4969_v13  ;;  %v5260_v13 = vand.u32 4294901760, %v14639_v38  ;;  %v5255_v21 = vsub.f32 %v14628_v55, %v5254_v46 }
 0x28a   : > { %5044 = vmatpush.msra.mxu2 %v14596_v45  ;;  %5081 = vmatpush.msra.mxu3 %v14558_v36 }
 0x28b   : > { %5096 = vmatpush.msrb.mxu0 %v4901_v8  ;;  %4976 = vmatpush.msra.mxu1 %v4975_v6  ;;  %v4993_v8 = vand.u32 4294901760, %v4992_v18  ;;  %v5261_v62 = vsub.f32 %v14639_v38, %v5260_v13  ;;  %v5256_v1 = vand.u32 4294901760, %v5255_v21  ;;  %v570_v18 = vld [vmem:[#allocation4 + $0x570] sm:$0xff]  ;;  %v16398_v21 = vand.u32 4294901760, %v14470_v56 }
 0x28c   : > { %5047 = vmatpush.msra.mxu2 %v14610_v3  ;;  %5083 = vmatpush.msra.mxu3 %v14570_v61  ;;  %v16399_v6 = vand.u32 4294901760, %v14490_v19  ;;  %v14704_v56 = vand.u32 4294901760, %v548_v54  ;;  %v14714_v19 = vand.u32 4294901760, %v537_v7 }
 0x28d   : > { %5100 = vmatpush.msrb.mxu0 %v4907_v29  ;;  %4982 = vmatpush.msra.mxu1 %v4981_v27  ;;  %v16396_v29 = vand.u32 4294901760, %v14445_v15  ;;  %v559_v15 = vld [vmem:[#allocation4 + $0x518] sm:$0xff]  ;;  %v16400_v27 = vand.u32 4294901760, %v14503_v26  ;;  %v16402_v26 = vand.u32 4294901760, %v14599_v57 }
 0x28e   : > { %5212 = vmatpush.msrb.mxu2 %v14572_v58  ;;  %5085 = vmatpush.msra.mxu3 %v14584_v52 }
 0x28f   : > { %5104 = vmatpush.msrb.mxu0 %v4913_v51  ;;  %4988 = vmatpush.msra.mxu1 %v4987_v37  ;;  %v5262_v51 = vand.u32 4294901760, %v5261_v62  ;;  %v16401_v37 = vand.u32 4294901760, %v14515_v0  ;;  %v515_v62 = vld [vmem:[#allocation4 + $0x3b8] sm:$0xff]  ;;  %v14735_v0 = vsub.f32 %v537_v7, %v14714_v19  ;;  %v460_v7 = vld [vmem:[#allocation4 + $0x200] sm:$0xff] }
 0x290   : > { %5214 = vmatpush.msrb.mxu2 %v14586_v14  ;;  %5245 = vmatpush.msrb.mxu3 %v5244_v25  ;;  %v14689_v25 = vand.u32 4294901760, %v570_v18 }
 0x291   : > { %5108 = vmatpush.msrb.mxu0 %v16396_v29  ;;  %4994 = vmatpush.msra.mxu1 %v4993_v8  ;;  %v14726_v8 = vand.u32 4294901760, %v526_v11  ;;  %v16403_v29 = vand.u32 4294901760, %v14527_v35  ;;  %v16404_v35 = vand.u32 4294901760, %v14540_v41  ;;  %v16405_v41 = vand.u32 4294901760, %v14552_v9 }
 0x292   : > { %5216 = vmatpush.msrb.mxu2 %v14605_v59  ;;  %5251 = vmatpush.msrb.mxu3 %v5250_v50  ;;  %v14724_v50 = vsub.f32 %v548_v54, %v14704_v56 }
 0x293   : > { %5050 = vmatmul.f32.vlgmr.msra.gmra.mxu2 %v12083_v40  ;;  %5112 = vmatpush.msrb.mxu0 %v16397_v24 }
 0x294   : > { %5163 = vmatpush.msrb.mxu1 %v14399_v20  ;;  %5218 = vmatpush.msrb.mxu2 %v14620_v48  ;;  %v14694_v20 = vand.u32 4294901760, %v559_v15  ;;  %v5439_v24 = vand.u32 4294901760, %v14724_v50 }
 0x295   : > { %5257 = vmatpush.msrb.mxu3 %v5256_v1  ;;  %5116 = vmatpush.msrb.mxu0 %v16398_v21  ;;  %v14740_v1 = vand.u32 4294901760, %v515_v62 }
 0x296   : > { %5283 = vmatpush.msra.mxu2 %v14599_v57  ;;  %5089 = vmatmul.f32.vlgmr.msra.gmra.mxu3 %v12098_v16  ;;  %v504_v57 = vld [vmem:[#allocation4 + $0x360] sm:$0xff] }
 0x297   : > { %5165 = vmatpush.msrb.mxu1 %v14406_v53  ;;  %5263 = vmatpush.msrb.mxu3 %v5262_v51  ;;  %v14702_v53 = vsub.f32 %v570_v18, %v14689_v25  ;;  %v14750_v51 = vsub.f32 %v526_v11, %v14726_v8  ;;  %v482_v18 = vld [vmem:[#allocation4 + $0x2b0] sm:$0xff] }
 0x298   : > { %5286 = vmatpush.msra.mxu2 %v14614_v42  ;;  %5120 = vmatpush.msrb.mxu0 %v16399_v6  ;;  %v493_v42 = vld [vmem:[#allocation4 + $0x308] sm:$0xff] }
 0x299   : > { %5312 = vmatpush.msra.mxu3 %v14572_v58  ;;  %5167 = vmatpush.msrb.mxu1 %v14411_v32  ;;  %v14712_v32 = vsub.f32 %v559_v15, %v14694_v20  ;;  %v14784_v15 = vand.u32 4294901760, %v482_v18 }
 0x29a   : > { %5289 = vmatpush.msra.mxu2 %v14628_v55  ;;  %5124 = vmatpush.msrb.mxu0 %v16400_v27  ;;  %v14770_v55 = vand.u32 4294901760, %v493_v42 }
 0x29b   : > { %5314 = vmatpush.msra.mxu3 %v14586_v14  ;;  %5169 = vmatpush.msrb.mxu1 %v14422_v30  ;;  %v5427_v30 = vand.u32 4294901760, %v14702_v53 }
 0x29c   : > { %5224 = vmatmul.f32.vlgmr.msrb.gmra.mxu2 %v12116_v34  ;;  %5128 = vmatpush.msrb.mxu0 %v16401_v37  ;;  %v14795_v54 = vsub.f32 %v493_v42, %v14770_v55  ;;  %v438_v42 = vld [vmem:[#allocation4 + $0x150] sm:$0xff] }
 0x29d   : > { %5316 = vmatpush.msra.mxu3 %v14605_v59  ;;  %5292 = vmatpush.msra.mxu2 %v14639_v38  ;;  %v5451_v38 = vand.u32 4294901760, %v14750_v51 }
 0x29e   : > { %5171 = vmatpush.msrb.mxu1 %v14437_v49  ;;  %5265 = vmatmul.f32.vlgmr.msrb.gmra.mxu3 %v12053_v63  ;;  %v5433_v49 = vand.u32 4294901760, %v14712_v32 }
 0x29f   : > { %5341 = vmatpush.msrb.mxu2 %v16402_v26  ;;  %5132 = vmatpush.msrb.mxu0 %v16403_v29  ;;  %v5452_v11 = vsub.f32 %v14750_v51, %v5451_v38  ;;  %v14808_v26 = vsub.f32 %v482_v18, %v14784_v15  ;;  %v14811_v29 = vand.u32 4294901760, %v460_v7 }
 0x2a0   : > { %5318 = vmatpush.msra.mxu3 %v14620_v48  ;;  %5173 = vmatpush.msrb.mxu1 %v14447_v22  ;;  %v5428_v22 = vsub.f32 %v14702_v53, %v5427_v30 }
 0x2a1   : > { %5345 = vmatpush.msrb.mxu2 %v5248_v60  ;;  %5136 = vmatpush.msrb.mxu0 %v16404_v35  ;;  %v14755_v60 = vand.u32 4294901760, %v504_v57  ;;  %v5469_v35 = vand.u32 4294901760, %v14795_v54  ;;  %v5475_v18 = vand.u32 4294901760, %v14808_v26 }
 0x2a2   : > { %5372 = vmatpush.msrb.mxu3 %v14572_v58  ;;  %5175 = vmatpush.msrb.mxu1 %v14465_v39  ;;  %v5434_v39 = vsub.f32 %v14712_v32, %v5433_v49  ;;  %v5445_v58 = vand.u32 4294901760, %v14735_v0  ;;  %v5429_v9 = vand.u32 4294901760, %v5428_v22 }
 0x2a3   : > { %5349 = vmatpush.msrb.mxu2 %v5254_v46  ;;  %5140 = vmatpush.msrb.mxu0 %v16405_v41  ;;  %v5440_v46 = vsub.f32 %v14724_v50, %v5439_v24  ;;  %v5453_v41 = vand.u32 4294901760, %v5452_v11 }
 0x2a4   : > { %5374 = vmatpush.msrb.mxu3 %v14586_v14  ;;  %5177 = vmatpush.msrb.mxu1 %v14478_v47  ;;  %v14768_v14 = vsub.f32 %v515_v62, %v14740_v1  ;;  %v16406_v47 = vand.u32 4294901760, %v14565_v12  ;;  %v5435_v12 = vand.u32 4294901760, %v5434_v39  ;;  %v5446_v21 = vsub.f32 %v14735_v0, %v5445_v58  ;;  %v449_v62 = vld [vmem:[#allocation4 + $0x1a8] sm:$0xff] }
 0x2a5   : > { %5353 = vmatpush.msrb.mxu2 %v5260_v13  ;;  %v471_v13 = vld [vmem:[#allocation4 + $0x258] sm:$0xff]  ;;  %4895 = vmatmul.f32.vlgmr.msra.gmra.mxu0 %v12186_v17  ;;  %v5441_v27 = vand.u32 4294901760, %v5440_v46  ;;  %v14824_v39 = vand.u32 4294901760, %v449_v62  ;;  %v14837_v46 = vand.u32 4294901760, %v438_v42 }
 0x2a6   : > { %5376 = vmatpush.msrb.mxu3 %v14605_v59  ;;  %5295 = vmatmul.f32.vlgmr.msra.gmra.mxu2 %v12073_v44  ;;  %v14782_v59 = vsub.f32 %v504_v57, %v14755_v60  ;;  %v14797_v6 = vand.u32 4294901760, %v471_v13  ;;  %v16408_v57 = vand.u32 4294901760, %v14596_v45  ;;  %v16409_v45 = vand.u32 4294901760, %v14610_v3 }
 0x2a7   : > { %5144 = vmatpush.msrb.mxu0 %v16406_v47  ;;  %5385 = vmatpush.msra.mxu2 %v14689_v25  ;;  %v427_v47 = vld [vmem:[#allocation4 + $0xf8] sm:$0xff]  ;;  %v5470_v3 = vsub.f32 %v14795_v54, %v5469_v35 }
 0x2a8   : > { %5179 = vmatpush.msrb.mxu1 %v14492_v28  ;;  %5378 = vmatpush.msrb.mxu3 %v14620_v48  ;;  %v5457_v28 = vand.u32 4294901760, %v14768_v14  ;;  %v16407_v48 = vand.u32 4294901760, %v14582_v2  ;;  %v5463_v37 = vand.u32 4294901760, %v14782_v59  ;;  %v5447_v2 = vand.u32 4294901760, %v5446_v21 }
 0x2a9   : > { %5322 = vmatmul.f32.vlgmr.msra.gmra.mxu3 %v12092_v23  ;;  %5387 = vmatpush.msra.mxu2 %v14694_v20  ;;  %v14821_v22 = vsub.f32 %v471_v13, %v14797_v6  ;;  %v14847_v21 = vsub.f32 %v449_v62, %v14824_v39  ;;  %v14860_v62 = vsub.f32 %v438_v42, %v14837_v46 }
 0x2aa   : > { %5430 = vmatpush.msra.mxu3 %v5429_v9  ;;  %5148 = vmatpush.msrb.mxu0 %v16407_v48  ;;  %v14835_v9 = vsub.f32 %v460_v7, %v14811_v29  ;;  %v14849_v7 = vand.u32 4294901760, %v427_v47  ;;  %v5476_v48 = vsub.f32 %v14808_v26, %v5475_v18 }
 0x2ab   : > { %5181 = vmatpush.msrb.mxu1 %v14505_v43  ;;  %5389 = vmatpush.msra.mxu2 %v14704_v56  ;;  %v5458_v43 = vsub.f32 %v14768_v14, %v5457_v28  ;;  %v5481_v13 = vand.u32 4294901760, %v14821_v22 }
 0x2ac   : > { %5436 = vmatpush.msra.mxu3 %v5435_v12  ;;  %4996 = vmatmul.f32.vlgmr.msra.gmra.mxu1 %v12065_v31  ;;  %v416_v12 = vld [vmem:[#allocation4 + $0xa0] sm:$0xff]  ;;  %v16304_v11 = vand.u32 4294901760, %v14835_v9 }
 0x2ad   : > { %5152 = vmatpush.msrb.mxu0 %v16408_v57  ;;  %5183 = vmatpush.msrb.mxu1 %v14517_v10  ;;  %v5464_v10 = vsub.f32 %v14782_v59, %v5463_v37  ;;  %v5482_v57 = vsub.f32 %v14821_v22, %v5481_v13 }
 0x2ae   : > { %5391 = vmatpush.msra.mxu2 %v14714_v19  ;;  %5442 = vmatpush.msra.mxu3 %v5441_v27  ;;  %v405_v27 = vld [vmem:[#allocation4 + $0x48] sm:$0xff] }
 0x2af   : > { %5156 = vmatpush.msrb.mxu0 %v16409_v45  ;;  %5185 = vmatpush.msrb.mxu1 %v14529_v33  ;;  %v5459_v33 = vand.u32 4294901760, %v5458_v43  ;;  %v16306_v43 = vand.u32 4294901760, %v14847_v21  ;;  %v14874_v42 = vand.u32 4294901760, %v405_v27  ;;  %v14876_v45 = vpop.f32.mrf.mxu2 }
 0x2b0   : > { %5393 = vmatpush.msra.mxu2 %v14726_v8  ;;  %5448 = vmatpush.msra.mxu3 %v5447_v2  ;;  %v14862_v2 = vand.u32 4294901760, %v416_v12 }
 0x2b1   : > { %5528 = vmatpush.msra.mxu0 %v14702_v53  ;;  %5187 = vmatpush.msrb.mxu1 %v14542_v5  ;;  %v5465_v5 = vand.u32 4294901760, %v5464_v10  ;;  %v5477_v10 = vand.u32 4294901760, %v5476_v48  ;;  %v14896_v48 = vsub.f32 %v405_v27, %v14874_v42 }
 0x2b2   : > { %5395 = vmatpush.msra.mxu2 %v14740_v1  ;;  %5454 = vmatpush.msra.mxu3 %v5453_v41  ;;  %v14872_v41 = vsub.f32 %v427_v47, %v14849_v7  ;;  %v14886_v47 = vsub.f32 %v416_v12, %v14862_v2 }
 0x2b3   : > { %5531 = vmatpush.msra.mxu0 %v14712_v32  ;;  %5189 = vmatpush.msrb.mxu1 %v14558_v36  ;;  %v5471_v36 = vand.u32 4294901760, %v5470_v3  ;;  %v5483_v3 = vand.u32 4294901760, %v5482_v57 }
 0x2b4   : > { %5158 = vmatmul.f32.vlgmr.msrb.gmra.mxu0 %v12065_v31  ;;  %5397 = vmatpush.msra.mxu2 %v14755_v60  ;;  %v16309_v57 = vand.u32 4294901760, %v14886_v47 }
 0x2b5   : > { %5460 = vmatpush.msra.mxu3 %v5459_v33  ;;  %5534 = vmatpush.msra.mxu0 %v14724_v50  ;;  %v16305_v33 = vand.u32 4294901760, %v14860_v62 }
 0x2b6   : > { %5191 = vmatpush.msrb.mxu1 %v14570_v61  ;;  %5399 = vmatpush.msra.mxu2 %v14770_v55  ;;  %v5488_v61 = vsub.f32 %v14835_v9, %v16304_v11  ;;  %v14898_v11 = vpop.f32.mrf.mxu3 }
 0x2b7   : > { %5466 = vmatpush.msra.mxu3 %v5465_v5  ;;  %5537 = vmatpush.msra.mxu0 %v14735_v0  ;;  %v16307_v5 = vand.u32 4294901760, %v14872_v41 }
 0x2b8   : > { %5193 = vmatpush.msrb.mxu1 %v14584_v52  ;;  %5401 = vmatpush.msra.mxu2 %v14784_v15  ;;  %v5494_v52 = vsub.f32 %v14847_v21, %v16306_v43  ;;  %v5489_v12 = vand.u32 4294901760, %v5488_v61  ;;  %v16308_v61 = vand.u32 4294901760, %v14896_v48  ;;  %v14920_v43 = vpop.f32.mrf.mxu2 }
 0x2b9   : > { %5195 = vmatmul.f32.vlgmr.msrb.gmra.mxu1 %v12065_v31  ;;  %5472 = vmatpush.msra.mxu3 %v5471_v36  ;;  %v5500_v36 = vsub.f32 %v14860_v62, %v16305_v33 }
 0x2ba   : > { %5540 = vmatpush.msra.mxu0 %v14750_v51  ;;  %5581 = vmatpush.msra.mxu1 %v14689_v25  ;;  %v5495_v27 = vand.u32 4294901760, %v5494_v52 }
 0x2bb   : > { %5403 = vmatpush.msra.mxu2 %v14797_v6  ;;  %5478 = vmatpush.msra.mxu3 %v5477_v10  ;;  %v5506_v10 = vsub.f32 %v14872_v41, %v16307_v5  ;;  %v5501_v33 = vand.u32 4294901760, %v5500_v36  ;;  %v5518_v5 = vsub.f32 %v14896_v48, %v16308_v61 }
 0x2bc   : > { %5543 = vmatpush.msra.mxu0 %v14768_v14  ;;  %5583 = vmatpush.msra.mxu1 %v14694_v20 }
 0x2bd   : > { %5355 = vmatmul.f32.vlgmr.msrb.gmra.mxu2 %v12053_v63  ;;  %5484 = vmatpush.msra.mxu3 %v5483_v3  ;;  %v5512_v3 = vsub.f32 %v14886_v47, %v16309_v57  ;;  %v5507_v52 = vand.u32 4294901760, %v5506_v10  ;;  %v614_v10 = vld [vmem:[#allocation4 + $0x6d0] sm:$0xff] }
 0x2be   : > { %5405 = vmatpush.msra.mxu2 %v14811_v29  ;;  %5546 = vmatpush.msra.mxu0 %v14782_v59  ;;  %v14931_v36 = vpop.f32.mrf.mxu3 }
 0x2bf   : > { %5585 = vmatpush.msra.mxu1 %v14704_v56  ;;  %5380 = vmatmul.f32.vlgmr.msrb.gmra.mxu3 %v12053_v63 }
 0x2c0   : > { %5407 = vmatpush.msra.mxu2 %v14824_v39  ;;  %5490 = vmatpush.msra.mxu3 %v5489_v12  ;;  %v5513_v12 = vand.u32 4294901760, %v5512_v3  ;;  %v14941_v3 = vand.u32 4294901760, %v614_v10 }
 0x2c1   : > { %5549 = vmatpush.msra.mxu0 %v14795_v54  ;;  %5587 = vmatpush.msra.mxu1 %v14714_v19 }
 0x2c2   : > { %5409 = vmatpush.msra.mxu2 %v14837_v46  ;;  %5496 = vmatpush.msra.mxu3 %v5495_v27  ;;  %v5519_v27 = vand.u32 4294901760, %v5518_v5  ;;  %v592_v5 = vld [vmem:[#allocation4 + $0x620] sm:$0xff] }
 0x2c3   : > { %5552 = vmatpush.msra.mxu0 %v14808_v26  ;;  %5589 = vmatpush.msra.mxu1 %v14726_v8  ;;  %v14956_v53 = vand.u32 4294901760, %v592_v5  ;;  %v571_v26 = vld [vmem:[#allocation4 + $0x578] sm:$0xff] }
 0x2c4   : > { %5411 = vmatpush.msra.mxu2 %v14849_v7  ;;  %5502 = vmatpush.msra.mxu3 %v5501_v33  ;;  %v603_v33 = vld [vmem:[#allocation4 + $0x678] sm:$0xff] }
 0x2c5   : > { %5555 = vmatpush.msra.mxu0 %v14821_v22  ;;  %5591 = vmatpush.msra.mxu1 %v14740_v1  ;;  %v14949_v61 = vand.u32 4294901760, %v603_v33 }
 0x2c6   : > { %5413 = vmatpush.msra.mxu2 %v14862_v2  ;;  %5508 = vmatpush.msra.mxu3 %v5507_v52  ;;  %v14945_v52 = vpop.f32.mrf.mxu2  ;;  %v14964_v32 = vpop.f32.mrf.mxu3 }
 0x2c7   : > { %5558 = vmatpush.msra.mxu0 %v14835_v9  ;;  %5593 = vmatpush.msra.mxu1 %v14755_v60 }
 0x2c8   : > { %5415 = vmatpush.msra.mxu2 %v14874_v42  ;;  %5514 = vmatpush.msra.mxu3 %v5513_v12  ;;  %v3844_v12 = vpop.f32.mrf.mxu0 }
 0x2c9   : > { %5561 = vmatpush.msra.mxu0 %v14847_v21  ;;  %5595 = vmatpush.msra.mxu1 %v14770_v55 }
 0x2ca   : > { %5622 = vmatpush.msrb.mxu2 %v5427_v30  ;;  %5520 = vmatpush.msra.mxu3 %v5519_v27  ;;  %v581_v30 = vld [vmem:[#allocation4 + $0x5c8] sm:$0xff]  ;;  %v14959_v27 = vsub.f32 %v614_v10, %v14941_v3  ;;  %v14983_v10 = vsub.f32 %v592_v5, %v14956_v53 }
 0x2cb   : > { %5564 = vmatpush.msra.mxu0 %v14860_v62  ;;  %5597 = vmatpush.msra.mxu1 %v14784_v15  ;;  %v14977_v50 = vand.u32 4294901760, %v581_v30 }
 0x2cc   : > { %5626 = vmatpush.msrb.mxu2 %v5433_v49  ;;  %5689 = vmatpush.msrb.mxu3 %v14689_v25  ;;  %v14969_v25 = vsub.f32 %v603_v33, %v14949_v61  ;;  %v14971_v49 = vld [vmem:[#allocation7] sm:$0xff]  ;;  %v5780_v51 = vand.u32 4294901760, %v14983_v10 }
 0x2cd   : > { %5567 = vmatpush.msra.mxu0 %v14872_v41  ;;  %5599 = vmatpush.msra.mxu1 %v14797_v6  ;;  %v626_v57 = vperm.slane %v14971_v49, 6 }
 0x2ce   : > { %5630 = vmatpush.msrb.mxu2 %v5439_v24  ;;  %5691 = vmatpush.msrb.mxu3 %v14694_v20  ;;  %v3945_v20 = vpop.f32.mrf.mxu1  ;;  %v5768_v24 = vand.u32 4294901760, %v14959_v27  ;;  %v14997_v33 = vpop.f32.mrf.mxu2  ;;  %v5781_v59 = vsub.f32 %v14983_v10, %v5780_v51 }
 0x2cf   : > { %5570 = vmatpush.msra.mxu0 %v14886_v47  ;;  %5601 = vmatpush.msra.mxu1 %v14811_v29  ;;  %v3845_v0 = vadd.f32 %v3844_v12, %v626_v57  ;;  %v15016_v5 = vpop.f32.mrf.mxu3 }
 0x2d0   : > { %5634 = vmatpush.msrb.mxu2 %v5445_v58  ;;  %5693 = vmatpush.msrb.mxu3 %v14704_v56  ;;  %v5774_v56 = vand.u32 4294901760, %v14969_v25  ;;  %v14995_v58 = vsub.f32 %v581_v30, %v14977_v50  ;;  %v4107_v14 = vpop.f32.mrf.mxu0 }
 0x2d1   : > { %5573 = vmatpush.msra.mxu0 %v14896_v48  ;;  %5603 = vmatpush.msra.mxu1 %v14824_v39 }
 0x2d2   : > { %5638 = vmatpush.msrb.mxu2 %v5451_v38  ;;  %5695 = vmatpush.msrb.mxu3 %v14714_v19  ;;  %v5769_v19 = vsub.f32 %v14959_v27, %v5768_v24  ;;  %v3946_v38 = vadd.f32 %v3945_v20, %v3845_v0  ;;  %v560_v0 = vld [vmem:[#allocation4 + $0x520] sm:$0xff] }
 0x2d3   : > { %5738 = vmatpush.msrb.mxu0 %v14941_v3  ;;  %5421 = vmatmul.f32.vlgmr.msra.gmra.mxu2 %v12186_v17 }
 0x2d4   : > { %5605 = vmatpush.msra.mxu1 %v14837_v46  ;;  %5642 = vmatpush.msrb.mxu2 %v5457_v28  ;;  %v5786_v28 = vand.u32 4294901760, %v14995_v58  ;;  %v4000_v12 = vadd.f32 %v14876_v45, %v3946_v38  ;;  %v16410_v45 = vand.u32 4294901760, %v14835_v9  ;;  %v16411_v9 = vand.u32 4294901760, %v14847_v21 }
 0x2d5   : > { %5697 = vmatpush.msrb.mxu3 %v14726_v8  ;;  %5740 = vmatpush.msrb.mxu0 %v14949_v61  ;;  %v5775_v8 = vsub.f32 %v14969_v25, %v5774_v56 }
 0x2d6   : > { %5522 = vmatmul.f32.vlgmr.msra.gmra.mxu3 %v12065_v31  ;;  %5607 = vmatpush.msra.mxu1 %v14849_v7  ;;  %v4144_v57 = vpop.f32.mrf.mxu1  ;;  %v5787_v54 = vsub.f32 %v14995_v58, %v5786_v28  ;;  %v4370_v30 = vpop.f32.mrf.mxu2 }
 0x2d7   : > { %5646 = vmatpush.msrb.mxu2 %v5463_v37  ;;  %5699 = vmatpush.msrb.mxu3 %v14740_v1  ;;  %v5770_v1 = vand.u32 4294901760, %v5769_v19  ;;  %v5776_v37 = vand.u32 4294901760, %v5775_v8  ;;  %v4471_v22 = vpop.f32.mrf.mxu3  ;;  %v538_v19 = vld [vmem:[#allocation4 + $0x470] sm:$0xff] }
 0x2d8   : > { %5742 = vmatpush.msrb.mxu0 %v14956_v53  ;;  %5609 = vmatpush.msra.mxu1 %v14862_v2 }
 0x2d9   : > { %5576 = vmatmul.f32.vlgmr.msra.gmra.mxu0 %v12083_v40  ;;  %5650 = vmatpush.msrb.mxu2 %v5469_v35  ;;  %v5782_v35 = vand.u32 4294901760, %v5781_v59 }
 0x2da   : > { %5701 = vmatpush.msrb.mxu3 %v14755_v60  ;;  %5744 = vmatpush.msrb.mxu0 %v14977_v50  ;;  %v627_v60 = vperm.slane %v14971_v49, 7  ;;  %v5788_v49 = vand.u32 4294901760, %v5787_v54 }
 0x2db   : > { %5611 = vmatpush.msra.mxu1 %v14874_v42  ;;  %5654 = vmatpush.msrb.mxu2 %v5475_v18  ;;  %v4039_v18 = vadd.f32 %v14898_v11, %v4000_v12  ;;  %v549_v11 = vld [vmem:[#allocation4 + $0x4c8] sm:$0xff] }
 0x2dc   : > { %5809 = vmatpush.msra.mxu0 %v14959_v27  ;;  %5703 = vmatpush.msrb.mxu3 %v14770_v55  ;;  %v4525_v55 = vpop.f32.mrf.mxu0  ;;  %v4371_v20 = vadd.f32 %v4370_v30, %v627_v60  ;;  %v15063_v21 = vand.u32 4294901760, %v549_v11  ;;  %v15068_v27 = vand.u32 4294901760, %v538_v19 }
 0x2dd   : > { %5771 = vmatpush.msrb.mxu1 %v5770_v1  ;;  %5658 = vmatpush.msrb.mxu2 %v5481_v13  ;;  %v4108_v8 = vadd.f32 %v4107_v14, %v4039_v18  ;;  %v16412_v1 = vand.u32 4294901760, %v14860_v62 }
 0x2de   : > { %5812 = vmatpush.msra.mxu0 %v14969_v25  ;;  %5705 = vmatpush.msrb.mxu3 %v14784_v15  ;;  %v15046_v15 = vand.u32 4294901760, %v571_v26  ;;  %v4564_v13 = vpop.f32.mrf.mxu1  ;;  %v4472_v38 = vadd.f32 %v4471_v22, %v4371_v20  ;;  %v516_v25 = vld [vmem:[#allocation4 + $0x3c0] sm:$0xff]  ;;  %v15086_v12 = vsub.f32 %v549_v11, %v15063_v21 }
 0x2df   : > { %5777 = vmatpush.msrb.mxu1 %v5776_v37  ;;  %5662 = vmatpush.msrb.mxu2 %v16410_v45  ;;  %v4145_v37 = vadd.f32 %v4144_v57, %v4108_v8 }
 0x2e0   : > { %5815 = vmatpush.msra.mxu0 %v14983_v10  ;;  %5707 = vmatpush.msrb.mxu3 %v14797_v6  ;;  %v15053_v6 = vand.u32 4294901760, %v560_v0  ;;  %v15061_v59 = vsub.f32 %v571_v26, %v15046_v15  ;;  %v4526_v14 = vadd.f32 %v4525_v55, %v4472_v38  ;;  %v505_v10 = vld [vmem:[#allocation4 + $0x368] sm:$0xff]  ;;  %v5965_v26 = vand.u32 4294901760, %v15086_v12  ;;  %v483_v55 = vld [vmem:[#allocation4 + $0x2b8] sm:$0xff] }
 0x2e1   : > { %5783 = vmatpush.msrb.mxu1 %v5782_v35  ;;  %5750 = vmatmul.f32.vlgmr.msrb.gmra.mxu0 %v12116_v34  ;;  %v15111_v30 = vand.u32 4294901760, %v505_v10 }
 0x2e2   : > { %5615 = vmatmul.f32.vlgmr.msra.gmra.mxu1 %v12098_v16  ;;  %5818 = vmatpush.msra.mxu0 %v14995_v58  ;;  %v15074_v62 = vsub.f32 %v560_v0, %v15053_v6  ;;  %v472_v0 = vld [vmem:[#allocation4 + $0x260] sm:$0xff]  ;;  %v5966_v11 = vsub.f32 %v15086_v12, %v5965_v26 }
 0x2e3   : > { %5666 = vmatpush.msrb.mxu2 %v16411_v9  ;;  %5709 = vmatpush.msrb.mxu3 %v14811_v29  ;;  %v527_v29 = vld [vmem:[#allocation4 + $0x418] sm:$0xff]  ;;  %v15139_v9 = vsub.f32 %v505_v10, %v15111_v30  ;;  %v15146_v38 = vand.u32 4294901760, %v472_v0 }
 0x2e4   : > { %5789 = vmatpush.msrb.mxu1 %v5788_v49  ;;  %5867 = vmatpush.msrb.mxu0 %v5768_v24  ;;  %v16413_v24 = vand.u32 4294901760, %v14872_v41  ;;  %v5953_v41 = vand.u32 4294901760, %v15061_v59  ;;  %v4699_v57 = vpop.f32.mrf.mxu0  ;;  %v5959_v54 = vand.u32 4294901760, %v15074_v62 }
 0x2e5   : > { %5670 = vmatpush.msrb.mxu2 %v16412_v1  ;;  %5711 = vmatpush.msrb.mxu3 %v14824_v39  ;;  %v15079_v39 = vand.u32 4294901760, %v527_v29  ;;  %v461_v1 = vld [vmem:[#allocation4 + $0x208] sm:$0xff] }
 0x2e6   : > { %5838 = vmatpush.msra.mxu1 %v14941_v3  ;;  %5871 = vmatpush.msrb.mxu0 %v5774_v56  ;;  %v16414_v56 = vand.u32 4294901760, %v14886_v47  ;;  %v15097_v47 = vand.u32 4294901760, %v516_v25  ;;  %v4740_v60 = vpop.f32.mrf.mxu1  ;;  %v5954_v35 = vsub.f32 %v15061_v59, %v5953_v41  ;;  %v15164_v10 = vand.u32 4294901760, %v461_v1 }
 0x2e7   : > { %5674 = vmatpush.msrb.mxu2 %v16413_v24  ;;  %5713 = vmatpush.msrb.mxu3 %v14837_v46  ;;  %v4174_v46 = vadd.f32 %v14920_v43, %v4145_v37  ;;  %v494_v43 = vld [vmem:[#allocation4 + $0x310] sm:$0xff]  ;;  %v15103_v58 = vsub.f32 %v527_v29, %v15079_v39 }
 0x2e8   : > { %5840 = vmatpush.msra.mxu1 %v14949_v61  ;;  %5875 = vmatpush.msrb.mxu0 %v5780_v51  ;;  %v15093_v51 = vsub.f32 %v538_v19, %v15068_v27  ;;  %v15123_v20 = vand.u32 4294901760, %v494_v43 }
 0x2e9   : > { %5678 = vmatpush.msrb.mxu2 %v16414_v56  ;;  %5715 = vmatpush.msrb.mxu3 %v14849_v7  ;;  %v4565_v7 = vadd.f32 %v4564_v13, %v4526_v14  ;;  %v4215_v45 = vadd.f32 %v14931_v36, %v4174_v46  ;;  %v15126_v36 = vsub.f32 %v516_v25, %v15097_v47  ;;  %v5977_v22 = vand.u32 4294901760, %v15103_v58  ;;  %v450_v25 = vld [vmem:[#allocation4 + $0x1b0] sm:$0xff] }
 0x2ea   : > { %5842 = vmatpush.msra.mxu1 %v14956_v53  ;;  %5879 = vmatpush.msrb.mxu0 %v5786_v28  ;;  %v16415_v28 = vand.u32 4294901760, %v14896_v48  ;;  %v5971_v48 = vand.u32 4294901760, %v15093_v51  ;;  %v5967_v46 = vand.u32 4294901760, %v5966_v11  ;;  %v15190_v11 = vsub.f32 %v461_v1, %v15164_v10 }
 0x2eb   : > { %5791 = vmatmul.f32.vlgmr.msrb.gmra.mxu1 %v12053_v63  ;;  %5821 = vmatmul.f32.vlgmr.msra.gmra.mxu0 %v12073_v44  ;;  %v4245_v19 = vadd.f32 %v14945_v52, %v4215_v45  ;;  %v5983_v24 = vand.u32 4294901760, %v15126_v36  ;;  %v5978_v14 = vsub.f32 %v15103_v58, %v5977_v22  ;;  %v15177_v45 = vand.u32 4294901760, %v450_v25 }
 0x2ec   : > { %5844 = vmatpush.msra.mxu1 %v14977_v50  ;;  %5911 = vmatpush.msra.mxu0 %v15046_v15  ;;  %v5972_v8 = vsub.f32 %v15093_v51, %v5971_v48  ;;  %v4770_v37 = vpop.f32.mrf.mxu0 }
 0x2ed   : > { %5682 = vmatpush.msrb.mxu2 %v16415_v28  ;;  %5717 = vmatpush.msrb.mxu3 %v14862_v2  ;;  %v4633_v18 = vpop.f32.mrf.mxu2  ;;  %v5960_v2 = vsub.f32 %v15074_v62, %v5959_v54 }
 0x2ee   : > { %5898 = vmatpush.msrb.mxu1 %v14941_v3  ;;  %5684 = vmatmul.f32.vlgmr.msrb.gmra.mxu2 %v12065_v31  ;;  %v4634_v49 = vadd.f32 %v4633_v18, %v4565_v7  ;;  %v15130_v3 = vand.u32 4294901760, %v483_v55  ;;  %v16312_v7 = vand.u32 4294901760, %v15139_v9  ;;  %v5973_v28 = vand.u32 4294901760, %v5972_v8 }
 0x2ef   : > { %5913 = vmatpush.msra.mxu0 %v15053_v6  ;;  %5719 = vmatpush.msrb.mxu3 %v14874_v42  ;;  %v5955_v42 = vand.u32 4294901760, %v5954_v35  ;;  %v5961_v29 = vand.u32 4294901760, %v5960_v2  ;;  %v439_v35 = vld [vmem:[#allocation4 + $0x158] sm:$0xff]  ;;  %v5984_v18 = vsub.f32 %v15126_v36, %v5983_v24 }
 0x2f0   : > { %5900 = vmatpush.msrb.mxu1 %v14949_v61  ;;  %5721 = vmatmul.f32.vlgmr.msrb.gmra.mxu3 %v12065_v31  ;;  %v4670_v13 = vpop.f32.mrf.mxu3  ;;  %v15161_v56 = vsub.f32 %v483_v55, %v15130_v3  ;;  %v15171_v55 = vsub.f32 %v472_v0, %v15146_v38  ;;  %v428_v0 = vld [vmem:[#allocation4 + $0x100] sm:$0xff] }
 0x2f1   : > { %5915 = vmatpush.msra.mxu0 %v15063_v21  ;;  %6054 = vmatpush.msra.mxu2 %v15061_v59  ;;  %v4671_v61 = vadd.f32 %v4670_v13, %v4634_v49  ;;  %v5979_v49 = vand.u32 4294901760, %v5978_v14  ;;  %v5990_v13 = vsub.f32 %v15139_v9, %v16312_v7  ;;  %v15200_v1 = vand.u32 4294901760, %v428_v0 }
 0x2f2   : > { %5902 = vmatpush.msrb.mxu1 %v14956_v53  ;;  %6107 = vmatpush.msra.mxu3 %v15046_v15  ;;  %v15153_v53 = vsub.f32 %v494_v43, %v15123_v20  ;;  %v4272_v43 = vadd.f32 %v14964_v32, %v4245_v19  ;;  %v16311_v2 = vand.u32 4294901760, %v15161_v56  ;;  %v16313_v8 = vand.u32 4294901760, %v15171_v55 }
 0x2f3   : > { %5917 = vmatpush.msra.mxu0 %v15068_v27  ;;  %5848 = vmatmul.f32.vlgmr.msra.gmra.mxu1 %v12092_v23  ;;  %v4700_v52 = vadd.f32 %v4699_v57, %v4671_v61  ;;  %v4797_v57 = vpop.f32.mrf.mxu1  ;;  %v15203_v14 = vsub.f32 %v450_v25, %v15177_v45  ;;  %v16315_v25 = vand.u32 4294901760, %v15190_v11 }
 0x2f4   : > { %5904 = vmatpush.msrb.mxu1 %v14977_v50  ;;  %5881 = vmatmul.f32.vlgmr.msrb.gmra.mxu0 %v12053_v63  ;;  %v16310_v32 = vand.u32 4294901760, %v15153_v53  ;;  %v4305_v19 = vadd.f32 %v14997_v33, %v4272_v43  ;;  %v5991_v43 = vand.u32 4294901760, %v5990_v13 }
 0x2f5   : > { %5919 = vmatpush.msra.mxu0 %v15079_v39  ;;  %v4741_v50 = vadd.f32 %v4740_v60, %v4700_v52  ;;  %6057 = vmatpush.msra.mxu2 %v15074_v62 }
 0x2f6   : > { %5956 = vmatpush.msra.mxu1 %v5955_v42  ;;  %6109 = vmatpush.msra.mxu3 %v15053_v6  ;;  %v15187_v42 = vand.u32 4294901760, %v439_v35  ;;  %v5996_v52 = vsub.f32 %v15153_v53, %v16310_v32  ;;  %v4330_v32 = vadd.f32 %v15016_v5, %v4305_v19  ;;  %v11399_v5 = vld [vmem:[#allocation1 + $0x10] sm:$0xff] }
 0x2f7   : > { %5921 = vmatpush.msra.mxu0 %v15097_v47  ;;  %v4771_v60 = vadd.f32 %v4770_v37, %v4741_v50  ;;  %6060 = vmatpush.msra.mxu2 %v15086_v12  ;;  %v5985_v37 = vand.u32 4294901760, %v5984_v18  ;;  %v6451_v19 = vrot.slane %v11399_v5, 4  ;;  %v6452_v7 = vrot.slane %v11399_v5, 7 }
 0x2f8   : > { %5962 = vmatpush.msra.mxu1 %v5961_v29  ;;  %6111 = vmatpush.msra.mxu3 %v15063_v21  ;;  %v417_v29 = vld [vmem:[#allocation4 + $0xa8] sm:$0xff]  ;;  %v15215_v18 = vsub.f32 %v439_v35, %v15187_v42  ;;  %v5997_v13 = vand.u32 4294901760, %v5996_v52  ;;  %v16314_v35 = vand.u32 4294901760, %v15203_v14 }
 0x2f9   : > { %5923 = vmatpush.msra.mxu0 %v15111_v30  ;;  %v4798_v61 = vadd.f32 %v4797_v57, %v4771_v60  ;;  %6063 = vmatpush.msra.mxu2 %v15093_v51  ;;  %v406_v57 = vld [vmem:[#allocation4 + $0x50] sm:$0xff] }
 0x2fa   : > { %5968 = vmatpush.msra.mxu1 %v5967_v46  ;;  %6113 = vmatpush.msra.mxu3 %v15068_v27  ;;  %v6002_v46 = vsub.f32 %v15161_v56, %v16311_v2  ;;  %v6008_v2 = vsub.f32 %v15171_v55, %v16313_v8  ;;  %v6025_v52 = vand.u32 4294901760, %v15215_v18 }
 0x2fb   : > { %5925 = vmatpush.msra.mxu0 %v15123_v20  ;;  %v4830_v33 = vpop.f32.mrf.mxu0  ;;  %5906 = vmatmul.f32.vlgmr.msrb.gmra.mxu1 %v12053_v63 }
 0x2fc   : > { %5974 = vmatpush.msra.mxu1 %v5973_v28  ;;  %6066 = vmatpush.msra.mxu2 %v15103_v58  ;;  %v4831_v50 = vadd.f32 %v4830_v33, %v4798_v61  ;;  %v15211_v28 = vand.u32 4294901760, %v417_v29  ;;  %v15224_v61 = vand.u32 4294901760, %v406_v57  ;;  %v15228_v33 = vsub.f32 %v428_v0, %v15200_v1 }
 0x2fd   : > { %5927 = vmatpush.msra.mxu0 %v15130_v3  ;;  %v4855_v60 = vpop.f32.mrf.mxu1  ;;  %6115 = vmatpush.msra.mxu3 %v15079_v39  ;;  %v6003_v8 = vand.u32 4294901760, %v6002_v46  ;;  %v16416_v58 = vand.u32 4294901760, %v15139_v9 }
 0x2fe   : > { %5980 = vmatpush.msra.mxu1 %v5979_v49  ;;  %6069 = vmatpush.msra.mxu2 %v15126_v36  ;;  %v4856_v49 = vadd.f32 %v4855_v60, %v4831_v50  ;;  %v15238_v0 = vsub.f32 %v417_v29, %v15211_v28  ;;  %v6009_v60 = vand.u32 4294901760, %v6008_v2  ;;  %v6031_v29 = vand.u32 4294901760, %v15228_v33 }
 0x2ff   : > { %5929 = vmatpush.msra.mxu0 %v15146_v38  ;;  %6117 = vmatpush.msra.mxu3 %v15097_v47  ;;  %v15248_v2 = vsub.f32 %v406_v57, %v15224_v61 }
 0x300   : > { %5986 = vmatpush.msra.mxu1 %v5985_v37  ;;  %6072 = vmatpush.msra.mxu2 %v15139_v9  ;;  %v6439_v50 = vpack.c.bf16 %v4856_v49, %v4330_v32  ;;  %v6014_v37 = vsub.f32 %v15190_v11, %v16315_v25  ;;  %v6020_v32 = vsub.f32 %v15203_v14, %v16314_v35  ;;  %v16316_v25 = vand.u32 4294901760, %v15238_v0 }
 0x301   : > { %5931 = vmatpush.msra.mxu0 %v15164_v10  ;;  %6119 = vmatpush.msra.mxu3 %v15111_v30  ;;  %v6026_v35 = vsub.f32 %v15215_v18, %v6025_v52  ;;  %v16419_v9 = vand.u32 4294901760, %v15171_v55 }
 0x302   : > { %5992 = vmatpush.msra.mxu1 %v5991_v43  ;;  %v6453_v46 = vrot.slane %v6439_v50, 2  ;;  %v6454_v5 = vrot.slane %v6439_v50, 5  ;;  %6501 = vst [vmem:[#allocation1 + $0x18] sm:$0xff] %v6439_v50  ;;  %6075 = vmatpush.msra.mxu2 %v15153_v53  ;;  %v6471_v43 = vsel %vm6468_vm4, %v6451_v19, %v6452_v7  ;;  %v615_v50 = vld [vmem:[#allocation4 + $0x6d8] sm:$0xff]  ;;  %v604_v19 = vld [vmem:[#allocation4 + $0x680] sm:$0xff] }
 0x303   : > { %5933 = vmatpush.msra.mxu0 %v15177_v45  ;;  %6121 = vmatpush.msra.mxu3 %v15123_v20 }
 0x304   : > { %5998 = vmatpush.msra.mxu1 %v5997_v13  ;;  %v6475_v49 = vsel %vm6472_vm5, %v6453_v46, %v6454_v5  ;;  %6078 = vmatpush.msra.mxu2 %v15161_v56  ;;  %v6015_v13 = vand.u32 4294901760, %v6014_v37  ;;  %v6032_v37 = vsub.f32 %v15228_v33, %v6031_v29  ;;  %v6043_v46 = vand.u32 4294901760, %v15248_v2 }
 0x305   : > { %5935 = vmatpush.msra.mxu0 %v15187_v42  ;;  %v6477_v57 = vsel %vm6476_vm6, %v6471_v43, %v6475_v49  ;;  %6123 = vmatpush.msra.mxu3 %v15130_v3  ;;  %v15268_v5 = vand.u32 4294901760, %v615_v50  ;;  %v6027_v43 = vand.u32 4294901760, %v6026_v35  ;;  %v15276_v49 = vand.u32 4294901760, %v604_v19 }
 0x306   : > { %6004 = vmatpush.msra.mxu1 %v6003_v8  ;;  %v6479_v7 = vsel %vm6478_vm7, %v13951_v4, %v6477_v57  ;;  %6081 = vmatpush.msra.mxu2 %v15171_v55  ;;  %v6021_v8 = vand.u32 4294901760, %v6020_v32  ;;  %v593_v4 = vld [vmem:[#allocation4 + $0x628] sm:$0xff]  ;;  %v6038_v32 = vsub.f32 %v15238_v0, %v16316_v25  ;;  %v582_v57 = vld [vmem:[#allocation4 + $0x5d0] sm:$0xff]  ;;  %v6044_v35 = vsub.f32 %v15248_v2, %v6043_v46 }
 0x307   : > { %5937 = vmatpush.msra.mxu0 %v15200_v1  ;;  %6489 = vst [vmem:[#allocation2] sm:$0xff] %v6479_v7  ;;  %6125 = vmatpush.msra.mxu3 %v15146_v38  ;;  %v6033_v7 = vand.u32 4294901760, %v6032_v37  ;;  %v15287_v25 = vand.u32 4294901760, %v593_v4  ;;  %v15296_v37 = vand.u32 4294901760, %v582_v57 }
 0x308   : > { %6010 = vmatpush.msra.mxu1 %v6009_v60  ;;  %6084 = vmatpush.msra.mxu2 %v15190_v11 }
 0x309   : > { %5939 = vmatpush.msra.mxu0 %v15211_v28  ;;  %v6506_v60 = vld [vmem:[#allocation1 + $0x1] ss:$4 sm:$0xff]  ;;  %6127 = vmatpush.msra.mxu3 %v15164_v10 }
 0x30a   : > { %6016 = vmatpush.msra.mxu1 %v6015_v13  ;;  %6512 = vst [vmem:[#allocation2 + $0xb] sm:$0xff] %v6506_v60  ;;  %6087 = vmatpush.msra.mxu2 %v15203_v14  ;;  %v15285_v13 = vsub.f32 %v615_v50, %v15268_v5  ;;  %v6039_v60 = vand.u32 4294901760, %v6038_v32  ;;  %v6045_v50 = vand.u32 4294901760, %v6044_v35 }
 0x30b   : > { %5941 = vmatpush.msra.mxu0 %v15224_v61  ;;  %6129 = vmatpush.msra.mxu3 %v15177_v45 }
 0x30c   : > { %6022 = vmatpush.msra.mxu1 %v6021_v8  ;;  %6090 = vmatpush.msra.mxu2 %v15215_v18  ;;  %v15294_v8 = vsub.f32 %v604_v19, %v15276_v49  ;;  %v6294_v59 = vand.u32 4294901760, %v15285_v13 }
 0x30d   : > { %6148 = vmatpush.msrb.mxu0 %v5953_v41  ;;  %6131 = vmatpush.msra.mxu3 %v15187_v42  ;;  %v15304_v41 = vsub.f32 %v593_v4, %v15287_v25 }
 0x30e   : > { %6028 = vmatpush.msra.mxu1 %v6027_v43  ;;  %6093 = vmatpush.msra.mxu2 %v15228_v33  ;;  %v6300_v62 = vand.u32 4294901760, %v15294_v8  ;;  %v6295_v12 = vsub.f32 %v15285_v13, %v6294_v59 }
 0x30f   : > { %6152 = vmatpush.msrb.mxu0 %v5959_v54  ;;  %6133 = vmatpush.msra.mxu3 %v15200_v1  ;;  %v15312_v54 = vsub.f32 %v582_v57, %v15296_v37 }
 0x310   : > { %6034 = vmatpush.msra.mxu1 %v6033_v7  ;;  %6096 = vmatpush.msra.mxu2 %v15238_v0  ;;  %v6301_v51 = vsub.f32 %v15294_v8, %v6300_v62 }
 0x311   : > { %6156 = vmatpush.msrb.mxu0 %v5965_v26  ;;  %6135 = vmatpush.msra.mxu3 %v15211_v28  ;;  %v6306_v26 = vand.u32 4294901760, %v15304_v41 }
 0x312   : > { %6040 = vmatpush.msra.mxu1 %v6039_v60  ;;  %6099 = vmatpush.msra.mxu2 %v15248_v2  ;;  %v6302_v36 = vand.u32 4294901760, %v6301_v51 }
 0x313   : > { %6160 = vmatpush.msrb.mxu0 %v5971_v48  ;;  %6102 = vmatmul.f32.vlgmr.msra.gmra.mxu2 %v12083_v40  ;;  %v6312_v48 = vand.u32 4294901760, %v15312_v54  ;;  %v6307_v40 = vsub.f32 %v15304_v41, %v6306_v26 }
 0x314   : > { %6046 = vmatpush.msra.mxu1 %v6045_v50  ;;  %6137 = vmatpush.msra.mxu3 %v15224_v61 }
 0x315   : > { %6164 = vmatpush.msrb.mxu0 %v5977_v22  ;;  %6264 = vmatpush.msrb.mxu2 %v15268_v5  ;;  %v6308_v22 = vand.u32 4294901760, %v6307_v40 }
 0x316   : > { %6215 = vmatpush.msrb.mxu1 %v15046_v15  ;;  %5947 = vmatmul.f32.vlgmr.msra.gmra.mxu0 %v12186_v17  ;;  %v6296_v15 = vand.u32 4294901760, %v6295_v12  ;;  %v16417_v17 = vand.u32 4294901760, %v15153_v53 }
 0x317   : > { %6168 = vmatpush.msrb.mxu0 %v5983_v24  ;;  %6141 = vmatmul.f32.vlgmr.msra.gmra.mxu3 %v12098_v16 }
 0x318   : > { %6217 = vmatpush.msrb.mxu1 %v15053_v6  ;;  %6266 = vmatpush.msrb.mxu2 %v15276_v49  ;;  %v6313_v6 = vsub.f32 %v15312_v54, %v6312_v48 }
 0x319   : > { %6172 = vmatpush.msrb.mxu0 %v16416_v58  ;;  %6297 = vmatpush.msrb.mxu3 %v6296_v15 }
 0x31a   : > { %6219 = vmatpush.msrb.mxu1 %v15063_v21  ;;  %v16418_v21 = vand.u32 4294901760, %v15161_v56  ;;  %6268 = vmatpush.msrb.mxu2 %v15287_v25  ;;  %v6314_v16 = vand.u32 4294901760, %v6313_v6 }
 0x31b   : > { %6176 = vmatpush.msrb.mxu0 %v16417_v17  ;;  %6048 = vmatmul.f32.vlgmr.msra.gmra.mxu1 %v12065_v31 }
 0x31c   : > { %6221 = vmatpush.msrb.mxu1 %v15068_v27  ;;  %6303 = vmatpush.msrb.mxu3 %v6302_v36  ;;  %v16420_v27 = vand.u32 4294901760, %v15190_v11 }
 0x31d   : > { %6180 = vmatpush.msrb.mxu0 %v16418_v21  ;;  %6270 = vmatpush.msrb.mxu2 %v15296_v37 }
 0x31e   : > { %6223 = vmatpush.msrb.mxu1 %v15079_v39  ;;  %6309 = vmatpush.msrb.mxu3 %v6308_v22  ;;  %v16421_v39 = vand.u32 4294901760, %v15203_v14 }
 0x31f   : > { %6184 = vmatpush.msrb.mxu0 %v16419_v9  ;;  %6276 = vmatmul.f32.vlgmr.msrb.gmra.mxu2 %v12116_v34  ;;  %v16422_v34 = vand.u32 4294901760, %v15238_v0 }
 0x320   : > { %6225 = vmatpush.msrb.mxu1 %v15097_v47  ;;  %6315 = vmatpush.msrb.mxu3 %v6314_v16 }
 0x321   : > { %6188 = vmatpush.msrb.mxu0 %v16420_v27  ;;  %6335 = vmatpush.msra.mxu2 %v15285_v13 }
 0x322   : > { %6227 = vmatpush.msrb.mxu1 %v15111_v30  ;;  %6317 = vmatmul.f32.vlgmr.msrb.gmra.mxu3 %v12053_v63 }
 0x323   : > { %6192 = vmatpush.msrb.mxu0 %v16421_v39  ;;  %6338 = vmatpush.msra.mxu2 %v15294_v8  ;;  %v11643_v39 = vmov 0.0  }
 0x324   : > { %6229 = vmatpush.msrb.mxu1 %v15123_v20  ;;  %6364 = vmatpush.msra.mxu3 %v15268_v5  ;;  %v4896_v20 = vpop.f32.mrf.mxu0  ;;  %6515 = vst.msk [vmem:[#allocation3] sm:$0x3] %vm6514_vm8, %v11643_v39 }
 0x325   : > { %6196 = vmatpush.msrb.mxu0 %v6025_v52  ;;  %6341 = vmatpush.msra.mxu2 %v15304_v41 }
 0x326   : > { %6231 = vmatpush.msrb.mxu1 %v15130_v3  ;;  %6366 = vmatpush.msra.mxu3 %v15276_v49  ;;  %v617_v3 = vld [vmem:[#allocation7 + $0x8] sm:$0x7] }
 0x327   : > { %6200 = vmatpush.msrb.mxu0 %v6031_v29  ;;  %6344 = vmatpush.msra.mxu2 %v15312_v54  ;;  %v628_v53 = vperm.slane %v617_v3, 0  ;;  %v630_v36 = vperm.slane %v617_v3, 2 }
 0x328   : > { %6233 = vmatpush.msrb.mxu1 %v15146_v38  ;;  %6368 = vmatpush.msra.mxu3 %v15287_v25 }
 0x329   : > { %6204 = vmatpush.msrb.mxu0 %v16422_v34  ;;  %6347 = vmatmul.f32.vlgmr.msra.gmra.mxu2 %v12073_v44  ;;  %v5051_v44 = vpop.f32.mrf.mxu2  ;;  %v4997_v24 = vpop.f32.mrf.mxu1 }
 0x32a   : > { %6235 = vmatpush.msrb.mxu1 %v15164_v10  ;;  %6370 = vmatpush.msra.mxu3 %v15296_v37 }
 0x32b   : > { %6208 = vmatpush.msrb.mxu0 %v6043_v46  ;;  %6393 = vmatpush.msrb.mxu2 %v6294_v59 }
 0x32c   : > { %6237 = vmatpush.msrb.mxu1 %v15177_v45  ;;  %6210 = vmatmul.f32.vlgmr.msrb.gmra.mxu0 %v12065_v31 }
 0x32d   : > { %6374 = vmatmul.f32.vlgmr.msra.gmra.mxu3 %v12092_v23  ;;  %6397 = vmatpush.msrb.mxu2 %v6300_v62  ;;  %v5090_v23 = vpop.f32.mrf.mxu3 }
 0x32e   : > { %6239 = vmatpush.msrb.mxu1 %v15187_v42  ;;  %6424 = vmatpush.msrb.mxu3 %v15268_v5 }
 0x32f   : > { %6401 = vmatpush.msrb.mxu2 %v6306_v26 }
 0x330   : > { %6241 = vmatpush.msrb.mxu1 %v15200_v1  ;;  %6426 = vmatpush.msrb.mxu3 %v15276_v49 }
 0x331   : > { %6405 = vmatpush.msrb.mxu2 %v6312_v48  ;;  %v5225_v47 = vpop.f32.mrf.mxu2  ;;  %v5159_v10 = vpop.f32.mrf.mxu0 }
 0x332   : > { %6243 = vmatpush.msrb.mxu1 %v15211_v28  ;;  %6428 = vmatpush.msrb.mxu3 %v15287_v25  ;;  %v629_v28 = vperm.slane %v617_v3, 1 }
 0x333   : > { %6407 = vmatmul.f32.vlgmr.msrb.gmra.mxu2 %v12053_v63 }
 0x334   : > { %6245 = vmatpush.msrb.mxu1 %v15224_v61  ;;  %6430 = vmatpush.msrb.mxu3 %v15296_v37 }
 0x335   : > { %6247 = vmatmul.f32.vlgmr.msrb.gmra.mxu1 %v12065_v31  ;;  %6432 = vmatmul.f32.vlgmr.msrb.gmra.mxu3 %v12053_v63  ;;  %v5266_v30 = vpop.f32.mrf.mxu3  ;;  %v4897_v31 = vadd.f32 %v4896_v20, %v628_v53 }
 0x336   : > { %v5196_v55 = vpop.f32.mrf.mxu1 }
 0x337   : > { %v4998_v42 = vadd.f32 %v4997_v24, %v4897_v31 }
 0x339   : > { %v5296_v38 = vpop.f32.mrf.mxu2  ;;  %v5052_v1 = vadd.f32 %v5051_v44, %v4998_v42 }
 0x33b   : > { %v5091_v18 = vadd.f32 %v5090_v23, %v5052_v1 }
 0x33d   : > { %v5323_v56 = vpop.f32.mrf.mxu3  ;;  %v5160_v52 = vadd.f32 %v5159_v10, %v5091_v18 }
 0x33f   : > { %v5197_v0 = vadd.f32 %v5196_v55, %v5160_v52 }
 0x341   : > { %v5356_v45 = vpop.f32.mrf.mxu2  ;;  %v5226_v46 = vadd.f32 %v5225_v47, %v5197_v0 }
 0x343   : > { %v5267_v4 = vadd.f32 %v5266_v30, %v5226_v46 }
 0x345   : > { %v5381_v11 = vpop.f32.mrf.mxu3  ;;  %v5297_v35 = vadd.f32 %v5296_v38, %v5267_v4 }
 0x347   : > { %v5324_v37 = vadd.f32 %v5323_v56, %v5297_v35 }
 0x349   : > { %v5357_v62 = vadd.f32 %v5356_v45, %v5324_v37 }
 0x34b   : > { %v5382_v51 = vadd.f32 %v5381_v11, %v5357_v62 }
 0x356   : > { %v5577_v14 = vpop.f32.mrf.mxu0  ;;  %v5422_v63 = vpop.f32.mrf.mxu2 }
 0x357   : > { %v5423_v61 = vadd.f32 %v5422_v63, %v629_v28 }
 0x359   : > { %v5523_v33 = vpop.f32.mrf.mxu3 }
 0x35a   : > { %v5524_v29 = vadd.f32 %v5523_v33, %v5423_v61 }
 0x35c   : > { %v5578_v5 = vadd.f32 %v5577_v14, %v5524_v29 }
 0x35e   : > { %v5751_v2 = vpop.f32.mrf.mxu0 }
 0x35f   : > { %v5616_v25 = vpop.f32.mrf.mxu1 }
 0x360   : > { %v5617_v43 = vadd.f32 %v5616_v25, %v5578_v5 }
 0x368   : > { %v5792_v19 = vpop.f32.mrf.mxu1  ;;  %v5822_v57 = vpop.f32.mrf.mxu0 }
 0x370   : > { %v5849_v60 = vpop.f32.mrf.mxu1 }
 0x371   : > { %v5685_v32 = vpop.f32.mrf.mxu2  ;;  %v5882_v41 = vpop.f32.mrf.mxu0 }
 0x372   : > { %v5686_v49 = vadd.f32 %v5685_v32, %v5617_v43 }
 0x373   : > { %v5722_v7 = vpop.f32.mrf.mxu3 }
 0x374   : > { %v5723_v13 = vadd.f32 %v5722_v7, %v5686_v49 }
 0x376   : > { %v5752_v8 = vadd.f32 %v5751_v2, %v5723_v13 }
 0x378   : > { %v5793_v50 = vadd.f32 %v5792_v19, %v5752_v8  ;;  %v5907_v12 = vpop.f32.mrf.mxu1 }
 0x37a   : > { %v5823_v59 = vadd.f32 %v5822_v57, %v5793_v50 }
 0x37c   : > { %v5850_v54 = vadd.f32 %v5849_v60, %v5823_v59 }
 0x37e   : > { %v5883_v26 = vadd.f32 %v5882_v41, %v5850_v54 }
 0x380   : > { %v5908_v48 = vadd.f32 %v5907_v12, %v5883_v26 }
 0x382   : > { %v6440_v15 = vpack.c.bf16 %v5908_v48, %v5382_v51 }
 0x384   : > { %6502 = vst [vmem:[#allocation1 + $0x20] sm:$0xff] %v6440_v15  ;;  %v6455_v42 = vrot.slane %v6440_v15, 3 }
 0x386   : > { %v6482_v28 = vsel %vm6458_vm1, %v6440_v15, %v6455_v42 }
 0x393   : > { %v5948_v6 = vpop.f32.mrf.mxu0 }
 0x394   : > { %v5949_v17 = vadd.f32 %v5948_v6, %v630_v36 }
 0x396   : > { %v6103_v40 = vpop.f32.mrf.mxu2 }
 0x398   : > { %v6049_v22 = vpop.f32.mrf.mxu1 }
 0x399   : > { %v6050_v16 = vadd.f32 %v6049_v22, %v5949_v17 }
 0x39a   : > { %v6142_v58 = vpop.f32.mrf.mxu3 }
 0x39b   : > { %v6104_v27 = vadd.f32 %v6103_v40, %v6050_v16 }
 0x39d   : > { %v6143_v44 = vadd.f32 %v6142_v58, %v6104_v27 }
 0x3a2   : > { %v6277_v21 = vpop.f32.mrf.mxu2 }
 0x3a5   : > { %v6318_v9 = vpop.f32.mrf.mxu3 }
 0x3a9   : > { %v6211_v34 = vpop.f32.mrf.mxu0 }
 0x3aa   : > { %v6212_v47 = vadd.f32 %v6211_v34, %v6143_v44 }
 0x3ac   : > { %v6348_v23 = vpop.f32.mrf.mxu2 }
 0x3b0   : > { %v6375_v20 = vpop.f32.mrf.mxu3 }
 0x3b2   : > { %v6248_v30 = vpop.f32.mrf.mxu1 }
 0x3b3   : > { %v6249_v38 = vadd.f32 %v6248_v30, %v6212_v47 }
 0x3b5   : > { %v6278_v24 = vadd.f32 %v6277_v21, %v6249_v38 }
 0x3b6   : > { %v6408_v56 = vpop.f32.mrf.mxu2 }
 0x3b7   : > { %v6319_v53 = vadd.f32 %v6318_v9, %v6278_v24 }
 0x3b8   : > { %v6433_v10 = vpop.f32.mrf.mxu3 }
 0x3b9   : > { %v6349_v3 = vadd.f32 %v6348_v23, %v6319_v53 }
 0x3bb   : > { %v6376_v31 = vadd.f32 %v6375_v20, %v6349_v3 }
 0x3bd   : > { %v6409_v55 = vadd.f32 %v6408_v56, %v6376_v31 }
 0x3bf   : > { %v6434_v45 = vadd.f32 %v6433_v10, %v6409_v55 }
 0x3c1   : > { %v6441_v11 = vpack.c.bf16 %v6434_v45, %v6434_v45 }
 0x3c3   : > { %v6456_v1 = vrot.slane %v6441_v11, 6  ;;  %v6457_v14 = vrot.slane %v6441_v11, 1  ;;  %6504 = vst [vmem:[#allocation1 + $0x28] sm:$0xff] %v6441_v11 }
 0x3c5   : > { %v6485_v63 = vsel %vm6462_vm2, %v6456_v1, %v6457_v14 }
 0x3c6   : > { %v6486_v25 = vsel %vm6466_vm3, %v6482_v28, %v6485_v63 }
 0x3c7   : > { %6494 = vst.msk [vmem:[#allocation2 + $0x8] sm:$0x7] %vm6493_vm12, %v6486_v25 }
 0x3ca   : > { %v6508_v18 = vld [vmem:[#allocation1 + $0x21] ss:$4 sm:$0xff] }
 0x3cb   : > { %6513 = vst.msk [vmem:[#allocation2 + $0x13] sm:$0x7] %vm6493_vm12, %v6508_v18 }
 0x3cc PF: > { %v9653_v61 = vld [vmem:[%s11821_s24 + $0x580] sm:$0xf]  ;;  %v11142_v33 = vld [vmem:[%s11821_s24 + $0x584] sm:$0xf0]  ;;  %v9645_v32 = vld [vmem:[%s11821_s24 + $0x570] sm:$0xf] }
 0x3cd   : > { %v9717_v52 = vld [vmem:[%s11821_s24 + $0x600] sm:$0xf]  ;;  %v9654_v0 = vor.u32 %v11142_v33, %v9653_v61  ;;  %v11158_v29 = vld [vmem:[%s11821_s24 + $0x604] sm:$0xf0]  ;;  %v11140_v57 = vld [vmem:[%s11821_s24 + $0x574] sm:$0xf0] }
 0x3ce   : > { %v9781_v2 = vld [vmem:[%s11821_s24 + $0x680] sm:$0xf]  ;;  %v11174_v19 = vld [vmem:[%s11821_s24 + $0x684] sm:$0xf0]  ;;  %v9718_v46 = vor.u32 %v11158_v29, %v9717_v52  ;;  %v9709_v7 = vld [vmem:[%s11821_s24 + $0x5f0] sm:$0xf]  ;;  %v9646_v13 = vor.u32 %v11140_v57, %v9645_v32 }
 0x3cf   : > { %v9782_v5 = vor.u32 %v11174_v19, %v9781_v2  ;;  %v9845_v4 = vld [vmem:[%s11821_s24 + $0x700] sm:$0xf]  ;;  %v11190_v43 = vld [vmem:[%s11821_s24 + $0x704] sm:$0xf0]  ;;  %7684 = vmatpush.bf16.msra.mxu0 %v9654_v0  ;;  %v11156_v35 = vld [vmem:[%s11821_s24 + $0x5f4] sm:$0xf0] }
 0x3d0   : > { %v9846_v49 = vor.u32 %v11190_v43, %v9845_v4  ;;  %7697 = vmatpush.bf16.msra.mxu1 %v9718_v46  ;;  %v9710_v60 = vor.u32 %v11156_v35, %v9709_v7  ;;  %v9773_v8 = vld [vmem:[%s11821_s24 + $0x670] sm:$0xf]  ;;  %v11172_v37 = vld [vmem:[%s11821_s24 + $0x674] sm:$0xf0]  ;;  %v9637_v62 = vld [vmem:[%s11821_s24 + $0x560] sm:$0xf] }
 0x3d1   : > { %7710 = vmatpush.bf16.msra.mxu2 %v9782_v5  ;;  %v9837_v50 = vld [vmem:[%s11821_s24 + $0x6f0] sm:$0xf]  ;;  %v9774_v59 = vor.u32 %v11172_v37, %v9773_v8  ;;  %v11188_v41 = vld [vmem:[%s11821_s24 + $0x6f4] sm:$0xf0]  ;;  %v11138_v54 = vld [vmem:[%s11821_s24 + $0x564] sm:$0xf0] }
 0x3d2   : > { %7723 = vmatpush.bf16.msra.mxu3 %v9846_v49  ;;  %v9838_v12 = vor.u32 %v11188_v41, %v9837_v50  ;;  %v9701_v26 = vld [vmem:[%s11821_s24 + $0x5e0] sm:$0xf]  ;;  %v11154_v51 = vld [vmem:[%s11821_s24 + $0x5e4] sm:$0xf0]  ;;  %v9638_v15 = vor.u32 %v11138_v54, %v9637_v62  ;;  %v9629_v22 = vld [vmem:[%s11821_s24 + $0x550] sm:$0xf] }
 0x3d3   : > { %v9765_v48 = vld [vmem:[%s11821_s24 + $0x660] sm:$0xf]  ;;  %7685 = vmatpush.bf16.msra.mxu0 %v9646_v13  ;;  %v11170_v40 = vld [vmem:[%s11821_s24 + $0x664] sm:$0xf0]  ;;  %v9702_v6 = vor.u32 %v11154_v51, %v9701_v26  ;;  %v11136_v21 = vld [vmem:[%s11821_s24 + $0x554] sm:$0xf0] }
 0x3d4   : > { %v9829_v58 = vld [vmem:[%s11821_s24 + $0x6e0] sm:$0xf]  ;;  %v11186_v36 = vld [vmem:[%s11821_s24 + $0x6e4] sm:$0xf0]  ;;  %7698 = vmatpush.bf16.msra.mxu1 %v9710_v60  ;;  %v9766_v17 = vor.u32 %v11170_v40, %v9765_v48  ;;  %v9693_v16 = vld [vmem:[%s11821_s24 + $0x5d0] sm:$0xf]  ;;  %v9630_v47 = vor.u32 %v11136_v21, %v9629_v22 }
 0x3d5   : > { %7711 = vmatpush.bf16.msra.mxu2 %v9774_v59  ;;  %v9830_v9 = vor.u32 %v11186_v36, %v9829_v58  ;;  %v11152_v27 = vld [vmem:[%s11821_s24 + $0x5d4] sm:$0xf0]  ;;  %v9757_v39 = vld [vmem:[%s11821_s24 + $0x650] sm:$0xf]  ;;  %v9621_v38 = vld [vmem:[%s11821_s24 + $0x540] sm:$0xf] }
 0x3d6   : > { %7724 = vmatpush.bf16.msra.mxu3 %v9838_v12  ;;  %v11168_v34 = vld [vmem:[%s11821_s24 + $0x654] sm:$0xf0]  ;;  %v9821_v44 = vld [vmem:[%s11821_s24 + $0x6d0] sm:$0xf]  ;;  %v9694_v30 = vor.u32 %v11152_v27, %v9693_v16  ;;  %v11134_v24 = vld [vmem:[%s11821_s24 + $0x544] sm:$0xf0] }
 0x3d7   : > { %v11184_v23 = vld [vmem:[%s11821_s24 + $0x6d4] sm:$0xf0]  ;;  %7686 = vmatpush.bf16.msra.mxu0 %v9638_v15  ;;  %v9758_v20 = vor.u32 %v11168_v34, %v9757_v39  ;;  %v9685_v53 = vld [vmem:[%s11821_s24 + $0x5c0] sm:$0xf]  ;;  %v11150_v56 = vld [vmem:[%s11821_s24 + $0x5c4] sm:$0xf0]  ;;  %v9622_v42 = vor.u32 %v11134_v24, %v9621_v38 }
 0x3d8   : > { %7699 = vmatpush.bf16.msra.mxu1 %v9702_v6  ;;  %v9822_v3 = vor.u32 %v11184_v23, %v9821_v44  ;;  %v9749_v31 = vld [vmem:[%s11821_s24 + $0x640] sm:$0xf]  ;;  %v11166_v10 = vld [vmem:[%s11821_s24 + $0x644] sm:$0xf0]  ;;  %v9686_v11 = vor.u32 %v11150_v56, %v9685_v53  ;;  %v9613_v14 = vld [vmem:[%s11821_s24 + $0x530] sm:$0xf] }
 0x3d9   : > { %7712 = vmatpush.bf16.msra.mxu2 %v9766_v17  ;;  %v9813_v55 = vld [vmem:[%s11821_s24 + $0x6c0] sm:$0xf]  ;;  %v11182_v45 = vld [vmem:[%s11821_s24 + $0x6c4] sm:$0xf0]  ;;  %v9750_v1 = vor.u32 %v11166_v10, %v9749_v31  ;;  %v11132_v28 = vld [vmem:[%s11821_s24 + $0x534] sm:$0xf0] }
 0x3da   : > { %7725 = vmatpush.bf16.msra.mxu3 %v9830_v9  ;;  %v9677_v63 = vld [vmem:[%s11821_s24 + $0x5b0] sm:$0xf]  ;;  %v9814_v25 = vor.u32 %v11182_v45, %v9813_v55  ;;  %v11148_v18 = vld [vmem:[%s11821_s24 + $0x5b4] sm:$0xf0]  ;;  %v9614_v29 = vor.u32 %v11132_v28, %v9613_v14  ;;  %v9605_v46 = vld [vmem:[%s11821_s24 + $0x520] sm:$0xf] }
 0x3db   : > { %7687 = vmatpush.bf16.msra.mxu0 %v9630_v47  ;;  %v9741_v61 = vld [vmem:[%s11821_s24 + $0x630] sm:$0xf]  ;;  %v11164_v33 = vld [vmem:[%s11821_s24 + $0x634] sm:$0xf0]  ;;  %v9678_v2 = vor.u32 %v11148_v18, %v9677_v63  ;;  %v11130_v5 = vld [vmem:[%s11821_s24 + $0x524] sm:$0xf0] }
 0x3dc   : > { %7700 = vmatpush.bf16.msra.mxu1 %v9694_v30  ;;  %v9805_v52 = vld [vmem:[%s11821_s24 + $0x6b0] sm:$0xf]  ;;  %v11180_v0 = vld [vmem:[%s11821_s24 + $0x6b4] sm:$0xf0]  ;;  %v9742_v19 = vor.u32 %v11164_v33, %v9741_v61  ;;  %v9669_v4 = vld [vmem:[%s11821_s24 + $0x5a0] sm:$0xf]  ;;  %v9606_v60 = vor.u32 %v11130_v5, %v9605_v46 }
 0x3dd   : > { %7713 = vmatpush.bf16.msra.mxu2 %v9758_v20  ;;  %v9806_v43 = vor.u32 %v11180_v0, %v9805_v52  ;;  %v11146_v32 = vld [vmem:[%s11821_s24 + $0x5a4] sm:$0xf0]  ;;  %v9733_v49 = vld [vmem:[%s11821_s24 + $0x620] sm:$0xf]  ;;  %v9597_v13 = vld [vmem:[%s11821_s24 + $0x510] sm:$0xf] }
 0x3de   : > { %7726 = vmatpush.bf16.msra.mxu3 %v9822_v3  ;;  %v11162_v57 = vld [vmem:[%s11821_s24 + $0x624] sm:$0xf0]  ;;  %v9797_v7 = vld [vmem:[%s11821_s24 + $0x6a0] sm:$0xf]  ;;  %v11128_v8 = vld [vmem:[%s11821_s24 + $0x514] sm:$0xf0]  ;;  %v9670_v59 = vor.u32 %v11146_v32, %v9669_v4 }
 0x3df   : > { %7688 = vmatpush.bf16.msra.mxu0 %v9622_v42  ;;  %v11178_v35 = vld [vmem:[%s11821_s24 + $0x6a4] sm:$0xf0]  ;;  %v9661_v37 = vld [vmem:[%s11821_s24 + $0x590] sm:$0xf]  ;;  %v11144_v50 = vld [vmem:[%s11821_s24 + $0x594] sm:$0xf0]  ;;  %v9734_v41 = vor.u32 %v11162_v57, %v9733_v49  ;;  %v9598_v6 = vor.u32 %v11128_v8, %v9597_v13 }
 0x3e0   : > { %7701 = vmatpush.bf16.msra.mxu1 %v9686_v11  ;;  %v9725_v62 = vld [vmem:[%s11821_s24 + $0x610] sm:$0xf]  ;;  %v11160_v54 = vld [vmem:[%s11821_s24 + $0x614] sm:$0xf0]  ;;  %v9798_v26 = vor.u32 %v11178_v35, %v9797_v7  ;;  %v9909_v48 = vld [vmem:[%s11821_s24 + $0x780] sm:$0xf]  ;;  %v9662_v21 = vor.u32 %v11144_v50, %v9661_v37 }
 0x3e1   : > { %7714 = vmatpush.bf16.msra.mxu2 %v9750_v1  ;;  %v9789_v12 = vld [vmem:[%s11821_s24 + $0x690] sm:$0xf]  ;;  %v11176_v51 = vld [vmem:[%s11821_s24 + $0x694] sm:$0xf0]  ;;  %v11206_v15 = vld [vmem:[%s11821_s24 + $0x784] sm:$0xf0]  ;;  %v9726_v16 = vor.u32 %v11160_v54, %v9725_v62 }
 0x3e2   : > { %7727 = vmatpush.bf16.msra.mxu3 %v9814_v25  ;;  %v9973_v40 = vld [vmem:[%s11821_s24 + $0x800] sm:$0xf]  ;;  %v11222_v58 = vld [vmem:[%s11821_s24 + $0x804] sm:$0xf0]  ;;  %v9790_v39 = vor.u32 %v11176_v51, %v9789_v12  ;;  %v9910_v34 = vor.u32 %v11206_v15, %v9909_v48  ;;  %v9901_v47 = vld [vmem:[%s11821_s24 + $0x770] sm:$0xf] }
 0x3e3   : > { %7689 = vmatpush.bf16.msra.mxu0 %v9614_v29  ;;  %v6681_v36 = vld [vmem:[#allocation2 + $0xb] sm:$0xff]  ;;  %v10037_v17 = vld [vmem:[%s11821_s24 + $0x880] sm:$0xf]  ;;  %v9974_v44 = vor.u32 %v11222_v58, %v9973_v40  ;;  %v11204_v30 = vld [vmem:[%s11821_s24 + $0x774] sm:$0xf0]  ;;  %vm7681_vm13 = vcmask 130048  }
 0x3e4   : > { %7702 = vmatpush.bf16.msra.mxu1 %v9678_v2  ;;  %v11238_v22 = vld [vmem:[%s11821_s24 + $0x884] sm:$0xf0]  ;;  %6847 = vst [vmem:[#allocation1] ss:$9 sm:$0xff] %v6681_v36  ;;  %v10101_v9 = vld [vmem:[%s11821_s24 + $0x900] sm:$0xf]  ;;  %v9902_v10 = vor.u32 %v11204_v30, %v9901_v47 }
 0x3e5   : > { %7715 = vmatpush.bf16.msra.mxu2 %v9742_v19  ;;  %v11254_v27 = vld [vmem:[%s11821_s24 + $0x904] sm:$0xf0]  ;;  %v10038_v23 = vor.u32 %v11238_v22, %v10037_v17  ;;  %v9965_v20 = vld [vmem:[%s11821_s24 + $0x7f0] sm:$0xf]  ;;  %v11220_v24 = vld [vmem:[%s11821_s24 + $0x7f4] sm:$0xf0] }
 0x3e6   : > { %7728 = vmatpush.bf16.msra.mxu3 %v9806_v43  ;;  %v10102_v38 = vor.u32 %v11254_v27, %v10101_v9  ;;  %v10029_v53 = vld [vmem:[%s11821_s24 + $0x870] sm:$0xf]  ;;  %v11236_v3 = vld [vmem:[%s11821_s24 + $0x874] sm:$0xf0]  ;;  %v9893_v55 = vld [vmem:[%s11821_s24 + $0x760] sm:$0xf]  ;;  %v9966_v42 = vor.u32 %v11220_v24, %v9965_v20 }
 0x3e7   : > { %7690 = vmatpush.bf16.msra.mxu0 %v9606_v60  ;;  %v10093_v56 = vld [vmem:[%s11821_s24 + $0x8f0] sm:$0xf]  ;;  %v11252_v31 = vld [vmem:[%s11821_s24 + $0x8f4] sm:$0xf0]  ;;  %v11202_v45 = vld [vmem:[%s11821_s24 + $0x764] sm:$0xf0]  ;;  %v10030_v11 = vor.u32 %v11236_v3, %v10029_v53 }
 0x3e8   : > { %7703 = vmatpush.bf16.msra.mxu1 %v9670_v59  ;;  %v9957_v14 = vld [vmem:[%s11821_s24 + $0x7e0] sm:$0xf]  ;;  %v10094_v63 = vor.u32 %v11252_v31, %v10093_v56  ;;  %v11218_v25 = vld [vmem:[%s11821_s24 + $0x7e4] sm:$0xf0]  ;;  %v9894_v29 = vor.u32 %v11202_v45, %v9893_v55  ;;  %v9885_v5 = vld [vmem:[%s11821_s24 + $0x750] sm:$0xf] }
 0x3e9   : > { %7716 = vmatpush.bf16.msra.mxu2 %v9734_v41  ;;  %v10021_v18 = vld [vmem:[%s11821_s24 + $0x860] sm:$0xf]  ;;  %v11234_v61 = vld [vmem:[%s11821_s24 + $0x864] sm:$0xf0]  ;;  %v9958_v19 = vor.u32 %v11218_v25, %v9957_v14  ;;  %v11200_v4 = vld [vmem:[%s11821_s24 + $0x754] sm:$0xf0] }
 0x3ea   : > { %7729 = vmatpush.bf16.msra.mxu3 %v9798_v26  ;;  %v10085_v33 = vld [vmem:[%s11821_s24 + $0x8e0] sm:$0xf]  ;;  %v11250_v52 = vld [vmem:[%s11821_s24 + $0x8e4] sm:$0xf0]  ;;  %v10022_v46 = vor.u32 %v11234_v61, %v10021_v18  ;;  %v9949_v43 = vld [vmem:[%s11821_s24 + $0x7d0] sm:$0xf]  ;;  %v9886_v60 = vor.u32 %v11200_v4, %v9885_v5 }
 0x3eb   : > { %7691 = vmatpush.bf16.msra.mxu0 %v9598_v6  ;;  %v15495_v1 = vld [vmem:[#allocation1 + $0x12] sm:$0xff]  ;;  %v15498_v28 = vld [vmem:[#allocation1] sm:$0xff]  ;;  %v15507_v0 = vld [vmem:[#allocation1 + $0x9] sm:$0xff]  ;;  %v10086_v32 = vor.u32 %v11250_v52, %v10085_v33  ;;  %vm9259_vm14 = vcmask 9216   ;;  %p10959_p5 = scmp.ne.s32.totalorder %s11704_s28, 3 }
 0x3ec   : > { %7704 = vmatpush.bf16.msra.mxu1 %v9662_v21  ;;  %v15510_v2 = vld [vmem:[#allocation1 + $0x1b] sm:$0xff]  ;;  %v11216_v49 = vld [vmem:[%s11821_s24 + $0x7d4] sm:$0xf0]  ;;  %v9877_v50 = vld [vmem:[%s11821_s24 + $0x740] sm:$0xf] }
 0x3ed   : > { %7717 = vmatpush.bf16.msra.mxu2 %v9726_v16  ;;  %v10013_v57 = vld [vmem:[%s11821_s24 + $0x850] sm:$0xf]  ;;  %v11232_v7 = vld [vmem:[%s11821_s24 + $0x854] sm:$0xf0]  ;;  %v9950_v8 = vor.u32 %v11216_v49, %v9949_v43  ;;  %v11198_v59 = vld [vmem:[%s11821_s24 + $0x744] sm:$0xf0] }
 0x3ee   : > { %7730 = vmatpush.bf16.msra.mxu3 %v9790_v39  ;;  %7692 = vmatmul.bf16.vlgmr.msra.gmra.mxu0 %v15498_v28  ;;  %v10077_v35 = vld [vmem:[%s11821_s24 + $0x8d0] sm:$0xf]  ;;  %v11248_v13 = vld [vmem:[%s11821_s24 + $0x8d4] sm:$0xf0]  ;;  %v10014_v37 = vor.u32 %v11232_v7, %v10013_v57  ;;  %v9941_v41 = vld [vmem:[%s11821_s24 + $0x7c0] sm:$0xf]  ;;  %v9878_v15 = vor.u32 %v11198_v59, %v9877_v50 }
 0x3ef   : > { %7736 = vmatpush.bf16.msrb.mxu0 %v9910_v34  ;;  %7705 = vmatmul.bf16.vlgmr.msra.gmra.mxu1 %v15507_v0  ;;  %v10078_v62 = vor.u32 %v11248_v13, %v10077_v35  ;;  %v11214_v54 = vld [vmem:[%s11821_s24 + $0x7c4] sm:$0xf0]  ;;  %v10005_v12 = vld [vmem:[%s11821_s24 + $0x840] sm:$0xf]  ;;  %v9869_v40 = vld [vmem:[%s11821_s24 + $0x730] sm:$0xf] }
 0x3f0   : > { %7749 = vmatpush.bf16.msrb.mxu1 %v9974_v44  ;;  %7718 = vmatmul.bf16.vlgmr.msra.gmra.mxu2 %v15495_v1  ;;  %v11230_v26 = vld [vmem:[%s11821_s24 + $0x844] sm:$0xf0]  ;;  %v10069_v51 = vld [vmem:[%s11821_s24 + $0x8c0] sm:$0xf]  ;;  %v11196_v58 = vld [vmem:[%s11821_s24 + $0x734] sm:$0xf0]  ;;  %v9942_v36 = vor.u32 %v11214_v54, %v9941_v41 }
 0x3f1   : > { %7762 = vmatpush.bf16.msrb.mxu2 %v10038_v23  ;;  %7731 = vmatmul.bf16.vlgmr.msra.gmra.mxu3 %v15510_v2  ;;  %v11246_v48 = vld [vmem:[%s11821_s24 + $0x8c4] sm:$0xf0]  ;;  %v10006_v6 = vor.u32 %v11230_v26, %v10005_v12  ;;  %v9933_v17 = vld [vmem:[%s11821_s24 + $0x7b0] sm:$0xf]  ;;  %v11212_v22 = vld [vmem:[%s11821_s24 + $0x7b4] sm:$0xf0]  ;;  %v9870_v47 = vor.u32 %v11196_v58, %v9869_v40 }
 0x3f2   : > { %7775 = vmatpush.bf16.msrb.mxu3 %v10102_v38  ;;  %v9997_v21 = vld [vmem:[%s11821_s24 + $0x830] sm:$0xf]  ;;  %v10070_v16 = vor.u32 %v11246_v48, %v10069_v51  ;;  %v11228_v9 = vld [vmem:[%s11821_s24 + $0x834] sm:$0xf0]  ;;  %v9861_v34 = vld [vmem:[%s11821_s24 + $0x720] sm:$0xf]  ;;  %v9934_v24 = vor.u32 %v11212_v22, %v9933_v17 }
 0x3f3   : > { %7737 = vmatpush.bf16.msrb.mxu0 %v9902_v10  ;;  %v10061_v27 = vld [vmem:[%s11821_s24 + $0x8b0] sm:$0xf]  ;;  %v11244_v39 = vld [vmem:[%s11821_s24 + $0x8b4] sm:$0xf0]  ;;  %v15542_v30 = vld [vmem:[#allocation1 + $0x2d] sm:$0xff]  ;;  %v9998_v53 = vor.u32 %v11228_v9, %v9997_v21 }
 0x3f4   : > { %7750 = vmatpush.bf16.msrb.mxu1 %v9966_v42  ;;  %v15538_v44 = vld [vmem:[#allocation1 + $0x24] sm:$0xff]  ;;  %v15540_v23 = vld [vmem:[#allocation1 + $0x36] sm:$0xff]  ;;  %v9925_v56 = vld [vmem:[%s11821_s24 + $0x7a0] sm:$0xf]  ;;  %v10062_v31 = vor.u32 %v11244_v39, %v10061_v27 }
 0x3f5   : > { %7763 = vmatpush.bf16.msrb.mxu2 %v10030_v11  ;;  %v6682_v20 = vld [vmem:[#allocation2 + $0x13] sm:$0x7]  ;;  %v15544_v38 = vld [vmem:[#allocation1 + $0x3f] sm:$0xff]  ;;  %v11194_v3 = vld [vmem:[%s11821_s24 + $0x724] sm:$0xf0] }
 0x3f6   : > { %7776 = vmatpush.bf16.msrb.mxu3 %v10094_v63  ;;  %6857 = vst [vmem:[#allocation1] ss:$9 sm:$0xff] %v6682_v20  ;;  %v11210_v10 = vld [vmem:[%s11821_s24 + $0x7a4] sm:$0xf0]  ;;  %v9989_v55 = vld [vmem:[%s11821_s24 + $0x820] sm:$0xf]  ;;  %v9862_v14 = vor.u32 %v11194_v3, %v9861_v34 }
 0x3f7   : > { %7738 = vmatpush.bf16.msrb.mxu0 %v9894_v29  ;;  %v11226_v45 = vld [vmem:[%s11821_s24 + $0x824] sm:$0xf0]  ;;  %v10053_v42 = vld [vmem:[%s11821_s24 + $0x8a0] sm:$0xf]  ;;  %v9853_v63 = vld [vmem:[%s11821_s24 + $0x710] sm:$0xf]  ;;  %v9926_v18 = vor.u32 %v11210_v10, %v9925_v56 }
 0x3f8   : > { %7751 = vmatpush.bf16.msrb.mxu1 %v9958_v19  ;;  %v11242_v11 = vld [vmem:[%s11821_s24 + $0x8a4] sm:$0xf0]  ;;  %v11192_v25 = vld [vmem:[%s11821_s24 + $0x714] sm:$0xf0]  ;;  %v9990_v61 = vor.u32 %v11226_v45, %v9989_v55  ;;  %v9917_v33 = vld [vmem:[%s11821_s24 + $0x790] sm:$0xf] }
 0x3f9   : > { %7764 = vmatpush.bf16.msrb.mxu2 %v10022_v46  ;;  %v11208_v52 = vld [vmem:[%s11821_s24 + $0x794] sm:$0xf0]  ;;  %v9981_v29 = vld [vmem:[%s11821_s24 + $0x810] sm:$0xf]  ;;  %v10054_v19 = vor.u32 %v11242_v11, %v10053_v42  ;;  %v10165_v43 = vld [vmem:[%s11821_s24 + $0x980] sm:$0xf]  ;;  %v9854_v57 = vor.u32 %v11192_v25, %v9853_v63 }
 0x3fa   : > { %7777 = vmatpush.bf16.msrb.mxu3 %v10086_v32  ;;  %v11224_v46 = vld [vmem:[%s11821_s24 + $0x814] sm:$0xf0]  ;;  %v10045_v5 = vld [vmem:[%s11821_s24 + $0x890] sm:$0xf]  ;;  %v11270_v32 = vld [vmem:[%s11821_s24 + $0x984] sm:$0xf0] }
 0x3fb   : > { %7739 = vmatpush.bf16.msrb.mxu0 %v9886_v60  ;;  %v11240_v4 = vld [vmem:[%s11821_s24 + $0x894] sm:$0xf0]  ;;  %v10229_v49 = vld [vmem:[%s11821_s24 + $0xa00] sm:$0xf]  ;;  %v11286_v7 = vld [vmem:[%s11821_s24 + $0xa04] sm:$0xf0]  ;;  %v9918_v60 = vor.u32 %v11208_v52, %v9917_v33  ;;  %v10166_v50 = vor.u32 %v11270_v32, %v10165_v43 }
 0x3fc   : > { %7752 = vmatpush.bf16.msrb.mxu1 %v9950_v8  ;;  %v11141_v35 = vld [vmem:[%s11821_s24 + $0x584] sm:$0xf]  ;;  %v9655_v13 = vld [vmem:[%s11821_s24 + $0x588] sm:$0xf0]  ;;  %v9982_v8 = vor.u32 %v11224_v46, %v9981_v29  ;;  %v10237_v59 = vld [vmem:[%s11821_s24 + $0xa10] sm:$0xf] }
 0x3fd   : > { %7765 = vmatpush.bf16.msrb.mxu2 %v10014_v37  ;;  %v10046_v37 = vor.u32 %v11240_v4, %v10045_v5  ;;  %v11288_v41 = vld [vmem:[%s11821_s24 + $0xa14] sm:$0xf0]  ;;  %v9658_v54 = vor.u32 %v11141_v35, %v9655_v13  ;;  %v11157_v12 = vld [vmem:[%s11821_s24 + $0x604] sm:$0xf]  ;;  %v9719_v26 = vld [vmem:[%s11821_s24 + $0x608] sm:$0xf0] }
 0x3fe   : > { %7778 = vmatpush.bf16.msrb.mxu3 %v10078_v62  ;;  %v10230_v62 = vor.u32 %v11286_v7, %v10229_v49  ;;  %v10157_v51 = vld [vmem:[%s11821_s24 + $0x970] sm:$0xf]  ;;  %v11268_v48 = vld [vmem:[%s11821_s24 + $0x974] sm:$0xf0]  ;;  %v10238_v58 = vor.u32 %v11288_v41, %v10237_v59  ;;  %v9722_v17 = vor.u32 %v11157_v12, %v9719_v26  ;;  %v9711_v9 = vld [vmem:[%s11821_s24 + $0x5f8] sm:$0xf0] }
 0x3ff   : > { %7740 = vmatpush.bf16.msrb.mxu0 %v9878_v15  ;;  %v10221_v15 = vld [vmem:[%s11821_s24 + $0x9f0] sm:$0xf]  ;;  %v11284_v40 = vld [vmem:[%s11821_s24 + $0x9f4] sm:$0xf0]  ;;  %v10158_v22 = vor.u32 %v11268_v48, %v10157_v51  ;;  %v10149_v27 = vld [vmem:[%s11821_s24 + $0x960] sm:$0xf] }
 0x400   : > { %7753 = vmatpush.bf16.msrb.mxu1 %v9942_v36  ;;  %v11139_v36 = vld [vmem:[%s11821_s24 + $0x574] sm:$0xf]  ;;  %v10222_v21 = vor.u32 %v11284_v40, %v10221_v15  ;;  %v11266_v34 = vld [vmem:[%s11821_s24 + $0x964] sm:$0xf0]  ;;  %v11153_v10 = vld [vmem:[%s11821_s24 + $0x5e4] sm:$0xf] }
 0x401   : > { %7766 = vmatpush.bf16.msrb.mxu2 %v10006_v6  ;;  %v9647_v6 = vld [vmem:[%s11821_s24 + $0x578] sm:$0xf0]  ;;  %v11282_v20 = vld [vmem:[%s11821_s24 + $0x9e4] sm:$0xf0]  ;;  %v10150_v56 = vor.u32 %v11266_v34, %v10149_v27  ;;  %v9703_v55 = vld [vmem:[%s11821_s24 + $0x5e8] sm:$0xf0] }
 0x402   : > { %7779 = vmatpush.bf16.msrb.mxu3 %v10070_v16  ;;  %v11155_v16 = vld [vmem:[%s11821_s24 + $0x5f4] sm:$0xf]  ;;  %v9650_v39 = vor.u32 %v11139_v36, %v9647_v6  ;;  %v10141_v45 = vld [vmem:[%s11821_s24 + $0x950] sm:$0xf]  ;;  %v11264_v11 = vld [vmem:[%s11821_s24 + $0x954] sm:$0xf0] }
 0x403   : > { %7741 = vmatpush.bf16.msrb.mxu0 %v9870_v47  ;;  %v10213_v47 = vld [vmem:[%s11821_s24 + $0x9e0] sm:$0xf]  ;;  %v9714_v3 = vor.u32 %v11155_v16, %v9711_v9  ;;  %v11280_v63 = vld [vmem:[%s11821_s24 + $0x9d4] sm:$0xf0]  ;;  %v11135_v25 = vld [vmem:[%s11821_s24 + $0x554] sm:$0xf]  ;;  %v10142_v33 = vor.u32 %v11264_v11, %v10141_v45 }
 0x404   : > { %7754 = vmatpush.bf16.msrb.mxu1 %v9934_v24  ;;  %v11137_v24 = vld [vmem:[%s11821_s24 + $0x564] sm:$0xf]  ;;  %v11151_v29 = vld [vmem:[%s11821_s24 + $0x5d4] sm:$0xf]  ;;  %v10133_v46 = vld [vmem:[%s11821_s24 + $0x940] sm:$0xf] }
 0x405   : > { %7767 = vmatpush.bf16.msrb.mxu2 %v9998_v53  ;;  %v9639_v53 = vld [vmem:[%s11821_s24 + $0x568] sm:$0xf0]  ;;  %v11262_v4 = vld [vmem:[%s11821_s24 + $0x944] sm:$0xf0]  ;;  %v10197_v43 = vld [vmem:[%s11821_s24 + $0x9c0] sm:$0xf] }
 0x406   : > { %7780 = vmatpush.bf16.msrb.mxu3 %v10062_v31  ;;  %v10214_v31 = vor.u32 %v11282_v20, %v10213_v47  ;;  %v9642_v42 = vor.u32 %v11137_v24, %v9639_v53  ;;  %v11278_v32 = vld [vmem:[%s11821_s24 + $0x9c4] sm:$0xf0]  ;;  %v11133_v49 = vld [vmem:[%s11821_s24 + $0x544] sm:$0xf]  ;;  %v10134_v35 = vor.u32 %v11262_v4, %v10133_v46  ;;  %v11260_v59 = vld [vmem:[%s11821_s24 + $0x934] sm:$0xf0] }
 0x407   : > { %7742 = vmatpush.bf16.msrb.mxu0 %v9862_v14  ;;  %v10205_v14 = vld [vmem:[%s11821_s24 + $0x9d0] sm:$0xf]  ;;  %v10198_v13 = vor.u32 %v11278_v32, %v10197_v43  ;;  %v9615_v12 = vld [vmem:[%s11821_s24 + $0x538] sm:$0xf0]  ;;  %v15613_v26 = vld [vmem:[#allocation1 + $0x12] sm:$0xff] }
 0x408   : > { %7755 = vmatpush.bf16.msrb.mxu1 %v9926_v18  ;;  %v9631_v18 = vld [vmem:[%s11821_s24 + $0x558] sm:$0xf0]  ;;  %v10206_v52 = vor.u32 %v11280_v63, %v10205_v14  ;;  %v10189_v41 = vld [vmem:[%s11821_s24 + $0x9b0] sm:$0xf]  ;;  %v11147_v40 = vld [vmem:[%s11821_s24 + $0x5b4] sm:$0xf] }
 0x409   : > { %7768 = vmatpush.bf16.msrb.mxu2 %v9990_v61  ;;  %v9706_v61 = vor.u32 %v11153_v10, %v9703_v55  ;;  %v9634_v5 = vor.u32 %v11135_v25, %v9631_v18  ;;  %v10117_v36 = vld [vmem:[%s11821_s24 + $0x920] sm:$0xf]  ;;  %v11129_v16 = vld [vmem:[%s11821_s24 + $0x524] sm:$0xf]  ;;  %v9607_v9 = vld [vmem:[%s11821_s24 + $0x528] sm:$0xf0] }
 0x40a   : > { %7781 = vmatpush.bf16.msrb.mxu3 %v10054_v19  ;;  %v9695_v19 = vld [vmem:[%s11821_s24 + $0x5d8] sm:$0xf0]  ;;  %v9671_v34 = vld [vmem:[%s11821_s24 + $0x5a8] sm:$0xf0]  ;;  %v10109_v24 = vld [vmem:[%s11821_s24 + $0x910] sm:$0xf] }
 0x40b   : > { %7743 = vmatpush.bf16.msrb.mxu0 %v9854_v57  ;;  %v9623_v57 = vld [vmem:[%s11821_s24 + $0x548] sm:$0xf0]  ;;  %v9698_v7 = vor.u32 %v11151_v29, %v9695_v19  ;;  %v11256_v53 = vld [vmem:[%s11821_s24 + $0x914] sm:$0xf0]  ;;  %v11127_v10 = vld [vmem:[%s11821_s24 + $0x514] sm:$0xf] }
 0x40c   : > { %7756 = vmatpush.bf16.msrb.mxu1 %v9918_v60  ;;  %v11149_v60 = vld [vmem:[%s11821_s24 + $0x5c4] sm:$0xf]  ;;  %v9599_v55 = vld [vmem:[%s11821_s24 + $0x518] sm:$0xf0]  ;;  %v9847_v63 = vld [vmem:[%s11821_s24 + $0x708] sm:$0xf0] }
 0x40d   : > { %7769 = vmatpush.bf16.msrb.mxu2 %v9982_v8  ;;  %v9687_v8 = vld [vmem:[%s11821_s24 + $0x5c8] sm:$0xf0]  ;;  %v11173_v45 = vld [vmem:[%s11821_s24 + $0x684] sm:$0xf]  ;;  %v9663_v29 = vld [vmem:[%s11821_s24 + $0x598] sm:$0xf0]  ;;  %v9602_v19 = vor.u32 %v11127_v10, %v9599_v55 }
 0x40e   : > { %7782 = vmatpush.bf16.msrb.mxu3 %v10046_v37  ;;  %7744 = vmatmul.bf16.vlgmr.msrb.gmra.mxu0 %v15538_v44  ;;  %v10125_v37 = vld [vmem:[%s11821_s24 + $0x930] sm:$0xf]  ;;  %v9690_v51 = vor.u32 %v11149_v60, %v9687_v8  ;;  %v11189_v11 = vld [vmem:[%s11821_s24 + $0x704] sm:$0xf]  ;;  %v9911_v18 = vld [vmem:[%s11821_s24 + $0x788] sm:$0xf0] }
 0x40f   : > { %7788 = vmatpush.bf16.msra.mxu0 %v10166_v50  ;;  %7757 = vmatmul.bf16.vlgmr.msrb.gmra.mxu1 %v15542_v30  ;;  %v9626_v50 = vor.u32 %v11133_v49, %v9623_v57  ;;  %v10126_v48 = vor.u32 %v11260_v59, %v10125_v37  ;;  %v11205_v25 = vld [vmem:[%s11821_s24 + $0x784] sm:$0xf]  ;;  %v9975_v4 = vld [vmem:[%s11821_s24 + $0x808] sm:$0xf0]  ;;  %v9850_v43 = vor.u32 %v11189_v11, %v9847_v63  ;;  %v11171_v49 = vld [vmem:[%s11821_s24 + $0x674] sm:$0xf] }
 0x410   : > { %7801 = vmatpush.bf16.msra.mxu1 %v10230_v62  ;;  %7770 = vmatmul.bf16.vlgmr.msrb.gmra.mxu2 %v15540_v23  ;;  %v11276_v62 = vld [vmem:[%s11821_s24 + $0x9b4] sm:$0xf0]  ;;  %v9914_v32 = vor.u32 %v11205_v25, %v9911_v18  ;;  %v9775_v57 = vld [vmem:[%s11821_s24 + $0x678] sm:$0xf0]  ;;  %v11203_v60 = vld [vmem:[%s11821_s24 + $0x774] sm:$0xf] }
 0x411   : > { %7821 = vmatpush.bf16.msra.mxu2 %v10238_v58  ;;  %7783 = vmatmul.bf16.vlgmr.msrb.gmra.mxu3 %v15544_v38  ;;  %v10190_v15 = vor.u32 %v11276_v62, %v10189_v41  ;;  %v9679_v58 = vld [vmem:[%s11821_s24 + $0x5b8] sm:$0xf0]  ;;  %v15649_v37 = vld [vmem:[#allocation1] sm:$0xff]  ;;  %v9778_v41 = vor.u32 %v11171_v49, %v9775_v57  ;;  %v11181_v11 = vld [vmem:[%s11821_s24 + $0x6c4] sm:$0xf] }
 0x412   : > { %7827 = vmatpush.bf16.msra.mxu3 %v9658_v54  ;;  %v11131_v54 = vld [vmem:[%s11821_s24 + $0x534] sm:$0xf]  ;;  %v9682_v27 = vor.u32 %v11147_v40, %v9679_v58  ;;  %v9903_v8 = vld [vmem:[%s11821_s24 + $0x778] sm:$0xf0]  ;;  %v11185_v40 = vld [vmem:[%s11821_s24 + $0x6e4] sm:$0xf] }
 0x413   : > { %7789 = vmatpush.bf16.msra.mxu0 %v10158_v22  ;;  %v9618_v6 = vor.u32 %v11131_v54, %v9615_v12  ;;  %v10181_v22 = vld [vmem:[%s11821_s24 + $0x9a0] sm:$0xf]  ;;  %v11219_v62 = vld [vmem:[%s11821_s24 + $0x7f4] sm:$0xf]  ;;  %v9967_v54 = vld [vmem:[%s11821_s24 + $0x7f8] sm:$0xf0] }
 0x414   : > { %7802 = vmatpush.bf16.msra.mxu1 %v10222_v21  ;;  %v11274_v21 = vld [vmem:[%s11821_s24 + $0x9a4] sm:$0xf0]  ;;  %v15651_v59 = vld [vmem:[#allocation1 + $0x9] sm:$0xff]  ;;  %v9831_v58 = vld [vmem:[%s11821_s24 + $0x6e8] sm:$0xf0] }
 0x415   : > { %7840 = vmatpush.bf16.msrb.mxu2 %v9722_v17  ;;  %v11258_v17 = vld [vmem:[%s11821_s24 + $0x924] sm:$0xf0]  ;;  %v10182_v20 = vor.u32 %v11274_v21, %v10181_v22  ;;  %v11217_v21 = vld [vmem:[%s11821_s24 + $0x7e4] sm:$0xf]  ;;  %v9879_v63 = vld [vmem:[%s11821_s24 + $0x748] sm:$0xf0] }
 0x416   : > { %7828 = vmatpush.bf16.msra.mxu3 %v9650_v39  ;;  %v11145_v39 = vld [vmem:[%s11821_s24 + $0x5a4] sm:$0xf]  ;;  %v10118_v47 = vor.u32 %v11258_v17, %v10117_v36  ;;  %v9970_v17 = vor.u32 %v11219_v62, %v9967_v54  ;;  %v9799_v62 = vld [vmem:[%s11821_s24 + $0x6a8] sm:$0xf0] }
 0x417   : > { %7790 = vmatpush.bf16.msra.mxu0 %v10150_v56  ;;  %v9610_v56 = vor.u32 %v11129_v16, %v9607_v9  ;;  %v9674_v14 = vor.u32 %v11145_v39, %v9671_v34  ;;  %v11201_v36 = vld [vmem:[%s11821_s24 + $0x764] sm:$0xf]  ;;  %v9959_v16 = vld [vmem:[%s11821_s24 + $0x7e8] sm:$0xf0]  ;;  %v9834_v9 = vor.u32 %v11185_v40, %v9831_v58  ;;  %v11167_v39 = vld [vmem:[%s11821_s24 + $0x654] sm:$0xf] }
 0x418   : > { %7803 = vmatpush.bf16.msra.mxu1 %v10214_v31  ;;  %v11272_v31 = vld [vmem:[%s11821_s24 + $0x994] sm:$0xf0]  ;;  %v9759_v34 = vld [vmem:[%s11821_s24 + $0x658] sm:$0xf0]  ;;  %v11193_v54 = vld [vmem:[%s11821_s24 + $0x724] sm:$0xf] }
 0x419   : > { %7841 = vmatpush.bf16.msrb.mxu2 %v9714_v3  ;;  %v10173_v3 = vld [vmem:[%s11821_s24 + $0x990] sm:$0xf]  ;;  %v9927_v40 = vld [vmem:[%s11821_s24 + $0x7a8] sm:$0xf0]  ;;  %v11159_v58 = vld [vmem:[%s11821_s24 + $0x614] sm:$0xf] }
 0x41a   : > { %7829 = vmatpush.bf16.msra.mxu3 %v9642_v42  ;;  %v9783_v42 = vld [vmem:[%s11821_s24 + $0x688] sm:$0xf0] }
 0x41b   : > { %7791 = vmatpush.bf16.msra.mxu0 %v10142_v33  ;;  %v10174_v33 = vor.u32 %v11272_v31, %v10173_v3  ;;  %v9786_v46 = vor.u32 %v11173_v45, %v9783_v42  ;;  %v9762_v3 = vor.u32 %v11167_v39, %v9759_v34  ;;  %v9951_v31 = vld [vmem:[%s11821_s24 + $0x7d8] sm:$0xf0]  ;;  %v11165_v45 = vld [vmem:[%s11821_s24 + $0x644] sm:$0xf]  ;;  %v9751_v42 = vld [vmem:[%s11821_s24 + $0x648] sm:$0xf0] }
 0x41c   : > { %7804 = vmatpush.bf16.msra.mxu1 %v10206_v52  ;;  %v11143_v52 = vld [vmem:[%s11821_s24 + $0x594] sm:$0xf]  ;;  %v9754_v18 = vor.u32 %v11165_v45, %v9751_v42  ;;  %v10039_v39 = vld [vmem:[%s11821_s24 + $0x888] sm:$0xf0] }
 0x41d   : > { %7842 = vmatpush.bf16.msrb.mxu2 %v9706_v61  ;;  %v10110_v61 = vor.u32 %v11256_v53, %v10109_v24  ;;  %v11199_v24 = vld [vmem:[%s11821_s24 + $0x754] sm:$0xf]  ;;  %v9887_v53 = vld [vmem:[%s11821_s24 + $0x758] sm:$0xf0]  ;;  %v10231_v45 = vld [vmem:[%s11821_s24 + $0xa08] sm:$0xf0] }
 0x41e   : > { %7830 = vmatpush.bf16.msra.mxu3 %v9634_v5  ;;  %v11221_v5 = vld [vmem:[%s11821_s24 + $0x804] sm:$0xf]  ;;  %v9890_v55 = vor.u32 %v11199_v24, %v9887_v53 }
 0x41f   : > { %7792 = vmatpush.bf16.msra.mxu0 %v10134_v35  ;;  %v9666_v35 = vor.u32 %v11143_v52, %v9663_v29  ;;  %v11269_v24 = vld [vmem:[%s11821_s24 + $0x984] sm:$0xf] }
 0x420   : > { %7805 = vmatpush.bf16.msra.mxu1 %v10198_v13  ;;  %10243 = vmatmul.msk.bf16.vlgmr.msra.gmra.mxu2 %vm7681_vm13, %v15613_v26  ;;  %v9839_v13 = vld [vmem:[%s11821_s24 + $0x6f8] sm:$0xf0] }
 0x421   : > { %7843 = vmatpush.bf16.msrb.mxu2 %v9698_v7  ;;  %v11187_v7 = vld [vmem:[%s11821_s24 + $0x6f4] sm:$0xf] }
 0x422   : > { %7831 = vmatpush.bf16.msra.mxu3 %v9626_v50  ;;  %v9978_v50 = vor.u32 %v11221_v5, %v9975_v4  ;;  %v9842_v12 = vor.u32 %v11187_v7, %v9839_v13  ;;  %v11179_v5 = vld [vmem:[%s11821_s24 + $0x6b4] sm:$0xf]  ;;  %v9807_v4 = vld [vmem:[%s11821_s24 + $0x6b8] sm:$0xf0] }
 0x423   : > { %7793 = vmatpush.bf16.msra.mxu0 %v10126_v48  ;;  %v11169_v48 = vld [vmem:[%s11821_s24 + $0x664] sm:$0xf]  ;;  %v11211_v7 = vld [vmem:[%s11821_s24 + $0x7b4] sm:$0xf]  ;;  %v9810_v13 = vor.u32 %v11179_v5, %v9807_v4 }
 0x424   : > { %7806 = vmatpush.bf16.msra.mxu1 %v10190_v15  ;;  %v9767_v15 = vld [vmem:[%s11821_s24 + $0x668] sm:$0xf0] }
 0x425   : > { %7844 = vmatpush.bf16.msrb.mxu2 %v9690_v51  ;;  %v9906_v51 = vor.u32 %v11203_v60, %v9903_v8  ;;  %v9770_v22 = vor.u32 %v11169_v48, %v9767_v15  ;;  %v11161_v8 = vld [vmem:[%s11821_s24 + $0x624] sm:$0xf] }
 0x426   : > { %7832 = vmatpush.bf16.msra.mxu3 %v9618_v6  ;;  %v9895_v6 = vld [vmem:[%s11821_s24 + $0x768] sm:$0xf0]  ;;  %v11209_v48 = vld [vmem:[%s11821_s24 + $0x7a4] sm:$0xf] }
 0x427   : > { %7794 = vmatpush.bf16.msra.mxu0 %v10118_v47  ;;  %v11183_v47 = vld [vmem:[%s11821_s24 + $0x6d4] sm:$0xf]  ;;  %v9930_v34 = vor.u32 %v11209_v48, %v9927_v40 }
 0x428   : > { %7807 = vmatpush.bf16.msra.mxu1 %v10182_v20  ;;  %v9823_v20 = vld [vmem:[%s11821_s24 + $0x6d8] sm:$0xf0]  ;;  %v11263_v48 = vld [vmem:[%s11821_s24 + $0x954] sm:$0xf] }
 0x429   : > { %7845 = vmatpush.bf16.msrb.mxu2 %v9682_v27  ;;  %v9898_v27 = vor.u32 %v11201_v36, %v9895_v6  ;;  %v9826_v10 = vor.u32 %v11183_v47, %v9823_v20  ;;  %v9727_v36 = vld [vmem:[%s11821_s24 + $0x618] sm:$0xf0]  ;;  %v11253_v47 = vld [vmem:[%s11821_s24 + $0x904] sm:$0xf]  ;;  %v10103_v20 = vld [vmem:[%s11821_s24 + $0x908] sm:$0xf0] }
 0x42a   : > { %7833 = vmatpush.bf16.msra.mxu3 %v9610_v56  ;;  %v11215_v56 = vld [vmem:[%s11821_s24 + $0x7d4] sm:$0xf]  ;;  %v9730_v53 = vor.u32 %v11159_v58, %v9727_v36  ;;  %v10207_v58 = vld [vmem:[%s11821_s24 + $0x9d8] sm:$0xf0] }
 0x42b   : > { %7795 = vmatpush.bf16.msra.mxu0 %v10110_v61  ;;  %v9954_v25 = vor.u32 %v11215_v56, %v9951_v31  ;;  %v11213_v61 = vld [vmem:[%s11821_s24 + $0x7c4] sm:$0xf]  ;;  %v9919_v56 = vld [vmem:[%s11821_s24 + $0x798] sm:$0xf0]  ;;  %v11279_v40 = vld [vmem:[%s11821_s24 + $0x9d4] sm:$0xf] }
 0x42c   : > { %7808 = vmatpush.bf16.msra.mxu1 %v10174_v33  ;;  %v9943_v33 = vld [vmem:[%s11821_s24 + $0x7c8] sm:$0xf0] }
 0x42d   : > { %7846 = vmatpush.bf16.msrb.mxu2 %v9674_v14  ;;  %v11197_v14 = vld [vmem:[%s11821_s24 + $0x744] sm:$0xf]  ;;  %v9946_v49 = vor.u32 %v11213_v61, %v9943_v33  ;;  %v10095_v61 = vld [vmem:[%s11821_s24 + $0x8f8] sm:$0xf0] }
 0x42e   : > { %7834 = vmatpush.bf16.msra.mxu3 %v9602_v19  ;;  %7796 = vmatmul.bf16.vlgmr.msra.gmra.mxu0 %v15649_v37  ;;  %v9882_v29 = vor.u32 %v11197_v14, %v9879_v63  ;;  %v11163_v19 = vld [vmem:[%s11821_s24 + $0x634] sm:$0xf] }
 0x42f   : > { %7853 = vmatpush.bf16.msrb.mxu0 %v9786_v46  ;;  %7809 = vmatmul.bf16.vlgmr.msra.gmra.mxu1 %v15651_v59  ;;  %v9743_v46 = vld [vmem:[%s11821_s24 + $0x638] sm:$0xf0] }
 0x430   : > { %7866 = vmatpush.bf16.msrb.mxu1 %v9850_v43  ;;  %v11195_v43 = vld [vmem:[%s11821_s24 + $0x734] sm:$0xf]  ;;  %v9746_v57 = vor.u32 %v11163_v19, %v9743_v46  ;;  %v10223_v46 = vld [vmem:[%s11821_s24 + $0x9f8] sm:$0xf0] }
 0x431   : > { %7847 = vmatpush.bf16.msrb.mxu2 %v9666_v35  ;;  %7835 = vmatmul.bf16.vlgmr.msra.gmra.mxu3 %v15498_v28  ;;  %v9962_v28 = vor.u32 %v11217_v21, %v9959_v16  ;;  %v9935_v35 = vld [vmem:[%s11821_s24 + $0x7b8] sm:$0xf0]  ;;  %v11191_v16 = vld [vmem:[%s11821_s24 + $0x714] sm:$0xf] }
 0x432   : > { %7879 = vmatpush.bf16.msrb.mxu3 %v9914_v32  ;;  %v9871_v32 = vld [vmem:[%s11821_s24 + $0x738] sm:$0xf0]  ;;  %v11283_v19 = vld [vmem:[%s11821_s24 + $0x9f4] sm:$0xf] }
 0x433   : > { %7854 = vmatpush.bf16.msrb.mxu0 %v9778_v41  ;;  %v9874_v60 = vor.u32 %v11195_v43, %v9871_v32  ;;  %v11177_v41 = vld [vmem:[%s11821_s24 + $0x6a4] sm:$0xf]  ;;  %v9791_v21 = vld [vmem:[%s11821_s24 + $0x698] sm:$0xf0] }
 0x434   : > { %7867 = vmatpush.bf16.msrb.mxu1 %v9842_v12  ;;  %7848 = vmatmul.bf16.vlgmr.msrb.gmra.mxu2 %v15507_v0  ;;  %v9815_v0 = vld [vmem:[%s11821_s24 + $0x6c8] sm:$0xf0]  ;;  %v9802_v6 = vor.u32 %v11177_v41, %v9799_v62  ;;  %v11233_v43 = vld [vmem:[%s11821_s24 + $0x864] sm:$0xf] }
 0x435   : > { %7892 = vmatpush.bf16.msra.mxu2 %v9978_v50  ;;  %v9818_v52 = vor.u32 %v11181_v11, %v9815_v0  ;;  %v9735_v50 = vld [vmem:[%s11821_s24 + $0x628] sm:$0xf0]  ;;  %v10106_v11 = vor.u32 %v11253_v47, %v10103_v20  ;;  %v11235_v0 = vld [vmem:[%s11821_s24 + $0x874] sm:$0xf] }
 0x436   : > { %7880 = vmatpush.bf16.msrb.mxu3 %v9906_v51  ;;  %v9863_v12 = vld [vmem:[%s11821_s24 + $0x728] sm:$0xf0]  ;;  %v9938_v51 = vor.u32 %v11211_v7, %v9935_v35  ;;  %v9738_v15 = vor.u32 %v11161_v8, %v9735_v50  ;;  %v10226_v35 = vor.u32 %v11283_v19, %v10223_v46  ;;  %v11281_v8 = vld [vmem:[%s11821_s24 + $0x9e4] sm:$0xf] }
 0x437   : > { %7855 = vmatpush.bf16.msrb.mxu0 %v9770_v22  ;;  %v11175_v22 = vld [vmem:[%s11821_s24 + $0x694] sm:$0xf]  ;;  %v10087_v7 = vld [vmem:[%s11821_s24 + $0x8e8] sm:$0xf0]  ;;  %v11273_v46 = vld [vmem:[%s11821_s24 + $0x9a4] sm:$0xf] }
 0x438   : > { %7868 = vmatpush.bf16.msrb.mxu1 %v9834_v9  ;;  %v9855_v9 = vld [vmem:[%s11821_s24 + $0x718] sm:$0xf0]  ;;  %v9794_v31 = vor.u32 %v11175_v22, %v9791_v21  ;;  %v10215_v50 = vld [vmem:[%s11821_s24 + $0x9e8] sm:$0xf0]  ;;  %v11245_v21 = vld [vmem:[%s11821_s24 + $0x8c4] sm:$0xf] }
 0x439   : > { %7893 = vmatpush.bf16.msra.mxu2 %v9970_v17  ;;  %v9866_v17 = vor.u32 %v11193_v54, %v9863_v12  ;;  %v11231_v54 = vld [vmem:[%s11821_s24 + $0x854] sm:$0xf]  ;;  %v10007_v22 = vld [vmem:[%s11821_s24 + $0x848] sm:$0xf0] }
 0x43a   : > { %7881 = vmatpush.bf16.msrb.mxu3 %v9898_v27  ;;  %v11237_v27 = vld [vmem:[%s11821_s24 + $0x884] sm:$0xf]  ;;  %v10199_v47 = vld [vmem:[%s11821_s24 + $0x9c8] sm:$0xf0] }
 0x43b   : > { %7856 = vmatpush.bf16.msrb.mxu0 %v9762_v3  ;;  %v11207_v3 = vld [vmem:[%s11821_s24 + $0x794] sm:$0xf]  ;;  %v10042_v42 = vor.u32 %v11237_v27, %v10039_v39  ;;  %v11261_v27 = vld [vmem:[%s11821_s24 + $0x944] sm:$0xf]  ;;  %v10135_v39 = vld [vmem:[%s11821_s24 + $0x948] sm:$0xf0] }
 0x43c   : > { %7869 = vmatpush.bf16.msrb.mxu1 %v9826_v10  ;;  %v9858_v10 = vor.u32 %v11191_v16, %v9855_v9  ;;  %v9922_v63 = vor.u32 %v11207_v3, %v9919_v56  ;;  %v10071_v16 = vld [vmem:[%s11821_s24 + $0x8c8] sm:$0xf0]  ;;  %v10210_v9 = vor.u32 %v11279_v40, %v10207_v58  ;;  %v9999_v3 = vld [vmem:[%s11821_s24 + $0x838] sm:$0xf0]  ;;  %v11243_v56 = vld [vmem:[%s11821_s24 + $0x8b4] sm:$0xf] }
 0x43d   : > { %7894 = vmatpush.bf16.msra.mxu2 %v9962_v28  ;;  %v10167_v28 = vld [vmem:[%s11821_s24 + $0x988] sm:$0xf0] }
 0x43e   : > { %7882 = vmatpush.bf16.msrb.mxu3 %v9890_v55  ;;  %v11285_v55 = vld [vmem:[%s11821_s24 + $0xa04] sm:$0xf]  ;;  %v10170_v14 = vor.u32 %v11269_v24, %v10167_v28  ;;  %v10074_v24 = vor.u32 %v11245_v21, %v10071_v16  ;;  %v10138_v28 = vor.u32 %v11261_v27, %v10135_v39  ;;  %v10119_v19 = vld [vmem:[%s11821_s24 + $0x928] sm:$0xf0]  ;;  %v10994_v21 = vld [vmem:[%s11821_s24 + $0xe4] sm:$0xf0] }
 0x43f   : > { %7857 = vmatpush.bf16.msrb.mxu0 %v9754_v18  ;;  %v11251_v18 = vld [vmem:[%s11821_s24 + $0x8f4] sm:$0xf]  ;;  %v10234_v33 = vor.u32 %v11285_v55, %v10231_v45  ;;  %v10127_v45 = vld [vmem:[%s11821_s24 + $0x938] sm:$0xf0]  ;;  %v10487_v39 = vld [vmem:[%s11821_s24 + $0x1e0] sm:$0xf] }
 0x440   : > { %7870 = vmatpush.bf16.msrb.mxu1 %v9818_v52  ;;  %v11267_v52 = vld [vmem:[%s11821_s24 + $0x974] sm:$0xf]  ;;  %v10098_v4 = vor.u32 %v11251_v18, %v10095_v61  ;;  %v9991_v18 = vld [vmem:[%s11821_s24 + $0x828] sm:$0xf0]  ;;  %v11241_v61 = vld [vmem:[%s11821_s24 + $0x8a4] sm:$0xf] }
 0x441   : > { %7895 = vmatpush.bf16.msra.mxu2 %v9954_v25  ;;  %v10031_v25 = vld [vmem:[%s11821_s24 + $0x878] sm:$0xf0]  ;;  %v11259_v55 = vld [vmem:[%s11821_s24 + $0x934] sm:$0xf] }
 0x442   : > { %7883 = vmatpush.bf16.msrb.mxu3 %v9882_v29  ;;  %v10159_v29 = vld [vmem:[%s11821_s24 + $0x978] sm:$0xf0]  ;;  %v10034_v5 = vor.u32 %v11235_v0, %v10031_v25  ;;  %v10130_v25 = vor.u32 %v11259_v55, %v10127_v45  ;;  %v10992_v55 = vld [vmem:[%s11821_s24 + $0xd4] sm:$0xf0] }
 0x443   : > { %7858 = vmatpush.bf16.msrb.mxu0 %v9746_v57  ;;  %v10162_v32 = vor.u32 %v11267_v52, %v10159_v29  ;;  %v11249_v57 = vld [vmem:[%s11821_s24 + $0x8e4] sm:$0xf]  ;;  %v10239_v27 = vld [vmem:[%s11821_s24 + $0xa18] sm:$0xf0] }
 0x444   : > { %7871 = vmatpush.bf16.msrb.mxu1 %v9810_v13  ;;  %v11265_v13 = vld [vmem:[%s11821_s24 + $0x964] sm:$0xf]  ;;  %v10090_v62 = vor.u32 %v11249_v57, %v10087_v7  ;;  %v11239_v57 = vld [vmem:[%s11821_s24 + $0x894] sm:$0xf]  ;;  %v10047_v7 = vld [vmem:[%s11821_s24 + $0x898] sm:$0xf0] }
 0x445   : > { %7896 = vmatpush.bf16.msra.mxu2 %v9946_v49  ;;  %v10023_v49 = vld [vmem:[%s11821_s24 + $0x868] sm:$0xf0]  ;;  %v11257_v29 = vld [vmem:[%s11821_s24 + $0x924] sm:$0xf] }
 0x446   : > { %7884 = vmatpush.bf16.msrb.mxu3 %v9874_v60  ;;  %v10151_v60 = vld [vmem:[%s11821_s24 + $0x968] sm:$0xf0]  ;;  %v10026_v41 = vor.u32 %v11233_v43, %v10023_v49  ;;  %v9983_v43 = vld [vmem:[%s11821_s24 + $0x818] sm:$0xf0] }
 0x447   : > { %7859 = vmatpush.bf16.msrb.mxu0 %v9738_v15  ;;  %v10154_v12 = vor.u32 %v11265_v13, %v10151_v60  ;;  %v10143_v15 = vld [vmem:[%s11821_s24 + $0x958] sm:$0xf0]  ;;  %v10122_v13 = vor.u32 %v11257_v29, %v10119_v19  ;;  %v11022_v29 = vld [vmem:[%s11821_s24 + $0x1c4] sm:$0xf0]  ;;  %v11008_v19 = vld [vmem:[%s11821_s24 + $0x154] sm:$0xf0] }
 0x448   : > { %7872 = vmatpush.bf16.msrb.mxu1 %v9802_v6  ;;  %v11229_v6 = vld [vmem:[%s11821_s24 + $0x844] sm:$0xf]  ;;  %v10111_v60 = vld [vmem:[%s11821_s24 + $0x918] sm:$0xf0] }
 0x449   : > { %7897 = vmatpush.bf16.msra.mxu2 %v9938_v51  ;;  %v10079_v51 = vld [vmem:[%s11821_s24 + $0x8d8] sm:$0xf0]  ;;  %v10010_v20 = vor.u32 %v11229_v6, %v10007_v22  ;;  %v10359_v22 = vld [vmem:[%s11821_s24 + $0xe0] sm:$0xf] }
 0x44a   : > { %7885 = vmatpush.bf16.msrb.mxu3 %v9866_v17  ;;  %v10146_v17 = vor.u32 %v11263_v48, %v10143_v15  ;;  %v10495_v48 = vld [vmem:[%s11821_s24 + $0x1f0] sm:$0xf]  ;;  %v11028_v15 = vld [vmem:[%s11821_s24 + $0x1f4] sm:$0xf0] }
 0x44b   : > { %7860 = vmatpush.bf16.msrb.mxu0 %v9730_v53  ;;  %v11227_v53 = vld [vmem:[%s11821_s24 + $0x834] sm:$0xf]  ;;  %v10496_v16 = vor.u32 %v11028_v15, %v10495_v48  ;;  %v10986_v48 = vld [vmem:[%s11821_s24 + $0xa4] sm:$0xf0] }
 0x44c   : > { %7873 = vmatpush.bf16.msrb.mxu1 %v9794_v31  ;;  %v10063_v31 = vld [vmem:[%s11821_s24 + $0x8b8] sm:$0xf0]  ;;  %v10002_v0 = vor.u32 %v11227_v53, %v9999_v3  ;;  %v10360_v53 = vor.u32 %v10994_v21, %v10359_v22  ;;  %v10287_v3 = vld [vmem:[%s11821_s24 + $0x50] sm:$0xf]  ;;  %v11004_v22 = vld [vmem:[%s11821_s24 + $0x134] sm:$0xf0] }
 0x44d   : > { %7898 = vmatpush.bf16.msra.mxu2 %v9930_v34  ;;  %v11277_v34 = vld [vmem:[%s11821_s24 + $0x9c4] sm:$0xf] }
 0x44e   : > { %7886 = vmatpush.bf16.msrb.mxu3 %v9858_v10  ;;  %7861 = vmatmul.bf16.vlgmr.msrb.gmra.mxu0 %v15495_v1  ;;  %v11247_v1 = vld [vmem:[%s11821_s24 + $0x8d4] sm:$0xf]  ;;  %v10202_v10 = vor.u32 %v11277_v34, %v10199_v47  ;;  %v11026_v34 = vld [vmem:[%s11821_s24 + $0x1e4] sm:$0xf0]  ;;  %v10431_v47 = vld [vmem:[%s11821_s24 + $0x170] sm:$0xf] }
 0x44f   : > { %7905 = vmatpush.bf16.msra.mxu0 %v10042_v42  ;;  %7874 = vmatmul.bf16.vlgmr.msrb.gmra.mxu1 %v15510_v2  ;;  %v10218_v2 = vor.u32 %v11281_v8, %v10215_v50  ;;  %v11275_v42 = vld [vmem:[%s11821_s24 + $0x9b4] sm:$0xf]  ;;  %v10303_v8 = vld [vmem:[%s11821_s24 + $0x70] sm:$0xf]  ;;  %v6516_v50 = vld [vmem:[#allocation2] sm:$0xff] }
 0x450   : > { %7918 = vmatpush.bf16.msra.mxu1 %v10106_v11  ;;  %v10191_v11 = vld [vmem:[%s11821_s24 + $0x9b8] sm:$0xf0]  ;;  %7971 = vst [vmem:[#allocation1] ss:$9 sm:$0xff] %v6516_v50 }
 0x451   : > { %7899 = vmatpush.bf16.msra.mxu2 %v9922_v63  ;;  %7887 = vmatmul.bf16.vlgmr.msrb.gmra.mxu3 %v15538_v44  ;;  %v10015_v44 = vld [vmem:[%s11821_s24 + $0x858] sm:$0xf0]  ;;  %v11225_v63 = vld [vmem:[%s11821_s24 + $0x824] sm:$0xf]  ;;  %v10194_v52 = vor.u32 %v11275_v42, %v10191_v11  ;;  %v10479_v42 = vld [vmem:[%s11821_s24 + $0x1d0] sm:$0xf] }
 0x452   : > { %7931 = vmatpush.bf16.msra.mxu3 %v10170_v14  ;;  %v10018_v36 = vor.u32 %v11231_v54, %v10015_v44  ;;  %v10066_v14 = vor.u32 %v11243_v56, %v10063_v31  ;;  %v10367_v54 = vld [vmem:[%s11821_s24 + $0xf0] sm:$0xf]  ;;  %v11271_v44 = vld [vmem:[%s11821_s24 + $0x994] sm:$0xf]  ;;  %v10976_v56 = vld [vmem:[%s11821_s24 + $0x54] sm:$0xf0]  ;;  %v10488_v31 = vor.u32 %v11026_v34, %v10487_v39 }
 0x453   : > { %7906 = vmatpush.bf16.msra.mxu0 %v10034_v5  ;;  %v10183_v5 = vld [vmem:[%s11821_s24 + $0x9a8] sm:$0xf0]  ;;  %v11024_v11 = vld [vmem:[%s11821_s24 + $0x1d4] sm:$0xf0]  ;;  %v10319_v34 = vld [vmem:[%s11821_s24 + $0x90] sm:$0xf] }
 0x454   : > { %7919 = vmatpush.bf16.msra.mxu1 %v10098_v4  ;;  %7900 = vmatmul.bf16.vlgmr.msra.gmra.mxu2 %v15542_v30  ;;  %v10082_v30 = vor.u32 %v11247_v1, %v10079_v51  ;;  %v11223_v4 = vld [vmem:[%s11821_s24 + $0x814] sm:$0xf]  ;;  %v10175_v1 = vld [vmem:[%s11821_s24 + $0x998] sm:$0xf0] }
 0x455   : > { %7944 = vmatpush.bf16.msrb.mxu2 %v10234_v33  ;;  %v10055_v33 = vld [vmem:[%s11821_s24 + $0x8a8] sm:$0xf0]  ;;  %v9986_v51 = vor.u32 %v11223_v4, %v9983_v43  ;;  %v10178_v6 = vor.u32 %v11271_v44, %v10175_v1  ;;  %v10271_v4 = vld [vmem:[%s11821_s24 + $0x30] sm:$0xf]  ;;  %v10972_v43 = vld [vmem:[%s11821_s24 + $0x34] sm:$0xf0] }
 0x456   : > { %7932 = vmatpush.bf16.msra.mxu3 %v10162_v32  ;;  %v9994_v32 = vor.u32 %v11225_v63, %v9991_v18  ;;  %v10058_v49 = vor.u32 %v11241_v61, %v10055_v33  ;;  %v10343_v18 = vld [vmem:[%s11821_s24 + $0xc0] sm:$0xf]  ;;  %v10990_v61 = vld [vmem:[%s11821_s24 + $0xc4] sm:$0xf0] }
 0x457   : > { %7907 = vmatpush.bf16.msra.mxu0 %v10026_v41  ;;  %v10186_v41 = vor.u32 %v11273_v46, %v10183_v5  ;;  %v10344_v5 = vor.u32 %v10990_v61, %v10343_v18  ;;  %v10263_v44 = vld [vmem:[%s11821_s24 + $0x20] sm:$0xf]  ;;  %v10970_v1 = vld [vmem:[%s11821_s24 + $0x24] sm:$0xf0]  ;;  %v11060_v18 = vld [vmem:[%s11821_s24 + $0x2f4] sm:$0xf0] }
 0x458   : > { %7920 = vmatpush.bf16.msra.mxu1 %v10090_v62  ;;  %v10980_v62 = vld [vmem:[%s11821_s24 + $0x74] sm:$0xf0]  ;;  %v10439_v61 = vld [vmem:[%s11821_s24 + $0x180] sm:$0xf] }
 0x459   : > { %7945 = vmatpush.bf16.msrb.mxu2 %v10226_v35  ;;  %v11255_v35 = vld [vmem:[%s11821_s24 + $0x914] sm:$0xf]  ;;  %v10304_v58 = vor.u32 %v10980_v62, %v10303_v8  ;;  %v11020_v8 = vld [vmem:[%s11821_s24 + $0x1b4] sm:$0xf0]  ;;  %v10407_v62 = vld [vmem:[%s11821_s24 + $0x140] sm:$0xf] }
 0x45a   : > { %7933 = vmatpush.bf16.msra.mxu3 %v10154_v12  ;;  %v10996_v12 = vld [vmem:[%s11821_s24 + $0xf4] sm:$0xf0]  ;;  %v10114_v40 = vor.u32 %v11255_v35, %v10111_v60  ;;  %v10463_v60 = vld [vmem:[%s11821_s24 + $0x1b0] sm:$0xf] }
 0x45b   : > { %7908 = vmatpush.bf16.msra.mxu0 %v10018_v36  ;;  %v10295_v36 = vld [vmem:[%s11821_s24 + $0x60] sm:$0xf] }
 0x45c   : > { %7921 = vmatpush.bf16.msra.mxu1 %v10082_v30  ;;  %v10368_v30 = vor.u32 %v10996_v12, %v10367_v54  ;;  %v11006_v54 = vld [vmem:[%s11821_s24 + $0x144] sm:$0xf0] }
 0x45d   : > { %7946 = vmatpush.bf16.msrb.mxu2 %v10218_v2  ;;  %v10050_v2 = vor.u32 %v11239_v57, %v10047_v7  ;;  %v10335_v57 = vld [vmem:[%s11821_s24 + $0xb0] sm:$0xf]  ;;  %v10988_v7 = vld [vmem:[%s11821_s24 + $0xb4] sm:$0xf0] }
 0x45e   : > { %7934 = vmatpush.bf16.msra.mxu3 %v10146_v17  ;;  %v10978_v17 = vld [vmem:[%s11821_s24 + $0x64] sm:$0xf0]  ;;  %v10336_v12 = vor.u32 %v10988_v7, %v10335_v57  ;;  %v10551_v57 = vld [vmem:[%s11821_s24 + $0x260] sm:$0xf] }
 0x45f   : > { %7909 = vmatpush.bf16.msra.mxu0 %v10010_v20  ;;  %v11012_v20 = vld [vmem:[%s11821_s24 + $0x174] sm:$0xf0]  ;;  %v11042_v7 = vld [vmem:[%s11821_s24 + $0x264] sm:$0xf0] }
 0x460   : > { %7922 = vmatpush.bf16.msra.mxu1 %v10074_v24  ;;  %v10296_v24 = vor.u32 %v10978_v17, %v10295_v36  ;;  %v10432_v45 = vor.u32 %v11012_v20, %v10431_v47  ;;  %v11018_v36 = vld [vmem:[%s11821_s24 + $0x1a4] sm:$0xf0]  ;;  %v10399_v17 = vld [vmem:[%s11821_s24 + $0x130] sm:$0xf]  ;;  %v10984_v47 = vld [vmem:[%s11821_s24 + $0x94] sm:$0xf0] }
 0x461   : > { %7947 = vmatpush.bf16.msrb.mxu2 %v10210_v9  ;;  %v11287_v9 = vld [vmem:[%s11821_s24 + $0xa14] sm:$0xf] }
 0x462   : > { %7935 = vmatpush.bf16.msra.mxu3 %v10138_v28  ;;  %v10242_v28 = vor.u32 %v11287_v9, %v10239_v27  ;;  %v10968_v9 = vld [vmem:[%s11821_s24 + $0x14] sm:$0xf0] }
 0x463   : > { %7910 = vmatpush.bf16.msra.mxu0 %v10002_v0  ;;  %v10423_v0 = vld [vmem:[%s11821_s24 + $0x160] sm:$0xf] }
 0x464   : > { %7923 = vmatpush.bf16.msra.mxu1 %v10066_v14  ;;  %v11010_v14 = vld [vmem:[%s11821_s24 + $0x164] sm:$0xf0] }
 0x465   : > { %7948 = vmatpush.bf16.msrb.mxu2 %v10202_v10  ;;  %v10351_v10 = vld [vmem:[%s11821_s24 + $0xd0] sm:$0xf]  ;;  %v10424_v33 = vor.u32 %v11010_v14, %v10423_v0  ;;  %v10982_v0 = vld [vmem:[%s11821_s24 + $0x84] sm:$0xf0] }
 0x466   : > { %7936 = vmatpush.bf16.msra.mxu3 %v10130_v25  ;;  %v10352_v63 = vor.u32 %v10992_v55, %v10351_v10  ;;  %v10279_v25 = vld [vmem:[%s11821_s24 + $0x40] sm:$0xf]  ;;  %v11002_v10 = vld [vmem:[%s11821_s24 + $0x124] sm:$0xf0] }
 0x467   : > { %7911 = vmatpush.bf16.msra.mxu0 %v9994_v32 }
 0x468   : > { %7924 = vmatpush.bf16.msra.mxu1 %v10058_v49 }
 0x469   : > { %7949 = vmatpush.bf16.msrb.mxu2 %v10194_v52  ;;  %v10471_v52 = vld [vmem:[%s11821_s24 + $0x1c0] sm:$0xf] }
 0x46a   : > { %7937 = vmatpush.bf16.msra.mxu3 %v10122_v13  ;;  %v10472_v49 = vor.u32 %v11022_v29, %v10471_v52  ;;  %v10383_v29 = vld [vmem:[%s11821_s24 + $0x110] sm:$0xf] }
 0x46b   : > { %7912 = vmatpush.bf16.msra.mxu0 %v9986_v51  ;;  %v7693_v32 = vpop.f32.mrf.mxu0  ;;  %v10464_v51 = vor.u32 %v11020_v8, %v10463_v60  ;;  %v10615_v60 = vld [vmem:[%s11821_s24 + $0x2e0] sm:$0xf]  ;;  %v11058_v8 = vld [vmem:[%s11821_s24 + $0x2e4] sm:$0xf0] }
 0x46c   : > { %7925 = vmatpush.bf16.msra.mxu1 %v10050_v2  ;;  %v7706_v13 = vpop.f32.mrf.mxu1  ;;  %v10327_v2 = vld [vmem:[%s11821_s24 + $0xa0] sm:$0xf] }
 0x46d   : > { %7950 = vmatpush.bf16.msrb.mxu2 %v10186_v41  ;;  %v7707_v50 = vadd.f32 %v7706_v13, %v7693_v32  ;;  %v10272_v41 = vor.u32 %v10972_v43, %v10271_v4  ;;  %v10328_v21 = vor.u32 %v10986_v48, %v10327_v2  ;;  %v11092_v4 = vld [vmem:[%s11821_s24 + $0x3f4] sm:$0xf0]  ;;  %v10616_v48 = vor.u32 %v11058_v8, %v10615_v60 }
 0x46e   : > { %7938 = vmatpush.bf16.msra.mxu3 %v10114_v40  ;;  %7913 = vmatmul.bf16.vlgmr.msra.gmra.mxu0 %v15540_v23  ;;  %v10288_v23 = vor.u32 %v10976_v56, %v10287_v3  ;;  %v10408_v40 = vor.u32 %v11006_v54, %v10407_v62  ;;  %v15853_v32 = vld [vmem:[#allocation1] sm:$0xff]  ;;  %v10375_v62 = vld [vmem:[%s11821_s24 + $0x100] sm:$0xf]  ;;  %v10998_v54 = vld [vmem:[%s11821_s24 + $0x104] sm:$0xf0] }
 0x46f   : > { %7926 = vmatmul.bf16.vlgmr.msra.gmra.mxu1 %v15544_v38  ;;  %7964 = vmatpush.bf16.msrb.mxu0 %v10242_v28  ;;  %v10480_v38 = vor.u32 %v11024_v11, %v10479_v42  ;;  %v11016_v28 = vld [vmem:[%s11821_s24 + $0x194] sm:$0xf0]  ;;  %v10966_v42 = vld [vmem:[%s11821_s24 + $0x4] sm:$0xf0]  ;;  %v10311_v11 = vld [vmem:[%s11821_s24 + $0x80] sm:$0xf] }
 0x470   : > { %8807 = vmatpush.bf16.msrb.mxu1 %v10304_v58  ;;  %v10455_v58 = vld [vmem:[%s11821_s24 + $0x1a0] sm:$0xf]  ;;  %v11076_v2 = vld [vmem:[%s11821_s24 + $0x374] sm:$0xf0] }
 0x471   : > { %7951 = vmatpush.bf16.msrb.mxu2 %v10178_v6  ;;  %7939 = vmatmul.bf16.vlgmr.msra.gmra.mxu3 %v15649_v37  ;;  %v10974_v37 = vld [vmem:[%s11821_s24 + $0x44] sm:$0xf0]  ;;  %v10264_v6 = vor.u32 %v10970_v1, %v10263_v44  ;;  %v10456_v39 = vor.u32 %v11018_v36, %v10455_v58  ;;  %v10552_v44 = vor.u32 %v11042_v7, %v10551_v57  ;;  %v11040_v58 = vld [vmem:[%s11821_s24 + $0x254] sm:$0xf0]  ;;  %v10711_v57 = vld [vmem:[%s11821_s24 + $0x3a0] sm:$0xf] }
 0x472   : > { %8820 = vmatpush.bf16.msrb.mxu3 %v10368_v30  ;;  %v10280_v46 = vor.u32 %v10974_v37, %v10279_v25  ;;  %v10623_v25 = vld [vmem:[%s11821_s24 + $0x2f0] sm:$0xf]  ;;  %v11090_v1 = vld [vmem:[%s11821_s24 + $0x3e4] sm:$0xf0]  ;;  %v10376_v36 = vor.u32 %v10998_v54, %v10375_v62  ;;  %v15908_v62 = vld [vmem:[#allocation1 + $0x24] sm:$0xff] }
 0x473   : > { %8833 = vmatpush.bf16.msra.mxu0 %v10432_v45  ;;  %v7719_v15 = vpop.f32.mrf.mxu2  ;;  %v7695_v27 = vpop.f32.mrf.mxu0  ;;  %v10320_v45 = vor.u32 %v10984_v47, %v10319_v34  ;;  %v10624_v43 = vor.u32 %v11060_v18, %v10623_v25  ;;  %v10535_v47 = vld [vmem:[%s11821_s24 + $0x240] sm:$0xf]  ;;  %v11082_v7 = vld [vmem:[%s11821_s24 + $0x3a4] sm:$0xf0] }
 0x474   : > { %8808 = vmatpush.bf16.msrb.mxu1 %v10296_v24  ;;  %7952 = vmatmul.bf16.vlgmr.msrb.gmra.mxu2 %v15651_v59  ;;  %v10415_v59 = vld [vmem:[%s11821_s24 + $0x150] sm:$0xf]  ;;  %v7720_v30 = vadd.f32 %v7719_v15, %v7707_v50  ;;  %v7708_v20 = vpop.f32.mrf.mxu1  ;;  %v10400_v24 = vor.u32 %v11004_v22, %v10399_v17  ;;  %v7732_v3 = vpop.f32.mrf.mxu3  ;;  %v10679_v27 = vld [vmem:[%s11821_s24 + $0x360] sm:$0xf] }
 0x475   : > { %8846 = vmatpush.bf16.msra.mxu2 %v10496_v16  ;;  %v10416_v35 = vor.u32 %v11008_v19, %v10415_v59  ;;  %v10255_v16 = vld [vmem:[%s11821_s24 + $0x10] sm:$0xf]  ;;  %v11000_v59 = vld [vmem:[%s11821_s24 + $0x114] sm:$0xf0]  ;;  %v10312_v19 = vor.u32 %v10982_v0, %v10311_v11  ;;  %v11038_v20 = vld [vmem:[%s11821_s24 + $0x244] sm:$0xf0] }
 0x476   : > { %8821 = vmatpush.bf16.msrb.mxu3 %v10360_v53  ;;  %v10447_v53 = vld [vmem:[%s11821_s24 + $0x190] sm:$0xf]  ;;  %v10256_v56 = vor.u32 %v10968_v9, %v10255_v16  ;;  %v15838_v55 = vadd.f32 %v7732_v3, %v7720_v30  ;;  %v10384_v13 = vor.u32 %v11000_v59, %v10383_v29  ;;  %v11088_v9 = vld [vmem:[%s11821_s24 + $0x3d4] sm:$0xf0]  ;;  %v15910_v54 = vld [vmem:[#allocation1 + $0x2d] sm:$0xff] }
 0x477   : > { %8834 = vmatpush.bf16.msra.mxu0 %v10424_v33  ;;  %v10448_v14 = vor.u32 %v11016_v28, %v10447_v53  ;;  %v11014_v33 = vld [vmem:[%s11821_s24 + $0x184] sm:$0xf0]  ;;  %v15867_v15 = vld [vmem:[#allocation1 + $0x1b] sm:$0xff]  ;;  %v10599_v53 = vld [vmem:[%s11821_s24 + $0x2c0] sm:$0xf] }
 0x478   : > { %8809 = vmatpush.bf16.msrb.mxu1 %v10288_v23  ;;  %v10559_v23 = vld [vmem:[%s11821_s24 + $0x270] sm:$0xf]  ;;  %v11054_v28 = vld [vmem:[%s11821_s24 + $0x2c4] sm:$0xf0] }
 0x479   : > { %8847 = vmatpush.bf16.msra.mxu2 %v10488_v31  ;;  %v10247_v31 = vld [vmem:[%s11821_s24] sm:$0xf]  ;;  %v10607_v30 = vld [vmem:[%s11821_s24 + $0x2d0] sm:$0xf]  ;;  %v10600_v0 = vor.u32 %v11054_v28, %v10599_v53 }
 0x47a   : > { %8822 = vmatpush.bf16.msrb.mxu3 %v10352_v63  ;;  %v11044_v63 = vld [vmem:[%s11821_s24 + $0x274] sm:$0xf0]  ;;  %v10248_v52 = vor.u32 %v10966_v42, %v10247_v31  ;;  %v10727_v31 = vld [vmem:[%s11821_s24 + $0x3c0] sm:$0xf] }
 0x47b   : > { %8835 = vmatpush.bf16.msra.mxu0 %v10416_v35  ;;  %v7721_v37 = vpop.f32.mrf.mxu2  ;;  %v15857_v35 = vld [vmem:[#allocation1 + $0x9] sm:$0xff]  ;;  %v11072_v42 = vld [vmem:[%s11821_s24 + $0x354] sm:$0xf0] }
 0x47c   : > { %8810 = vmatpush.bf16.msrb.mxu1 %v10280_v46  ;;  %v10560_v46 = vor.u32 %v11044_v63, %v10559_v23  ;;  %v7734_v50 = vpop.f32.mrf.mxu3  ;;  %v11036_v23 = vld [vmem:[%s11821_s24 + $0x234] sm:$0xf0]  ;;  %v10591_v37 = vld [vmem:[%s11821_s24 + $0x2b0] sm:$0xf]  ;;  %v10503_v28 = vld [vmem:[%s11821_s24 + $0x200] sm:$0xf] }
 0x47d   : > { %8848 = vmatpush.bf16.msra.mxu2 %v10480_v38 }
 0x47e   : > { %8823 = vmatpush.bf16.msrb.mxu3 %v10344_v5  ;;  %10244 = vmatmul.msk.bf16.vlgmr.msrb.gmra.mxu0 %vm7681_vm13, %v15613_v26  ;;  %v10391_v26 = vld [vmem:[%s11821_s24 + $0x120] sm:$0xf]  ;;  %v10751_v5 = vld [vmem:[%s11821_s24 + $0x3f0] sm:$0xf] }
 0x47f   : > { %8836 = vmatpush.bf16.msra.mxu0 %v10408_v40  ;;  %v10392_v38 = vor.u32 %v11002_v10, %v10391_v26  ;;  %v10543_v40 = vld [vmem:[%s11821_s24 + $0x250] sm:$0xf]  ;;  %v10536_v26 = vor.u32 %v11038_v20, %v10535_v47  ;;  %v11086_v10 = vld [vmem:[%s11821_s24 + $0x3c4] sm:$0xf0]  ;;  %v10647_v47 = vld [vmem:[%s11821_s24 + $0x320] sm:$0xf] }
 0x480   : > { %8811 = vmatpush.bf16.msrb.mxu1 %v10272_v41  ;;  %v10752_v41 = vor.u32 %v11092_v4, %v10751_v5  ;;  %v10544_v16 = vor.u32 %v11040_v58, %v10543_v40  ;;  %v10728_v18 = vor.u32 %v11086_v10, %v10727_v31  ;;  %v11034_v4 = vld [vmem:[%s11821_s24 + $0x224] sm:$0xf0]  ;;  %v10511_v58 = vld [vmem:[%s11821_s24 + $0x210] sm:$0xf]  ;;  %v11108_v10 = vld [vmem:[%s11821_s24 + $0x474] sm:$0xf0] }
 0x481   : > { %8849 = vmatpush.bf16.msra.mxu2 %v10472_v49  ;;  %v10440_v49 = vor.u32 %v11014_v33, %v10439_v61  ;;  %v10719_v33 = vld [vmem:[%s11821_s24 + $0x3b0] sm:$0xf]  ;;  %v11066_v20 = vld [vmem:[%s11821_s24 + $0x324] sm:$0xf0] }
 0x482   : > { %8824 = vmatpush.bf16.msrb.mxu3 %v10336_v12  ;;  %v10743_v12 = vld [vmem:[%s11821_s24 + $0x3e0] sm:$0xf]  ;;  %v11046_v31 = vld [vmem:[%s11821_s24 + $0x284] sm:$0xf0] }
 0x483   : > { %8837 = vmatpush.bf16.msra.mxu0 %v10400_v24  ;;  %v10744_v17 = vor.u32 %v11090_v1, %v10743_v12  ;;  %v15882_v24 = vld [vmem:[#allocation1 + $0x12] sm:$0xff]  ;;  %v15912_v1 = vld [vmem:[#allocation1 + $0x3f] sm:$0xff] }
 0x484   : > { %8812 = vmatpush.bf16.msrb.mxu1 %v10264_v6  ;;  %v11056_v6 = vld [vmem:[%s11821_s24 + $0x2d4] sm:$0xf0] }
 0x485   : > { %8850 = vmatpush.bf16.msra.mxu2 %v10464_v51  ;;  %v10687_v51 = vld [vmem:[%s11821_s24 + $0x370] sm:$0xf]  ;;  %v10608_v34 = vor.u32 %v11056_v6, %v10607_v30 }
 0x486   : > { %8825 = vmatpush.bf16.msrb.mxu3 %v10328_v21  ;;  %v10688_v22 = vor.u32 %v11076_v2, %v10687_v51  ;;  %v10735_v21 = vld [vmem:[%s11821_s24 + $0x3d0] sm:$0xf]  ;;  %v6517_v2 = vld [vmem:[#allocation2 + $0x8] sm:$0x7] }
 0x487   : > { %8838 = vmatpush.bf16.msra.mxu0 %v10392_v38  ;;  %v10736_v3 = vor.u32 %v11088_v9, %v10735_v21  ;;  %v11052_v38 = vld [vmem:[%s11821_s24 + $0x2b4] sm:$0xf0]  ;;  %v15914_v51 = vld [vmem:[#allocation1 + $0x36] sm:$0xff] }
 0x488   : > { %8813 = vmatpush.bf16.msrb.mxu1 %v10256_v56  ;;  %v10592_v5 = vor.u32 %v11052_v38, %v10591_v37  ;;  %7981 = vst [vmem:[#allocation1] ss:$9 sm:$0xff] %v6517_v2  ;;  %v11120_v2 = vld [vmem:[%s11821_s24 + $0x4d4] sm:$0xf0] }
 0x489   : > { %8851 = vmatpush.bf16.msra.mxu2 %v10456_v39  ;;  %v11074_v39 = vld [vmem:[%s11821_s24 + $0x364] sm:$0xf0] }
 0x48a   : > { %8826 = vmatpush.bf16.msrb.mxu3 %v10320_v45  ;;  %v10680_v56 = vor.u32 %v11074_v39, %v10679_v27  ;;  %v10671_v45 = vld [vmem:[%s11821_s24 + $0x350] sm:$0xf] }
 0x48b   : > { %8839 = vmatpush.bf16.msra.mxu0 %v10384_v13  ;;  %v7745_v11 = vpop.f32.mrf.mxu0  ;;  %v10672_v61 = vor.u32 %v11072_v42, %v10671_v45  ;;  %v10655_v13 = vld [vmem:[%s11821_s24 + $0x330] sm:$0xf] }
 0x48c   : > { %8814 = vmatpush.bf16.msrb.mxu1 %v10248_v52  ;;  %v7746_v63 = vadd.f32 %v7745_v11, %v15838_v55  ;;  %v7758_v25 = vpop.f32.mrf.mxu1  ;;  %v11084_v52 = vld [vmem:[%s11821_s24 + $0x3b4] sm:$0xf0]  ;;  %v10663_v55 = vld [vmem:[%s11821_s24 + $0x340] sm:$0xf]  ;;  %v10703_v27 = vld [vmem:[%s11821_s24 + $0x390] sm:$0xf]  ;;  %v10648_v11 = vor.u32 %v11066_v20, %v10647_v47 }
 0x48d   : > { %8852 = vmatpush.bf16.msra.mxu2 %v10448_v14  ;;  %v10527_v14 = vld [vmem:[%s11821_s24 + $0x230] sm:$0xf]  ;;  %v10720_v8 = vor.u32 %v11084_v52, %v10719_v33  ;;  %v10979_v33 = vld [vmem:[%s11821_s24 + $0x74] sm:$0xf]  ;;  %v11102_v47 = vld [vmem:[%s11821_s24 + $0x444] sm:$0xf0] }
 0x48e   : > { %8827 = vmatpush.bf16.msrb.mxu3 %v10312_v19  ;;  %v7759_v29 = vadd.f32 %v7758_v25, %v7746_v63  ;;  %v10528_v59 = vor.u32 %v11036_v23, %v10527_v14  ;;  %v10519_v19 = vld [vmem:[%s11821_s24 + $0x220] sm:$0xf]  ;;  %v11124_v14 = vld [vmem:[%s11821_s24 + $0x4f4] sm:$0xf0]  ;;  %v11078_v25 = vld [vmem:[%s11821_s24 + $0x384] sm:$0xf0] }
 0x48f   : > { %8815 = vmatmul.bf16.vlgmr.msrb.gmra.mxu1 %v15853_v32  ;;  %8840 = vmatpush.bf16.msra.mxu0 %v10376_v36  ;;  %v11032_v36 = vld [vmem:[%s11821_s24 + $0x214] sm:$0xf0]  ;;  %v10695_v63 = vld [vmem:[%s11821_s24 + $0x380] sm:$0xf] }
 0x490   : > { %8859 = vmatpush.bf16.msra.mxu1 %v10560_v46  ;;  %v11070_v46 = vld [vmem:[%s11821_s24 + $0x344] sm:$0xf0]  ;;  %v10512_v39 = vor.u32 %v11032_v36, %v10511_v58  ;;  %v10855_v20 = vld [vmem:[%s11821_s24 + $0x4c0] sm:$0xf] }
 0x491   : > { %8853 = vmatpush.bf16.msra.mxu2 %v10440_v49  ;;  %8828 = vmatmul.bf16.vlgmr.msrb.gmra.mxu3 %v15857_v35  ;;  %v11050_v49 = vld [vmem:[%s11821_s24 + $0x2a4] sm:$0xf0]  ;;  %v10664_v50 = vor.u32 %v11070_v46, %v10663_v55  ;;  %v10696_v46 = vor.u32 %v11078_v25, %v10695_v63  ;;  %v11116_v63 = vld [vmem:[%s11821_s24 + $0x4b4] sm:$0xf0] }
 0x492   : > { %8872 = vmatpush.bf16.msra.mxu3 %v10624_v43  ;;  %8841 = vmatmul.bf16.vlgmr.msra.gmra.mxu0 %v15882_v24  ;;  %v10583_v43 = vld [vmem:[%s11821_s24 + $0x2a0] sm:$0xf]  ;;  %v11106_v55 = vld [vmem:[%s11821_s24 + $0x464] sm:$0xf0] }
 0x493   : > { %8885 = vmatpush.bf16.msrb.mxu0 %v10688_v22  ;;  %v7771_v60 = vpop.f32.mrf.mxu2  ;;  %v10584_v40 = vor.u32 %v11050_v49, %v10583_v43  ;;  %v7747_v30 = vpop.f32.mrf.mxu0  ;;  %v11048_v22 = vld [vmem:[%s11821_s24 + $0x294] sm:$0xf0]  ;;  %v10631_v49 = vld [vmem:[%s11821_s24 + $0x300] sm:$0xf]  ;;  %v11126_v58 = vld [vmem:[%s11821_s24 + $0x504] sm:$0xf0] }
 0x494   : > { %8860 = vmatpush.bf16.msra.mxu1 %v10552_v44  ;;  %8854 = vmatmul.bf16.vlgmr.msra.gmra.mxu2 %v15867_v15  ;;  %v7772_v12 = vadd.f32 %v7771_v60, %v7759_v29  ;;  %v10520_v44 = vor.u32 %v11034_v4, %v10519_v19  ;;  %v7760_v21 = vpop.f32.mrf.mxu1  ;;  %v10807_v19 = vld [vmem:[%s11821_s24 + $0x460] sm:$0xf]  ;;  %v11122_v4 = vld [vmem:[%s11821_s24 + $0x4e4] sm:$0xf0]  ;;  %v10977_v60 = vld [vmem:[%s11821_s24 + $0x64] sm:$0xf] }
 0x495   : > { %8898 = vmatpush.bf16.msrb.mxu2 %v10752_v41  ;;  %v11068_v41 = vld [vmem:[%s11821_s24 + $0x334] sm:$0xf0]  ;;  %v10995_v21 = vld [vmem:[%s11821_s24 + $0xf4] sm:$0xf] }
 0x496   : > { %8873 = vmatpush.bf16.msra.mxu3 %v10616_v48  ;;  %v7784_v48 = vpop.f32.mrf.mxu3  ;;  %v10656_v9 = vor.u32 %v11068_v41, %v10655_v13  ;;  %v11062_v13 = vld [vmem:[%s11821_s24 + $0x304] sm:$0xf0]  ;;  %v10799_v41 = vld [vmem:[%s11821_s24 + $0x450] sm:$0xf] }
 0x497   : > { %8886 = vmatpush.bf16.msrb.mxu0 %v10680_v56  ;;  %v15918_v6 = vadd.f32 %v7784_v48, %v7772_v12  ;;  %v10567_v56 = vld [vmem:[%s11821_s24 + $0x280] sm:$0xf]  ;;  %v11104_v12 = vld [vmem:[%s11821_s24 + $0x454] sm:$0xf0]  ;;  %v10632_v36 = vor.u32 %v11062_v13, %v10631_v49 }
 0x498   : > { %8861 = vmatpush.bf16.msra.mxu1 %v10544_v16  ;;  %v10712_v16 = vor.u32 %v11082_v7, %v10711_v57  ;;  %v10568_v37 = vor.u32 %v11046_v31, %v10567_v56  ;;  %v10808_v7 = vor.u32 %v11106_v55, %v10807_v19  ;;  %v10973_v31 = vld [vmem:[%s11821_s24 + $0x44] sm:$0xf] }
 0x499   : > { %8899 = vmatpush.bf16.msrb.mxu2 %v10744_v17  ;;  %v10575_v17 = vld [vmem:[%s11821_s24 + $0x290] sm:$0xf] }
 0x49a   : > { %8874 = vmatpush.bf16.msra.mxu3 %v10608_v34  ;;  %v11080_v34 = vld [vmem:[%s11821_s24 + $0x394] sm:$0xf0]  ;;  %v10576_v53 = vor.u32 %v11048_v22, %v10575_v17  ;;  %v10800_v17 = vor.u32 %v11104_v12, %v10799_v41  ;;  %v10975_v22 = vld [vmem:[%s11821_s24 + $0x54] sm:$0xf]  ;;  %v10265_v12 = vld [vmem:[%s11821_s24 + $0x28] sm:$0xf0] }
 0x49b   : > { %8887 = vmatpush.bf16.msrb.mxu0 %v10672_v61  ;;  %v7773_v45 = vpop.f32.mrf.mxu2  ;;  %v10704_v42 = vor.u32 %v11080_v34, %v10703_v27  ;;  %v11064_v61 = vld [vmem:[%s11821_s24 + $0x314] sm:$0xf0]  ;;  %v10791_v34 = vld [vmem:[%s11821_s24 + $0x440] sm:$0xf] }
 0x49c   : > { %8862 = vmatpush.bf16.msra.mxu1 %v10536_v26  ;;  %v10815_v26 = vld [vmem:[%s11821_s24 + $0x470] sm:$0xf]  ;;  %v10792_v56 = vor.u32 %v11102_v47, %v10791_v34 }
 0x49d   : > { %8900 = vmatpush.bf16.msrb.mxu2 %v10736_v3  ;;  %v11030_v3 = vld [vmem:[%s11821_s24 + $0x204] sm:$0xf0]  ;;  %v10816_v38 = vor.u32 %v11108_v10, %v10815_v26  ;;  %v10993_v26 = vld [vmem:[%s11821_s24 + $0xe4] sm:$0xf]  ;;  %v10361_v10 = vld [vmem:[%s11821_s24 + $0xe8] sm:$0xf0] }
 0x49e   : > { %8875 = vmatpush.bf16.msra.mxu3 %v10600_v0  ;;  %v10879_v0 = vld [vmem:[%s11821_s24 + $0x4f0] sm:$0xf]  ;;  %v10504_v23 = vor.u32 %v11030_v3, %v10503_v28  ;;  %v7786_v52 = vpop.f32.mrf.mxu3 }
 0x49f   : > { %8888 = vmatpush.bf16.msrb.mxu0 %v10664_v50  ;;  %v10880_v29 = vor.u32 %v11124_v14, %v10879_v0  ;;  %v11100_v0 = vld [vmem:[%s11821_s24 + $0x434] sm:$0xf0]  ;;  %v10971_v52 = vld [vmem:[%s11821_s24 + $0x34] sm:$0xf] }
 0x4a0   : > { %8863 = vmatpush.bf16.msra.mxu1 %v10528_v59  ;;  %v10305_v59 = vld [vmem:[%s11821_s24 + $0x78] sm:$0xf0] }
 0x4a1   : > { %8901 = vmatpush.bf16.msrb.mxu2 %v10728_v18  ;;  %v10639_v18 = vld [vmem:[%s11821_s24 + $0x310] sm:$0xf]  ;;  %v10308_v57 = vor.u32 %v10979_v33, %v10305_v59  ;;  %v10353_v59 = vld [vmem:[%s11821_s24 + $0xd8] sm:$0xf0] }
 0x4a2   : > { %8876 = vmatpush.bf16.msra.mxu3 %v10592_v5  ;;  %v10871_v5 = vld [vmem:[%s11821_s24 + $0x4e0] sm:$0xf]  ;;  %v10640_v43 = vor.u32 %v11064_v61, %v10639_v18  ;;  %v10364_v18 = vor.u32 %v10993_v26, %v10361_v10  ;;  %v10433_v26 = vld [vmem:[%s11821_s24 + $0x178] sm:$0xf0]  ;;  %v16008_v10 = vld [vmem:[#allocation1 + $0x12] sm:$0xff] }
 0x4a3   : > { %8889 = vmatpush.bf16.msrb.mxu0 %v10656_v9  ;;  %v10872_v50 = vor.u32 %v11122_v4, %v10871_v5  ;;  %v15953_v48 = vpop.f32.mrf.mxu2  ;;  %v11098_v5 = vld [vmem:[%s11821_s24 + $0x424] sm:$0xf0]  ;;  %v10839_v4 = vld [vmem:[%s11821_s24 + $0x4a0] sm:$0xf] }
 0x4a4   : > { %8864 = vmatpush.bf16.msra.mxu1 %v10520_v44  ;;  %v10863_v44 = vld [vmem:[%s11821_s24 + $0x4d0] sm:$0xf] }
 0x4a5   : > { %8902 = vmatpush.bf16.msrb.mxu2 %v10720_v8  ;;  %v10297_v8 = vld [vmem:[%s11821_s24 + $0x68] sm:$0xf0]  ;;  %v10864_v9 = vor.u32 %v11120_v2, %v10863_v44  ;;  %v10767_v44 = vld [vmem:[%s11821_s24 + $0x410] sm:$0xf]  ;;  %v11096_v2 = vld [vmem:[%s11821_s24 + $0x414] sm:$0xf0] }
 0x4a6   : > { %8877 = vmatpush.bf16.msra.mxu3 %v10584_v40  ;;  %v10887_v40 = vld [vmem:[%s11821_s24 + $0x500] sm:$0xf]  ;;  %v10300_v30 = vor.u32 %v10977_v60, %v10297_v8  ;;  %v10969_v60 = vld [vmem:[%s11821_s24 + $0x24] sm:$0xf] }
 0x4a7   : > { %8890 = vmatpush.bf16.msrb.mxu0 %v10648_v11  ;;  %v10888_v27 = vor.u32 %v11126_v58, %v10887_v40  ;;  %v10783_v11 = vld [vmem:[%s11821_s24 + $0x430] sm:$0xf]  ;;  %v10989_v8 = vld [vmem:[%s11821_s24 + $0xc4] sm:$0xf]  ;;  %v11112_v58 = vld [vmem:[%s11821_s24 + $0x494] sm:$0xf0] }
 0x4a8   : > { %8865 = vmatpush.bf16.msra.mxu1 %v10512_v39  ;;  %v10289_v39 = vld [vmem:[%s11821_s24 + $0x58] sm:$0xf0]  ;;  %v10784_v33 = vor.u32 %v11100_v0, %v10783_v11  ;;  %v10831_v40 = vld [vmem:[%s11821_s24 + $0x490] sm:$0xf] }
 0x4a9   : > { %8903 = vmatpush.bf16.msrb.mxu2 %v10712_v16  ;;  %v10369_v16 = vld [vmem:[%s11821_s24 + $0xf8] sm:$0xf0]  ;;  %v10292_v3 = vor.u32 %v10975_v22, %v10289_v39  ;;  %v10832_v47 = vor.u32 %v11112_v58, %v10831_v40  ;;  %v11023_v58 = vld [vmem:[%s11821_s24 + $0x1d4] sm:$0xf] }
 0x4aa   : > { %8878 = vmatpush.bf16.msra.mxu3 %v10576_v53  ;;  %v11118_v53 = vld [vmem:[%s11821_s24 + $0x4c4] sm:$0xf0]  ;;  %v10372_v28 = vor.u32 %v10995_v21, %v10369_v16  ;;  %v10268_v21 = vor.u32 %v10969_v60, %v10265_v12  ;;  %v10768_v16 = vor.u32 %v11096_v2, %v10767_v44  ;;  %v10337_v39 = vld [vmem:[%s11821_s24 + $0xb8] sm:$0xf0]  ;;  %v10553_v12 = vld [vmem:[%s11821_s24 + $0x268] sm:$0xf0] }
 0x4ab   : > { %8891 = vmatpush.bf16.msrb.mxu0 %v10640_v43  ;;  %v10856_v45 = vor.u32 %v11118_v53, %v10855_v20  ;;  %v7797_v14 = vpop.f32.mrf.mxu0  ;;  %v7825_v25 = vpop.f32.mrf.mxu2  ;;  %v11114_v43 = vld [vmem:[%s11821_s24 + $0x4a4] sm:$0xf0]  ;;  %v10759_v20 = vld [vmem:[%s11821_s24 + $0x400] sm:$0xf]  ;;  %v10497_v11 = vld [vmem:[%s11821_s24 + $0x1f8] sm:$0xf0] }
 0x4ac   : > { %8866 = vmatpush.bf16.msra.mxu1 %v10504_v23  ;;  %v10847_v23 = vld [vmem:[%s11821_s24 + $0x4b0] sm:$0xf]  ;;  %v10840_v41 = vor.u32 %v11114_v43, %v10839_v4  ;;  %v11094_v53 = vld [vmem:[%s11821_s24 + $0x404] sm:$0xf0]  ;;  %v10983_v43 = vld [vmem:[%s11821_s24 + $0x94] sm:$0xf] }
 0x4ad   : > { %8904 = vmatpush.bf16.msrb.mxu2 %v10704_v42  ;;  %v10281_v42 = vld [vmem:[%s11821_s24 + $0x48] sm:$0xf0]  ;;  %v10848_v55 = vor.u32 %v11116_v63, %v10847_v23  ;;  %v10985_v23 = vld [vmem:[%s11821_s24 + $0xa4] sm:$0xf]  ;;  %v11007_v44 = vld [vmem:[%s11821_s24 + $0x154] sm:$0xf] }
 0x4ae   : > { %8879 = vmatpush.bf16.msra.mxu3 %v10568_v37  ;;  %v7798_v37 = vadd.f32 %v7797_v14, %v15918_v6  ;;  %v10284_v61 = vor.u32 %v10973_v31, %v10281_v42  ;;  %v10273_v6 = vld [vmem:[%s11821_s24 + $0x38] sm:$0xf0]  ;;  %v11011_v31 = vld [vmem:[%s11821_s24 + $0x174] sm:$0xf]  ;;  %v10760_v14 = vor.u32 %v11094_v53, %v10759_v20  ;;  %v10329_v63 = vld [vmem:[%s11821_s24 + $0xa8] sm:$0xf0] }
 0x4af   : > { %8867 = vmatmul.bf16.vlgmr.msra.gmra.mxu1 %v15908_v62  ;;  %8892 = vmatpush.bf16.msrb.mxu0 %v10632_v36  ;;  %v11027_v42 = vld [vmem:[%s11821_s24 + $0x1f4] sm:$0xf]  ;;  %v10417_v2 = vld [vmem:[%s11821_s24 + $0x158] sm:$0xf0]  ;;  %v11021_v53 = vld [vmem:[%s11821_s24 + $0x1c4] sm:$0xf] }
 0x4b0   : > { %8911 = vmatpush.bf16.msrb.mxu1 %v10816_v38  ;;  %v7810_v38 = vpop.f32.mrf.mxu1 }
 0x4b1   : > { %8905 = vmatpush.bf16.msrb.mxu2 %v10696_v46  ;;  %8880 = vmatmul.bf16.vlgmr.msra.gmra.mxu3 %v15910_v54  ;;  %v7811_v19 = vadd.f32 %v7810_v38, %v7798_v37  ;;  %v10775_v46 = vld [vmem:[%s11821_s24 + $0x420] sm:$0xf]  ;;  %v10436_v37 = vor.u32 %v11011_v31, %v10433_v26  ;;  %v10965_v38 = vld [vmem:[%s11821_s24 + $0x4] sm:$0xf] }
 0x4b2   : > { %8924 = vmatpush.bf16.msrb.mxu3 %v10880_v29  ;;  %8893 = vmatmul.bf16.vlgmr.msrb.gmra.mxu0 %v15914_v51  ;;  %v10991_v29 = vld [vmem:[%s11821_s24 + $0xd4] sm:$0xf]  ;;  %v10776_v13 = vor.u32 %v11098_v5, %v10775_v46  ;;  %v10489_v46 = vld [vmem:[%s11821_s24 + $0x1e8] sm:$0xf0] }
 0x4b3   : > { %8944 = vmatpush.bf16.msra.mxu0 %v10888_v27  ;;  %v10356_v49 = vor.u32 %v10991_v29, %v10353_v59  ;;  %v7799_v36 = vpop.f32.mrf.mxu0  ;;  %v10987_v27 = vld [vmem:[%s11821_s24 + $0xb4] sm:$0xf]  ;;  %v11009_v29 = vld [vmem:[%s11821_s24 + $0x164] sm:$0xf]  ;;  %v10425_v59 = vld [vmem:[%s11821_s24 + $0x168] sm:$0xf0] }
 0x4b4   : > { %8912 = vmatpush.bf16.msrb.mxu1 %v10808_v7  ;;  %8906 = vmatmul.bf16.vlgmr.msrb.gmra.mxu2 %v15912_v1  ;;  %v10276_v7 = vor.u32 %v10971_v52, %v10273_v6  ;;  %v10561_v52 = vld [vmem:[%s11821_s24 + $0x278] sm:$0xf0]  ;;  %v11025_v6 = vld [vmem:[%s11821_s24 + $0x1e4] sm:$0xf]  ;;  %v16024_v5 = vld [vmem:[#allocation1] sm:$0xff] }
 0x4b5   : > { %8950 = vmatpush.bf16.msra.mxu2 %v10308_v57  ;;  %v15986_v57 = vadd.f32 %v15953_v48, %v7811_v19  ;;  %v7836_v48 = vpop.f32.mrf.mxu3  ;;  %v10981_v36 = vld [vmem:[%s11821_s24 + $0x84] sm:$0xf] }
 0x4b6   : > { %8925 = vmatpush.bf16.msrb.mxu3 %v10872_v50  ;;  %v10345_v50 = vld [vmem:[%s11821_s24 + $0xc8] sm:$0xf0] }
 0x4b7   : > { %8963 = vmatpush.bf16.msrb.mxu0 %v10372_v28  ;;  %v7849_v34 = vpop.f32.mrf.mxu2  ;;  %v10823_v28 = vld [vmem:[%s11821_s24 + $0x480] sm:$0xf] }
 0x4b8   : > { %8913 = vmatpush.bf16.msrb.mxu1 %v10800_v17  ;;  %v10967_v17 = vld [vmem:[%s11821_s24 + $0x14] sm:$0xf]  ;;  %v7812_v22 = vpop.f32.mrf.mxu1 }
 0x4b9   : > { %8951 = vmatpush.bf16.msra.mxu2 %v10300_v30  ;;  %v10348_v30 = vor.u32 %v10989_v8, %v10345_v50  ;;  %v10428_v8 = vor.u32 %v11009_v29, %v10425_v59  ;;  %v11041_v50 = vld [vmem:[%s11821_s24 + $0x264] sm:$0xf]  ;;  %v10420_v22 = vor.u32 %v11007_v44, %v10417_v2  ;;  %v10521_v44 = vld [vmem:[%s11821_s24 + $0x228] sm:$0xf0] }
 0x4ba   : > { %8926 = vmatpush.bf16.msrb.mxu3 %v10864_v9  ;;  %v10257_v9 = vld [vmem:[%s11821_s24 + $0x18] sm:$0xf0] }
 0x4bb   : > { %8964 = vmatpush.bf16.msrb.mxu0 %v10364_v18  ;;  %v10260_v0 = vor.u32 %v10967_v17, %v10257_v9  ;;  %v10249_v18 = vld [vmem:[%s11821_s24 + $0x8] sm:$0xf0]  ;;  %v10556_v17 = vor.u32 %v11041_v50, %v10553_v12  ;;  %v10625_v9 = vld [vmem:[%s11821_s24 + $0x2f8] sm:$0xf0]  ;;  %v11033_v50 = vld [vmem:[%s11821_s24 + $0x224] sm:$0xf] }
 0x4bc   : > { %8914 = vmatpush.bf16.msrb.mxu1 %v10792_v56  ;;  %v11110_v56 = vld [vmem:[%s11821_s24 + $0x484] sm:$0xf0]  ;;  %v10252_v4 = vor.u32 %v10965_v38, %v10249_v18 }
 0x4bd   : > { %8952 = vmatpush.bf16.msra.mxu2 %v10292_v3  ;;  %v16003_v3 = vadd.f32 %v7849_v34, %v7836_v48  ;;  %v10824_v25 = vor.u32 %v11110_v56, %v10823_v28  ;;  %v7838_v19 = vpop.f32.mrf.mxu3  ;;  %v10481_v48 = vld [vmem:[%s11821_s24 + $0x1d8] sm:$0xf0]  ;;  %v11005_v34 = vld [vmem:[%s11821_s24 + $0x144] sm:$0xf]  ;;  %v10473_v28 = vld [vmem:[%s11821_s24 + $0x1c8] sm:$0xf0] }
 0x4be   : > { %8927 = vmatpush.bf16.msrb.mxu3 %v10856_v45  ;;  %v10340_v45 = vor.u32 %v10987_v27, %v10337_v39  ;;  %v10484_v27 = vor.u32 %v11023_v58, %v10481_v48  ;;  %v10545_v39 = vld [vmem:[%s11821_s24 + $0x258] sm:$0xf0] }
 0x4bf   : > { %8965 = vmatpush.bf16.msrb.mxu0 %v10356_v49  ;;  %v10321_v49 = vld [vmem:[%s11821_s24 + $0x98] sm:$0xf0] }
 0x4c0   : > { %8915 = vmatpush.bf16.msrb.mxu1 %v10784_v33  ;;  %v10500_v33 = vor.u32 %v11027_v42, %v10497_v11  ;;  %v10324_v40 = vor.u32 %v10983_v43, %v10321_v49  ;;  %v11057_v42 = vld [vmem:[%s11821_s24 + $0x2e4] sm:$0xf]  ;;  %v10617_v11 = vld [vmem:[%s11821_s24 + $0x2e8] sm:$0xf0]  ;;  %v10385_v58 = vld [vmem:[%s11821_s24 + $0x118] sm:$0xf0] }
 0x4c1   : > { %8953 = vmatpush.bf16.msra.mxu2 %v10284_v61  ;;  %v11043_v61 = vld [vmem:[%s11821_s24 + $0x274] sm:$0xf]  ;;  %v11017_v43 = vld [vmem:[%s11821_s24 + $0x1a4] sm:$0xf]  ;;  %v10457_v49 = vld [vmem:[%s11821_s24 + $0x1a8] sm:$0xf0] }
 0x4c2   : > { %8928 = vmatpush.bf16.msrb.mxu3 %v10848_v55  ;;  %10893 = vmatmul.msk.bf16.vlgmr.msra.gmra.mxu0 %vm7681_vm13, %v16008_v10  ;;  %v10332_v55 = vor.u32 %v10985_v23, %v10329_v63  ;;  %v10564_v60 = vor.u32 %v11043_v61, %v10561_v52  ;;  %v10401_v23 = vld [vmem:[%s11821_s24 + $0x138] sm:$0xf0]  ;;  %v11019_v63 = vld [vmem:[%s11821_s24 + $0x1b4] sm:$0xf]  ;;  %v10460_v12 = vor.u32 %v11017_v43, %v10457_v49  ;;  %v10745_v43 = vld [vmem:[%s11821_s24 + $0x3e8] sm:$0xf0] }
 0x4c3   : > { %8966 = vmatpush.bf16.msrb.mxu0 %v10348_v30  ;;  %v10313_v30 = vld [vmem:[%s11821_s24 + $0x88] sm:$0xf0]  ;;  %v11035_v61 = vld [vmem:[%s11821_s24 + $0x234] sm:$0xf]  ;;  %v10609_v52 = vld [vmem:[%s11821_s24 + $0x2d8] sm:$0xf0] }
 0x4c4   : > { %8916 = vmatpush.bf16.msrb.mxu1 %v10776_v13  ;;  %v16028_v13 = vld [vmem:[#allocation1 + $0x9] sm:$0xff]  ;;  %v10316_v20 = vor.u32 %v10981_v36, %v10313_v30  ;;  %v11015_v36 = vld [vmem:[%s11821_s24 + $0x194] sm:$0xf] }
 0x4c5   : > { %8954 = vmatpush.bf16.msra.mxu2 %v10276_v7  ;;  %v7851_v7 = vpop.f32.mrf.mxu2  ;;  %v10449_v30 = vld [vmem:[%s11821_s24 + $0x198] sm:$0xf0] }
 0x4c6   : > { %8929 = vmatpush.bf16.msrb.mxu3 %v10840_v41  ;;  %v10492_v41 = vor.u32 %v11025_v6, %v10489_v46  ;;  %v11001_v46 = vld [vmem:[%s11821_s24 + $0x124] sm:$0xf] }
 0x4c7   : > { %8967 = vmatpush.bf16.msrb.mxu0 %v10340_v45  ;;  %v11037_v45 = vld [vmem:[%s11821_s24 + $0x244] sm:$0xf] }
 0x4c8   : > { %8917 = vmatpush.bf16.msrb.mxu1 %v10768_v16  ;;  %v11059_v16 = vld [vmem:[%s11821_s24 + $0x2f4] sm:$0xf] }
 0x4c9   : > { %8955 = vmatpush.bf16.msra.mxu2 %v10268_v21  ;;  %v11039_v21 = vld [vmem:[%s11821_s24 + $0x254] sm:$0xf]  ;;  %v10628_v56 = vor.u32 %v11059_v16, %v10625_v9 }
 0x4ca   : > { %8930 = vmatpush.bf16.msrb.mxu3 %v10832_v47  ;;  %v10409_v47 = vld [vmem:[%s11821_s24 + $0x148] sm:$0xf0]  ;;  %v10548_v31 = vor.u32 %v11039_v21, %v10545_v39  ;;  %v10524_v21 = vor.u32 %v11033_v50, %v10521_v44  ;;  %v11051_v39 = vld [vmem:[%s11821_s24 + $0x2b4] sm:$0xf] }
 0x4cb   : > { %8968 = vmatpush.bf16.msrb.mxu0 %v10332_v55  ;;  %v10412_v26 = vor.u32 %v11005_v34, %v10409_v47  ;;  %v7862_v29 = vpop.f32.mrf.mxu0  ;;  %v10529_v55 = vld [vmem:[%s11821_s24 + $0x238] sm:$0xf0]  ;;  %v11071_v44 = vld [vmem:[%s11821_s24 + $0x354] sm:$0xf] }
 0x4cc   : > { %8918 = vmatpush.bf16.msrb.mxu1 %v10760_v14  ;;  %v11003_v14 = vld [vmem:[%s11821_s24 + $0x134] sm:$0xf]  ;;  %v7875_v59 = vpop.f32.mrf.mxu1  ;;  %v7863_v6 = vadd.f32 %v7862_v29, %v16003_v3  ;;  %v10601_v3 = vld [vmem:[%s11821_s24 + $0x2c8] sm:$0xf0]  ;;  %v10593_v34 = vld [vmem:[%s11821_s24 + $0x2b8] sm:$0xf0] }
 0x4cd   : > { %8956 = vmatpush.bf16.msra.mxu2 %v10260_v0  ;;  %v10537_v0 = vld [vmem:[%s11821_s24 + $0x248] sm:$0xf0]  ;;  %v10404_v18 = vor.u32 %v11003_v14, %v10401_v23  ;;  %v10753_v14 = vld [vmem:[%s11821_s24 + $0x3f8] sm:$0xf0] }
 0x4ce   : > { %8931 = vmatpush.bf16.msrb.mxu3 %v10824_v25  ;;  %v10465_v25 = vld [vmem:[%s11821_s24 + $0x1b8] sm:$0xf0]  ;;  %v10540_v38 = vor.u32 %v11037_v45, %v10537_v0  ;;  %v10441_v45 = vld [vmem:[%s11821_s24 + $0x188] sm:$0xf0]  ;;  %v11091_v0 = vld [vmem:[%s11821_s24 + $0x3f4] sm:$0xf] }
 0x4cf   : > { %8919 = vmatmul.bf16.vlgmr.msrb.gmra.mxu1 %v16024_v5  ;;  %8969 = vmatpush.bf16.msrb.mxu0 %v10324_v40  ;;  %v10468_v19 = vor.u32 %v11019_v63, %v10465_v25  ;;  %v10999_v40 = vld [vmem:[%s11821_s24 + $0x114] sm:$0xf]  ;;  %v11049_v25 = vld [vmem:[%s11821_s24 + $0x2a4] sm:$0xf] }
 0x4d0   : > { %8976 = vmatpush.bf16.msra.mxu1 %v10436_v37  ;;  %v10620_v37 = vor.u32 %v11057_v42, %v10617_v11  ;;  %v10388_v16 = vor.u32 %v10999_v40, %v10385_v58  ;;  %v11075_v42 = vld [vmem:[%s11821_s24 + $0x374] sm:$0xf]  ;;  %v10689_v11 = vld [vmem:[%s11821_s24 + $0x378] sm:$0xf0] }
 0x4d1   : > { %8932 = vmatmul.bf16.vlgmr.msrb.gmra.mxu3 %v16028_v13  ;;  %8957 = vmatpush.bf16.msra.mxu2 %v10252_v4  ;;  %v10393_v4 = vld [vmem:[%s11821_s24 + $0x128] sm:$0xf0]  ;;  %v11087_v58 = vld [vmem:[%s11821_s24 + $0x3d4] sm:$0xf] }
 0x4d2   : > { %8989 = vmatpush.bf16.msra.mxu3 %v10500_v33  ;;  %v11055_v33 = vld [vmem:[%s11821_s24 + $0x2d4] sm:$0xf] }
 0x4d3   : > { %8970 = vmatpush.bf16.msrb.mxu0 %v10316_v20  ;;  %v10612_v7 = vor.u32 %v11055_v33, %v10609_v52  ;;  %v7864_v47 = vpop.f32.mrf.mxu0  ;;  %v10452_v20 = vor.u32 %v11015_v36, %v10449_v30  ;;  %v10505_v33 = vld [vmem:[%s11821_s24 + $0x208] sm:$0xf0]  ;;  %v11107_v52 = vld [vmem:[%s11821_s24 + $0x474] sm:$0xf]  ;;  %v11045_v36 = vld [vmem:[%s11821_s24 + $0x284] sm:$0xf] }
 0x4d4   : > { %8977 = vmatpush.bf16.msra.mxu1 %v10428_v8  ;;  %8958 = vmatmul.bf16.vlgmr.msra.gmra.mxu2 %v15853_v32  ;;  %v10476_v32 = vor.u32 %v11021_v53, %v10473_v28  ;;  %v10396_v8 = vor.u32 %v11001_v46, %v10393_v4  ;;  %v7888_v2 = vpop.f32.mrf.mxu3  ;;  %v10997_v28 = vld [vmem:[%s11821_s24 + $0x104] sm:$0xf]  ;;  %v10569_v30 = vld [vmem:[%s11821_s24 + $0x288] sm:$0xf0] }
 0x4d5   : > { %9002 = vmatpush.bf16.msrb.mxu2 %v10564_v60  ;;  %v7876_v60 = vadd.f32 %v7875_v59, %v7863_v6  ;;  %v10756_v59 = vor.u32 %v11091_v0, %v10753_v14  ;;  %v10681_v6 = vld [vmem:[%s11821_s24 + $0x368] sm:$0xf0]  ;;  %v11089_v4 = vld [vmem:[%s11821_s24 + $0x3e4] sm:$0xf]  ;;  %v10657_v0 = vld [vmem:[%s11821_s24 + $0x338] sm:$0xf0] }
 0x4d6   : > { %8990 = vmatpush.bf16.msra.mxu3 %v10492_v41  ;;  %8971 = vmatmul.bf16.vlgmr.msrb.gmra.mxu0 %v15857_v35  ;;  %v10532_v35 = vor.u32 %v11035_v61, %v10529_v55  ;;  %v11053_v41 = vld [vmem:[%s11821_s24 + $0x2c4] sm:$0xf]  ;;  %v11083_v14 = vld [vmem:[%s11821_s24 + $0x3b4] sm:$0xf] }
 0x4d7   : > { %9015 = vmatpush.bf16.msra.mxu0 %v10628_v56  ;;  %v7889_v48 = vadd.f32 %v7888_v2, %v7876_v60  ;;  %v7901_v9 = vpop.f32.mrf.mxu2  ;;  %v10377_v56 = vld [vmem:[%s11821_s24 + $0x108] sm:$0xf0]  ;;  %v11029_v61 = vld [vmem:[%s11821_s24 + $0x204] sm:$0xf]  ;;  %v10577_v60 = vld [vmem:[%s11821_s24 + $0x298] sm:$0xf0] }
 0x4d8   : > { %8978 = vmatpush.bf16.msra.mxu1 %v10420_v22  ;;  %v11031_v22 = vld [vmem:[%s11821_s24 + $0x214] sm:$0xf]  ;;  %v10380_v63 = vor.u32 %v10997_v28, %v10377_v56  ;;  %v11073_v55 = vld [vmem:[%s11821_s24 + $0x364] sm:$0xf]  ;;  %v10508_v49 = vor.u32 %v11029_v61, %v10505_v33  ;;  %v10673_v2 = vld [vmem:[%s11821_s24 + $0x358] sm:$0xf0] }
 0x4d9   : > { %9003 = vmatpush.bf16.msrb.mxu2 %v10556_v17  ;;  %v10604_v17 = vor.u32 %v11053_v41, %v10601_v3  ;;  %v16079_v53 = vadd.f32 %v7901_v9, %v7889_v48  ;;  %v10684_v50 = vor.u32 %v11073_v55, %v10681_v6  ;;  %v11105_v41 = vld [vmem:[%s11821_s24 + $0x464] sm:$0xf]  ;;  %v10748_v3 = vor.u32 %v11089_v4, %v10745_v43  ;;  %v10737_v48 = vld [vmem:[%s11821_s24 + $0x3d8] sm:$0xf0]  ;;  %v11099_v33 = vld [vmem:[%s11821_s24 + $0x434] sm:$0xf] }
 0x4da   : > { %8991 = vmatpush.bf16.msra.mxu3 %v10484_v27  ;;  %v10513_v27 = vld [vmem:[%s11821_s24 + $0x218] sm:$0xf0]  ;;  %v10740_v9 = vor.u32 %v11087_v58, %v10737_v48  ;;  %v11085_v47 = vld [vmem:[%s11821_s24 + $0x3c4] sm:$0xf]  ;;  %v10713_v4 = vld [vmem:[%s11821_s24 + $0x3a8] sm:$0xf0] }
 0x4db   : > { %9016 = vmatpush.bf16.msra.mxu0 %v10620_v37  ;;  %v10516_v23 = vor.u32 %v11031_v22, %v10513_v27  ;;  %v10585_v37 = vld [vmem:[%s11821_s24 + $0x2a8] sm:$0xf0]  ;;  %v10676_v22 = vor.u32 %v11071_v44, %v10673_v2  ;;  %v10801_v27 = vld [vmem:[%s11821_s24 + $0x458] sm:$0xf0]  ;;  %v11065_v55 = vld [vmem:[%s11821_s24 + $0x324] sm:$0xf] }
 0x4dc   : > { %8979 = vmatpush.bf16.msra.mxu1 %v10412_v26  ;;  %v7877_v26 = vpop.f32.mrf.mxu1  ;;  %v7890_v29 = vpop.f32.mrf.mxu3  ;;  %v10588_v46 = vor.u32 %v11049_v25, %v10585_v37  ;;  %v11079_v44 = vld [vmem:[%s11821_s24 + $0x394] sm:$0xf]  ;;  %v10705_v2 = vld [vmem:[%s11821_s24 + $0x398] sm:$0xf0] }
 0x4dd   : > { %9004 = vmatpush.bf16.msrb.mxu2 %v10548_v31  ;;  %v11013_v31 = vld [vmem:[%s11821_s24 + $0x184] sm:$0xf]  ;;  %v10865_v29 = vld [vmem:[%s11821_s24 + $0x4d8] sm:$0xf0] }
 0x4de   : > { %8992 = vmatpush.bf16.msra.mxu3 %v10476_v32  ;;  %v10596_v32 = vor.u32 %v11051_v39, %v10593_v34  ;;  %v11069_v39 = vld [vmem:[%s11821_s24 + $0x344] sm:$0xf]  ;;  %v10572_v34 = vor.u32 %v11045_v36, %v10569_v30 }
 0x4df   : > { %9017 = vmatpush.bf16.msra.mxu0 %v10612_v7  ;;  %v11047_v7 = vld [vmem:[%s11821_s24 + $0x294] sm:$0xf]  ;;  %v11101_v26 = vld [vmem:[%s11821_s24 + $0x444] sm:$0xf] }
 0x4e0   : > { %8980 = vmatpush.bf16.msra.mxu1 %v10404_v18  ;;  %v10692_v18 = vor.u32 %v11075_v42, %v10689_v11  ;;  %v10580_v40 = vor.u32 %v11047_v7, %v10577_v60  ;;  %v10873_v42 = vld [vmem:[%s11821_s24 + $0x4e8] sm:$0xf0]  ;;  %v11117_v60 = vld [vmem:[%s11821_s24 + $0x4c4] sm:$0xf] }
 0x4e1   : > { %9005 = vmatpush.bf16.msrb.mxu2 %v10540_v38  ;;  %v10444_v38 = vor.u32 %v11013_v31, %v10441_v45  ;;  %v11121_v45 = vld [vmem:[%s11821_s24 + $0x4e4] sm:$0xf] }
 0x4e2   : > { %8993 = vmatpush.bf16.msra.mxu3 %v10468_v19  ;;  %v10817_v19 = vld [vmem:[%s11821_s24 + $0x478] sm:$0xf0]  ;;  %v10876_v25 = vor.u32 %v11121_v45, %v10873_v42  ;;  %v10841_v45 = vld [vmem:[%s11821_s24 + $0x4a8] sm:$0xf0] }
 0x4e3   : > { %9018 = vmatpush.bf16.msra.mxu0 %v10604_v17 }
 0x4e4   : > { %8981 = vmatpush.bf16.msra.mxu1 %v10396_v8  ;;  %v10820_v8 = vor.u32 %v11107_v52, %v10817_v19  ;;  %v11119_v52 = vld [vmem:[%s11821_s24 + $0x4d4] sm:$0xf]  ;;  %v10785_v19 = vld [vmem:[%s11821_s24 + $0x438] sm:$0xf0] }
 0x4e5   : > { %9006 = vmatpush.bf16.msrb.mxu2 %v10532_v35  ;;  %v7903_v35 = vpop.f32.mrf.mxu2  ;;  %v10868_v43 = vor.u32 %v11119_v52, %v10865_v29  ;;  %v11109_v29 = vld [vmem:[%s11821_s24 + $0x484] sm:$0xf] }
 0x4e6   : > { %8994 = vmatpush.bf16.msra.mxu3 %v10460_v12  ;;  %v10809_v12 = vld [vmem:[%s11821_s24 + $0x468] sm:$0xf0] }
 0x4e7   : > { %9019 = vmatpush.bf16.msra.mxu0 %v10596_v32  ;;  %v10812_v17 = vor.u32 %v11105_v41, %v10809_v12  ;;  %v11067_v32 = vld [vmem:[%s11821_s24 + $0x334] sm:$0xf]  ;;  %v10857_v35 = vld [vmem:[%s11821_s24 + $0x4c8] sm:$0xf0] }
 0x4e8   : > { %8982 = vmatpush.bf16.msra.mxu1 %v10388_v16  ;;  %v10881_v16 = vld [vmem:[%s11821_s24 + $0x4f8] sm:$0xf0]  ;;  %v10660_v61 = vor.u32 %v11067_v32, %v10657_v0  ;;  %v11063_v41 = vld [vmem:[%s11821_s24 + $0x314] sm:$0xf]  ;;  %v10860_v36 = vor.u32 %v11117_v60, %v10857_v35  ;;  %v11125_v32 = vld [vmem:[%s11821_s24 + $0x504] sm:$0xf] }
 0x4e9   : > { %9007 = vmatpush.bf16.msrb.mxu2 %v10524_v21  ;;  %v11103_v21 = vld [vmem:[%s11821_s24 + $0x454] sm:$0xf]  ;;  %v10889_v0 = vld [vmem:[%s11821_s24 + $0x508] sm:$0xf0] }
 0x4ea   : > { %8995 = vmatpush.bf16.msra.mxu3 %v10452_v20  ;;  %v10729_v20 = vld [vmem:[%s11821_s24 + $0x3c8] sm:$0xf0]  ;;  %v10804_v56 = vor.u32 %v11103_v21, %v10801_v27  ;;  %v11115_v21 = vld [vmem:[%s11821_s24 + $0x4b4] sm:$0xf]  ;;  %v10708_v27 = vor.u32 %v11079_v44, %v10705_v2 }
 0x4eb   : > { %9020 = vmatpush.bf16.msra.mxu0 %v10588_v46  ;;  %v10732_v11 = vor.u32 %v11085_v47, %v10729_v20  ;;  %v11081_v46 = vld [vmem:[%s11821_s24 + $0x3a4] sm:$0xf]  ;;  %v10697_v20 = vld [vmem:[%s11821_s24 + $0x388] sm:$0xf0] }
 0x4ec   : > { %8983 = vmatpush.bf16.msra.mxu1 %v10380_v63  ;;  %v7914_v63 = vpop.f32.mrf.mxu0  ;;  %v11077_v47 = vld [vmem:[%s11821_s24 + $0x384] sm:$0xf]  ;;  %v11292_v60 = vld [vmem:[%s11838_s11 + $0x18] sm:$0xff] }
 0x4ed   : > { %9008 = vmatpush.bf16.msrb.mxu2 %v10516_v23  ;;  %v10721_v23 = vld [vmem:[%s11821_s24 + $0x3b8] sm:$0xf0]  ;;  %v7915_v37 = vadd.f32 %v7914_v63, %v16079_v53  ;;  %v10649_v53 = vld [vmem:[%s11821_s24 + $0x328] sm:$0xf0]  ;;  %v10700_v42 = vor.u32 %v11077_v47, %v10697_v20 }
 0x4ee   : > { %8996 = vmatpush.bf16.msra.mxu3 %v10444_v38  ;;  %v7927_v38 = vpop.f32.mrf.mxu1  ;;  %v10652_v7 = vor.u32 %v11065_v55, %v10649_v53 }
 0x4ef   : > { %8984 = vmatmul.bf16.vlgmr.msra.gmra.mxu1 %v15882_v24  ;;  %v11123_v24 = vld [vmem:[%s11821_s24 + $0x4f4] sm:$0xf]  ;;  %9021 = vmatpush.bf16.msra.mxu0 %v10580_v40  ;;  %v7928_v6 = vadd.f32 %v7927_v38, %v7915_v37 }
 0x4f0   : > { %9028 = vmatpush.bf16.msrb.mxu1 %v10692_v18  ;;  %v10884_v28 = vor.u32 %v11123_v24, %v10881_v16  ;;  %v10849_v24 = vld [vmem:[%s11821_s24 + $0x4b8] sm:$0xf0] }
 0x4f1   : > { %8997 = vmatmul.bf16.vlgmr.msra.gmra.mxu3 %v15867_v15  ;;  %9009 = vmatpush.bf16.msrb.mxu2 %v10508_v49  ;;  %v10665_v15 = vld [vmem:[%s11821_s24 + $0x348] sm:$0xf0]  ;;  %v10788_v49 = vor.u32 %v11099_v33, %v10785_v19  ;;  %v10892_v33 = vor.u32 %v11125_v32, %v10889_v0 }
 0x4f2   : > { %9041 = vmatpush.bf16.msrb.mxu3 %v10756_v59  ;;  %v10668_v31 = vor.u32 %v11069_v39, %v10665_v15  ;;  %v10724_v59 = vor.u32 %v11083_v14, %v10721_v23  ;;  %v10769_v39 = vld [vmem:[%s11821_s24 + $0x418] sm:$0xf0]  ;;  %v11061_v15 = vld [vmem:[%s11821_s24 + $0x304] sm:$0xf]  ;;  %v11304_v0 = vld [vmem:[%s11838_s11 + $0x78] sm:$0xff] }
 0x4f3   : > { %9022 = vmatpush.bf16.msra.mxu0 %v10572_v34  ;;  %v10633_v34 = vld [vmem:[%s11821_s24 + $0x308] sm:$0xf0] }
 0x4f4   : > { %9029 = vmatpush.bf16.msrb.mxu1 %v10684_v50  ;;  %9010 = vmatmul.bf16.vlgmr.msrb.gmra.mxu2 %v15908_v62  ;;  %v10793_v62 = vld [vmem:[%s11821_s24 + $0x448] sm:$0xf0]  ;;  %v7940_v12 = vpop.f32.mrf.mxu3  ;;  %v7916_v58 = vpop.f32.mrf.mxu0 }
 0x4f5   : > { %9054 = vmatpush.bf16.msra.mxu2 %v10820_v8  ;;  %v10796_v18 = vor.u32 %v11101_v26, %v10793_v62  ;;  %v10716_v8 = vor.u32 %v11081_v46, %v10713_v4  ;;  %v10777_v50 = vld [vmem:[%s11821_s24 + $0x428] sm:$0xf0]  ;;  %v7941_v40 = vadd.f32 %v7940_v12, %v7928_v6  ;;  %v11113_v26 = vld [vmem:[%s11821_s24 + $0x4a4] sm:$0xf]  ;;  %v11289_v12 = vld [vmem:[%s11838_s11] sm:$0xff] }
 0x4f6   : > { %9042 = vmatpush.bf16.msrb.mxu3 %v10748_v3  ;;  %9023 = vmatmul.bf16.vlgmr.msra.gmra.mxu0 %v15910_v54  ;;  %v11097_v54 = vld [vmem:[%s11821_s24 + $0x424] sm:$0xf]  ;;  %v10641_v3 = vld [vmem:[%s11821_s24 + $0x318] sm:$0xf0]  ;;  %v7929_v16 = vpop.f32.mrf.mxu1  ;;  %v10761_v62 = vld [vmem:[%s11821_s24 + $0x408] sm:$0xf0]  ;;  %v10844_v63 = vor.u32 %v11113_v26, %v10841_v45 }
 0x4f7   : > { %9067 = vmatpush.bf16.msrb.mxu0 %v10884_v28  ;;  %v7953_v48 = vpop.f32.mrf.mxu2  ;;  %v10780_v30 = vor.u32 %v11097_v54, %v10777_v50  ;;  %v10852_v28 = vor.u32 %v11115_v21, %v10849_v24  ;;  %v11296_v4 = vld [vmem:[%s11838_s11 + $0x38] sm:$0xff]  ;;  %v11290_v50 = vld [vmem:[%s11838_s11 + $0x8] sm:$0xff] }
 0x4f8   : > { %9030 = vmatpush.bf16.msrb.mxu1 %v10676_v22  ;;  %v11095_v22 = vld [vmem:[%s11821_s24 + $0x414] sm:$0xf] }
 0x4f9   : > { %9055 = vmatpush.bf16.msra.mxu2 %v10812_v17  ;;  %v10644_v17 = vor.u32 %v11063_v41, %v10641_v3 }
 0x4fa   : > { %9043 = vmatpush.bf16.msrb.mxu3 %v10740_v9  ;;  %v7954_v9 = vadd.f32 %v7953_v48, %v7941_v40 }
 0x4fb   : > { %9068 = vmatpush.bf16.msrb.mxu0 %v10876_v25 }
 0x4fc   : > { %9031 = vmatpush.bf16.msrb.mxu1 %v10668_v31  ;;  %v10636_v31 = vor.u32 %v11061_v15, %v10633_v34  ;;  %v7942_v14 = vpop.f32.mrf.mxu3  ;;  %v7966_v23 = vpop.f32.mrf.mxu0  ;;  %v9093_v15 = vld [vmem:[%s340_s21] sm:$0x3] }
 0x4fd   : > { %9056 = vmatpush.bf16.msra.mxu2 %v10804_v56  ;;  %v10772_v56 = vor.u32 %v11095_v22, %v10769_v39  ;;  %v16160_v37 = vadd.f32 %v7966_v23, %v7954_v9  ;;  %v9095_v20 = vperm.slane %v9093_v15, 0  ;;  %v11303_v14 = vld [vmem:[%s11838_s11 + $0x70] sm:$0xff] }
 0x4fe   : > { %9044 = vmatpush.bf16.msrb.mxu3 %v10732_v11  ;;  %v11093_v11 = vld [vmem:[%s11821_s24 + $0x404] sm:$0xf] }
 0x4ff   : > { %9069 = vmatpush.bf16.msrb.mxu0 %v10868_v43  ;;  %v7955_v25 = vpop.f32.mrf.mxu2  ;;  %v10764_v38 = vor.u32 %v11093_v11, %v10761_v62 }
 0x500   : > { %9032 = vmatpush.bf16.msrb.mxu1 %v10660_v61  ;;  %v10833_v61 = vld [vmem:[%s11821_s24 + $0x498] sm:$0xf0] }
 0x501   : > { %9057 = vmatpush.bf16.msra.mxu2 %v10796_v18  ;;  %v11111_v18 = vld [vmem:[%s11821_s24 + $0x494] sm:$0xf] }
 0x502   : > { %9045 = vmatpush.bf16.msrb.mxu3 %v10724_v59  ;;  %v10836_v52 = vor.u32 %v11111_v18, %v10833_v61  ;;  %v10825_v59 = vld [vmem:[%s11821_s24 + $0x488] sm:$0xf0]  ;;  %v11301_v18 = vld [vmem:[%s11838_s11 + $0x60] sm:$0xff] }
 0x503   : > { %9070 = vmatpush.bf16.msrb.mxu0 %v10860_v36  ;;  %v10828_v19 = vor.u32 %v11109_v29, %v10825_v59  ;;  %v11299_v59 = vld [vmem:[%s11838_s11 + $0x50] sm:$0xff] }
 0x504   : > { %9033 = vmatpush.bf16.msrb.mxu1 %v10652_v7  ;;  %v7968_v55 = vpop.f32.mrf.mxu0  ;;  %v11294_v7 = vld [vmem:[%s11838_s11 + $0x28] sm:$0xff] }
 0x505   : > { %9058 = vmatpush.bf16.msra.mxu2 %v10788_v49 }
 0x506   : > { %9046 = vmatpush.bf16.msrb.mxu3 %v10716_v8  ;;  %v11291_v8 = vld [vmem:[%s11838_s11 + $0x10] sm:$0xff] }
 0x507   : > { %9071 = vmatpush.bf16.msrb.mxu0 %v10852_v28 }
 0x508   : > { %9034 = vmatpush.bf16.msrb.mxu1 %v10644_v17 }
 0x509   : > { %9059 = vmatpush.bf16.msra.mxu2 %v10780_v30 }
 0x50a   : > { %9047 = vmatpush.bf16.msrb.mxu3 %v10708_v27 }
 0x50b   : > { %9072 = vmatpush.bf16.msrb.mxu0 %v10844_v63  ;;  %v11302_v63 = vld [vmem:[%s11838_s11 + $0x68] sm:$0xff] }
 0x50c   : > { %9035 = vmatpush.bf16.msrb.mxu1 %v10636_v31  ;;  %v8816_v53 = vpop.f32.mrf.mxu1 }
 0x50d   : > { %9060 = vmatpush.bf16.msra.mxu2 %v10772_v56  ;;  %v8817_v2 = vadd.f32 %v8816_v53, %v15986_v57  ;;  %v11298_v53 = vld [vmem:[%s11838_s11 + $0x48] sm:$0xff] }
 0x50e   : > { %9048 = vmatpush.bf16.msrb.mxu3 %v10700_v42 }
 0x50f   : > { %9036 = vmatmul.bf16.vlgmr.msrb.gmra.mxu1 %v15914_v51  ;;  %9073 = vmatpush.bf16.msrb.mxu0 %v10836_v52  ;;  %v11300_v52 = vld [vmem:[%s11838_s11 + $0x58] sm:$0xff] }
 0x510   : > { %9245 = vmatpush.bf16.msra.mxu1 %v11304_v0 }
 0x511   : > { %9049 = vmatmul.bf16.vlgmr.msrb.gmra.mxu3 %v15912_v1  ;;  %9061 = vmatpush.bf16.msra.mxu2 %v10764_v38  ;;  %v8842_v1 = vpop.f32.mrf.mxu0 }
 0x512   : > { %9232 = vmatpush.bf16.msra.mxu3 %v11296_v4 }
 0x513   : > { %9074 = vmatpush.bf16.msrb.mxu0 %v10828_v19 }
 0x514   : > { %9062 = vmatmul.bf16.vlgmr.msra.gmra.mxu2 %v16024_v5  ;;  %v8829_v51 = vpop.f32.mrf.mxu3  ;;  %v8818_v46 = vpop.f32.mrf.mxu1  ;;  %v11295_v5 = vld [vmem:[%s11838_s11 + $0x30] sm:$0xff]  ;;  %9246 = vmatpush.bf16.msra.mxu1 %v11303_v14 }
 0x515   : > { %9087 = vmatpush.bf16.msrb.mxu2 %v10892_v33  ;;  %v8830_v40 = vadd.f32 %v8829_v51, %v8817_v2  ;;  %v11297_v51 = vld [vmem:[%s11838_s11 + $0x40] sm:$0xff] }
 0x516   : > { %9075 = vmatmul.bf16.vlgmr.msrb.gmra.mxu0 %v16028_v13  ;;  %9233 = vmatpush.bf16.msra.mxu3 %v11295_v5  ;;  %v11293_v13 = vld [vmem:[%s11838_s11 + $0x20] sm:$0xff] }
 0x517   : > { %v8855_v6 = vpop.f32.mrf.mxu2  ;;  %v8843_v36 = vadd.f32 %v8842_v1, %v8830_v40 }
 0x518   : > { %9247 = vmatpush.bf16.msra.mxu1 %v11302_v63 }
 0x519   : > { %v8844_v49 = vpop.f32.mrf.mxu0  ;;  %v8856_v17 = vadd.f32 %v8855_v6, %v8843_v36 }
 0x51a   : > { %9234 = vmatpush.bf16.msra.mxu3 %v11294_v7 }
 0x51c   : > { %v8831_v43 = vpop.f32.mrf.mxu3  ;;  %9248 = vmatpush.bf16.msra.mxu1 %v11301_v18 }
 0x51e   : > { %9235 = vmatpush.bf16.msra.mxu3 %v11293_v13 }
 0x51f   : > { %v8857_v54 = vpop.f32.mrf.mxu2 }
 0x520   : > { %9249 = vmatpush.bf16.msra.mxu1 %v11300_v52 }
 0x522   : > { %9236 = vmatpush.bf16.msra.mxu3 %v11292_v60 }
 0x524   : > { %10894 = vmatmul.msk.bf16.vlgmr.msrb.gmra.mxu2 %vm7681_vm13, %v16008_v10  ;;  %9250 = vmatpush.bf16.msra.mxu1 %v11299_v59 }
 0x526   : > { %9237 = vmatpush.bf16.msra.mxu3 %v11291_v8 }
 0x528   : > { %9251 = vmatpush.bf16.msra.mxu1 %v11298_v53 }
 0x52a   : > { %9238 = vmatpush.bf16.msra.mxu3 %v11290_v50 }
 0x52c   : > { %v8868_v35 = vpop.f32.mrf.mxu1  ;;  %9252 = vmatpush.bf16.msra.mxu1 %v11297_v51 }
 0x52d   : > { %v8869_v22 = vadd.f32 %v8868_v35, %v8856_v17  ;;  %v9101_v17 = vld [vmem:[#allocation3] sm:$0x3] }
 0x52e   : > { %9239 = vmatpush.bf16.msra.mxu3 %v11289_v12 }
 0x52f   : > { %v8894_v41 = vpop.f32.mrf.mxu0 }
 0x534   : > { %v8881_v10 = vpop.f32.mrf.mxu3  ;;  %v8870_v3 = vpop.f32.mrf.mxu1 }
 0x535   : > { %v8882_v24 = vadd.f32 %v8881_v10, %v8869_v22 }
 0x537   : > { %v8907_v44 = vpop.f32.mrf.mxu2  ;;  %v8896_v48 = vpop.f32.mrf.mxu0  ;;  %v8895_v16 = vadd.f32 %v8894_v41, %v8882_v24 }
 0x539   : > { %v8908_v39 = vadd.f32 %v8907_v44, %v8895_v16  ;;  %v9096_v44 = vperm.slane %v9093_v15, 1 }
 0x53c   : > { %v8883_v58 = vpop.f32.mrf.mxu3 }
 0x53f   : > { %v8909_v30 = vpop.f32.mrf.mxu2  ;;  %v8946_v21 = vpop.f32.mrf.mxu0 }
 0x547   : > { %v8948_v27 = vpop.f32.mrf.mxu0 }
 0x54c   : > { %v8920_v9 = vpop.f32.mrf.mxu1 }
 0x54d   : > { %v8921_v34 = vadd.f32 %v8920_v9, %v8908_v39 }
 0x553   : > { %v8972_v26 = vpop.f32.mrf.mxu0 }
 0x554   : > { %v8933_v47 = vpop.f32.mrf.mxu3  ;;  %v8922_v28 = vpop.f32.mrf.mxu1 }
 0x555   : > { %v8934_v57 = vadd.f32 %v8933_v47, %v8921_v34 }
 0x557   : > { %v8947_v56 = vadd.f32 %v8946_v21, %v8934_v57  ;;  %v8959_v31 = vpop.f32.mrf.mxu2 }
 0x558   : > { %v8960_v1 = vadd.f32 %v8959_v31, %v16160_v37 }
 0x559   : > { %v9099_v45 = vadd.f32 %v9095_v20, %v8947_v56 }
 0x55a   : > { %v8973_v46 = vadd.f32 %v8972_v26, %v8960_v1 }
 0x55b   : > { %v9102_v42 = vpack.c.bf16 %v9099_v45, %v9099_v45  ;;  %v8974_v32 = vpop.f32.mrf.mxu0 }
 0x55c   : > { %v8935_v11 = vpop.f32.mrf.mxu3 }
 0x55d   : > { %9240 = vmatmul.bf16.vlgmr.msra.gmra.mxu3 %v9102_v42 }
 0x55f   : > { %v8961_v62 = vpop.f32.mrf.mxu2 }
 0x56c   : > { %v8985_v23 = vpop.f32.mrf.mxu1 }
 0x56d   : > { %v8986_v4 = vadd.f32 %v8985_v23, %v8973_v46 }
 0x573   : > { %v9024_v33 = vpop.f32.mrf.mxu0 }
 0x574   : > { %v8998_v25 = vpop.f32.mrf.mxu3  ;;  %v8987_v38 = vpop.f32.mrf.mxu1 }
 0x575   : > { %v8999_v5 = vadd.f32 %v8998_v25, %v8986_v4 }
 0x577   : > { %v9011_v61 = vpop.f32.mrf.mxu2 }
 0x578   : > { %v9012_v7 = vadd.f32 %v9011_v61, %v8999_v5 }
 0x57a   : > { %v9025_v60 = vadd.f32 %v9024_v33, %v9012_v7 }
 0x57b   : > { %v9026_v55 = vpop.f32.mrf.mxu0 }
 0x57c   : > { %v9000_v29 = vpop.f32.mrf.mxu3 }
 0x57f   : > { %v9013_v19 = vpop.f32.mrf.mxu2 }
 0x58c   : > { %v9037_v6 = vpop.f32.mrf.mxu1 }
 0x58d   : > { %v9038_v35 = vadd.f32 %v9037_v6, %v9025_v60 }
 0x593   : > { %v9076_v13 = vpop.f32.mrf.mxu0 }
 0x594   : > { %v9050_v43 = vpop.f32.mrf.mxu3  ;;  %v9039_v49 = vpop.f32.mrf.mxu1 }
 0x595   : > { %v9051_v50 = vadd.f32 %v9050_v43, %v9038_v35 }
 0x597   : > { %v9063_v54 = vpop.f32.mrf.mxu2 }
 0x598   : > { %v9064_v3 = vadd.f32 %v9063_v54, %v9051_v50 }
 0x59a   : > { %v9077_v12 = vadd.f32 %v9076_v13, %v9064_v3 }
 0x59b   : > { %v9078_v41 = vpop.f32.mrf.mxu0 }
 0x59c   : > { %v9052_v8 = vpop.f32.mrf.mxu3 }
 0x59f   : > { %v9065_v10 = vpop.f32.mrf.mxu2 }
 0x5a7   : > { %v9089_v37 = vpop.f32.mrf.mxu2 }
 0x5a8   : > { %v9090_v2 = vadd.f32 %v9089_v37, %v9077_v12 }
 0x5aa   : > { %v9100_v40 = vadd.f32 %v9096_v44, %v9090_v2 }
 0x5ac   : > { %v9103_v58 = vpack.c.bf16 %v9100_v40, %v9100_v40 }
 0x5ae   : > { %9253 = vmatmul.bf16.vlgmr.msra.gmra.mxu1 %v9103_v58 }
 0x5af   : > { %v9091_v48 = vpop.f32.mrf.mxu2 }
 0x5e0   : > { %v9241_v36 = vpop.f32.mrf.mxu3 }
 0x5e8   : > { %v9243_v30 = vpop.f32.mrf.mxu3 }
 0x62b   : > { %v9254_v22 = vpop.f32.mrf.mxu1 }
 0x62c   : > { %v9255_v21 = vadd.f32 %v9254_v22, %v9241_v36 }
 0x62e   : > { %v9258_v24 = vadd.f32 %v9255_v21, %v9101_v17 }
 0x62f   : > { %9264 = sbr.rel (%p10959_p5) target bundleno = 1859 (0x743), region = 76 }
 0x630   : > { %9260 = vst.msk [vmem:[#allocation3] sm:$0x3] %vm9259_vm14, %v9258_v24 }
 0x633   : > { %v9256_v16 = vpop.f32.mrf.mxu1 }
 0x634   : > { %v11400_v27 = vld [vmem:[#allocation11] ss:$0 sm:$0xff] }
 0x637   : > { %v9265_v9 = vld [vmem:[#allocation3] sm:$0x3] }
 0x638   : > { %v9270_v39 = vadd.f32 %v11400_v27, %v9265_v9 }
 0x63a   : > { %v9271_v15 = vsel %vm9259_vm14, %v9270_v39, -inf }
 0x63b   : > { %9272 = vmax.xlane.f32.xlu0 %v9271_v15 }
 0x6ae   : > { %v9273_v34 = vpop.xlane.xlu0 %9272 }
 0x6af   : > { %v9274_v47 = vsub.f32 %v9270_v39, %v9273_v34 }
 0x6b1   : > { %v9275_v57 = vmul.f32 1.442695, %v9274_v47 }
 0x6b3   : > { %11401 = vpow2.f32 %v9275_v57 }
 0x6b9   : > { %v11402_v20 = vpop.eup %11401 }
 0x6ba   : > { %v9277_v28 = vsel %vm9259_vm14, %v11402_v20, 0.0 }
 0x6bb   : > { %9278 = vadd.xlane.f32.xlu0 %v9277_v28 }
 0x72e   : > { %v9279_v56 = vpop.xlane.xlu0 %9278 }
 0x72f   : > { %11403 = vrcp.f32 %v9279_v56  ;;  %v9291_v42 = vand.u32 2147483648, %v9279_v56  ;;  %v9289_v62 = vand.u32 2147483647, %v9279_v56  ;;  %vm9285_vm0 = vweird.f32 %v9279_v56 }
 0x731   : > { %v9292_v0 = vor.u32 1.1754944e-38, %v9291_v42  ;;  %vm9290_vm2 = vcmp.eq.f32.partialorder %v9289_v62, 8.507059e+37 }
 0x735   : > { %v11404_v31 = vpop.eup %11403 }
 0x736   : > { %v9281_v26 = vmul.f32 %v11404_v31, %v9279_v56  ;;  %vm9286_vm15 = vweird.f32 %v11404_v31 }
 0x737   : > { %vm9287_vm1 = vmor %vm9285_vm0, %vm9286_vm15 }
 0x738   : > { %v9282_v45 = vsub.f32 1.0, %v9281_v26 }
 0x73a   : > { %v9283_v11 = vmul.f32 %v11404_v31, %v9282_v45 }
 0x73c   : > { %v9284_v32 = vadd.f32 %v11404_v31, %v9283_v11 }
 0x73e   : > { %v9288_v14 = vsel %vm9287_vm1, %v11404_v31, %v9284_v32 }
 0x73f   : > { %v9293_v23 = vsel %vm9290_vm2, %v9292_v0, %v9288_v14 }
 0x740   : > { %v9294_v63 = vmul.f32 %v11402_v20, %v9293_v23 }
 0x742   : > { %9295 = vst.msk [vmem:[#allocation12] sm:$0x3] %vm9259_vm14, %v9294_v63 }
 0x743 PF: > { %p11351_p8 = scmp.eq.s32.totalorder %s11704_s28, 3  ;;  %s11644_s17 = smov [#allocation12]  }
 0x744   : > { %s9302_s23 = sshll.u32 %s11644_s17, 4  ;;  %s9304_s18 = sshll.u32 %s16221_s7, 4  ;;  %s9303_s23 = int_to_ptr.vmem [resolvable:$true] %s9302_s23  ;;  %s9305_s18 = int_to_ptr.hbm [resolvable:$true] %s9304_s18 }
 0x745   : > { %11324 = dma.vmem_to_hbm [thread:$0]  (%p11351_p8), %s9303_s23, 32, %s9305_s18, [#allocation6]  }
 0x746   : > { %11616 = dma.done.wait (%p11351_p8), [#allocation6], 32  }
 0x747   : > { %11618 = vsyncadd (%p11351_p8), [#allocation6], 4294967264 }
 0x748 PF: > { %s16423_s27 = sld [smem:[#allocation18_spill]]  ;;  %s16425_s24 = smov %s11625_s25 }
 0x749   : > { %s16424_s14 = sld [smem:[#allocation19_spill]]  ;;  %s16426_s25 = smov %s11629_s26 }
 0x74e   : > { %p17_p9 = scmp.ge.s32.totalorder %s16423_s27, 6  }
 0x74f   : > { %s16427_s26 = smov %s16424_s14 }
 0x750   :  { %19 = sbr.rel (!%p17_p9) target bundleno = 8 (0x8), region = 123 }
 0x755   :  { %9318 = vsyncpa [#allocation5], 1 }
 0x756   :  { %9320 = vsyncpa [#allocation5 + $0x1], 1 }
 0x757   :  { %9321 = vsyncpa [#allocation8], 1 }
 0x758   :  { %9322 = vsyncpa [#allocation6], 1 }
 0x759   :  { %9324 = vsyncpa [#allocation6 + $0x1], 1 }

</bundles_post_ra>
